<compile_context>
chip_gen: v6e
topology: v6e:2x2x1
jax: 0.10.0
libtpu: 0.0.40
codegen_flags: <defaults>
</compile_context>

<pallas_src>
import functools

import numpy as np
import jax
import jax.numpy as jnp
from jax import lax
from jax.experimental import pallas as pl
from jax.experimental.pallas import tpu as pltpu


_MIX = [(2.0, 0.7, 0.1), (2.0, 0.08, 0.2), (0.05, 0.01, 0.02),
        (0.07, 0.01, 0.02), (0.12, 0.01, 0.02)]
_HIGHEST = lax.Precision.HIGHEST
# Review suggests lax.Precision.HIGH (bf16_3x) for the warp matmuls; kept at
# HIGHEST until the 5e-4 tolerance is re-validated on the target jaxlib
# (MXU is not the binding unit at small C, so this is a secondary lever).
_WARP_PRECISION = lax.Precision.HIGHEST


# ---------------------------------------------------------------------------
# Reflect-boundary index folds (float math, exact for integer-valued inputs;
# shared by the Pallas kernel and the pure-JAX reference).
# ---------------------------------------------------------------------------
def _fold_reflect101(i, n):
    """cv2.BORDER_REFLECT_101 / 'mirror':   ... c b | a b c d | c b a ..."""
    period = float(2 * n - 2)
    m = i - period * jnp.floor(i / period)
    return jnp.where(m > n - 1, period - m, m)


def _fold_symmetric(i, n):
    """scipy ndimage 'reflect' (symmetric): ... b a | a b c d | d c ..."""
    period = float(2 * n)
    m = i - period * jnp.floor(i / period)
    return jnp.where(m > n - 1, period - 1.0 - m, m)


# ---------------------------------------------------------------------------
# Pallas kernel: two bilinear warps as chunked one-hot matmuls on the MXU.
# ---------------------------------------------------------------------------
def _elastic_kernel(img_ref, par_ref, o_ref, wscr_ref, *, H, W, TQ):
    HW = H * W
    n_chunks = HW // TQ

    par = par_ref[...]                       # (8, HW) f32
    sy_aff = par[0:1, :]                     # affine source row coords
    sx_aff = par[1:2, :]                     # affine source col coords
    base_r = par[2:3, :]                     # output-pixel row index
    base_c = par[3:4, :]                     # output-pixel col index
    dy = par[4:5, :]                         # smoothed row displacement
    dx = par[5:6, :]                         # smoothed col displacement

    # Chunk-local source index, built once and reused by both warps & corners.
    q_iota = lax.broadcasted_iota(jnp.int32, (TQ, HW), 0)

    def bilinear_warp(src_ref, yy, xx, fold):
        # src_ref: (C, HW) ref; yy/xx: (1, HW) float sample coords (row, col).
        y0 = jnp.floor(yy)
        x0 = jnp.floor(xx)
        wy = yy - y0
        wx = xx - x0
        # Hoisted (1, HW) source indices / bilinear weights of the 4 corners.
        corners = ((y0,       x0,       (1.0 - wy) * (1.0 - wx)),
                   (y0,       x0 + 1.0, (1.0 - wy) * wx),
                   (y0 + 1.0, x0,       wy * (1.0 - wx)),
                   (y0 + 1.0, x0 + 1.0, wy * wx))
        srcs = [(fold(yc, H) * W + fold(xc, W)).astype(jnp.int32)
                for yc, xc, _ in corners]
        wgts = [wgt for _, _, wgt in corners]

        out = None
        # Static (small, fully visible) loop over contraction-axis chunks.
        for ci in range(n_chunks):
            q0 = ci * TQ
            m = jnp.where(q_iota == (srcs[0] - q0), wgts[0], 0.0)
            for s, wv in zip(srcs[1:], wgts[1:]):
                m = m + jnp.where(q_iota == (s - q0), wv, 0.0)
            part = jnp.dot(src_ref[:, q0:q0 + TQ], m,
                           preferred_element_type=jnp.float32,
                           precision=_WARP_PRECISION)
            out = part if out is None else out + part
        return out

    warped = bilinear_warp(img_ref, sy_aff, sx_aff, _fold_reflect101)   # affine
    wscr_ref[...] = warped
    out = bilinear_warp(wscr_ref, base_r + dy, base_c + dx, _fold_symmetric)
    o_ref[...] = jnp.clip(out, 0.0, 1.0).astype(o_ref.dtype)


# ---------------------------------------------------------------------------
# Host-side preparation (RNG, affine solve, separable Gaussian smoothing).
# ---------------------------------------------------------------------------
def _gaussian_reflect_matrix(n: int, sigma: float, truncate: float = 3.0):
    """(n, n) matrix applying a 1-D Gaussian filter, scipy 'reflect' mode."""
    radius = int(truncate * float(sigma) + 0.5)
    taps = np.arange(-radius, radius + 1)
    w = np.exp(-0.5 * (taps / float(sigma)) ** 2)
    w = w / w.sum()
    k = np.zeros((n, n), dtype=np.float64)
    period = 2 * n
    for i in range(n):
        for t, wt in zip(taps, w):
            m = (i + t) % period
            j = m if m < n else period - 1 - m
            k[i, j] += wt
    return k


def _prepare_elastic_inputs(img, severity, key):
    """img: (B, C, H, W). Returns (B, C, HW) image and (B, 8, HW) packed params."""
    alpha_f, sigma_f, aff_f = _MIX[severity - 1]
    B, C, H, W = img.shape
    assert H >= 2 and W >= 2, "image must be at least 2x2"
    HW = H * W
    alpha = alpha_f * H
    sigma = sigma_f * H
    aff = aff_f * H

    # Static control-point geometry (same convention as the cv2 reference).
    shape_size = np.float32([H, W])
    center = shape_size // 2
    square = float(min(H, W) // 3)
    pts1 = np.float32([center + square,
                       [center[0] + square, center[1] - square],
                       center - square])                      # (3, 2)
    pts1_j = jnp.asarray(pts1)

    rows = jnp.arange(H, dtype=jnp.float32)
    cols = jnp.arange(W, dtype=jnp.float32)
    rr, cc = jnp.meshgrid(rows, cols, indexing="ij")          # (H, W)
    base_r = rr.reshape(HW)
    base_c = cc.reshape(HW)

    # Small separable reflect-mode Gaussian matrices (replaces the dense kron).
    kh = jnp.asarray(_gaussian_reflect_matrix(H, sigma).astype(np.float32))
    kwT = jnp.asarray(_gaussian_reflect_matrix(W, sigma).T.astype(np.float32))
    zeros_row = jnp.zeros((HW,), jnp.float32)

    def per_image(k):
        k_aff, k_dx, k_dy = jax.random.split(k, 3)

        # Random affine: inverse map sends destination control points (pts2)
        # back to pts1 (cv2.warpAffine default inverts the given transform).
        delta = jax.random.uniform(k_aff, (3, 2), jnp.float32, -aff, aff)
        pts2 = pts1_j + delta
        a3 = jnp.concatenate([pts2, jnp.ones((3, 1), jnp.float32)], axis=1)
        minv = jnp.linalg.solve(a3, pts1_j)                   # (3, 2)
        sx_aff = minv[0, 0] * base_c + minv[1, 0] * base_r + minv[2, 0]
        sy_aff = minv[0, 1] * base_c + minv[1, 1] * base_r + minv[2, 1]

        # Separable reflect-mode Gaussian smoothing of the U(-1,1) noise,
        # alpha pre-folded: Kh @ noise @ Kw^T (row-major flattening).
        n_dx = jax.random.uniform(k_dx, (H, W), jnp.float32, -1.0, 1.0)
        n_dy = jax.random.uniform(k_dy, (H, W), jnp.float32, -1.0, 1.0)

        def smooth(n2d):
            t = jnp.matmul(kh, n2d, precision=_HIGHEST)
            return (alpha * jnp.matmul(t, kwT, precision=_HIGHEST)).reshape(HW)

        dxs = smooth(n_dx)
        dys = smooth(n_dy)
        # Packed (8, HW): rows 0-3 coords, 4-5 displacements, 6-7 sublane pad.
        return jnp.stack([sy_aff, sx_aff, base_r, base_c, dys, dxs,
                          zeros_row, zeros_row], axis=0)

    packed = jax.vmap(per_image)(jax.random.split(key, B))    # (B, 8, HW)
    img_flat = img.reshape(B, C, HW).astype(jnp.float32)
    return img_flat, packed


def _pick_chunk(hw: int, cap: int = 512) -> int:
    """Largest divisor of hw that is <= cap (contraction-axis chunk size)."""
    tq = 1
    for d in range(1, min(hw, cap) + 1):
        if hw % d == 0:
            tq = d
    return tq


def elastic(img: jax.Array, severity: int, key: jax.Array) -> jax.Array:
    """Elastic corruption.  img: (C, H, W) or (B, C, H, W) float in [0, 1]."""
    if not 0 <= severity <= 5:
        raise ValueError("Severity must be between 0 and 5.")
    if severity == 0:
        return img
    squeeze = img.ndim == 3
    if squeeze:
        img = img[None]
    B, C, H, W = img.shape
    HW = H * W
    TQ = _pick_chunk(HW)
    assert HW % TQ == 0

    img_flat, packed = _prepare_elastic_inputs(img, severity, key)

    # Advisory cost for XLA scheduling around the custom call.
    warp_flops = 2 * (2 * C * HW * HW)            # two one-hot matmuls
    build_flops = 2 * 11 * HW * HW                # compare/select/add build
    cost = pl.CostEstimate(
        flops=B * (warp_flops + build_flops),
        transcendentals=0,
        bytes_accessed=B * 4 * (2 * C * HW + 8 * HW))

    # Per-step VMEM estimate: pipelined ins/outs + chunked one-hot temporaries.
    vmem_est = 4 * (4 * C * HW + 2 * 8 * HW + 3 * TQ * HW + 4 * C * HW)
    vmem_limit = int(min(48 << 20, max(32 << 20, 2 * vmem_est)))

    out_flat = pl.pallas_call(
        functools.partial(_elastic_kernel, H=H, W=W, TQ=TQ),
        out_shape=jax.ShapeDtypeStruct((B, C, HW), jnp.float32),
        grid=(B,),
        in_specs=[pl.BlockSpec((None, C, HW), lambda b: (b, 0, 0)),
                  pl.BlockSpec((None, 8, HW), lambda b: (b, 0, 0))],
        out_specs=pl.BlockSpec((None, C, HW), lambda b: (b, 0, 0)),
        scratch_shapes=[pltpu.VMEM((C, HW), jnp.float32)],
        compiler_params=pltpu.CompilerParams(
            dimension_semantics=("parallel",),
            vmem_limit_bytes=vmem_limit),
        cost_estimate=cost,
    )(img_flat, packed)

    out = out_flat.reshape(B, C, H, W).astype(img.dtype)
    return out[0] if squeeze else out


# ---------------------------------------------------------------------------
# Pure-JAX reference (gather-based), sharing the same prepared inputs.
# ---------------------------------------------------------------------------
def _bilinear_warp_ref(img_flat, yy, xx, h, w, fold):
    y0 = jnp.floor(yy)
    x0 = jnp.floor(xx)
    wy = yy - y0
    wx = xx - x0

    def gather(yc, xc):
        src = (fold(yc, h) * w + fold(xc, w)).astype(jnp.int32)
        return jnp.take(img_flat, src, axis=1)

    return (gather(y0, x0) * ((1.0 - wy) * (1.0 - wx))
            + gather(y0, x0 + 1.0) * ((1.0 - wy) * wx)
            + gather(y0 + 1.0, x0) * (wy * (1.0 - wx))
            + gather(y0 + 1.0, x0 + 1.0) * (wy * wx))


def elastic_reference(img: jax.Array, severity: int, key: jax.Array) -> jax.Array:
    if severity == 0:
        return img
    squeeze = img.ndim == 3
    if squeeze:
        img = img[None]
    B, C, H, W = img.shape
    img_flat, packed = _prepare_elastic_inputs(img, severity, key)

    def one(imf, par):
        sy, sx, br, bc, dy, dx = (par[0], par[1], par[2], par[3], par[4], par[5])
        warped = _bilinear_warp_ref(imf, sy, sx, H, W, _fold_reflect101)
        out = _bilinear_warp_ref(warped, br + dy, bc + dx, H, W, _fold_symmetric)
        return jnp.clip(out, 0.0, 1.0)

    out_flat = jax.vmap(one)(img_flat, packed)
    out = out_flat.reshape(B, C, H, W).astype(img.dtype)
    return out[0] if squeeze else out


if __name__ == "__main__":
    root = jax.random.PRNGKey(0)
    k_img, k_param = jax.random.split(root)
    img = jax.random.uniform(k_img, (2, 4, 16, 16), dtype=jnp.float32)
    severity = 2

    out = jax.block_until_ready(elastic(img, severity, k_param))
    ref = elastic_reference(img, severity, k_param)

    assert out.shape == img.shape and out.dtype == img.dtype
    assert bool(jnp.all(jnp.isfinite(out)))
    err = float(jnp.max(jnp.abs(out - ref)))
    assert jnp.allclose(out, ref, atol=5e-4, rtol=0.0), err

    # severity 0 is the identity.
    assert jnp.array_equal(elastic(img, 0, k_param), img)

    # single-image (C, H, W) path also works.
    single = jax.block_until_ready(elastic(img[0], severity, k_param))
    assert single.shape == img[0].shape and bool(jnp.all(jnp.isfinite(single)))

    print("KERNEL_OK")
</pallas_src>

<mosaic_0001>
module attributes {stable_mosaic.version = 11 : i64} {
  func.func @_elastic_kernel(%arg0: i32, %arg1: memref<1x4x256xf32, #tpu.memory_space<vmem>>, %arg2: memref<1x8x256xf32, #tpu.memory_space<vmem>>, %arg3: memref<1x4x256xf32, #tpu.memory_space<vmem>>, %arg4: memref<4x256xf32, #tpu.memory_space<vmem>>) attributes {dimension_semantics = [#tpu.dimension_semantics<parallel>], iteration_bounds = array<i64: 2>, scalar_prefetch = 0 : i64, scratch_operands = 1 : i64, tpu.core_type = #tpu.core_type<tc>, window_params = [{transform_indices = @transform_0, window_bounds = array<i64: 1, 4, 256>}, {transform_indices = @transform_1, window_bounds = array<i64: 1, 8, 256>}, {transform_indices = @transform_2, window_bounds = array<i64: 1, 4, 256>}]} {
    %c0 = arith.constant 0 : index
    %c0_0 = arith.constant 0 : index
    %c0_1 = arith.constant 0 : index
    %0 = vector.load %arg2[%c0, %c0_0, %c0_1] : memref<1x8x256xf32, #tpu.memory_space<vmem>>, vector<1x8x256xf32>
    %1 = vector.shape_cast %0 : vector<1x8x256xf32> to vector<8x256xf32>
    %2 = vector.extract_strided_slice %1 {offsets = [0, 0], sizes = [1, 256], strides = [1, 1]} : vector<8x256xf32> to vector<1x256xf32>
    %3 = vector.extract_strided_slice %1 {offsets = [1, 0], sizes = [1, 256], strides = [1, 1]} : vector<8x256xf32> to vector<1x256xf32>
    %4 = vector.extract_strided_slice %1 {offsets = [2, 0], sizes = [1, 256], strides = [1, 1]} : vector<8x256xf32> to vector<1x256xf32>
    %5 = vector.extract_strided_slice %1 {offsets = [3, 0], sizes = [1, 256], strides = [1, 1]} : vector<8x256xf32> to vector<1x256xf32>
    %6 = vector.extract_strided_slice %1 {offsets = [4, 0], sizes = [1, 256], strides = [1, 1]} : vector<8x256xf32> to vector<1x256xf32>
    %7 = vector.extract_strided_slice %1 {offsets = [5, 0], sizes = [1, 256], strides = [1, 1]} : vector<8x256xf32> to vector<1x256xf32>
    %8 = tpu.iota {dimensions = array<i32: 0>} : vector<256x256xi32>
    %9 = math.floor %2 : vector<1x256xf32>
    %10 = math.floor %3 : vector<1x256xf32>
    %11 = arith.subf %2, %9 : vector<1x256xf32>
    %12 = arith.subf %3, %10 : vector<1x256xf32>
    %cst = arith.constant 1.000000e+00 : f32
    %13 = vector.broadcast %cst : f32 to vector<1x256xf32>
    %14 = arith.subf %13, %11 : vector<1x256xf32>
    %cst_2 = arith.constant 1.000000e+00 : f32
    %15 = vector.broadcast %cst_2 : f32 to vector<1x256xf32>
    %16 = arith.subf %15, %12 : vector<1x256xf32>
    %17 = arith.mulf %14, %16 : vector<1x256xf32>
    %cst_3 = arith.constant 1.000000e+00 : f32
    %18 = vector.broadcast %cst_3 : f32 to vector<1x256xf32>
    %19 = arith.addf %10, %18 : vector<1x256xf32>
    %cst_4 = arith.constant 1.000000e+00 : f32
    %20 = vector.broadcast %cst_4 : f32 to vector<1x256xf32>
    %21 = arith.subf %20, %11 : vector<1x256xf32>
    %22 = arith.mulf %21, %12 : vector<1x256xf32>
    %cst_5 = arith.constant 1.000000e+00 : f32
    %23 = vector.broadcast %cst_5 : f32 to vector<1x256xf32>
    %24 = arith.addf %9, %23 : vector<1x256xf32>
    %cst_6 = arith.constant 1.000000e+00 : f32
    %25 = vector.broadcast %cst_6 : f32 to vector<1x256xf32>
    %26 = arith.subf %25, %12 : vector<1x256xf32>
    %27 = arith.mulf %11, %26 : vector<1x256xf32>
    %cst_7 = arith.constant 1.000000e+00 : f32
    %28 = vector.broadcast %cst_7 : f32 to vector<1x256xf32>
    %29 = arith.addf %9, %28 : vector<1x256xf32>
    %cst_8 = arith.constant 1.000000e+00 : f32
    %30 = vector.broadcast %cst_8 : f32 to vector<1x256xf32>
    %31 = arith.addf %10, %30 : vector<1x256xf32>
    %32 = arith.mulf %11, %12 : vector<1x256xf32>
    %cst_9 = arith.constant 3.000000e+01 : f32
    %33 = vector.broadcast %cst_9 : f32 to vector<1x256xf32>
    %34 = arith.divf %9, %33 : vector<1x256xf32>
    %35 = math.floor %34 : vector<1x256xf32>
    %cst_10 = arith.constant 3.000000e+01 : f32
    %36 = vector.broadcast %cst_10 : f32 to vector<1x256xf32>
    %37 = arith.mulf %36, %35 : vector<1x256xf32>
    %38 = arith.subf %9, %37 : vector<1x256xf32>
    %cst_11 = arith.constant 1.500000e+01 : f32
    %39 = vector.broadcast %cst_11 : f32 to vector<1x256xf32>
    %40 = arith.cmpf ogt, %38, %39 : vector<1x256xf32>
    %cst_12 = arith.constant 3.000000e+01 : f32
    %41 = vector.broadcast %cst_12 : f32 to vector<1x256xf32>
    %42 = arith.subf %41, %38 : vector<1x256xf32>
    %43 = arith.select %40, %42, %38 : vector<1x256xi1>, vector<1x256xf32>
    %cst_13 = arith.constant 1.600000e+01 : f32
    %44 = vector.broadcast %cst_13 : f32 to vector<1x256xf32>
    %45 = arith.mulf %43, %44 : vector<1x256xf32>
    %cst_14 = arith.constant 3.000000e+01 : f32
    %46 = vector.broadcast %cst_14 : f32 to vector<1x256xf32>
    %47 = arith.divf %10, %46 : vector<1x256xf32>
    %48 = math.floor %47 : vector<1x256xf32>
    %cst_15 = arith.constant 3.000000e+01 : f32
    %49 = vector.broadcast %cst_15 : f32 to vector<1x256xf32>
    %50 = arith.mulf %49, %48 : vector<1x256xf32>
    %51 = arith.subf %10, %50 : vector<1x256xf32>
    %cst_16 = arith.constant 1.500000e+01 : f32
    %52 = vector.broadcast %cst_16 : f32 to vector<1x256xf32>
    %53 = arith.cmpf ogt, %51, %52 : vector<1x256xf32>
    %cst_17 = arith.constant 3.000000e+01 : f32
    %54 = vector.broadcast %cst_17 : f32 to vector<1x256xf32>
    %55 = arith.subf %54, %51 : vector<1x256xf32>
    %56 = arith.select %53, %55, %51 : vector<1x256xi1>, vector<1x256xf32>
    %57 = arith.addf %45, %56 : vector<1x256xf32>
    %58 = arith.fptosi %57 : vector<1x256xf32> to vector<1x256xi32>
    %cst_18 = arith.constant 3.000000e+01 : f32
    %59 = vector.broadcast %cst_18 : f32 to vector<1x256xf32>
    %60 = arith.divf %9, %59 : vector<1x256xf32>
    %61 = math.floor %60 : vector<1x256xf32>
    %cst_19 = arith.constant 3.000000e+01 : f32
    %62 = vector.broadcast %cst_19 : f32 to vector<1x256xf32>
    %63 = arith.mulf %62, %61 : vector<1x256xf32>
    %64 = arith.subf %9, %63 : vector<1x256xf32>
    %cst_20 = arith.constant 1.500000e+01 : f32
    %65 = vector.broadcast %cst_20 : f32 to vector<1x256xf32>
    %66 = arith.cmpf ogt, %64, %65 : vector<1x256xf32>
    %cst_21 = arith.constant 3.000000e+01 : f32
    %67 = vector.broadcast %cst_21 : f32 to vector<1x256xf32>
    %68 = arith.subf %67, %64 : vector<1x256xf32>
    %69 = arith.select %66, %68, %64 : vector<1x256xi1>, vector<1x256xf32>
    %cst_22 = arith.constant 1.600000e+01 : f32
    %70 = vector.broadcast %cst_22 : f32 to vector<1x256xf32>
    %71 = arith.mulf %69, %70 : vector<1x256xf32>
    %cst_23 = arith.constant 3.000000e+01 : f32
    %72 = vector.broadcast %cst_23 : f32 to vector<1x256xf32>
    %73 = arith.divf %19, %72 : vector<1x256xf32>
    %74 = math.floor %73 : vector<1x256xf32>
    %cst_24 = arith.constant 3.000000e+01 : f32
    %75 = vector.broadcast %cst_24 : f32 to vector<1x256xf32>
    %76 = arith.mulf %75, %74 : vector<1x256xf32>
    %77 = arith.subf %19, %76 : vector<1x256xf32>
    %cst_25 = arith.constant 1.500000e+01 : f32
    %78 = vector.broadcast %cst_25 : f32 to vector<1x256xf32>
    %79 = arith.cmpf ogt, %77, %78 : vector<1x256xf32>
    %cst_26 = arith.constant 3.000000e+01 : f32
    %80 = vector.broadcast %cst_26 : f32 to vector<1x256xf32>
    %81 = arith.subf %80, %77 : vector<1x256xf32>
    %82 = arith.select %79, %81, %77 : vector<1x256xi1>, vector<1x256xf32>
    %83 = arith.addf %71, %82 : vector<1x256xf32>
    %84 = arith.fptosi %83 : vector<1x256xf32> to vector<1x256xi32>
    %cst_27 = arith.constant 3.000000e+01 : f32
    %85 = vector.broadcast %cst_27 : f32 to vector<1x256xf32>
    %86 = arith.divf %24, %85 : vector<1x256xf32>
    %87 = math.floor %86 : vector<1x256xf32>
    %cst_28 = arith.constant 3.000000e+01 : f32
    %88 = vector.broadcast %cst_28 : f32 to vector<1x256xf32>
    %89 = arith.mulf %88, %87 : vector<1x256xf32>
    %90 = arith.subf %24, %89 : vector<1x256xf32>
    %cst_29 = arith.constant 1.500000e+01 : f32
    %91 = vector.broadcast %cst_29 : f32 to vector<1x256xf32>
    %92 = arith.cmpf ogt, %90, %91 : vector<1x256xf32>
    %cst_30 = arith.constant 3.000000e+01 : f32
    %93 = vector.broadcast %cst_30 : f32 to vector<1x256xf32>
    %94 = arith.subf %93, %90 : vector<1x256xf32>
    %95 = arith.select %92, %94, %90 : vector<1x256xi1>, vector<1x256xf32>
    %cst_31 = arith.constant 1.600000e+01 : f32
    %96 = vector.broadcast %cst_31 : f32 to vector<1x256xf32>
    %97 = arith.mulf %95, %96 : vector<1x256xf32>
    %cst_32 = arith.constant 3.000000e+01 : f32
    %98 = vector.broadcast %cst_32 : f32 to vector<1x256xf32>
    %99 = arith.divf %10, %98 : vector<1x256xf32>
    %100 = math.floor %99 : vector<1x256xf32>
    %cst_33 = arith.constant 3.000000e+01 : f32
    %101 = vector.broadcast %cst_33 : f32 to vector<1x256xf32>
    %102 = arith.mulf %101, %100 : vector<1x256xf32>
    %103 = arith.subf %10, %102 : vector<1x256xf32>
    %cst_34 = arith.constant 1.500000e+01 : f32
    %104 = vector.broadcast %cst_34 : f32 to vector<1x256xf32>
    %105 = arith.cmpf ogt, %103, %104 : vector<1x256xf32>
    %cst_35 = arith.constant 3.000000e+01 : f32
    %106 = vector.broadcast %cst_35 : f32 to vector<1x256xf32>
    %107 = arith.subf %106, %103 : vector<1x256xf32>
    %108 = arith.select %105, %107, %103 : vector<1x256xi1>, vector<1x256xf32>
    %109 = arith.addf %97, %108 : vector<1x256xf32>
    %110 = arith.fptosi %109 : vector<1x256xf32> to vector<1x256xi32>
    %cst_36 = arith.constant 3.000000e+01 : f32
    %111 = vector.broadcast %cst_36 : f32 to vector<1x256xf32>
    %112 = arith.divf %29, %111 : vector<1x256xf32>
    %113 = math.floor %112 : vector<1x256xf32>
    %cst_37 = arith.constant 3.000000e+01 : f32
    %114 = vector.broadcast %cst_37 : f32 to vector<1x256xf32>
    %115 = arith.mulf %114, %113 : vector<1x256xf32>
    %116 = arith.subf %29, %115 : vector<1x256xf32>
    %cst_38 = arith.constant 1.500000e+01 : f32
    %117 = vector.broadcast %cst_38 : f32 to vector<1x256xf32>
    %118 = arith.cmpf ogt, %116, %117 : vector<1x256xf32>
    %cst_39 = arith.constant 3.000000e+01 : f32
    %119 = vector.broadcast %cst_39 : f32 to vector<1x256xf32>
    %120 = arith.subf %119, %116 : vector<1x256xf32>
    %121 = arith.select %118, %120, %116 : vector<1x256xi1>, vector<1x256xf32>
    %cst_40 = arith.constant 1.600000e+01 : f32
    %122 = vector.broadcast %cst_40 : f32 to vector<1x256xf32>
    %123 = arith.mulf %121, %122 : vector<1x256xf32>
    %cst_41 = arith.constant 3.000000e+01 : f32
    %124 = vector.broadcast %cst_41 : f32 to vector<1x256xf32>
    %125 = arith.divf %31, %124 : vector<1x256xf32>
    %126 = math.floor %125 : vector<1x256xf32>
    %cst_42 = arith.constant 3.000000e+01 : f32
    %127 = vector.broadcast %cst_42 : f32 to vector<1x256xf32>
    %128 = arith.mulf %127, %126 : vector<1x256xf32>
    %129 = arith.subf %31, %128 : vector<1x256xf32>
    %cst_43 = arith.constant 1.500000e+01 : f32
    %130 = vector.broadcast %cst_43 : f32 to vector<1x256xf32>
    %131 = arith.cmpf ogt, %129, %130 : vector<1x256xf32>
    %cst_44 = arith.constant 3.000000e+01 : f32
    %132 = vector.broadcast %cst_44 : f32 to vector<1x256xf32>
    %133 = arith.subf %132, %129 : vector<1x256xf32>
    %134 = arith.select %131, %133, %129 : vector<1x256xi1>, vector<1x256xf32>
    %135 = arith.addf %123, %134 : vector<1x256xf32>
    %136 = arith.fptosi %135 : vector<1x256xf32> to vector<1x256xi32>
    %c0_i32 = arith.constant 0 : i32
    %137 = vector.broadcast %c0_i32 : i32 to vector<1x256xi32>
    %138 = arith.subi %58, %137 : vector<1x256xi32>
    %139 = vector.broadcast %138 : vector<1x256xi32> to vector<256x256xi32>
    %140 = arith.cmpi eq, %8, %139 : vector<256x256xi32>
    %cst_45 = arith.constant 0.000000e+00 : f32
    %141 = vector.shape_cast %17 : vector<1x256xf32> to vector<1x256xf32>
    %142 = vector.broadcast %141 : vector<1x256xf32> to vector<256x256xf32>
    %143 = vector.broadcast %cst_45 : f32 to vector<256x256xf32>
    %144 = arith.select %140, %142, %143 : vector<256x256xi1>, vector<256x256xf32>
    %c0_i32_46 = arith.constant 0 : i32
    %145 = vector.broadcast %c0_i32_46 : i32 to vector<1x256xi32>
    %146 = arith.subi %84, %145 : vector<1x256xi32>
    %147 = vector.broadcast %146 : vector<1x256xi32> to vector<256x256xi32>
    %148 = arith.cmpi eq, %8, %147 : vector<256x256xi32>
    %cst_47 = arith.constant 0.000000e+00 : f32
    %149 = vector.shape_cast %22 : vector<1x256xf32> to vector<1x256xf32>
    %150 = vector.broadcast %149 : vector<1x256xf32> to vector<256x256xf32>
    %151 = vector.broadcast %cst_47 : f32 to vector<256x256xf32>
    %152 = arith.select %148, %150, %151 : vector<256x256xi1>, vector<256x256xf32>
    %153 = arith.addf %144, %152 : vector<256x256xf32>
    %c0_i32_48 = arith.constant 0 : i32
    %154 = vector.broadcast %c0_i32_48 : i32 to vector<1x256xi32>
    %155 = arith.subi %110, %154 : vector<1x256xi32>
    %156 = vector.broadcast %155 : vector<1x256xi32> to vector<256x256xi32>
    %157 = arith.cmpi eq, %8, %156 : vector<256x256xi32>
    %cst_49 = arith.constant 0.000000e+00 : f32
    %158 = vector.shape_cast %27 : vector<1x256xf32> to vector<1x256xf32>
    %159 = vector.broadcast %158 : vector<1x256xf32> to vector<256x256xf32>
    %160 = vector.broadcast %cst_49 : f32 to vector<256x256xf32>
    %161 = arith.select %157, %159, %160 : vector<256x256xi1>, vector<256x256xf32>
    %162 = arith.addf %153, %161 : vector<256x256xf32>
    %c0_i32_50 = arith.constant 0 : i32
    %163 = vector.broadcast %c0_i32_50 : i32 to vector<1x256xi32>
    %164 = arith.subi %136, %163 : vector<1x256xi32>
    %165 = vector.broadcast %164 : vector<1x256xi32> to vector<256x256xi32>
    %166 = arith.cmpi eq, %8, %165 : vector<256x256xi32>
    %cst_51 = arith.constant 0.000000e+00 : f32
    %167 = vector.shape_cast %32 : vector<1x256xf32> to vector<1x256xf32>
    %168 = vector.broadcast %167 : vector<1x256xf32> to vector<256x256xf32>
    %169 = vector.broadcast %cst_51 : f32 to vector<256x256xf32>
    %170 = arith.select %166, %168, %169 : vector<256x256xi1>, vector<256x256xf32>
    %171 = arith.addf %162, %170 : vector<256x256xf32>
    %c0_52 = arith.constant 0 : index
    %c0_53 = arith.constant 0 : index
    %c0_54 = arith.constant 0 : index
    %172 = vector.load %arg1[%c0_52, %c0_53, %c0_54] : memref<1x4x256xf32, #tpu.memory_space<vmem>>, vector<1x4x256xf32>
    %173 = vector.shape_cast %172 : vector<1x4x256xf32> to vector<4x256xf32>
    %cst_55 = arith.constant dense<0.000000e+00> : vector<4x256xf32>
    %174 = tpu.matmul %173, %171, %cst_55 {dimension_numbers = #tpu.dot_dimension_numbers<[1], [0], [0], [1], [0, 0, 1, 1], [], []>, precision = #tpu.contract_precision<fp32>} : vector<4x256xf32>, vector<256x256xf32>, vector<4x256xf32> -> vector<4x256xf32>
    %c0_56 = arith.constant 0 : index
    %c0_57 = arith.constant 0 : index
    %175 = vector.load %arg4[%c0_56, %c0_57] : memref<4x256xf32, #tpu.memory_space<vmem>>, vector<4x256xf32>
    tpu.vector_store %arg4[%c0_56, %c0_57], %174 {strides = array<i32>} : memref<4x256xf32, #tpu.memory_space<vmem>>, vector<4x256xf32>,
    %176 = arith.addf %4, %6 : vector<1x256xf32>
    %177 = arith.addf %5, %7 : vector<1x256xf32>
    %178 = math.floor %176 : vector<1x256xf32>
    %179 = math.floor %177 : vector<1x256xf32>
    %180 = arith.subf %176, %178 : vector<1x256xf32>
    %181 = arith.subf %177, %179 : vector<1x256xf32>
    %cst_58 = arith.constant 1.000000e+00 : f32
    %182 = vector.broadcast %cst_58 : f32 to vector<1x256xf32>
    %183 = arith.subf %182, %180 : vector<1x256xf32>
    %cst_59 = arith.constant 1.000000e+00 : f32
    %184 = vector.broadcast %cst_59 : f32 to vector<1x256xf32>
    %185 = arith.subf %184, %181 : vector<1x256xf32>
    %186 = arith.mulf %183, %185 : vector<1x256xf32>
    %cst_60 = arith.constant 1.000000e+00 : f32
    %187 = vector.broadcast %cst_60 : f32 to vector<1x256xf32>
    %188 = arith.addf %179, %187 : vector<1x256xf32>
    %cst_61 = arith.constant 1.000000e+00 : f32
    %189 = vector.broadcast %cst_61 : f32 to vector<1x256xf32>
    %190 = arith.subf %189, %180 : vector<1x256xf32>
    %191 = arith.mulf %190, %181 : vector<1x256xf32>
    %cst_62 = arith.constant 1.000000e+00 : f32
    %192 = vector.broadcast %cst_62 : f32 to vector<1x256xf32>
    %193 = arith.addf %178, %192 : vector<1x256xf32>
    %cst_63 = arith.constant 1.000000e+00 : f32
    %194 = vector.broadcast %cst_63 : f32 to vector<1x256xf32>
    %195 = arith.subf %194, %181 : vector<1x256xf32>
    %196 = arith.mulf %180, %195 : vector<1x256xf32>
    %cst_64 = arith.constant 1.000000e+00 : f32
    %197 = vector.broadcast %cst_64 : f32 to vector<1x256xf32>
    %198 = arith.addf %178, %197 : vector<1x256xf32>
    %cst_65 = arith.constant 1.000000e+00 : f32
    %199 = vector.broadcast %cst_65 : f32 to vector<1x256xf32>
    %200 = arith.addf %179, %199 : vector<1x256xf32>
    %201 = arith.mulf %180, %181 : vector<1x256xf32>
    %cst_66 = arith.constant 3.200000e+01 : f32
    %202 = vector.broadcast %cst_66 : f32 to vector<1x256xf32>
    %203 = arith.divf %178, %202 : vector<1x256xf32>
    %204 = math.floor %203 : vector<1x256xf32>
    %cst_67 = arith.constant 3.200000e+01 : f32
    %205 = vector.broadcast %cst_67 : f32 to vector<1x256xf32>
    %206 = arith.mulf %205, %204 : vector<1x256xf32>
    %207 = arith.subf %178, %206 : vector<1x256xf32>
    %cst_68 = arith.constant 1.500000e+01 : f32
    %208 = vector.broadcast %cst_68 : f32 to vector<1x256xf32>
    %209 = arith.cmpf ogt, %207, %208 : vector<1x256xf32>
    %cst_69 = arith.constant 3.100000e+01 : f32
    %210 = vector.broadcast %cst_69 : f32 to vector<1x256xf32>
    %211 = arith.subf %210, %207 : vector<1x256xf32>
    %212 = arith.select %209, %211, %207 : vector<1x256xi1>, vector<1x256xf32>
    %cst_70 = arith.constant 1.600000e+01 : f32
    %213 = vector.broadcast %cst_70 : f32 to vector<1x256xf32>
    %214 = arith.mulf %212, %213 : vector<1x256xf32>
    %cst_71 = arith.constant 3.200000e+01 : f32
    %215 = vector.broadcast %cst_71 : f32 to vector<1x256xf32>
    %216 = arith.divf %179, %215 : vector<1x256xf32>
    %217 = math.floor %216 : vector<1x256xf32>
    %cst_72 = arith.constant 3.200000e+01 : f32
    %218 = vector.broadcast %cst_72 : f32 to vector<1x256xf32>
    %219 = arith.mulf %218, %217 : vector<1x256xf32>
    %220 = arith.subf %179, %219 : vector<1x256xf32>
    %cst_73 = arith.constant 1.500000e+01 : f32
    %221 = vector.broadcast %cst_73 : f32 to vector<1x256xf32>
    %222 = arith.cmpf ogt, %220, %221 : vector<1x256xf32>
    %cst_74 = arith.constant 3.100000e+01 : f32
    %223 = vector.broadcast %cst_74 : f32 to vector<1x256xf32>
    %224 = arith.subf %223, %220 : vector<1x256xf32>
    %225 = arith.select %222, %224, %220 : vector<1x256xi1>, vector<1x256xf32>
    %226 = arith.addf %214, %225 : vector<1x256xf32>
    %227 = arith.fptosi %226 : vector<1x256xf32> to vector<1x256xi32>
    %cst_75 = arith.constant 3.200000e+01 : f32
    %228 = vector.broadcast %cst_75 : f32 to vector<1x256xf32>
    %229 = arith.divf %178, %228 : vector<1x256xf32>
    %230 = math.floor %229 : vector<1x256xf32>
    %cst_76 = arith.constant 3.200000e+01 : f32
    %231 = vector.broadcast %cst_76 : f32 to vector<1x256xf32>
    %232 = arith.mulf %231, %230 : vector<1x256xf32>
    %233 = arith.subf %178, %232 : vector<1x256xf32>
    %cst_77 = arith.constant 1.500000e+01 : f32
    %234 = vector.broadcast %cst_77 : f32 to vector<1x256xf32>
    %235 = arith.cmpf ogt, %233, %234 : vector<1x256xf32>
    %cst_78 = arith.constant 3.100000e+01 : f32
    %236 = vector.broadcast %cst_78 : f32 to vector<1x256xf32>
    %237 = arith.subf %236, %233 : vector<1x256xf32>
    %238 = arith.select %235, %237, %233 : vector<1x256xi1>, vector<1x256xf32>
    %cst_79 = arith.constant 1.600000e+01 : f32
    %239 = vector.broadcast %cst_79 : f32 to vector<1x256xf32>
    %240 = arith.mulf %238, %239 : vector<1x256xf32>
    %cst_80 = arith.constant 3.200000e+01 : f32
    %241 = vector.broadcast %cst_80 : f32 to vector<1x256xf32>
    %242 = arith.divf %188, %241 : vector<1x256xf32>
    %243 = math.floor %242 : vector<1x256xf32>
    %cst_81 = arith.constant 3.200000e+01 : f32
    %244 = vector.broadcast %cst_81 : f32 to vector<1x256xf32>
    %245 = arith.mulf %244, %243 : vector<1x256xf32>
    %246 = arith.subf %188, %245 : vector<1x256xf32>
    %cst_82 = arith.constant 1.500000e+01 : f32
    %247 = vector.broadcast %cst_82 : f32 to vector<1x256xf32>
    %248 = arith.cmpf ogt, %246, %247 : vector<1x256xf32>
    %cst_83 = arith.constant 3.100000e+01 : f32
    %249 = vector.broadcast %cst_83 : f32 to vector<1x256xf32>
    %250 = arith.subf %249, %246 : vector<1x256xf32>
    %251 = arith.select %248, %250, %246 : vector<1x256xi1>, vector<1x256xf32>
    %252 = arith.addf %240, %251 : vector<1x256xf32>
    %253 = arith.fptosi %252 : vector<1x256xf32> to vector<1x256xi32>
    %cst_84 = arith.constant 3.200000e+01 : f32
    %254 = vector.broadcast %cst_84 : f32 to vector<1x256xf32>
    %255 = arith.divf %193, %254 : vector<1x256xf32>
    %256 = math.floor %255 : vector<1x256xf32>
    %cst_85 = arith.constant 3.200000e+01 : f32
    %257 = vector.broadcast %cst_85 : f32 to vector<1x256xf32>
    %258 = arith.mulf %257, %256 : vector<1x256xf32>
    %259 = arith.subf %193, %258 : vector<1x256xf32>
    %cst_86 = arith.constant 1.500000e+01 : f32
    %260 = vector.broadcast %cst_86 : f32 to vector<1x256xf32>
    %261 = arith.cmpf ogt, %259, %260 : vector<1x256xf32>
    %cst_87 = arith.constant 3.100000e+01 : f32
    %262 = vector.broadcast %cst_87 : f32 to vector<1x256xf32>
    %263 = arith.subf %262, %259 : vector<1x256xf32>
    %264 = arith.select %261, %263, %259 : vector<1x256xi1>, vector<1x256xf32>
    %cst_88 = arith.constant 1.600000e+01 : f32
    %265 = vector.broadcast %cst_88 : f32 to vector<1x256xf32>
    %266 = arith.mulf %264, %265 : vector<1x256xf32>
    %cst_89 = arith.constant 3.200000e+01 : f32
    %267 = vector.broadcast %cst_89 : f32 to vector<1x256xf32>
    %268 = arith.divf %179, %267 : vector<1x256xf32>
    %269 = math.floor %268 : vector<1x256xf32>
    %cst_90 = arith.constant 3.200000e+01 : f32
    %270 = vector.broadcast %cst_90 : f32 to vector<1x256xf32>
    %271 = arith.mulf %270, %269 : vector<1x256xf32>
    %272 = arith.subf %179, %271 : vector<1x256xf32>
    %cst_91 = arith.constant 1.500000e+01 : f32
    %273 = vector.broadcast %cst_91 : f32 to vector<1x256xf32>
    %274 = arith.cmpf ogt, %272, %273 : vector<1x256xf32>
    %cst_92 = arith.constant 3.100000e+01 : f32
    %275 = vector.broadcast %cst_92 : f32 to vector<1x256xf32>
    %276 = arith.subf %275, %272 : vector<1x256xf32>
    %277 = arith.select %274, %276, %272 : vector<1x256xi1>, vector<1x256xf32>
    %278 = arith.addf %266, %277 : vector<1x256xf32>
    %279 = arith.fptosi %278 : vector<1x256xf32> to vector<1x256xi32>
    %cst_93 = arith.constant 3.200000e+01 : f32
    %280 = vector.broadcast %cst_93 : f32 to vector<1x256xf32>
    %281 = arith.divf %198, %280 : vector<1x256xf32>
    %282 = math.floor %281 : vector<1x256xf32>
    %cst_94 = arith.constant 3.200000e+01 : f32
    %283 = vector.broadcast %cst_94 : f32 to vector<1x256xf32>
    %284 = arith.mulf %283, %282 : vector<1x256xf32>
    %285 = arith.subf %198, %284 : vector<1x256xf32>
    %cst_95 = arith.constant 1.500000e+01 : f32
    %286 = vector.broadcast %cst_95 : f32 to vector<1x256xf32>
    %287 = arith.cmpf ogt, %285, %286 : vector<1x256xf32>
    %cst_96 = arith.constant 3.100000e+01 : f32
    %288 = vector.broadcast %cst_96 : f32 to vector<1x256xf32>
    %289 = arith.subf %288, %285 : vector<1x256xf32>
    %290 = arith.select %287, %289, %285 : vector<1x256xi1>, vector<1x256xf32>
    %cst_97 = arith.constant 1.600000e+01 : f32
    %291 = vector.broadcast %cst_97 : f32 to vector<1x256xf32>
    %292 = arith.mulf %290, %291 : vector<1x256xf32>
    %cst_98 = arith.constant 3.200000e+01 : f32
    %293 = vector.broadcast %cst_98 : f32 to vector<1x256xf32>
    %294 = arith.divf %200, %293 : vector<1x256xf32>
    %295 = math.floor %294 : vector<1x256xf32>
    %cst_99 = arith.constant 3.200000e+01 : f32
    %296 = vector.broadcast %cst_99 : f32 to vector<1x256xf32>
    %297 = arith.mulf %296, %295 : vector<1x256xf32>
    %298 = arith.subf %200, %297 : vector<1x256xf32>
    %cst_100 = arith.constant 1.500000e+01 : f32
    %299 = vector.broadcast %cst_100 : f32 to vector<1x256xf32>
    %300 = arith.cmpf ogt, %298, %299 : vector<1x256xf32>
    %cst_101 = arith.constant 3.100000e+01 : f32
    %301 = vector.broadcast %cst_101 : f32 to vector<1x256xf32>
    %302 = arith.subf %301, %298 : vector<1x256xf32>
    %303 = arith.select %300, %302, %298 : vector<1x256xi1>, vector<1x256xf32>
    %304 = arith.addf %292, %303 : vector<1x256xf32>
    %305 = arith.fptosi %304 : vector<1x256xf32> to vector<1x256xi32>
    %c0_i32_102 = arith.constant 0 : i32
    %306 = vector.broadcast %c0_i32_102 : i32 to vector<1x256xi32>
    %307 = arith.subi %227, %306 : vector<1x256xi32>
    %308 = vector.broadcast %307 : vector<1x256xi32> to vector<256x256xi32>
    %309 = arith.cmpi eq, %8, %308 : vector<256x256xi32>
    %cst_103 = arith.constant 0.000000e+00 : f32
    %310 = vector.shape_cast %186 : vector<1x256xf32> to vector<1x256xf32>
    %311 = vector.broadcast %310 : vector<1x256xf32> to vector<256x256xf32>
    %312 = vector.broadcast %cst_103 : f32 to vector<256x256xf32>
    %313 = arith.select %309, %311, %312 : vector<256x256xi1>, vector<256x256xf32>
    %c0_i32_104 = arith.constant 0 : i32
    %314 = vector.broadcast %c0_i32_104 : i32 to vector<1x256xi32>
    %315 = arith.subi %253, %314 : vector<1x256xi32>
    %316 = vector.broadcast %315 : vector<1x256xi32> to vector<256x256xi32>
    %317 = arith.cmpi eq, %8, %316 : vector<256x256xi32>
    %cst_105 = arith.constant 0.000000e+00 : f32
    %318 = vector.shape_cast %191 : vector<1x256xf32> to vector<1x256xf32>
    %319 = vector.broadcast %318 : vector<1x256xf32> to vector<256x256xf32>
    %320 = vector.broadcast %cst_105 : f32 to vector<256x256xf32>
    %321 = arith.select %317, %319, %320 : vector<256x256xi1>, vector<256x256xf32>
    %322 = arith.addf %313, %321 : vector<256x256xf32>
    %c0_i32_106 = arith.constant 0 : i32
    %323 = vector.broadcast %c0_i32_106 : i32 to vector<1x256xi32>
    %324 = arith.subi %279, %323 : vector<1x256xi32>
    %325 = vector.broadcast %324 : vector<1x256xi32> to vector<256x256xi32>
    %326 = arith.cmpi eq, %8, %325 : vector<256x256xi32>
    %cst_107 = arith.constant 0.000000e+00 : f32
    %327 = vector.shape_cast %196 : vector<1x256xf32> to vector<1x256xf32>
    %328 = vector.broadcast %327 : vector<1x256xf32> to vector<256x256xf32>
    %329 = vector.broadcast %cst_107 : f32 to vector<256x256xf32>
    %330 = arith.select %326, %328, %329 : vector<256x256xi1>, vector<256x256xf32>
    %331 = arith.addf %322, %330 : vector<256x256xf32>
    %c0_i32_108 = arith.constant 0 : i32
    %332 = vector.broadcast %c0_i32_108 : i32 to vector<1x256xi32>
    %333 = arith.subi %305, %332 : vector<1x256xi32>
    %334 = vector.broadcast %333 : vector<1x256xi32> to vector<256x256xi32>
    %335 = arith.cmpi eq, %8, %334 : vector<256x256xi32>
    %cst_109 = arith.constant 0.000000e+00 : f32
    %336 = vector.shape_cast %201 : vector<1x256xf32> to vector<1x256xf32>
    %337 = vector.broadcast %336 : vector<1x256xf32> to vector<256x256xf32>
    %338 = vector.broadcast %cst_109 : f32 to vector<256x256xf32>
    %339 = arith.select %335, %337, %338 : vector<256x256xi1>, vector<256x256xf32>
    %340 = arith.addf %331, %339 : vector<256x256xf32>
    %c0_110 = arith.constant 0 : index
    %c0_111 = arith.constant 0 : index
    %341 = vector.load %arg4[%c0_110, %c0_111] : memref<4x256xf32, #tpu.memory_space<vmem>>, vector<4x256xf32>
    %cst_112 = arith.constant dense<0.000000e+00> : vector<4x256xf32>
    %342 = tpu.matmul %341, %340, %cst_112 {dimension_numbers = #tpu.dot_dimension_numbers<[1], [0], [0], [1], [0, 0, 1, 1], [], []>, precision = #tpu.contract_precision<fp32>} : vector<4x256xf32>, vector<256x256xf32>, vector<4x256xf32> -> vector<4x256xf32>
    %cst_113 = arith.constant 0.000000e+00 : f32
    %cst_114 = arith.constant 1.000000e+00 : f32
    %343 = vector.broadcast %cst_113 : f32 to vector<4x256xf32>
    %344 = arith.maximumf %343, %342 : vector<4x256xf32>
    %345 = vector.broadcast %cst_114 : f32 to vector<4x256xf32>
    %346 = arith.minimumf %345, %344 : vector<4x256xf32>
    %c0_115 = arith.constant 0 : index
    %c0_116 = arith.constant 0 : index
    %c0_117 = arith.constant 0 : index
    %347 = vector.load %arg3[%c0_115, %c0_116, %c0_117] : memref<1x4x256xf32, #tpu.memory_space<vmem>>, vector<1x4x256xf32>
    %348 = vector.shape_cast %347 : vector<1x4x256xf32> to vector<4x256xf32>
    %349 = vector.shape_cast %346 : vector<4x256xf32> to vector<1x4x256xf32>
    tpu.vector_store %arg3[%c0_115, %c0_116, %c0_117], %349 {strides = array<i32>} : memref<1x4x256xf32, #tpu.memory_space<vmem>>, vector<1x4x256xf32>,
    return
  }
  func.func @transform_0(%arg0: i32) -> (i32, i32, i32) {
    %c0_i32 = arith.constant 0 : i32
    %c0_i32_0 = arith.constant 0 : i32
    %c0_i32_1 = arith.constant 0 : i32
    return %arg0, %c0_i32, %c0_i32_0 : i32, i32, i32
  }
  func.func @transform_1(%arg0: i32) -> (i32, i32, i32) {
    %c0_i32 = arith.constant 0 : i32
    %c0_i32_0 = arith.constant 0 : i32
    %c0_i32_1 = arith.constant 0 : i32
    return %arg0, %c0_i32, %c0_i32_0 : i32, i32, i32
  }
  func.func @transform_2(%arg0: i32) -> (i32, i32, i32) {
    %c0_i32 = arith.constant 0 : i32
    %c0_i32_0 = arith.constant 0 : i32
    %c0_i32_1 = arith.constant 0 : i32
    return %arg0, %c0_i32, %c0_i32_0 : i32, i32, i32
  }
}

</mosaic_0001>

<bundles_post_ra>
// kernel: tpu_custom_call.1
= control target key start
LH: loop header
LB: loop body
LE: loop exit
PB: predicated region body
PF: predicated region fallthrough
CT: control target
= control target key end

     0   :  { %7 = vsyncpa [#allocation4], 0  ;;  %s9096_s0 = inlined_call_operand.hbm [shape: f32[2,4,256], index: 0, kind: input, shape index: {}]   ;;  %s9097_s1 = inlined_call_operand.hbm [shape: f32[2,8,256], index: 1, kind: input, shape index: {}]   ;;  %s9098_s2 = inlined_call_operand.hbm [shape: f32[2,4,256], index: 2, kind: output, shape index: {}]  }
   0x1   :  { %9 = vsyncpa [#allocation4 + $0x1], 0 }
   0x2   :  { %10 = vsyncpa [#allocation7], 0 }
   0x3   :  { %12 = vsyncpa [#allocation7 + $0x1], 0 }
   0x4   :  { %13 = vsyncpa [#allocation5], 0 }
   0x5   :  { %15 = vsyncpa [#allocation5 + $0x1], 0  ;;  %s4905_s9 = smov 0   ;;  %s4907_s10 = smov 0  }
   0x6   :  { %s4909_s11 = smov 0   ;;  %s4911_s12 = smov 0  }
   0x7 LB: > { %s4926_s13 = sadd.s32 4294967295, %s4885_s12   ;;  %s4653_s14 = sadd.s32 4294967294, %s4885_s12   ;;  %s4885_s12 = sphi %s4911_s12, %s10401_s12   ;;  %s4881_s11 = sphi %s4909_s11, %s10400_s11   ;;  %s4877_s10 = sphi %s4907_s10, %s10399_s10   ;;  %s4873_s9 = sphi %s4905_s9, %s10398_s9  }
   0x8   : > { %s4930_s15 = sadd.s32 1, %s4885_s12   ;;  %s28_s16 = sadd.s32 1, %s4881_s11 }
   0x9   : > { %s25_s17 = ssub.s32 %s4885_s12, %s4930_s15  ;;  %p35_p0 = scmp.ne.s32.totalorder %s4881_s11, %s4877_s10 }
   0xa   : > { %p26_p1 = scmp.eq.s32.totalorder %s25_s17, 0  ;;  %p36_p2 = scmp.eq.s32.totalorder %s4885_s12, 0 }
   0xb   : > { %p41_p3 = scmp.ne.s32.totalorder %s4877_s10, %s4873_s9  ;;  %p42_p4 = scmp.eq.s32.totalorder %s4926_s13, 0 }
   0xc   : > { %s4942_s18 = scalar_select %p26_p1, %s4881_s11, %s28_s16  }
   0xd   : > { %p4944_p5 = por %p36_p2, %p35_p0  ;;  %p4948_p6 = por %p42_p4, %p41_p3 }
   0xe   : > { %p91_p7 = scmp.eq.s32.totalorder %s4926_s13, 1  ;;  %p97_p8 = scmp.eq.s32.totalorder %s4653_s14, 1 }
   0xf   : > { %s9673_s20 = scalar_select %p4948_p6, 1, 0 }
  0x10   : > { %p4724_p10 = scmp.lt.s32.totalorder %s4885_s12, 2  ;;  %p4955_p11 = por %p91_p7, %p35_p0 }
  0x11   : > { %p4959_p12 = por %p97_p8, %p41_p3  ;;  %s4964_s23 = sand.u32 1, %s4881_s11  }
  0x12   : > { %s9674_s21 = scalar_select %p4955_p11, 1, 0 }
  0x13   : > { %s9675_s22 = scalar_select %p4959_p12, 1, 0 }
  0x14   : > { %s4671_s24 = sshll.u32 %s4885_s12, 7  ;;  %s4656_s25 = sshll.u32 %s4964_s23, 3 }
  0x15   : > { %s4971_s28 = scalar_lea.hbm %s9096_s0, %s4671_s24  ;;  %s121_s29 = scalar_lea.vmem [#allocation3], %s4656_s25 }
  0x16   : > { %s129_s30 = sshll.u32 %s121_s29, 4  ;;  %p4975_p13 = pnand %p4724_p10, %p4944_p5  ;;  %s4979_s30 = int_to_ptr.vmem [resolvable:$true] %s129_s30 }
  0x17   : > { %s118_s4 = scalar_lea.sflag [#allocation4], %s4964_s23  ;;  %s4761_s5 = scalar_lea.hbm %s4971_s28, 128 }
  0x18   : > { %p4762_p2 = scmp.ne.s32.totalorder %s4971_s28, %s4761_s5  ;;  %p4763_p3 = pneg %p4975_p13 }
  0x19   : > { %s4766_s8 = scalar_lea.hbm %s9096_s0, 256  ;;  %p4767_p5 = scmp.lt.s32.totalorder %s4971_s28, %s9096_s0 }
  0x1a   : > { %p4764_p4 = pnand %p4763_p3, %p4762_p2  ;;  %p4768_p8 = scmp.lt.s32.totalorder %s4766_s8, %s4761_s5 }
  0x1c   : > { %p4765_p7 = pneg %p4764_p4  ;;  %p4769_p10 = por %p4768_p8, %p4767_p5 }
  0x1e   : > { %p4770_p9 = pnand %p4769_p10, %p4765_p7 }
  0x20   : > { %4773 = shalt.err (!%p4770_p9)
}
  0x21   : > { %s4774_s17 = scalar_lea.vmem %s4979_s30, 128  ;;  %s4887_s19 = smov [#allocation3]  }
  0x22   : > { %p4775_p0 = scmp.ne.s32.totalorder %s4979_s30, %s4774_s17  ;;  %s4779_s24 = sshll.u32 %s4887_s19, 4  ;;  %s4780_s24 = int_to_ptr.vmem [resolvable:$false] %s4779_s24 }
  0x23   : > { %s4781_s25 = scalar_lea.vmem %s4780_s24, 256  ;;  %p4782_p1 = scmp.lt.s32.totalorder %s4979_s30, %s4780_s24 }
  0x24   : > { %p4777_p2 = pnand %p4775_p0, %p4763_p3  ;;  %p4783_p12 = scmp.lt.s32.totalorder %s4781_s25, %s4774_s17 }
  0x26   : > { %p4778_p4 = pneg %p4777_p2  ;;  %p4784_p11 = por %p4783_p12, %p4782_p1 }
  0x28   : > { %p4785_p5 = pnand %p4784_p11, %p4778_p4 }
  0x2a   : > { %4788 = shalt.err (!%p4785_p5)
}
  0x2b   : > { %4716 = dma.hbm_to_vmem [thread:$0]  (!%p4975_p13), %s4971_s28, 128, %s4979_s30, %s118_s4  }
  0x2c   : > { %p9677_p9 = scmp.lt.s32.totalorder %s4885_s12, 3  ;;  %p9678_p0 = scmp.ge.s32.totalorder %s4885_s12, 1 }
  0x2d   : > { %s4659_s27 = sshll.u32 %s4964_s23, 4  ;;  %s4672_s29 = sshll.u32 %s4885_s12, 8 }
  0x2e   : > { %p5012_p7 = pnand %p9678_p0, %p9677_p9  ;;  %s5021_s7 = scalar_lea.hbm %s9097_s1, %s4672_s29 }
  0x2f   : > { %s140_s8 = scalar_lea.vmem [#allocation6], %s4659_s27  ;;  %s137_s28 = scalar_lea.sflag [#allocation7], %s4964_s23 }
  0x30   : > { %s9679_s26 = scalar_select %p5012_p7, 1, 0 }
  0x31   : > { %s148_s14 = sshll.u32 %s140_s8, 4  ;;  %s4789_s30 = scalar_lea.hbm %s5021_s7, 256  ;;  %s149_s14 = int_to_ptr.vmem [resolvable:$true] %s148_s14 }
  0x32   : > { %p4790_p11 = scmp.ne.s32.totalorder %s5021_s7, %s4789_s30  ;;  %s4794_s17 = scalar_lea.hbm %s9097_s1, 512 }
  0x33   : > { %p4795_p8 = scmp.lt.s32.totalorder %s5021_s7, %s9097_s1  ;;  %p4796_p10 = scmp.lt.s32.totalorder %s4794_s17, %s4789_s30 }
  0x34   : > { %p4792_p12 = pnand %p4790_p11, %p4763_p3 }
  0x35   : > { %p4797_p2 = por %p4796_p10, %p4795_p8 }
  0x36   : > { %p4793_p1 = pneg %p4792_p12 }
  0x38   : > { %p4798_p4 = pnand %p4797_p2, %p4793_p1 }
  0x3a   : > { %4801 = shalt.err (!%p4798_p4)
}
  0x3b   : > { %s4802_s25 = scalar_lea.vmem %s149_s14, 256  ;;  %s4888_s23 = smov [#allocation6]  }
  0x3c   : > { %p4803_p5 = scmp.ne.s32.totalorder %s149_s14, %s4802_s25  ;;  %s4807_s27 = sshll.u32 %s4888_s23, 4  ;;  %s4808_s27 = int_to_ptr.vmem [resolvable:$false] %s4807_s27 }
  0x3d   : > { %s4809_s29 = scalar_lea.vmem %s4808_s27, 512  ;;  %p4810_p11 = scmp.lt.s32.totalorder %s149_s14, %s4808_s27 }
  0x3e   : > { %p4805_p9 = pnand %p4803_p5, %p4763_p3  ;;  %p4811_p12 = scmp.lt.s32.totalorder %s4809_s29, %s4802_s25 }
  0x40   : > { %p4806_p0 = pneg %p4805_p9  ;;  %p4812_p6 = por %p4811_p12, %p4810_p11 }
  0x42   : > { %p4813_p7 = pnand %p4812_p6, %p4806_p0 }
  0x44   : > { %4816 = shalt.err (!%p4813_p7)
}
  0x45   : > { %4719 = dma.hbm_to_vmem [thread:$0]  (!%p4975_p13), %s5021_s7, 256, %s149_s14, %s137_s28  }
  0x46   : > { %p9680_p1 = scmp.ne.s32.totalorder %s9679_s26, 0 }
  0x48   : > { %157 = sbr.rel (%p9680_p1) target bundleno = 1121 (0x461), region = 28 }
  0x4d   : > { %s5045_s5 = sand.u32 1, %s4877_s10   ;;  %p9681_p6 = scmp.ne.s32.totalorder %s9673_s20, 0 }
  0x4e   : > { %s4663_s6 = sshll.u32 %s5045_s5, 3  ;;  %s160_s8 = scalar_lea.sflag [#allocation4], %s5045_s5 }
  0x4f   : > { %s5051_s30 = scalar_lea.vmem [#allocation3], %s4663_s6 }
  0x50   : > { %4860 = dma.done.wait (%p9681_p6), %s160_s8, 128  }
  0x51   : > { %4862 = vsyncadd (%p9681_p6), %s160_s8, 4294967168  ;;  %s4664_s3 = sshll.u32 %s5045_s5, 4  ;;  %s169_s26 = scalar_lea.sflag [#allocation7], %s5045_s5 }
  0x52   : > { %s5059_s7 = scalar_lea.vmem [#allocation6], %s4664_s3 }
  0x53   : > { %4864 = dma.done.wait (%p9681_p6), %s169_s26, 256  }
  0x54   : > { %4866 = vsyncadd (%p9681_p6), %s169_s26, 4294967040  ;;  %v198_v0 = vld [vmem:[%s5059_s7] sm:$0xff]  ;;  %v199_v1 = vld [vmem:[%s5059_s7 + $0x8] sm:$0xff]  ;;  %v200_v28 = vlaneseq  ;;  %s4673_s20 = sshll.u32 %s4926_s13, 7  ;;  %s197_s14 = scalar_lea.vmem [#allocation8], %s4663_s6 }
  0x55   : > { %v234_v2 = vfloor.f32 %v199_v1  ;;  %v233_v3 = vfloor.f32 %v198_v0  ;;  %s4560_s28 = sshll.u32 %s197_s14, 4  ;;  %s4558_s17 = scalar_lea.hbm %s9098_s2, %s4673_s20  ;;  %s4561_s28 = int_to_ptr.vmem [resolvable:$true] %s4560_s28 }
  0x56   : > { %v5067_v37 = vshrl.u32 %v200_v28, 7  ;;  %s4546_s19 = scalar_lea.sflag [#allocation5], %s5045_s5  ;;  %s4817_s24 = scalar_lea.vmem %s4561_s28, 128 }
  0x57   : > { %v248_v4 = vadd.f32 1.0, %v234_v2  ;;  %v263_v5 = vmul.f32 0.033333335, %v234_v2  ;;  %v247_v8 = vadd.f32 1.0, %v233_v3  ;;  %v262_v9 = vmul.f32 0.033333335, %v233_v3  ;;  %p4818_p13 = scmp.ne.s32.totalorder %s4561_s28, %s4817_s24 }
  0x58   : > { %v236_v23 = vsub.f32 %v199_v1, %v234_v2  ;;  %9682 = vst [vmem:[#allocation12_spill] sm:$0xff] %v5067_v37  ;;  %v5070_v48 = vsub.s32 0, %v5067_v37  ;;  %v235_v56 = vsub.f32 %v198_v0, %v233_v3  ;;  %v5079_v60 = vadd.s32 120, %v5067_v37  ;;  %p10395_p3 = scmp.ne.s32.totalorder %s9674_s21, 0  ;;  %s4889_s25 = smov [#allocation8]  }
  0x59   : > { %v265_v6 = vfloor.f32 %v263_v5  ;;  %v289_v7 = vmul.f32 0.033333335, %v248_v4  ;;  %v264_v13 = vfloor.f32 %v262_v9  ;;  %v288_v14 = vmul.f32 0.033333335, %v247_v8  ;;  %s4821_s13 = sshll.u32 %s4889_s25, 4  ;;  %s4822_s13 = int_to_ptr.vmem [resolvable:$false] %s4821_s13 }
  0x5a   : > { %v238_v31 = vsub.f32 1.0, %v236_v23  ;;  %v252_v41 = vrot.slane %v236_v23, 1  ;;  %9683 = vst [vmem:[#allocation13_spill] sm:$0xff] %v5079_v60  ;;  %p4819_p7 = pnand %p4818_p13, %p10395_p3  ;;  %s4823_s23 = scalar_lea.vmem %s4822_s13, 256 }
  0x5b   : > { %v267_v10 = vmul.f32 30.0, %v265_v6  ;;  %v291_v12 = vfloor.f32 %v289_v7  ;;  %v266_v18 = vmul.f32 30.0, %v264_v13  ;;  %v290_v19 = vfloor.f32 %v288_v14  ;;  %p4824_p10 = scmp.lt.s32.totalorder %s4561_s28, %s4822_s13  ;;  %p4825_p2 = scmp.lt.s32.totalorder %s4823_s23, %s4817_s24 }
  0x5c   : > { %v242_v40 = vrot.slane %v238_v31, 1  ;;  %v256_v50 = vmul.f32 %v252_v41, %v238_v31  ;;  %v260_v5 = vmul.f32 %v252_v41, %v236_v23  ;;  %v5135_v41 = vadd.s32 72, %v5067_v37  ;;  %p4820_p8 = pneg %p4819_p7 }
  0x5d   : > { %v269_v11 = vsub.f32 %v234_v2, %v267_v10  ;;  %v293_v16 = vmul.f32 30.0, %v291_v12  ;;  %v268_v25 = vsub.f32 %v233_v3, %v266_v18  ;;  %v292_v26 = vmul.f32 30.0, %v290_v19  ;;  %p4826_p4 = por %p4825_p2, %p4824_p10 }
  0x5e   : > { %v246_v49 = vmul.f32 %v242_v40, %v238_v31  ;;  %v258_v57 = vmul.f32 %v242_v40, %v236_v23  ;;  %v5085_v1 = vrot.slane %v256_v50, %v5070_v48  ;;  %v5132_v40 = vadd.s32 80, %v5067_v37  ;;  %9689 = vst [vmem:[#allocation19_spill] sm:$0xff] %v5135_v41 }
  0x5f   : > { %vm271_vm0 = vcmp.gt.f32.partialorder %v269_v11, 15.0  ;;  %v273_v15 = vsub.f32 30.0, %v269_v11  ;;  %v295_v20 = vsub.f32 %v248_v4, %v293_v16  ;;  %v272_v33 = vsub.f32 30.0, %v268_v25  ;;  %p4827_p5 = pnand %p4826_p4, %p4820_p8 }
  0x60   : > { %v294_v34 = vsub.f32 %v247_v8, %v292_v26  ;;  %vm270_vm2 = vcmp.gt.f32.partialorder %v268_v25, 15.0  ;;  %v5082_v63 = vrot.slane %v246_v49, %v5070_v48  ;;  %v237_v4 = vsub.f32 1.0, %v235_v56  ;;  %9688 = vst [vmem:[#allocation18_spill] sm:$0xff] %v5132_v40 }
  0x61   : > { %v275_v17 = vsel %vm271_vm0, %v273_v15, %v269_v11  ;;  %vm297_vm1 = vcmp.gt.f32.partialorder %v295_v20, 15.0  ;;  %v299_v24 = vsub.f32 30.0, %v295_v20  ;;  %v274_v42 = vsel %vm270_vm2, %v272_v33, %v268_v25 }
  0x62   : > { %v277_v21 = vmul.f32 16.0, %v275_v17  ;;  %v281_v22 = vrot.slane %v275_v17, 1  ;;  %v298_v43 = vsub.f32 30.0, %v294_v34  ;;  %vm296_vm3 = vcmp.gt.f32.partialorder %v294_v34, 15.0 }
  0x63   : > { %v301_v27 = vsel %vm297_vm1, %v299_v24, %v295_v20  ;;  %v276_v51 = vmul.f32 16.0, %v274_v42  ;;  %v280_v52 = vrot.slane %v274_v42, 1  ;;  %v5091_v6 = vrot.slane %v258_v57, %v5070_v48 }
  0x64   : > { %v285_v29 = vadd.f32 %v281_v22, %v277_v21  ;;  %v305_v30 = vrot.slane %v301_v27, 1  ;;  %v313_v32 = vmul.f32 16.0, %v301_v27  ;;  %v300_v53 = vsel %vm296_vm3, %v298_v43, %v294_v34 }
  0x65   : > { %v284_v61 = vadd.f32 %v280_v52, %v276_v51  ;;  %v304_v62 = vrot.slane %v300_v53, 1  ;;  %v312_v2 = vmul.f32 16.0, %v300_v53  ;;  %v241_v15 = vrot.slane %v237_v4, 1 }
  0x66   : > { %v309_v35 = vadd.f32 %v305_v30, %v277_v21  ;;  %v315_v36 = vadd.f32 %v313_v32, %v281_v22  ;;  %v4677_v38 = vtrunc.f32 %v285_v29  ;;  %v319_v45 = vadd.f32 %v313_v32, %v305_v30 }
  0x67   : > { %v4675_v7 = vtrunc.f32 %v284_v61  ;;  %v308_v8 = vadd.f32 %v304_v62, %v276_v51  ;;  %v314_v11 = vadd.f32 %v312_v2, %v280_v52  ;;  %v318_v12 = vadd.f32 %v312_v2, %v304_v62 }
  0x68   : > { %v4681_v39 = vtrunc.f32 %v309_v35  ;;  %v4685_v44 = vtrunc.f32 %v315_v36  ;;  %v4678_v46 = vcvt.f32.s32 %v4677_v38  ;;  %v4689_v55 = vtrunc.f32 %v319_v45 }
  0x69   : > { %v4676_v16 = vcvt.f32.s32 %v4675_v7  ;;  %v5105_v17 = vrot.slane %v260_v5, %v5070_v48  ;;  %v4679_v19 = vtrunc.f32 %v308_v8  ;;  %v4683_v20 = vtrunc.f32 %v314_v11 }
  0x6a   : > { %v4682_v47 = vcvt.f32.s32 %v4681_v39  ;;  %v4686_v54 = vcvt.f32.s32 %v4685_v44  ;;  %v5073_v58 = vrot.slane %v4678_v46, %v5070_v48  ;;  %v4690_v0 = vcvt.f32.s32 %v4689_v55 }
  0x6b   : > { %v4687_v21 = vtrunc.f32 %v318_v12  ;;  %v251_v22 = vrot.slane %v235_v56, 1  ;;  %v245_v24 = vmul.f32 %v241_v15, %v237_v4  ;;  %v4680_v26 = vcvt.f32.s32 %v4679_v19 }
  0x6c   : > { %v5076_v59 = vrot.slane %v4682_v47, %v5070_v48  ;;  %v5088_v3 = vrot.slane %v4686_v54, %v5070_v48  ;;  %vm361_vm4 = vcmp.eq.s32.totalorder %v5079_v60, %v5073_v58  ;;  %v5100_v13 = vrot.slane %v4690_v0, %v5070_v48 }
  0x6d   : > { %v433_v9 = vsel %vm361_vm4, %v5082_v63, 0.0  ;;  %v4684_v27 = vcvt.f32.s32 %v4683_v20  ;;  %v4688_v28 = vcvt.f32.s32 %v4687_v21  ;;  %v5112_v29 = vrot.slane %v4676_v16, %v5070_v48 }
  0x6e   : > { %vm505_vm5 = vcmp.eq.s32.totalorder %v5079_v60, %v5076_v59  ;;  %vm713_vm6 = vcmp.eq.s32.totalorder %v5079_v60, %v5088_v3  ;;  %vm921_vm7 = vcmp.eq.s32.totalorder %v5079_v60, %v5100_v13  ;;  %v255_v30 = vmul.f32 %v251_v22, %v237_v4 }
  0x6f   : > { %v577_v10 = vsel %vm505_vm5, %v5085_v1, 0.0  ;;  %v785_v18 = vsel %vm713_vm6, %v5091_v6, 0.0  ;;  %v993_v25 = vsel %vm921_vm7, %v5105_v17, 0.0  ;;  %v257_v31 = vmul.f32 %v241_v15, %v235_v56 }
  0x70   : > { %v641_v14 = vadd.f32 %v577_v10, %v433_v9  ;;  %v259_v32 = vmul.f32 %v251_v22, %v235_v56  ;;  %v5117_v34 = vadd.s32 112, %v5067_v37  ;;  %v5120_v35 = vadd.s32 104, %v5067_v37 }
  0x71   : > { %v5123_v36 = vadd.s32 96, %v5067_v37  ;;  %v5126_v38 = vrot.slane %v245_v24, %v5070_v48  ;;  %v5129_v39 = vadd.s32 88, %v5067_v37  ;;  %v5138_v42 = vrot.slane %v4680_v26, %v5070_v48 }
  0x72   : > { %v849_v23 = vadd.f32 %v785_v18, %v641_v14  ;;  %9684 = vst [vmem:[#allocation14_spill] sm:$0xff] %v5117_v34  ;;  %9685 = vst [vmem:[#allocation15_spill] sm:$0xff] %v5120_v35  ;;  %v5141_v43 = vrot.slane %v4684_v27, %v5070_v48  ;;  %v5144_v44 = vrot.slane %v4688_v28, %v5070_v48  ;;  %v5158_v49 = vadd.s32 64, %v5067_v37 }
  0x73   : > { %9686 = vst [vmem:[#allocation16_spill] sm:$0xff] %v5123_v36  ;;  %9687 = vst [vmem:[#allocation17_spill] sm:$0xff] %v5129_v39  ;;  %vm360_vm8 = vcmp.eq.s32.totalorder %v5079_v60, %v5112_v29  ;;  %v5149_v45 = vrot.slane %v255_v30, %v5070_v48  ;;  %v5152_v46 = vrot.slane %v257_v31, %v5070_v48  ;;  %v5164_v51 = vadd.s32 56, %v5067_v37 }
  0x74   : > { %v5114_v33 = vadd.f32 %v993_v25, %v849_v23  ;;  %v5155_v47 = vrot.slane %v259_v32, %v5070_v48  ;;  %9690 = vst [vmem:[#allocation20_spill] sm:$0xff] %v5158_v49  ;;  %v5167_v52 = vadd.s32 48, %v5067_v37  ;;  %v5170_v53 = vadd.s32 40, %v5067_v37 }
  0x75   : > { %9691 = vst [vmem:[#allocation21_spill] sm:$0xff] %v5164_v51  ;;  %v432_v54 = vsel %vm360_vm8, %v5126_v38, 0.0  ;;  %v5174_v48 = vadd.s32 32, %v5067_v37  ;;  %v5177_v55 = vadd.s32 24, %v5067_v37  ;;  %v5180_v56 = vadd.s32 16, %v5067_v37 }
  0x76   : > { %v5161_v50 = vand.u32 4294901760, %v5114_v33  ;;  %9692 = vst [vmem:[#allocation22_spill] sm:$0xff] %v5167_v52  ;;  %9693 = vst [vmem:[#allocation23_spill] sm:$0xff] %v5170_v53  ;;  %vm504_vm9 = vcmp.eq.s32.totalorder %v5079_v60, %v5138_v42  ;;  %vm712_vm10 = vcmp.eq.s32.totalorder %v5079_v60, %v5141_v43  ;;  %vm920_vm11 = vcmp.eq.s32.totalorder %v5079_v60, %v5144_v44 }
  0x77   : > { %9694 = vst [vmem:[#allocation24_spill] sm:$0xff] %v5174_v48  ;;  %9695 = vst [vmem:[#allocation25_spill] sm:$0xff] %v5177_v55  ;;  %vm359_vm12 = vcmp.eq.s32.totalorder %v5117_v34, %v5073_v58  ;;  %v576_v57 = vsel %vm504_vm9, %v5149_v45, 0.0  ;;  %v784_v61 = vsel %vm712_vm10, %v5152_v46, 0.0  ;;  %v992_v62 = vsel %vm920_vm11, %v5155_v47, 0.0 }
  0x78   : > { %9696 = vst [vmem:[#allocation26_spill] sm:$0xff] %v5180_v56  ;;  %1095 = vmatprep.subr.mxu0 %v5161_v50  ;;  %v431_v2 = vsel %vm359_vm12, %v5082_v63, 0.0  ;;  %v640_v0 = vadd.f32 %v576_v57, %v432_v54  ;;  %vm503_vm13 = vcmp.eq.s32.totalorder %v5117_v34, %v5076_v59  ;;  %vm711_vm14 = vcmp.eq.s32.totalorder %v5117_v34, %v5088_v3 }
  0x79   : > { %vm919_vm15 = vcmp.eq.s32.totalorder %v5117_v34, %v5100_v13  ;;  %v575_v4 = vsel %vm503_vm13, %v5085_v1, 0.0  ;;  %v783_v5 = vsel %vm711_vm14, %v5091_v6, 0.0  ;;  %vm358_vm0 = vcmp.eq.s32.totalorder %v5117_v34, %v5112_v29 }
  0x7a   : > { %v991_v7 = vsel %vm919_vm15, %v5105_v17, 0.0  ;;  %v848_v8 = vadd.f32 %v784_v61, %v640_v0  ;;  %v639_v9 = vadd.f32 %v575_v4, %v431_v2  ;;  %v430_v10 = vsel %vm358_vm0, %v5126_v38, 0.0 }
  0x7b   : > { %vm502_vm1 = vcmp.eq.s32.totalorder %v5117_v34, %v5138_v42  ;;  %vm710_vm2 = vcmp.eq.s32.totalorder %v5117_v34, %v5141_v43  ;;  %vm918_vm3 = vcmp.eq.s32.totalorder %v5117_v34, %v5144_v44  ;;  %vm357_vm4 = vcmp.eq.s32.totalorder %v5120_v35, %v5073_v58 }
  0x7c   : > { %v574_v11 = vsel %vm502_vm1, %v5149_v45, 0.0  ;;  %v5216_v12 = vadd.f32 %v992_v62, %v848_v8  ;;  %v847_v14 = vadd.f32 %v783_v5, %v639_v9  ;;  %v782_v16 = vsel %vm710_vm2, %v5152_v46, 0.0 }
  0x7d   : > { %v638_v15 = vadd.f32 %v574_v11, %v430_v10  ;;  %v990_v18 = vsel %vm918_vm3, %v5155_v47, 0.0  ;;  %v429_v19 = vsel %vm357_vm4, %v5082_v63, 0.0  ;;  %vm501_vm5 = vcmp.eq.s32.totalorder %v5120_v35, %v5076_v59 }
  0x7e   : > { %vm709_vm6 = vcmp.eq.s32.totalorder %v5120_v35, %v5088_v3  ;;  %v5226_v20 = vand.u32 4294901760, %v5216_v12  ;;  %v5228_v21 = vadd.f32 %v991_v7, %v847_v14  ;;  %v573_v23 = vsel %vm501_vm5, %v5085_v1, 0.0 }
  0x7f   : > { %v846_v22 = vadd.f32 %v782_v16, %v638_v15  ;;  %v637_v24 = vadd.f32 %v573_v23, %v429_v19  ;;  %v781_v25 = vsel %vm709_vm6, %v5091_v6, 0.0  ;;  %vm917_vm7 = vcmp.eq.s32.totalorder %v5120_v35, %v5100_v13 }
  0x80   : > { %vm356_vm8 = vcmp.eq.s32.totalorder %v5120_v35, %v5112_v29  ;;  %1097 = vmatpush1.msra.mxu0 %v5226_v20  ;;  %v5238_v26 = vand.u32 4294901760, %v5228_v21  ;;  %v989_v28 = vsel %vm917_vm7, %v5105_v17, 0.0  ;;  %vm500_vm9 = vcmp.eq.s32.totalorder %v5120_v35, %v5138_v42 }
  0x81   : > { %v5240_v27 = vadd.f32 %v990_v18, %v846_v22  ;;  %v428_v30 = vsel %vm356_vm8, %v5126_v38, 0.0  ;;  %v845_v31 = vadd.f32 %v781_v25, %v637_v24  ;;  %vm708_vm10 = vcmp.eq.s32.totalorder %v5120_v35, %v5141_v43 }
  0x82   : > { %vm916_vm11 = vcmp.eq.s32.totalorder %v5120_v35, %v5144_v44  ;;  %1099 = vmatprep.subr.mxu0 %v5238_v26  ;;  %v572_v54 = vsel %vm500_vm9, %v5149_v45, 0.0  ;;  %v780_v57 = vsel %vm708_vm10, %v5152_v46, 0.0  ;;  %vm355_vm12 = vcmp.eq.s32.totalorder %v5123_v36, %v5073_v58 }
  0x83   : > { %v5252_v32 = vand.u32 4294901760, %v5240_v27  ;;  %v988_v61 = vsel %vm916_vm11, %v5155_v47, 0.0  ;;  %v5257_v62 = vadd.f32 %v989_v28, %v845_v31  ;;  %v636_v2 = vadd.f32 %v572_v54, %v428_v30 }
  0x84   : > { %vm499_vm13 = vcmp.eq.s32.totalorder %v5123_v36, %v5076_v59  ;;  %v427_v0 = vsel %vm355_vm12, %v5082_v63, 0.0  ;;  %vm707_vm14 = vcmp.eq.s32.totalorder %v5123_v36, %v5088_v3  ;;  %vm915_vm15 = vcmp.eq.s32.totalorder %v5123_v36, %v5100_v13 }
  0x85   : > { %1101 = vmatpush1.msra.mxu0 %v5252_v32  ;;  %v571_v4 = vsel %vm499_vm13, %v5085_v1, 0.0  ;;  %v5271_v5 = vand.u32 4294901760, %v5257_v62  ;;  %v844_v7 = vadd.f32 %v780_v57, %v636_v2  ;;  %v779_v9 = vsel %vm707_vm14, %v5091_v6, 0.0 }
  0x86   : > { %v635_v8 = vadd.f32 %v571_v4, %v427_v0  ;;  %v987_v10 = vsel %vm915_vm15, %v5105_v17, 0.0  ;;  %vm354_vm0 = vcmp.eq.s32.totalorder %v5123_v36, %v5112_v29  ;;  %vm498_vm1 = vcmp.eq.s32.totalorder %v5123_v36, %v5138_v42 }
  0x87   : > { %9697 = vst [vmem:[#allocation27_spill] sm:$0xff] %v5271_v5  ;;  %vm706_vm2 = vcmp.eq.s32.totalorder %v5123_v36, %v5141_v43  ;;  %1103 = vmatprep.subr.mxu0 %v5271_v5  ;;  %v5282_v11 = vadd.f32 %v988_v61, %v844_v7  ;;  %v426_v15 = vsel %vm354_vm0, %v5126_v38, 0.0  ;;  %v570_v16 = vsel %vm498_vm1, %v5149_v45, 0.0 }
  0x88   : > { %v843_v14 = vadd.f32 %v779_v9, %v635_v8  ;;  %v634_v18 = vadd.f32 %v570_v16, %v426_v15  ;;  %v778_v19 = vsel %vm706_vm2, %v5152_v46, 0.0  ;;  %vm914_vm3 = vcmp.eq.s32.totalorder %v5123_v36, %v5144_v44 }
  0x89   : > { %vm353_vm4 = vcmp.eq.s32.totalorder %v5129_v39, %v5073_v58  ;;  %v5292_v22 = vand.u32 4294901760, %v5282_v11  ;;  %v986_v24 = vsel %vm914_vm3, %v5155_v47, 0.0  ;;  %vm497_vm5 = vcmp.eq.s32.totalorder %v5129_v39, %v5076_v59 }
  0x8a   : > { %v5294_v23 = vadd.f32 %v987_v10, %v843_v14  ;;  %v425_v25 = vsel %vm353_vm4, %v5082_v63, 0.0  ;;  %v842_v28 = vadd.f32 %v778_v19, %v634_v18  ;;  %vm705_vm6 = vcmp.eq.s32.totalorder %v5129_v39, %v5088_v3 }
  0x8b   : > { %9698 = vst [vmem:[#allocation28_spill] sm:$0xff] %v5292_v22  ;;  %vm913_vm7 = vcmp.eq.s32.totalorder %v5129_v39, %v5100_v13  ;;  %1105 = vmatpush1.msra.mxu0 %v5292_v22  ;;  %v569_v31 = vsel %vm497_vm5, %v5085_v1, 0.0  ;;  %v777_v54 = vsel %vm705_vm6, %v5091_v6, 0.0  ;;  %v5315_v0 = vsub.f32 %v5114_v33, %v5161_v50 }
  0x8c   : > { %v5306_v30 = vand.u32 4294901760, %v5294_v23  ;;  %v985_v57 = vsel %vm913_vm7, %v5105_v17, 0.0  ;;  %v5311_v61 = vadd.f32 %v986_v24, %v842_v28  ;;  %v633_v2 = vadd.f32 %v569_v31, %v425_v25 }
  0x8d   : > { %vm352_vm8 = vcmp.eq.s32.totalorder %v5129_v39, %v5112_v29  ;;  %vm496_vm9 = vcmp.eq.s32.totalorder %v5129_v39, %v5138_v42  ;;  %vm704_vm10 = vcmp.eq.s32.totalorder %v5129_v39, %v5141_v43  ;;  %vm912_vm11 = vcmp.eq.s32.totalorder %v5129_v39, %v5144_v44 }
  0x8e   : > { %9699 = vst [vmem:[#allocation29_spill] sm:$0xff] %v5306_v30  ;;  %1107 = vmatprep.subr.mxu0 %v5306_v30  ;;  %v424_v4 = vsel %vm352_vm8, %v5126_v38, 0.0  ;;  %v5328_v7 = vand.u32 4294901760, %v5311_v61  ;;  %v841_v33 = vadd.f32 %v777_v54, %v633_v2  ;;  %v9103_v8 = vand.u32 4294901760, %v5315_v0 }
  0x8f   : > { %v568_v9 = vsel %vm496_vm9, %v5149_v45, 0.0  ;;  %v776_v14 = vsel %vm704_vm10, %v5152_v46, 0.0  ;;  %v984_v15 = vsel %vm912_vm11, %v5155_v47, 0.0  ;;  %v5336_v16 = vsub.f32 %v5216_v12, %v5226_v20 }
  0x90   : > { %9700 = vst [vmem:[#allocation30_spill] sm:$0xff] %v5328_v7  ;;  %v632_v10 = vadd.f32 %v568_v9, %v424_v4  ;;  %1109 = vmatpush1.msra.mxu0 %v5328_v7  ;;  %v5339_v18 = vadd.f32 %v985_v57, %v841_v33  ;;  %v1242_v19 = vsub.f32 %v5315_v0, %v9103_v8 }
  0x91   : > { %vm351_vm12 = vcmp.eq.s32.totalorder %v5132_v40, %v5073_v58  ;;  %vm495_vm13 = vcmp.eq.s32.totalorder %v5132_v40, %v5076_v59  ;;  %v9101_v25 = vand.u32 4294901760, %v5336_v16  ;;  %vm703_vm14 = vcmp.eq.s32.totalorder %v5132_v40, %v5088_v3 }
  0x92   : > { %v840_v24 = vadd.f32 %v776_v14, %v632_v10  ;;  %v423_v12 = vsel %vm351_vm12, %v5082_v63, 0.0  ;;  %v567_v28 = vsel %vm495_vm13, %v5085_v1, 0.0  ;;  %v5352_v31 = vand.u32 4294901760, %v5339_v18 }
  0x93   : > { %v1243_v54 = vand.u32 4294901760, %v1242_v19  ;;  %v631_v57 = vadd.f32 %v567_v28, %v423_v12  ;;  %v1248_v4 = vsub.f32 %v5336_v16, %v9101_v25  ;;  %v775_v33 = vsel %vm703_vm14, %v5091_v6, 0.0 }
  0x94   : > { %9701 = vst [vmem:[#allocation31_spill] sm:$0xff] %v5352_v31  ;;  %v5356_v2 = vadd.f32 %v984_v15, %v840_v24  ;;  %vm911_vm15 = vcmp.eq.s32.totalorder %v5132_v40, %v5100_v13  ;;  %1111 = vmatprep.subr.mxu0 %v5352_v31  ;;  %v5368_v14 = vsub.f32 %v5228_v21, %v5238_v26 }
  0x95   : > { %1244 = vmatprep.subr.mxu1 %v1243_v54  ;;  %v839_v9 = vadd.f32 %v775_v33, %v631_v57  ;;  %v983_v10 = vsel %vm911_vm15, %v5105_v17, 0.0  ;;  %vm350_vm0 = vcmp.eq.s32.totalorder %v5132_v40, %v5112_v29  ;;  %v1249_v19 = vand.u32 4294901760, %v1248_v4 }
  0x96   : > { %v5373_v15 = vand.u32 4294901760, %v5356_v2  ;;  %v422_v24 = vsel %vm350_vm0, %v5126_v38, 0.0  ;;  %vm494_vm1 = vcmp.eq.s32.totalorder %v5132_v40, %v5138_v42  ;;  %v9102_v28 = vand.u32 4294901760, %v5368_v14 }
  0x97   : > { %v5378_v12 = vadd.f32 %v983_v10, %v839_v9  ;;  %v566_v54 = vsel %vm494_vm1, %v5149_v45, 0.0  ;;  %vm702_vm2 = vcmp.eq.s32.totalorder %v5132_v40, %v5141_v43  ;;  %1250 = vmatpush1.msra.mxu1 %v1249_v19  ;;  %vm910_vm3 = vcmp.eq.s32.totalorder %v5132_v40, %v5144_v44 }
  0x98   : > { %9702 = vst [vmem:[#allocation32_spill] sm:$0xff] %v5373_v15  ;;  %1113 = vmatpush1.msra.mxu0 %v5373_v15  ;;  %v630_v21 = vadd.f32 %v566_v54, %v422_v24  ;;  %v774_v57 = vsel %vm702_vm2, %v5152_v46, 0.0  ;;  %v5390_v4 = vsub.f32 %v5240_v27, %v5252_v32  ;;  %v1254_v9 = vsub.f32 %v5368_v14, %v9102_v28 }
  0x99   : > { %v5393_v33 = vand.u32 4294901760, %v5378_v12  ;;  %v982_v10 = vsel %vm910_vm3, %v5155_v47, 0.0  ;;  %vm349_vm4 = vcmp.eq.s32.totalorder %v5135_v41, %v5073_v58  ;;  %vm493_vm5 = vcmp.eq.s32.totalorder %v5135_v41, %v5076_v59 }
  0x9a   : > { %v838_v19 = vadd.f32 %v774_v57, %v630_v21  ;;  %v9106_v24 = vand.u32 4294901760, %v5390_v4  ;;  %v421_v54 = vsel %vm349_vm4, %v5082_v63, 0.0  ;;  %v1255_v27 = vand.u32 4294901760, %v1254_v9 }
  0x9b   : > { %9703 = vst [vmem:[#allocation33_spill] sm:$0xff] %v5393_v33  ;;  %1115 = vmatprep.subr.mxu0 %v5393_v33  ;;  %v565_v25 = vsel %vm493_vm5, %v5085_v1, 0.0  ;;  %vm701_vm6 = vcmp.eq.s32.totalorder %v5135_v41, %v5088_v3  ;;  %vm909_vm7 = vcmp.eq.s32.totalorder %v5135_v41, %v5100_v13  ;;  %v5420_v40 = vsub.f32 %v5257_v62, %v5271_v5 }
  0x9c   : > { %v5411_v28 = vadd.f32 %v982_v10, %v838_v19  ;;  %v1260_v21 = vsub.f32 %v5390_v4, %v9106_v24  ;;  %v629_v57 = vadd.f32 %v565_v25, %v421_v54  ;;  %v773_v8 = vsel %vm701_vm6, %v5091_v6, 0.0  ;;  %1256 = vmatprep.subr.mxu1 %v1255_v27 }
  0x9d   : > { %v981_v9 = vsel %vm909_vm7, %v5105_v17, 0.0  ;;  %vm348_vm8 = vcmp.eq.s32.totalorder %v5135_v41, %v5112_v29  ;;  %vm492_vm9 = vcmp.eq.s32.totalorder %v5135_v41, %v5138_v42  ;;  %v9111_v27 = vand.u32 4294901760, %v5420_v40 }
  0x9e   : > { %v5427_v10 = vand.u32 4294901760, %v5411_v28  ;;  %v1261_v19 = vand.u32 4294901760, %v1260_v21  ;;  %v837_v25 = vadd.f32 %v773_v8, %v629_v57  ;;  %v420_v54 = vsel %vm348_vm8, %v5126_v38, 0.0 }
  0x9f   : > { %v564_v24 = vsel %vm492_vm9, %v5149_v45, 0.0  ;;  %vm700_vm10 = vcmp.eq.s32.totalorder %v5135_v41, %v5141_v43  ;;  %vm908_vm11 = vcmp.eq.s32.totalorder %v5135_v41, %v5144_v44  ;;  %v1266_v57 = vsub.f32 %v5420_v40, %v9111_v27 }
  0xa0   : > { %9704 = vst [vmem:[#allocation34_spill] sm:$0xff] %v5427_v10  ;;  %1117 = vmatpush1.msra.mxu0 %v5427_v10  ;;  %1262 = vmatpush1.msra.mxu1 %v1261_v19  ;;  %v5437_v62 = vadd.f32 %v981_v9, %v837_v25  ;;  %v628_v39 = vadd.f32 %v564_v24, %v420_v54  ;;  %v772_v8 = vsel %vm700_vm10, %v5152_v46, 0.0  ;;  %v980_v21 = vsel %vm908_vm11, %v5155_v47, 0.0 }
  0xa1   : > { %v5446_v36 = vsub.f32 %v5282_v11, %v5292_v22  ;;  %vm347_vm12 = vcmp.eq.s32.totalorder %v5158_v49, %v5073_v58  ;;  %vm491_vm13 = vcmp.eq.s32.totalorder %v5158_v49, %v5076_v59  ;;  %v1267_v54 = vand.u32 4294901760, %v1266_v57 }
  0xa2   : > { %v5453_v24 = vand.u32 4294901760, %v5437_v62  ;;  %v836_v9 = vadd.f32 %v772_v8, %v628_v39  ;;  %v419_v19 = vsel %vm347_vm12, %v5082_v63, 0.0  ;;  %v563_v25 = vsel %vm491_vm13, %v5085_v1, 0.0 }
  0xa3   : > { %v9116_v27 = vand.u32 4294901760, %v5446_v36  ;;  %v627_v41 = vadd.f32 %v563_v25, %v419_v19  ;;  %vm699_vm14 = vcmp.eq.s32.totalorder %v5158_v49, %v5088_v3  ;;  %vm907_vm15 = vcmp.eq.s32.totalorder %v5158_v49, %v5100_v13  ;;  %1268 = vmatprep.subr.mxu1 %v1267_v54 }
  0xa4   : > { %9705 = vst [vmem:[#allocation35_spill] sm:$0xff] %v5453_v24  ;;  %1119 = vmatprep.subr.mxu0 %v5453_v24  ;;  %v5461_v11 = vadd.f32 %v980_v21, %v836_v9  ;;  %v771_v35 = vsel %vm699_vm14, %v5091_v6, 0.0  ;;  %v5468_v39 = vsub.f32 %v5294_v23, %v5306_v30  ;;  %v979_v19 = vsel %vm907_vm15, %v5105_v17, 0.0 }
  0xa5   : > { %v1272_v8 = vsub.f32 %v5446_v36, %v9116_v27  ;;  %v835_v57 = vadd.f32 %v771_v35, %v627_v41  ;;  %vm346_vm0 = vcmp.eq.s32.totalorder %v5158_v49, %v5112_v29  ;;  %vm490_vm1 = vcmp.eq.s32.totalorder %v5158_v49, %v5138_v42 }
  0xa6   : > { %v5477_v21 = vand.u32 4294901760, %v5461_v11  ;;  %v9119_v9 = vand.u32 4294901760, %v5468_v39  ;;  %v418_v25 = vsel %vm346_vm0, %v5126_v38, 0.0  ;;  %v562_v35 = vsel %vm490_vm1, %v5149_v45, 0.0 }
  0xa7   : > { %v1273_v23 = vand.u32 4294901760, %v1272_v8  ;;  %v5483_v54 = vadd.f32 %v979_v19, %v835_v57  ;;  %vm698_vm2 = vcmp.eq.s32.totalorder %v5158_v49, %v5141_v43  ;;  %v626_v27 = vadd.f32 %v562_v35, %v418_v25 }
  0xa8   : > { %9706 = vst [vmem:[#allocation36_spill] sm:$0xff] %v5477_v21  ;;  %1121 = vmatpush1.msra.mxu0 %v5477_v21  ;;  %v1278_v41 = vsub.f32 %v5468_v39, %v9119_v9  ;;  %v770_v34 = vsel %vm698_vm2, %v5152_v46, 0.0  ;;  %vm906_vm3 = vcmp.eq.s32.totalorder %v5158_v49, %v5144_v44  ;;  %v5501_v19 = vsub.f32 %v5311_v61, %v5328_v7 }
  0xa9   : > { %1274 = vmatpush1.msra.mxu1 %v1273_v23  ;;  %v5496_v8 = vand.u32 4294901760, %v5483_v54  ;;  %v978_v57 = vsel %vm906_vm3, %v5155_v47, 0.0  ;;  %vm345_vm4 = vcmp.eq.s32.totalorder %v5164_v51, %v5073_v58  ;;  %v834_v25 = vadd.f32 %v770_v34, %v626_v27 }
  0xaa   : > { %v1279_v9 = vand.u32 4294901760, %v1278_v41  ;;  %v417_v35 = vsel %vm345_vm4, %v5082_v63, 0.0  ;;  %vm489_vm5 = vcmp.eq.s32.totalorder %v5164_v51, %v5076_v59  ;;  %v9126_v23 = vand.u32 4294901760, %v5501_v19 }
  0xab   : > { %9707 = vst [vmem:[#allocation37_spill] sm:$0xff] %v5496_v8  ;;  %1123 = vmatprep.subr.mxu0 %v5496_v8  ;;  %v561_v49 = vsel %vm489_vm5, %v5085_v1, 0.0  ;;  %vm697_vm6 = vcmp.eq.s32.totalorder %v5164_v51, %v5088_v3  ;;  %vm905_vm7 = vcmp.eq.s32.totalorder %v5164_v51, %v5100_v13  ;;  %v5515_v61 = vadd.f32 %v978_v57, %v834_v25 }
  0xac   : > { %1280 = vmatprep.subr.mxu1 %v1279_v9  ;;  %v625_v34 = vadd.f32 %v561_v49, %v417_v35  ;;  %v769_v27 = vsel %vm697_vm6, %v5091_v6, 0.0  ;;  %v977_v41 = vsel %vm905_vm7, %v5105_v17, 0.0  ;;  %v1284_v60 = vsub.f32 %v5501_v19, %v9126_v23 }
  0xad   : > { %v5524_v7 = vsub.f32 %v5339_v18, %v5352_v31  ;;  %vm344_vm8 = vcmp.eq.s32.totalorder %v5164_v51, %v5112_v29  ;;  %vm488_vm9 = vcmp.eq.s32.totalorder %v5164_v51, %v5138_v42  ;;  %v5531_v49 = vand.u32 4294901760, %v5515_v61 }
  0xae   : > { %v833_v9 = vadd.f32 %v769_v27, %v625_v34  ;;  %v416_v57 = vsel %vm344_vm8, %v5126_v38, 0.0  ;;  %v560_v25 = vsel %vm488_vm9, %v5149_v45, 0.0  ;;  %v1285_v35 = vand.u32 4294901760, %v1284_v60 }
  0xaf   : > { %9708 = vst [vmem:[#allocation38_spill] sm:$0xff] %v5531_v49  ;;  %v9131_v23 = vand.u32 4294901760, %v5524_v7  ;;  %v624_v30 = vadd.f32 %v560_v25, %v416_v57  ;;  %vm696_vm10 = vcmp.eq.s32.totalorder %v5164_v51, %v5141_v43  ;;  %1125 = vmatpush1.msra.mxu0 %v5531_v49  ;;  %vm904_vm11 = vcmp.eq.s32.totalorder %v5164_v51, %v5144_v44 }
  0xb0   : > { %v5539_v18 = vadd.f32 %v977_v41, %v833_v9  ;;  %v768_v31 = vsel %vm696_vm10, %v5152_v46, 0.0  ;;  %v5546_v34 = vsub.f32 %v5356_v2, %v5373_v15  ;;  %1286 = vmatpush1.msra.mxu1 %v1285_v35  ;;  %v976_v57 = vsel %vm904_vm11, %v5155_v47, 0.0 }
  0xb1   : > { %v1290_v60 = vsub.f32 %v5524_v7, %v9131_v23  ;;  %v832_v27 = vadd.f32 %v768_v31, %v624_v30  ;;  %vm343_vm12 = vcmp.eq.s32.totalorder %v5167_v52, %v5073_v58  ;;  %vm487_vm13 = vcmp.eq.s32.totalorder %v5167_v52, %v5076_v59 }
  0xb2   : > { %v5555_v41 = vand.u32 4294901760, %v5539_v18  ;;  %v9134_v9 = vand.u32 4294901760, %v5546_v34  ;;  %v415_v25 = vsel %vm343_vm12, %v5082_v63, 0.0  ;;  %v559_v30 = vsel %vm487_vm13, %v5085_v1, 0.0 }
  0xb3   : > { %v1291_v2 = vand.u32 4294901760, %v1290_v60  ;;  %v5561_v35 = vadd.f32 %v976_v57, %v832_v27  ;;  %vm695_vm14 = vcmp.eq.s32.totalorder %v5167_v52, %v5088_v3  ;;  %v623_v23 = vadd.f32 %v559_v30, %v415_v25 }
  0xb4   : > { %9709 = vst [vmem:[#allocation39_spill] sm:$0xff] %v5555_v41  ;;  %1127 = vmatprep.subr.mxu0 %v5555_v41  ;;  %v1296_v31 = vsub.f32 %v5546_v34, %v9134_v9  ;;  %v767_v51 = vsel %vm695_vm14, %v5091_v6, 0.0  ;;  %vm903_vm15 = vcmp.eq.s32.totalorder %v5167_v52, %v5100_v13  ;;  %v5579_v57 = vsub.f32 %v5378_v12, %v5393_v33 }
  0xb5   : > { %1292 = vmatprep.subr.mxu1 %v1291_v2  ;;  %v5574_v60 = vand.u32 4294901760, %v5561_v35  ;;  %v975_v27 = vsel %vm903_vm15, %v5105_v17, 0.0  ;;  %vm342_vm0 = vcmp.eq.s32.totalorder %v5167_v52, %v5112_v29  ;;  %v831_v25 = vadd.f32 %v767_v51, %v623_v23 }
  0xb6   : > { %v1297_v9 = vand.u32 4294901760, %v1296_v31  ;;  %v414_v30 = vsel %vm342_vm0, %v5126_v38, 0.0  ;;  %vm486_vm1 = vcmp.eq.s32.totalorder %v5167_v52, %v5138_v42  ;;  %v9141_v2 = vand.u32 4294901760, %v5579_v57 }
  0xb7   : > { %9710 = vst [vmem:[#allocation40_spill] sm:$0xff] %v5574_v60  ;;  %1129 = vmatpush1.msra.mxu0 %v5574_v60  ;;  %v558_v15 = vsel %vm486_vm1, %v5149_v45, 0.0  ;;  %vm694_vm2 = vcmp.eq.s32.totalorder %v5167_v52, %v5141_v43  ;;  %vm902_vm3 = vcmp.eq.s32.totalorder %v5167_v52, %v5144_v44  ;;  %v5593_v12 = vadd.f32 %v975_v27, %v831_v25 }
  0xb8   : > { %1298 = vmatpush1.msra.mxu1 %v1297_v9  ;;  %v622_v51 = vadd.f32 %v558_v15, %v414_v30  ;;  %v766_v23 = vsel %vm694_vm2, %v5152_v46, 0.0  ;;  %v974_v31 = vsel %vm902_vm3, %v5155_v47, 0.0  ;;  %v1302_v33 = vsub.f32 %v5579_v57, %v9141_v2 }
  0xb9   : > { %v5602_v22 = vsub.f32 %v5411_v28, %v5427_v10  ;;  %vm341_vm4 = vcmp.eq.s32.totalorder %v5170_v53, %v5073_v58  ;;  %vm485_vm5 = vcmp.eq.s32.totalorder %v5170_v53, %v5076_v59  ;;  %v5609_v15 = vand.u32 4294901760, %v5593_v12 }
  0xba   : > { %v830_v9 = vadd.f32 %v766_v23, %v622_v51  ;;  %v413_v27 = vsel %vm341_vm4, %v5082_v63, 0.0  ;;  %v557_v25 = vsel %vm485_vm5, %v5085_v1, 0.0  ;;  %v1303_v30 = vand.u32 4294901760, %v1302_v33 }
  0xbb   : > { %9711 = vst [vmem:[#allocation41_spill] sm:$0xff] %v5609_v15  ;;  %v9146_v2 = vand.u32 4294901760, %v5602_v22  ;;  %v621_v52 = vadd.f32 %v557_v25, %v413_v27  ;;  %vm693_vm6 = vcmp.eq.s32.totalorder %v5170_v53, %v5088_v3  ;;  %1131 = vmatprep.subr.mxu0 %v5609_v15  ;;  %vm901_vm7 = vcmp.eq.s32.totalorder %v5170_v53, %v5100_v13 }
  0xbc   : > { %v5617_v28 = vadd.f32 %v974_v31, %v830_v9  ;;  %v765_v10 = vsel %vm693_vm6, %v5091_v6, 0.0  ;;  %v5624_v51 = vsub.f32 %v5437_v62, %v5453_v24  ;;  %1304 = vmatprep.subr.mxu1 %v1303_v30  ;;  %v973_v27 = vsel %vm901_vm7, %v5105_v17, 0.0 }
  0xbd   : > { %v1308_v33 = vsub.f32 %v5602_v22, %v9146_v2  ;;  %v829_v23 = vadd.f32 %v765_v10, %v621_v52  ;;  %vm340_vm8 = vcmp.eq.s32.totalorder %v5170_v53, %v5112_v29  ;;  %vm484_vm9 = vcmp.eq.s32.totalorder %v5170_v53, %v5138_v42 }
  0xbe   : > { %v5633_v31 = vand.u32 4294901760, %v5617_v28  ;;  %v9149_v9 = vand.u32 4294901760, %v5624_v51  ;;  %v412_v25 = vsel %vm340_vm8, %v5126_v38, 0.0  ;;  %v556_v52 = vsel %vm484_vm9, %v5149_v45, 0.0 }
  0xbf   : > { %v1309_v62 = vand.u32 4294901760, %v1308_v33  ;;  %v5639_v30 = vadd.f32 %v973_v27, %v829_v23  ;;  %vm692_vm10 = vcmp.eq.s32.totalorder %v5170_v53, %v5141_v43  ;;  %v620_v2 = vadd.f32 %v556_v52, %v412_v25 }
  0xc0   : > { %9712 = vst [vmem:[#allocation42_spill] sm:$0xff] %v5633_v31  ;;  %1133 = vmatpush1.msra.mxu0 %v5633_v31  ;;  %v1314_v10 = vsub.f32 %v5624_v51, %v9149_v9  ;;  %v764_v24 = vsel %vm692_vm10, %v5152_v46, 0.0  ;;  %vm900_vm11 = vcmp.eq.s32.totalorder %v5170_v53, %v5144_v44  ;;  %v5657_v27 = vsub.f32 %v5461_v11, %v5477_v21 }
  0xc1   : > { %1310 = vmatpush1.msra.mxu1 %v1309_v62  ;;  %v5652_v33 = vand.u32 4294901760, %v5639_v30  ;;  %v972_v23 = vsel %vm900_vm11, %v5155_v47, 0.0  ;;  %vm339_vm12 = vcmp.eq.s32.totalorder %v5174_v48, %v5073_v58  ;;  %v828_v25 = vadd.f32 %v764_v24, %v620_v2 }
  0xc2   : > { %9714 = vst [vmem:[#allocation44_spill] sm:$0xff] %v5657_v27  ;;  %v1315_v9 = vand.u32 4294901760, %v1314_v10  ;;  %v411_v52 = vsel %vm339_vm12, %v5082_v63, 0.0  ;;  %vm483_vm13 = vcmp.eq.s32.totalorder %v5174_v48, %v5076_v59  ;;  %v9156_v62 = vand.u32 4294901760, %v5657_v27 }
  0xc3   : > { %9713 = vst [vmem:[#allocation43_spill] sm:$0xff] %v5652_v33  ;;  %1135 = vmatprep.subr.mxu0 %v5652_v33  ;;  %v555_v53 = vsel %vm483_vm13, %v5085_v1, 0.0  ;;  %vm691_vm14 = vcmp.eq.s32.totalorder %v5174_v48, %v5088_v3  ;;  %vm899_vm15 = vcmp.eq.s32.totalorder %v5174_v48, %v5100_v13  ;;  %v5671_v11 = vadd.f32 %v972_v23, %v828_v25 }
  0xc4   : > { %1316 = vmatprep.subr.mxu1 %v1315_v9  ;;  %v619_v24 = vadd.f32 %v555_v53, %v411_v52  ;;  %v763_v2 = vsel %vm691_vm14, %v5091_v6, 0.0  ;;  %v971_v10 = vsel %vm899_vm15, %v5105_v17, 0.0  ;;  %v1320_v21 = vsub.f32 %v5657_v27, %v9156_v62 }
  0xc5   : > { %v5680_v5 = vsub.f32 %v5483_v54, %v5496_v8  ;;  %vm338_vm0 = vcmp.eq.s32.totalorder %v5174_v48, %v5112_v29  ;;  %vm482_vm1 = vcmp.eq.s32.totalorder %v5174_v48, %v5138_v42  ;;  %v5687_v53 = vand.u32 4294901760, %v5671_v11 }
  0xc6   : > { %v827_v9 = vadd.f32 %v763_v2, %v619_v24  ;;  %v410_v23 = vsel %vm338_vm0, %v5126_v38, 0.0  ;;  %v554_v25 = vsel %vm482_vm1, %v5149_v45, 0.0  ;;  %v1321_v52 = vand.u32 4294901760, %v1320_v21 }
  0xc7   : > { %9715 = vst [vmem:[#allocation45_spill] sm:$0xff] %v5687_v53  ;;  %v9161_v62 = vand.u32 4294901760, %v5680_v5  ;;  %v618_v27 = vadd.f32 %v554_v25, %v410_v23  ;;  %vm690_vm2 = vcmp.eq.s32.totalorder %v5174_v48, %v5141_v43  ;;  %1137 = vmatpush1.msra.mxu0 %v5687_v53  ;;  %vm898_vm3 = vcmp.eq.s32.totalorder %v5174_v48, %v5144_v44 }
  0xc8   : > { %v5695_v54 = vadd.f32 %v971_v10, %v827_v9  ;;  %v762_v8 = vsel %vm690_vm2, %v5152_v46, 0.0  ;;  %v5702_v24 = vsub.f32 %v5515_v61, %v5531_v49  ;;  %1322 = vmatpush1.msra.mxu1 %v1321_v52  ;;  %v970_v23 = vsel %vm898_vm3, %v5155_v47, 0.0 }
  0xc9   : > { %v1326_v21 = vsub.f32 %v5680_v5, %v9161_v62  ;;  %v826_v2 = vadd.f32 %v762_v8, %v618_v27  ;;  %vm337_vm4 = vcmp.eq.s32.totalorder %v5177_v55, %v5073_v58  ;;  %vm481_vm5 = vcmp.eq.s32.totalorder %v5177_v55, %v5076_v59 }
  0xca   : > { %9716 = vst [vmem:[#allocation46_spill] sm:$0xff] %v5702_v24  ;;  %v5711_v10 = vand.u32 4294901760, %v5695_v54  ;;  %v9164_v9 = vand.u32 4294901760, %v5702_v24  ;;  %v409_v25 = vsel %vm337_vm4, %v5082_v63, 0.0  ;;  %v553_v8 = vsel %vm481_vm5, %v5085_v1, 0.0 }
  0xcb   : > { %v1327_v61 = vand.u32 4294901760, %v1326_v21  ;;  %v5717_v52 = vadd.f32 %v970_v23, %v826_v2  ;;  %vm689_vm6 = vcmp.eq.s32.totalorder %v5177_v55, %v5088_v3  ;;  %v617_v62 = vadd.f32 %v553_v8, %v409_v25 }
  0xcc   : > { %9717 = vst [vmem:[#allocation47_spill] sm:$0xff] %v5711_v10  ;;  %1139 = vmatprep.subr.mxu0 %v5711_v10  ;;  %v1332_v27 = vsub.f32 %v5702_v24, %v9164_v9  ;;  %v761_v48 = vsel %vm689_vm6, %v5091_v6, 0.0  ;;  %vm897_vm7 = vcmp.eq.s32.totalorder %v5177_v55, %v5100_v13  ;;  %v5735_v23 = vsub.f32 %v5539_v18, %v5555_v41 }
  0xcd   : > { %1328 = vmatprep.subr.mxu1 %v1327_v61  ;;  %v5730_v21 = vand.u32 4294901760, %v5717_v52  ;;  %v969_v2 = vsel %vm897_vm7, %v5105_v17, 0.0  ;;  %vm336_vm8 = vcmp.eq.s32.totalorder %v5177_v55, %v5112_v29  ;;  %v825_v25 = vadd.f32 %v761_v48, %v617_v62 }
  0xce   : > { %9719 = vst [vmem:[#allocation49_spill] sm:$0xff] %v5735_v23  ;;  %v1333_v9 = vand.u32 4294901760, %v1332_v27  ;;  %v408_v8 = vsel %vm336_vm8, %v5126_v38, 0.0  ;;  %vm480_vm9 = vcmp.eq.s32.totalorder %v5177_v55, %v5138_v42  ;;  %v9171_v61 = vand.u32 4294901760, %v5735_v23 }
  0xcf   : > { %9718 = vst [vmem:[#allocation48_spill] sm:$0xff] %v5730_v21  ;;  %1141 = vmatpush1.msra.mxu0 %v5730_v21  ;;  %v552_v49 = vsel %vm480_vm9, %v5149_v45, 0.0  ;;  %vm688_vm10 = vcmp.eq.s32.totalorder %v5177_v55, %v5141_v43  ;;  %vm896_vm11 = vcmp.eq.s32.totalorder %v5177_v55, %v5144_v44  ;;  %v5749_v18 = vadd.f32 %v969_v2, %v825_v25 }
  0xd0   : > { %1334 = vmatpush1.msra.mxu1 %v1333_v9  ;;  %v616_v48 = vadd.f32 %v552_v49, %v408_v8  ;;  %v760_v62 = vsel %vm688_vm10, %v5152_v46, 0.0  ;;  %v968_v27 = vsel %vm896_vm11, %v5155_v47, 0.0  ;;  %v1338_v41 = vsub.f32 %v5735_v23, %v9171_v61 }
  0xd1   : > { %v5758_v24 = vsub.f32 %v5561_v35, %v5574_v60  ;;  %vm335_vm12 = vcmp.eq.s32.totalorder %v5180_v56, %v5073_v58  ;;  %vm479_vm13 = vcmp.eq.s32.totalorder %v5180_v56, %v5076_v59  ;;  %v5765_v49 = vand.u32 4294901760, %v5749_v18 }
  0xd2   : > { %v824_v9 = vadd.f32 %v760_v62, %v616_v48  ;;  %v407_v2 = vsel %vm335_vm12, %v5082_v63, 0.0  ;;  %v551_v25 = vsel %vm479_vm13, %v5085_v1, 0.0  ;;  %v1339_v8 = vand.u32 4294901760, %v1338_v41 }
  0xd3   : > { %9720 = vst [vmem:[#allocation50_spill] sm:$0xff] %v5758_v24  ;;  %9721 = vst [vmem:[#allocation51_spill] sm:$0xff] %v5765_v49  ;;  %v9176_v61 = vand.u32 4294901760, %v5758_v24  ;;  %v615_v55 = vadd.f32 %v551_v25, %v407_v2  ;;  %vm687_vm14 = vcmp.eq.s32.totalorder %v5180_v56, %v5088_v3  ;;  %1143 = vmatprep.subr.mxu0 %v5765_v49 }
  0xd4   : > { %v5773_v35 = vadd.f32 %v968_v27, %v824_v9  ;;  %v759_v60 = vsel %vm687_vm14, %v5091_v6, 0.0  ;;  %vm895_vm15 = vcmp.eq.s32.totalorder %v5180_v56, %v5100_v13  ;;  %v5780_v48 = vsub.f32 %v5593_v12, %v5609_v15  ;;  %1340 = vmatprep.subr.mxu1 %v1339_v8 }
  0xd5   : > { %v1344_v41 = vsub.f32 %v5758_v24, %v9176_v61  ;;  %v823_v62 = vadd.f32 %v759_v60, %v615_v55  ;;  %v967_v2 = vsel %vm895_vm15, %v5105_v17, 0.0  ;;  %vm334_vm0 = vcmp.eq.s32.totalorder %v5180_v56, %v5112_v29 }
  0xd6   : > { %9722 = vst [vmem:[#allocation52_spill] sm:$0xff] %v5780_v48  ;;  %v5789_v27 = vand.u32 4294901760, %v5773_v35  ;;  %v9181_v9 = vand.u32 4294901760, %v5780_v48  ;;  %v406_v25 = vsel %vm334_vm0, %v5126_v38, 0.0  ;;  %vm478_vm1 = vcmp.eq.s32.totalorder %v5180_v56, %v5138_v42 }
  0xd7   : > { %v1345_v12 = vand.u32 4294901760, %v1344_v41  ;;  %v5795_v8 = vadd.f32 %v967_v2, %v823_v62  ;;  %v550_v55 = vsel %vm478_vm1, %v5149_v45, 0.0  ;;  %vm686_vm2 = vcmp.eq.s32.totalorder %v5180_v56, %v5141_v43 }
  0xd8   : > { %9723 = vst [vmem:[#allocation53_spill] sm:$0xff] %v5789_v27  ;;  %1145 = vmatpush1.msra.mxu0 %v5789_v27  ;;  %v1350_v60 = vsub.f32 %v5780_v48, %v9181_v9  ;;  %v614_v61 = vadd.f32 %v550_v55, %v406_v25  ;;  %v758_v15 = vsel %vm686_vm2, %v5152_v46, 0.0  ;;  %vm894_vm3 = vcmp.eq.s32.totalorder %v5180_v56, %v5144_v44 }
  0xd9   : > { %1346 = vmatpush1.msra.mxu1 %v1345_v12  ;;  %v5808_v41 = vand.u32 4294901760, %v5795_v8  ;;  %v966_v62 = vsel %vm894_vm3, %v5155_v47, 0.0  ;;  %v5813_v2 = vsub.f32 %v5617_v28, %v5633_v31  ;;  %v5816_v24 = vadd.s32 8, %v5067_v37 }
  0xda   : > { %v1351_v9 = vand.u32 4294901760, %v1350_v60  ;;  %v822_v25 = vadd.f32 %v758_v15, %v614_v61  ;;  %v5820_v55 = vsub.f32 %v5639_v30, %v5652_v33  ;;  %v5824_v12 = vsub.f32 %v5671_v11, %v5687_v53 }
  0xdb   : > { %9724 = vst [vmem:[#allocation54_spill] sm:$0xff] %v5808_v41  ;;  %9725 = vst [vmem:[#allocation55_spill] sm:$0xff] %v5813_v2  ;;  %1147 = vmatprep.subr.mxu0 %v5808_v41  ;;  %v9188_v56 = vand.u32 4294901760, %v5813_v2  ;;  %vm333_vm4 = vcmp.eq.s32.totalorder %v5816_v24, %v5073_v58  ;;  %vm477_vm5 = vcmp.eq.s32.totalorder %v5816_v24, %v5076_v59 }
  0xdc   : > { %9726 = vst [vmem:[#allocation56_spill] sm:$0xff] %v5816_v24  ;;  %9727 = vst [vmem:[#allocation57_spill] sm:$0xff] %v5820_v55  ;;  %vm685_vm6 = vcmp.eq.s32.totalorder %v5816_v24, %v5088_v3  ;;  %1352 = vmatprep.subr.mxu1 %v1351_v9  ;;  %v5834_v15 = vadd.f32 %v966_v62, %v822_v25  ;;  %v405_v28 = vsel %vm333_vm4, %v5082_v63, 0.0  ;;  %v549_v30 = vsel %vm477_vm5, %v5085_v1, 0.0 }
  0xdd   : > { %9728 = vst [vmem:[#allocation58_spill] sm:$0xff] %v5824_v12  ;;  %v757_v11 = vsel %vm685_vm6, %v5091_v6, 0.0  ;;  %v1356_v61 = vsub.f32 %v5813_v2, %v9188_v56  ;;  %v613_v60 = vadd.f32 %v549_v30, %v405_v28  ;;  %vm893_vm7 = vcmp.eq.s32.totalorder %v5816_v24, %v5100_v13 }
  0xde   : > { %v9191_v53 = vand.u32 4294901760, %v5820_v55  ;;  %v5846_v9 = vand.u32 4294901760, %v5834_v15  ;;  %v965_v62 = vsel %vm893_vm7, %v5105_v17, 0.0  ;;  %vm332_vm8 = vcmp.eq.s32.totalorder %v5816_v24, %v5112_v29 }
  0xdf   : > { %vm476_vm9 = vcmp.eq.s32.totalorder %v5816_v24, %v5138_v42  ;;  %v1357_v25 = vand.u32 4294901760, %v1356_v61  ;;  %v821_v33 = vadd.f32 %v757_v11, %v613_v60  ;;  %v404_v30 = vsel %vm332_vm8, %v5126_v38, 0.0 }
  0xe0   : > { %9729 = vst [vmem:[#allocation59_spill] sm:$0xff] %v5846_v9  ;;  %v1362_v28 = vsub.f32 %v5820_v55, %v9191_v53  ;;  %1149 = vmatpush1.msra.mxu0 %v5846_v9  ;;  %v548_v56 = vsel %vm476_vm9, %v5149_v45, 0.0  ;;  %vm684_vm10 = vcmp.eq.s32.totalorder %v5816_v24, %v5141_v43  ;;  %vm892_vm11 = vcmp.eq.s32.totalorder %v5816_v24, %v5144_v44 }
  0xe1   : > { %v9196_v31 = vand.u32 4294901760, %v5824_v12  ;;  %1358 = vmatpush1.msra.mxu1 %v1357_v25  ;;  %v5864_v11 = vadd.f32 %v965_v62, %v821_v33  ;;  %v612_v60 = vadd.f32 %v548_v56, %v404_v30  ;;  %v756_v53 = vsel %vm684_vm10, %v5152_v46, 0.0 }
  0xe2   : > { %v1363_v61 = vand.u32 4294901760, %v1362_v28  ;;  %v964_v55 = vsel %vm892_vm11, %v5155_v47, 0.0  ;;  %vm331_vm12 = vcmp.eq.s32.totalorder %v5067_v37, %v5073_v58  ;;  %vm475_vm13 = vcmp.eq.s32.totalorder %v5067_v37, %v5076_v59 }
  0xe3   : > { %v1368_v2 = vsub.f32 %v5824_v12, %v9196_v31  ;;  %v5876_v25 = vand.u32 4294901760, %v5864_v11  ;;  %v820_v33 = vadd.f32 %v756_v53, %v612_v60  ;;  %v403_v56 = vsel %vm331_vm12, %v5082_v63, 0.0 }
  0xe4   : > { %1364 = vmatprep.subr.mxu1 %v1363_v61  ;;  %v547_v62 = vsel %vm475_vm13, %v5085_v1, 0.0  ;;  %vm683_vm14 = vcmp.eq.s32.totalorder %v5067_v37, %v5088_v3  ;;  %vm891_vm15 = vcmp.eq.s32.totalorder %v5067_v37, %v5100_v13  ;;  %v5891_v61 = vsub.f32 %v5695_v54, %v5711_v10 }
  0xe5   : > { %9730 = vst [vmem:[#allocation60_spill] sm:$0xff] %v5876_v25  ;;  %v1369_v28 = vand.u32 4294901760, %v1368_v2  ;;  %v611_v30 = vadd.f32 %v547_v62, %v403_v56  ;;  %1151 = vmatprep.subr.mxu0 %v5876_v25  ;;  %v5885_v31 = vadd.f32 %v964_v55, %v820_v33  ;;  %v755_v24 = vsel %vm683_vm14, %v5091_v6, 0.0 }
  0xe6   : > { %v963_v53 = vsel %vm891_vm15, %v5105_v17, 0.0  ;;  %9731 = vst [vmem:[#allocation61_spill] sm:$0xff] %v5891_v61  ;;  %vm330_vm0 = vcmp.eq.s32.totalorder %v5067_v37, %v5112_v29  ;;  %vm474_vm1 = vcmp.eq.s32.totalorder %v5067_v37, %v5138_v42  ;;  %vm682_vm2 = vcmp.eq.s32.totalorder %v5067_v37, %v5141_v43 }
  0xe7   : > { %1370 = vmatpush1.msra.mxu1 %v1369_v28  ;;  %v819_v2 = vadd.f32 %v755_v24, %v611_v30  ;;  %v5900_v55 = vand.u32 4294901760, %v5885_v31  ;;  %v9201_v60 = vand.u32 4294901760, %v5891_v61  ;;  %v402_v33 = vsel %vm330_vm0, %v5126_v38, 0.0 }
  0xe8   : > { %v546_v54 = vsel %vm474_vm1, %v5149_v45, 0.0  ;;  %v754_v62 = vsel %vm682_vm2, %v5152_v46, 0.0  ;;  %vm890_vm3 = vcmp.eq.s32.totalorder %v5067_v37, %v5144_v44  ;;  %v5917_v10 = vsub.f32 %v5717_v52, %v5730_v21 }
  0xe9   : > { %9732 = vst [vmem:[#allocation62_spill] sm:$0xff] %v5900_v55  ;;  %v5905_v56 = vadd.f32 %v963_v53, %v819_v2  ;;  %v610_v24 = vadd.f32 %v546_v54, %v402_v33  ;;  %1153 = vmatpush1.msra.mxu0 %v5900_v55  ;;  %v1374_v28 = vsub.f32 %v5891_v61, %v9201_v60  ;;  %v962_v30 = vsel %vm890_vm3, %v5155_v47, 0.0 }
  0xea   : > { %9733 = vst [vmem:[#allocation63_spill] sm:$0xff] %v5917_v10  ;;  %v5920_v53 = vadd.s32 248, %v5067_v37  ;;  %v5927_v54 = vsub.f32 %v5749_v18, %v5765_v49  ;;  %v5931_v60 = vsub.f32 %v5773_v35, %v5789_v27  ;;  %v9210_v12 = vand.u32 4294901760, %v5917_v10 }
  0xeb   : > { %v5923_v2 = vand.u32 4294901760, %v5905_v56  ;;  %v818_v33 = vadd.f32 %v754_v62, %v610_v24  ;;  %v1375_v61 = vand.u32 4294901760, %v1374_v28 }
  0xec   : > { %9734 = vst [vmem:[#allocation64_spill] sm:$0xff] %v5920_v53  ;;  %9736 = vst [vmem:[#allocation66_spill] sm:$0xff] %v5927_v54  ;;  %vm393_vm4 = vcmp.eq.s32.totalorder %v5920_v53, %v5073_v58  ;;  %vm537_vm5 = vcmp.eq.s32.totalorder %v5920_v53, %v5076_v59  ;;  %vm745_vm6 = vcmp.eq.s32.totalorder %v5920_v53, %v5088_v3  ;;  %v9217_v27 = vand.u32 4294901760, %v5927_v54 }
  0xed   : > { %9735 = vst [vmem:[#allocation65_spill] sm:$0xff] %v5923_v2  ;;  %9737 = vst [vmem:[#allocation67_spill] sm:$0xff] %v5931_v60  ;;  %1155 = vmatprep.subr.mxu0 %v5923_v2  ;;  %v5939_v52 = vadd.f32 %v962_v30, %v818_v33  ;;  %v465_v18 = vsel %vm393_vm4, %v5082_v63, 0.0  ;;  %v609_v24 = vsel %vm537_vm5, %v5085_v1, 0.0  ;;  %1376 = vmatprep.subr.mxu1 %v1375_v61  ;;  %v817_v28 = vsel %vm745_vm6, %v5091_v6, 0.0 }
  0xee   : > { %v1380_v35 = vsub.f32 %v5917_v10, %v9210_v12  ;;  %v673_v62 = vadd.f32 %v609_v24, %v465_v18  ;;  %vm953_vm7 = vcmp.eq.s32.totalorder %v5920_v53, %v5100_v13  ;;  %vm392_vm8 = vcmp.eq.s32.totalorder %v5920_v53, %v5112_v29 }
  0xef   : > { %v5952_v30 = vand.u32 4294901760, %v5939_v52  ;;  %v1025_v33 = vsel %vm953_vm7, %v5105_v17, 0.0  ;;  %v464_v12 = vsel %vm392_vm8, %v5126_v38, 0.0  ;;  %vm536_vm9 = vcmp.eq.s32.totalorder %v5920_v53, %v5138_v42 }
  0xf0   : > { %v1381_v61 = vand.u32 4294901760, %v1380_v35  ;;  %v881_v49 = vadd.f32 %v817_v28, %v673_v62  ;;  %v1386_v18 = vsub.f32 %v5927_v54, %v9217_v27  ;;  %v608_v24 = vsel %vm536_vm9, %v5149_v45, 0.0 }
  0xf1   : > { %9738 = vst [vmem:[#allocation68_spill] sm:$0xff] %v5952_v30  ;;  %1157 = vmatpush1.msra.mxu0 %v5952_v30  ;;  %vm744_vm10 = vcmp.eq.s32.totalorder %v5920_v53, %v5141_v43  ;;  %vm952_vm11 = vcmp.eq.s32.totalorder %v5920_v53, %v5144_v44  ;;  %v672_v62 = vadd.f32 %v608_v24, %v464_v12  ;;  %v9222_v48 = vand.u32 4294901760, %v5931_v60 }
  0xf2   : > { %1382 = vmatpush1.msra.mxu1 %v1381_v61  ;;  %v5970_v35 = vadd.f32 %v1025_v33, %v881_v49  ;;  %v816_v28 = vsel %vm744_vm10, %v5152_v46, 0.0  ;;  %v1024_v21 = vsel %vm952_vm11, %v5155_v47, 0.0  ;;  %v1387_v10 = vand.u32 4294901760, %v1386_v18 }
  0xf3   : > { %v5976_v27 = vadd.s32 240, %v5067_v37  ;;  %v5980_v54 = vsub.f32 %v5795_v8, %v5808_v41  ;;  %v880_v49 = vadd.f32 %v816_v28, %v672_v62  ;;  %v5987_v12 = vsub.f32 %v5834_v15, %v5846_v9 }
  0xf4   : > { %v5983_v53 = vand.u32 4294901760, %v5970_v35  ;;  %v5990_v33 = vadd.s32 232, %v5067_v37  ;;  %1388 = vmatprep.subr.mxu1 %v1387_v10  ;;  %v1392_v61 = vsub.f32 %v5931_v60, %v9222_v48  ;;  %v6085_v60 = vadd.s32 224, %v5067_v37 }
  0xf5   : > { %9739 = vst [vmem:[#allocation69_spill] sm:$0xff] %v5976_v27  ;;  %9740 = vst [vmem:[#allocation70_spill] sm:$0xff] %v5980_v54  ;;  %vm391_vm12 = vcmp.eq.s32.totalorder %v5976_v27, %v5073_v58  ;;  %vm535_vm13 = vcmp.eq.s32.totalorder %v5976_v27, %v5076_v59  ;;  %vm743_vm14 = vcmp.eq.s32.totalorder %v5976_v27, %v5088_v3  ;;  %v9225_v28 = vand.u32 4294901760, %v5980_v54 }
  0xf6   : > { %9741 = vst [vmem:[#allocation71_spill] sm:$0xff] %v5983_v53  ;;  %9742 = vst [vmem:[#allocation72_spill] sm:$0xff] %v5987_v12  ;;  %1159 = vmatprep.subr.mxu0 %v5983_v53  ;;  %v6002_v8 = vadd.f32 %v1024_v21, %v880_v49  ;;  %v463_v15 = vsel %vm391_vm12, %v5082_v63, 0.0  ;;  %v607_v10 = vsel %vm535_vm13, %v5085_v1, 0.0  ;;  %v815_v18 = vsel %vm743_vm14, %v5091_v6, 0.0 }
  0xf7   : > { %9743 = vst [vmem:[#allocation73_spill] sm:$0xff] %v5990_v33  ;;  %v1393_v24 = vand.u32 4294901760, %v1392_v61  ;;  %v671_v62 = vadd.f32 %v607_v10, %v463_v15  ;;  %vm951_vm15 = vcmp.eq.s32.totalorder %v5976_v27, %v5100_v13  ;;  %vm390_vm0 = vcmp.eq.s32.totalorder %v5976_v27, %v5112_v29  ;;  %9749 = vst [vmem:[#allocation79_spill] sm:$0xff] %v6085_v60 }
  0xf8   : > { %v6011_v48 = vand.u32 4294901760, %v6002_v8  ;;  %v1023_v9 = vsel %vm951_vm15, %v5105_v17, 0.0  ;;  %vm534_vm1 = vcmp.eq.s32.totalorder %v5976_v27, %v5138_v42  ;;  %v1398_v49 = vsub.f32 %v5980_v54, %v9225_v28 }
  0xf9   : > { %1394 = vmatpush1.msra.mxu1 %v1393_v24  ;;  %v879_v21 = vadd.f32 %v815_v18, %v671_v62  ;;  %v462_v61 = vsel %vm390_vm0, %v5126_v38, 0.0  ;;  %v606_v15 = vsel %vm534_vm1, %v5149_v45, 0.0  ;;  %vm742_vm2 = vcmp.eq.s32.totalorder %v5976_v27, %v5141_v43 }
  0xfa   : > { %9744 = vst [vmem:[#allocation74_spill] sm:$0xff] %v6011_v48  ;;  %1161 = vmatpush2.msra.mxu0 %v6011_v48  ;;  %v670_v10 = vadd.f32 %v606_v15, %v462_v61  ;;  %vm950_vm3 = vcmp.eq.s32.totalorder %v5976_v27, %v5144_v44  ;;  %v9230_v24 = vand.u32 4294901760, %v5987_v12  ;;  %v1399_v62 = vand.u32 4294901760, %v1398_v49 }
  0xfb   : > { %v6029_v18 = vadd.f32 %v1023_v9, %v879_v21  ;;  %v814_v28 = vsel %vm742_vm2, %v5152_v46, 0.0  ;;  %v1022_v41 = vsel %vm950_vm3, %v5155_v47, 0.0  ;;  %vm389_vm4 = vcmp.eq.s32.totalorder %v5990_v33, %v5073_v58 }
  0xfc   : > { %v878_v54 = vadd.f32 %v814_v28, %v670_v10  ;;  %v1404_v61 = vsub.f32 %v5987_v12, %v9230_v24  ;;  %vm533_vm5 = vcmp.eq.s32.totalorder %v5990_v33, %v5076_v59  ;;  %1400 = vmatprep.subr.mxu1 %v1399_v62  ;;  %v461_v9 = vsel %vm389_vm4, %v5082_v63, 0.0 }
  0xfd   : > { %v6041_v15 = vand.u32 4294901760, %v6029_v18  ;;  %v605_v21 = vsel %vm533_vm5, %v5085_v1, 0.0  ;;  %vm741_vm6 = vcmp.eq.s32.totalorder %v5990_v33, %v5088_v3  ;;  %vm949_vm7 = vcmp.eq.s32.totalorder %v5990_v33, %v5100_v13 }
  0xfe   : > { %v6047_v28 = vadd.f32 %v1022_v41, %v878_v54  ;;  %v1405_v49 = vand.u32 4294901760, %v1404_v61  ;;  %v669_v10 = vadd.f32 %v605_v21, %v461_v9  ;;  %v813_v24 = vsel %vm741_vm6, %v5091_v6, 0.0 }
  0xff   : > { %9745 = vst [vmem:[#allocation75_spill] sm:$0xff] %v6041_v15  ;;  %1163 = vmatprep.subr.mxu0 %v6041_v15  ;;  %v6055_v62 = vsub.f32 %v5864_v11, %v5876_v25  ;;  %vm388_vm8 = vcmp.eq.s32.totalorder %v5990_v33, %v5112_v29  ;;  %vm532_vm9 = vcmp.eq.s32.totalorder %v5990_v33, %v5138_v42  ;;  %v1021_v61 = vsel %vm949_vm7, %v5105_v17, 0.0 }
 0x100   : > { %v6062_v41 = vand.u32 4294901760, %v6047_v28  ;;  %1406 = vmatpush1.msra.mxu1 %v1405_v49  ;;  %v877_v54 = vadd.f32 %v813_v24, %v669_v10  ;;  %v460_v9 = vsel %vm388_vm8, %v5126_v38, 0.0  ;;  %v604_v11 = vsel %vm532_vm9, %v5149_v45, 0.0 }
 0x101   : > { %9746 = vst [vmem:[#allocation76_spill] sm:$0xff] %v6055_v62  ;;  %v9239_v21 = vand.u32 4294901760, %v6055_v62  ;;  %vm740_vm10 = vcmp.eq.s32.totalorder %v5990_v33, %v5141_v43  ;;  %vm948_vm11 = vcmp.eq.s32.totalorder %v5990_v33, %v5144_v44  ;;  %v668_v49 = vadd.f32 %v604_v11, %v460_v9 }
 0x102   : > { %9747 = vst [vmem:[#allocation77_spill] sm:$0xff] %v6062_v41  ;;  %1165 = vmatpush2.msra.mxu0 %v6062_v41  ;;  %v6073_v27 = vadd.f32 %v1021_v61, %v877_v54  ;;  %v812_v24 = vsel %vm740_vm10, %v5152_v46, 0.0  ;;  %v1020_v10 = vsel %vm948_vm11, %v5155_v47, 0.0  ;;  %v6082_v12 = vsub.f32 %v5885_v31, %v5900_v55 }
 0x103   : > { %v1410_v25 = vsub.f32 %v6055_v62, %v9239_v21  ;;  %v6089_v54 = vsub.f32 %v5905_v56, %v5923_v2  ;;  %v876_v9 = vadd.f32 %v812_v24, %v668_v49  ;;  %v6096_v11 = vsub.f32 %v5939_v52, %v5952_v30 }
 0x104   : > { %9748 = vst [vmem:[#allocation78_spill] sm:$0xff] %v6082_v12  ;;  %v6092_v61 = vand.u32 4294901760, %v6073_v27  ;;  %v6099_v21 = vadd.s32 216, %v5067_v37  ;;  %v9248_v33 = vand.u32 4294901760, %v6082_v12  ;;  %vm387_vm12 = vcmp.eq.s32.totalorder %v6085_v60, %v5073_v58 }
 0x105   : > { %9750 = vst [vmem:[#allocation80_spill] sm:$0xff] %v6089_v54  ;;  %9752 = vst [vmem:[#allocation82_spill] sm:$0xff] %v6096_v11  ;;  %v1411_v31 = vand.u32 4294901760, %v1410_v25  ;;  %vm531_vm13 = vcmp.eq.s32.totalorder %v6085_v60, %v5076_v59  ;;  %v6107_v56 = vadd.f32 %v1020_v10, %v876_v9  ;;  %v459_v49 = vsel %vm387_vm12, %v5082_v63, 0.0 }
 0x106   : > { %9751 = vst [vmem:[#allocation81_spill] sm:$0xff] %v6092_v61  ;;  %9753 = vst [vmem:[#allocation83_spill] sm:$0xff] %v6099_v21  ;;  %1167 = vmatprep.subr.mxu0 %v6092_v61  ;;  %v603_v52 = vsel %vm531_vm13, %v5085_v1, 0.0  ;;  %vm739_vm14 = vcmp.eq.s32.totalorder %v6085_v60, %v5088_v3  ;;  %v1416_v25 = vsub.f32 %v6082_v12, %v9248_v33  ;;  %v9255_v2 = vand.u32 4294901760, %v6089_v54 }
 0x107   : > { %1412 = vmatprep.subr.mxu1 %v1411_v31  ;;  %v667_v24 = vadd.f32 %v603_v52, %v459_v49  ;;  %v811_v30 = vsel %vm739_vm14, %v5091_v6, 0.0  ;;  %vm947_vm15 = vcmp.eq.s32.totalorder %v6085_v60, %v5100_v13  ;;  %v6120_v10 = vand.u32 4294901760, %v6107_v56 }
 0x108   : > { %v1019_v9 = vsel %vm947_vm15, %v5105_v17, 0.0  ;;  %vm386_vm0 = vcmp.eq.s32.totalorder %v6085_v60, %v5112_v29  ;;  %v1417_v31 = vand.u32 4294901760, %v1416_v25  ;;  %vm530_vm1 = vcmp.eq.s32.totalorder %v6085_v60, %v5138_v42 }
 0x109   : > { %9754 = vst [vmem:[#allocation84_spill] sm:$0xff] %v6120_v10  ;;  %v875_v55 = vadd.f32 %v811_v30, %v667_v24  ;;  %v458_v33 = vsel %vm386_vm0, %v5126_v38, 0.0  ;;  %1169 = vmatpush2.msra.mxu0 %v6120_v10  ;;  %v1422_v49 = vsub.f32 %v6089_v54, %v9255_v2  ;;  %v602_v52 = vsel %vm530_vm1, %v5149_v45, 0.0 }
 0x10a   : > { %vm738_vm2 = vcmp.eq.s32.totalorder %v6085_v60, %v5141_v43  ;;  %vm946_vm3 = vcmp.eq.s32.totalorder %v6085_v60, %v5144_v44  ;;  %1418 = vmatpush1.msra.mxu1 %v1417_v31  ;;  %v666_v25 = vadd.f32 %v602_v52, %v458_v33  ;;  %v9256_v23 = vand.u32 4294901760, %v6096_v11 }
 0x10b   : > { %v6138_v30 = vadd.f32 %v1019_v9, %v875_v55  ;;  %v810_v24 = vsel %vm738_vm2, %v5152_v46, 0.0  ;;  %v1018_v12 = vsel %vm946_vm3, %v5155_v47, 0.0  ;;  %v1423_v62 = vand.u32 4294901760, %v1422_v49 }
 0x10c   : > { %vm385_vm4 = vcmp.eq.s32.totalorder %v6099_v21, %v5073_v58  ;;  %vm529_vm5 = vcmp.eq.s32.totalorder %v6099_v21, %v5076_v59  ;;  %v874_v31 = vadd.f32 %v810_v24, %v666_v25  ;;  %v1428_v9 = vsub.f32 %v6096_v11, %v9256_v23 }
 0x10d   : > { %v6148_v2 = vand.u32 4294901760, %v6138_v30  ;;  %v457_v55 = vsel %vm385_vm4, %v5082_v63, 0.0  ;;  %v601_v33 = vsel %vm529_vm5, %v5085_v1, 0.0  ;;  %1424 = vmatprep.subr.mxu1 %v1423_v62  ;;  %vm737_vm6 = vcmp.eq.s32.totalorder %v6099_v21, %v5088_v3 }
 0x10e   : > { %v665_v49 = vadd.f32 %v601_v33, %v457_v55  ;;  %vm945_vm7 = vcmp.eq.s32.totalorder %v6099_v21, %v5100_v13  ;;  %v6160_v52 = vadd.f32 %v1018_v12, %v874_v31  ;;  %v809_v25 = vsel %vm737_vm6, %v5091_v6, 0.0 }
 0x10f   : > { %9755 = vst [vmem:[#allocation85_spill] sm:$0xff] %v6148_v2  ;;  %1171 = vmatprep.subr.mxu0 %v6148_v2  ;;  %v1017_v24 = vsel %vm945_vm7, %v5105_v17, 0.0  ;;  %v6166_v62 = vsub.f32 %v5970_v35, %v5983_v53  ;;  %v1429_v23 = vand.u32 4294901760, %v1428_v9  ;;  %vm384_vm8 = vcmp.eq.s32.totalorder %v6099_v21, %v5112_v29 }
 0x110   : > { %v873_v55 = vadd.f32 %v809_v25, %v665_v49  ;;  %vm528_vm9 = vcmp.eq.s32.totalorder %v6099_v21, %v5138_v42  ;;  %v6173_v33 = vand.u32 4294901760, %v6160_v52  ;;  %v456_v31 = vsel %vm384_vm8, %v5126_v38, 0.0 }
 0x111   : > { %9756 = vst [vmem:[#allocation86_spill] sm:$0xff] %v6166_v62  ;;  %v9261_v12 = vand.u32 4294901760, %v6166_v62  ;;  %v600_v60 = vsel %vm528_vm9, %v5149_v45, 0.0  ;;  %1430 = vmatpush1.msra.mxu1 %v1429_v23  ;;  %vm736_vm10 = vcmp.eq.s32.totalorder %v6099_v21, %v5141_v43  ;;  %vm944_vm11 = vcmp.eq.s32.totalorder %v6099_v21, %v5144_v44 }
 0x112   : > { %9757 = vst [vmem:[#allocation87_spill] sm:$0xff] %v6173_v33  ;;  %v6178_v35 = vadd.f32 %v1017_v24, %v873_v55  ;;  %v664_v9 = vadd.f32 %v600_v60, %v456_v31  ;;  %1173 = vmatpush2.msra.mxu0 %v6173_v33  ;;  %v808_v25 = vsel %vm736_vm10, %v5152_v46, 0.0  ;;  %v1016_v53 = vsel %vm944_vm11, %v5155_v47, 0.0 }
 0x113   : > { %v1434_v49 = vsub.f32 %v6166_v62, %v9261_v12  ;;  %v6192_v23 = vsub.f32 %v6002_v8, %v6011_v48  ;;  %v6198_v55 = vadd.s32 208, %v5067_v37  ;;  %v6202_v31 = vsub.f32 %v6029_v18, %v6041_v15 }
 0x114   : > { %v6195_v60 = vand.u32 4294901760, %v6178_v35  ;;  %v872_v24 = vadd.f32 %v808_v25, %v664_v9  ;;  %v6207_v62 = vsub.f32 %v6047_v28, %v6062_v41  ;;  %v6210_v8 = vadd.s32 200, %v5067_v37 }
 0x115   : > { %9758 = vst [vmem:[#allocation88_spill] sm:$0xff] %v6192_v23  ;;  %9760 = vst [vmem:[#allocation90_spill] sm:$0xff] %v6198_v55  ;;  %v1435_v12 = vand.u32 4294901760, %v1434_v49  ;;  %v9270_v21 = vand.u32 4294901760, %v6192_v23  ;;  %vm383_vm12 = vcmp.eq.s32.totalorder %v6198_v55, %v5073_v58  ;;  %vm527_vm13 = vcmp.eq.s32.totalorder %v6198_v55, %v5076_v59 }
 0x116   : > { %9759 = vst [vmem:[#allocation89_spill] sm:$0xff] %v6195_v60  ;;  %9761 = vst [vmem:[#allocation91_spill] sm:$0xff] %v6202_v31  ;;  %1175 = vmatprep.subr.mxu0 %v6195_v60  ;;  %v6213_v9 = vadd.f32 %v1016_v53, %v872_v24  ;;  %vm735_vm14 = vcmp.eq.s32.totalorder %v6198_v55, %v5088_v3  ;;  %v455_v28 = vsel %vm383_vm12, %v5082_v63, 0.0  ;;  %v599_v49 = vsel %vm527_vm13, %v5085_v1, 0.0 }
 0x117   : > { %9762 = vst [vmem:[#allocation92_spill] sm:$0xff] %v6207_v62  ;;  %9763 = vst [vmem:[#allocation93_spill] sm:$0xff] %v6210_v8  ;;  %1436 = vmatprep.subr.mxu1 %v1435_v12  ;;  %v1440_v18 = vsub.f32 %v6192_v23, %v9270_v21  ;;  %v807_v53 = vsel %vm735_vm14, %v5091_v6, 0.0  ;;  %v663_v24 = vadd.f32 %v599_v49, %v455_v28  ;;  %v9277_v41 = vand.u32 4294901760, %v6202_v31 }
 0x118   : > { %v6228_v25 = vand.u32 4294901760, %v6213_v9  ;;  %vm943_vm15 = vcmp.eq.s32.totalorder %v6198_v55, %v5100_v13  ;;  %vm382_vm0 = vcmp.eq.s32.totalorder %v6198_v55, %v5112_v29  ;;  %vm526_vm1 = vcmp.eq.s32.totalorder %v6198_v55, %v5138_v42 }
 0x119   : > { %v1441_v12 = vand.u32 4294901760, %v1440_v18  ;;  %v1015_v15 = vsel %vm943_vm15, %v5105_v17, 0.0  ;;  %v871_v21 = vadd.f32 %v807_v53, %v663_v24  ;;  %v1446_v28 = vsub.f32 %v6202_v31, %v9277_v41 }
 0x11a   : > { %9764 = vst [vmem:[#allocation94_spill] sm:$0xff] %v6228_v25  ;;  %1177 = vmatpush2.msra.mxu0 %v6228_v25  ;;  %v454_v49 = vsel %vm382_vm0, %v5126_v38, 0.0  ;;  %v598_v48 = vsel %vm526_vm1, %v5149_v45, 0.0  ;;  %vm734_vm2 = vcmp.eq.s32.totalorder %v6198_v55, %v5141_v43  ;;  %vm942_vm3 = vcmp.eq.s32.totalorder %v6198_v55, %v5144_v44 }
 0x11b   : > { %1442 = vmatpush2.msra.mxu1 %v1441_v12  ;;  %v662_v18 = vadd.f32 %v598_v48, %v454_v49  ;;  %v9280_v23 = vand.u32 4294901760, %v6207_v62  ;;  %v6249_v11 = vadd.f32 %v1015_v15, %v871_v21  ;;  %v1447_v53 = vand.u32 4294901760, %v1446_v28 }
 0x11c   : > { %v806_v24 = vsel %vm734_vm2, %v5152_v46, 0.0  ;;  %v1014_v41 = vsel %vm942_vm3, %v5155_v47, 0.0  ;;  %vm381_vm4 = vcmp.eq.s32.totalorder %v6210_v8, %v5073_v58  ;;  %vm525_vm5 = vcmp.eq.s32.totalorder %v6210_v8, %v5076_v59 }
 0x11d   : > { %v870_v31 = vadd.f32 %v806_v24, %v662_v18  ;;  %v1452_v48 = vsub.f32 %v6207_v62, %v9280_v23  ;;  %v6261_v12 = vand.u32 4294901760, %v6249_v11  ;;  %1448 = vmatprep.subr.mxu1 %v1447_v53  ;;  %v453_v15 = vsel %vm381_vm4, %v5082_v63, 0.0 }
 0x11e   : > { %v597_v21 = vsel %vm525_vm5, %v5085_v1, 0.0  ;;  %vm733_vm6 = vcmp.eq.s32.totalorder %v6210_v8, %v5088_v3  ;;  %vm941_vm7 = vcmp.eq.s32.totalorder %v6210_v8, %v5100_v13  ;;  %v6275_v53 = vsub.f32 %v6073_v27, %v6092_v61 }
 0x11f   : > { %9765 = vst [vmem:[#allocation95_spill] sm:$0xff] %v6261_v12  ;;  %v6267_v28 = vadd.f32 %v1014_v41, %v870_v31  ;;  %v1453_v49 = vand.u32 4294901760, %v1452_v48  ;;  %v661_v18 = vadd.f32 %v597_v21, %v453_v15  ;;  %v805_v24 = vsel %vm733_vm6, %v5091_v6, 0.0  ;;  %1179 = vmatprep.subr.mxu0 %v6261_v12 }
 0x120   : > { %9766 = vst [vmem:[#allocation96_spill] sm:$0xff] %v6275_v53  ;;  %vm380_vm8 = vcmp.eq.s32.totalorder %v6210_v8, %v5112_v29  ;;  %vm524_vm9 = vcmp.eq.s32.totalorder %v6210_v8, %v5138_v42  ;;  %v1013_v48 = vsel %vm941_vm7, %v5105_v17, 0.0  ;;  %v9287_v21 = vand.u32 4294901760, %v6275_v53 }
 0x121   : > { %v6282_v41 = vand.u32 4294901760, %v6267_v28  ;;  %1454 = vmatpush2.msra.mxu1 %v1453_v49  ;;  %v869_v31 = vadd.f32 %v805_v24, %v661_v18  ;;  %v452_v15 = vsel %vm380_vm8, %v5126_v38, 0.0  ;;  %v596_v27 = vsel %vm524_vm9, %v5149_v45, 0.0 }
 0x122   : > { %vm732_vm10 = vcmp.eq.s32.totalorder %v6210_v8, %v5141_v43  ;;  %vm940_vm11 = vcmp.eq.s32.totalorder %v6210_v8, %v5144_v44  ;;  %v660_v49 = vadd.f32 %v596_v27, %v452_v15  ;;  %v1458_v55 = vsub.f32 %v6275_v53, %v9287_v21 }
 0x123   : > { %9767 = vst [vmem:[#allocation97_spill] sm:$0xff] %v6282_v41  ;;  %1181 = vmatpush2.msra.mxu0 %v6282_v41  ;;  %v6293_v23 = vadd.f32 %v1013_v48, %v869_v31  ;;  %v804_v18 = vsel %vm732_vm10, %v5152_v46, 0.0  ;;  %v1012_v24 = vsel %vm940_vm11, %v5155_v47, 0.0  ;;  %v6302_v61 = vsub.f32 %v6107_v56, %v6120_v10 }
 0x124   : > { %v6305_v62 = vadd.s32 192, %v5067_v37  ;;  %v6309_v31 = vsub.f32 %v6138_v30, %v6148_v2  ;;  %v868_v15 = vadd.f32 %v804_v18, %v660_v49  ;;  %v6316_v27 = vsub.f32 %v6160_v52, %v6173_v33 }
 0x125   : > { %9768 = vst [vmem:[#allocation98_spill] sm:$0xff] %v6302_v61  ;;  %v6312_v48 = vand.u32 4294901760, %v6293_v23  ;;  %v6319_v21 = vadd.s32 184, %v5067_v37  ;;  %v1459_v56 = vand.u32 4294901760, %v1458_v55  ;;  %v9296_v8 = vand.u32 4294901760, %v6302_v61 }
 0x126   : > { %9769 = vst [vmem:[#allocation99_spill] sm:$0xff] %v6305_v62  ;;  %9770 = vst [vmem:[#allocation100_spill] sm:$0xff] %v6309_v31  ;;  %vm379_vm12 = vcmp.eq.s32.totalorder %v6305_v62, %v5073_v58  ;;  %vm523_vm13 = vcmp.eq.s32.totalorder %v6305_v62, %v5076_v59  ;;  %v6327_v30 = vadd.f32 %v1012_v24, %v868_v15  ;;  %v9303_v2 = vand.u32 4294901760, %v6309_v31 }
 0x127   : > { %9771 = vst [vmem:[#allocation101_spill] sm:$0xff] %v6312_v48  ;;  %9772 = vst [vmem:[#allocation102_spill] sm:$0xff] %v6316_v27  ;;  %1183 = vmatprep.subr.mxu0 %v6312_v48  ;;  %v451_v49 = vsel %vm379_vm12, %v5082_v63, 0.0  ;;  %v595_v52 = vsel %vm523_vm13, %v5085_v1, 0.0  ;;  %vm731_vm14 = vcmp.eq.s32.totalorder %v6305_v62, %v5088_v3  ;;  %1460 = vmatprep.subr.mxu1 %v1459_v56  ;;  %v9304_v54 = vand.u32 4294901760, %v6316_v27 }
 0x128   : > { %9773 = vst [vmem:[#allocation103_spill] sm:$0xff] %v6319_v21  ;;  %v1464_v55 = vsub.f32 %v6302_v61, %v9296_v8  ;;  %v659_v18 = vadd.f32 %v595_v52, %v451_v49  ;;  %v803_v33 = vsel %vm731_vm14, %v5091_v6, 0.0  ;;  %vm939_vm15 = vcmp.eq.s32.totalorder %v6305_v62, %v5100_v13 }
 0x129   : > { %v6340_v24 = vand.u32 4294901760, %v6327_v30  ;;  %v1011_v15 = vsel %vm939_vm15, %v5105_v17, 0.0  ;;  %vm378_vm0 = vcmp.eq.s32.totalorder %v6305_v62, %v5112_v29  ;;  %vm522_vm1 = vcmp.eq.s32.totalorder %v6305_v62, %v5138_v42 }
 0x12a   : > { %v1465_v56 = vand.u32 4294901760, %v1464_v55  ;;  %v867_v10 = vadd.f32 %v803_v33, %v659_v18  ;;  %v450_v8 = vsel %vm378_vm0, %v5126_v38, 0.0  ;;  %v1470_v49 = vsub.f32 %v6309_v31, %v9303_v2 }
 0x12b   : > { %9774 = vst [vmem:[#allocation104_spill] sm:$0xff] %v6340_v24  ;;  %1185 = vmatpush2.msra.mxu0 %v6340_v24  ;;  %v594_v52 = vsel %vm522_vm1, %v5149_v45, 0.0  ;;  %vm730_vm2 = vcmp.eq.s32.totalorder %v6305_v62, %v5141_v43  ;;  %vm938_vm3 = vcmp.eq.s32.totalorder %v6305_v62, %v5144_v44  ;;  %vm377_vm4 = vcmp.eq.s32.totalorder %v6319_v21, %v5073_v58 }
 0x12c   : > { %1466 = vmatpush2.msra.mxu1 %v1465_v56  ;;  %v6358_v33 = vadd.f32 %v1011_v15, %v867_v10  ;;  %v658_v55 = vadd.f32 %v594_v52, %v450_v8  ;;  %v802_v18 = vsel %vm730_vm2, %v5152_v46, 0.0  ;;  %v1010_v61 = vsel %vm938_vm3, %v5155_v47, 0.0 }
 0x12d   : > { %v1471_v53 = vand.u32 4294901760, %v1470_v49  ;;  %vm521_vm5 = vcmp.eq.s32.totalorder %v6319_v21, %v5076_v59  ;;  %v449_v10 = vsel %vm377_vm4, %v5082_v63, 0.0  ;;  %v1476_v15 = vsub.f32 %v6316_v27, %v9304_v54 }
 0x12e   : > { %v6368_v2 = vand.u32 4294901760, %v6358_v33  ;;  %v866_v56 = vadd.f32 %v802_v18, %v658_v55  ;;  %v593_v8 = vsel %vm521_vm5, %v5085_v1, 0.0  ;;  %vm729_vm6 = vcmp.eq.s32.totalorder %v6319_v21, %v5088_v3 }
 0x12f   : > { %1472 = vmatprep.subr.mxu1 %v1471_v53  ;;  %v657_v49 = vadd.f32 %v593_v8, %v449_v10  ;;  %vm937_vm7 = vcmp.eq.s32.totalorder %v6319_v21, %v5100_v13  ;;  %v801_v55 = vsel %vm729_vm6, %v5091_v6, 0.0  ;;  %v6386_v53 = vsub.f32 %v6178_v35, %v6195_v60 }
 0x130   : > { %9775 = vst [vmem:[#allocation105_spill] sm:$0xff] %v6368_v2  ;;  %1187 = vmatprep.subr.mxu0 %v6368_v2  ;;  %v6380_v52 = vadd.f32 %v1010_v61, %v866_v56  ;;  %v1009_v18 = vsel %vm937_vm7, %v5105_v17, 0.0  ;;  %v1477_v54 = vand.u32 4294901760, %v1476_v15  ;;  %vm376_vm8 = vcmp.eq.s32.totalorder %v6319_v21, %v5112_v29 }
 0x131   : > { %9776 = vst [vmem:[#allocation106_spill] sm:$0xff] %v6386_v53  ;;  %v865_v10 = vadd.f32 %v801_v55, %v657_v49  ;;  %vm520_vm9 = vcmp.eq.s32.totalorder %v6319_v21, %v5138_v42  ;;  %v9309_v61 = vand.u32 4294901760, %v6386_v53  ;;  %v448_v56 = vsel %vm376_vm8, %v5126_v38, 0.0 }
 0x132   : > { %v6393_v8 = vand.u32 4294901760, %v6380_v52  ;;  %v592_v62 = vsel %vm520_vm9, %v5149_v45, 0.0  ;;  %1478 = vmatpush2.msra.mxu1 %v1477_v54  ;;  %vm728_vm10 = vcmp.eq.s32.totalorder %v6319_v21, %v5141_v43  ;;  %vm936_vm11 = vcmp.eq.s32.totalorder %v6319_v21, %v5144_v44 }
 0x133   : > { %v6398_v35 = vadd.f32 %v1009_v18, %v865_v10  ;;  %v656_v15 = vadd.f32 %v592_v62, %v448_v56  ;;  %v1482_v49 = vsub.f32 %v6386_v53, %v9309_v61  ;;  %v800_v55 = vsel %vm728_vm10, %v5152_v46, 0.0 }
 0x134   : > { %9777 = vst [vmem:[#allocation107_spill] sm:$0xff] %v6393_v8  ;;  %1189 = vmatpush2.msra.mxu0 %v6393_v8  ;;  %v1008_v60 = vsel %vm936_vm11, %v5155_v47, 0.0  ;;  %v6412_v54 = vsub.f32 %v6213_v9, %v6228_v25  ;;  %v6418_v10 = vadd.s32 176, %v5067_v37  ;;  %v6422_v56 = vsub.f32 %v6249_v11, %v6261_v12 }
 0x135   : > { %v6415_v62 = vand.u32 4294901760, %v6398_v35  ;;  %v864_v18 = vadd.f32 %v800_v55, %v656_v15  ;;  %v1483_v61 = vand.u32 4294901760, %v1482_v49  ;;  %v6427_v53 = vsub.f32 %v6267_v28, %v6282_v41 }
 0x136   : > { %9778 = vst [vmem:[#allocation108_spill] sm:$0xff] %v6412_v54  ;;  %9780 = vst [vmem:[#allocation110_spill] sm:$0xff] %v6418_v10  ;;  %v9318_v21 = vand.u32 4294901760, %v6412_v54  ;;  %v6430_v9 = vadd.s32 168, %v5067_v37  ;;  %vm375_vm12 = vcmp.eq.s32.totalorder %v6418_v10, %v5073_v58  ;;  %vm519_vm13 = vcmp.eq.s32.totalorder %v6418_v10, %v5076_v59 }
 0x137   : > { %9779 = vst [vmem:[#allocation109_spill] sm:$0xff] %v6415_v62  ;;  %9781 = vst [vmem:[#allocation111_spill] sm:$0xff] %v6422_v56  ;;  %1191 = vmatprep.subr.mxu0 %v6415_v62  ;;  %v6433_v15 = vadd.f32 %v1008_v60, %v864_v18  ;;  %vm727_vm14 = vcmp.eq.s32.totalorder %v6418_v10, %v5088_v3  ;;  %1484 = vmatprep.subr.mxu1 %v1483_v61  ;;  %v447_v28 = vsel %vm375_vm12, %v5082_v63, 0.0 }
 0x138   : > { %9782 = vst [vmem:[#allocation112_spill] sm:$0xff] %v6427_v53  ;;  %9783 = vst [vmem:[#allocation113_spill] sm:$0xff] %v6430_v9  ;;  %v1488_v11 = vsub.f32 %v6412_v54, %v9318_v21  ;;  %v591_v49 = vsel %vm519_vm13, %v5085_v1, 0.0  ;;  %v799_v60 = vsel %vm727_vm14, %v5091_v6, 0.0  ;;  %vm935_vm15 = vcmp.eq.s32.totalorder %v6418_v10, %v5100_v13 }
 0x139   : > { %v6448_v55 = vand.u32 4294901760, %v6433_v15  ;;  %v655_v18 = vadd.f32 %v591_v49, %v447_v28  ;;  %v9325_v41 = vand.u32 4294901760, %v6422_v56  ;;  %v1007_v12 = vsel %vm935_vm15, %v5105_v17, 0.0 }
 0x13a   : > { %v1489_v61 = vand.u32 4294901760, %v1488_v11  ;;  %vm374_vm0 = vcmp.eq.s32.totalorder %v6418_v10, %v5112_v29  ;;  %vm518_vm1 = vcmp.eq.s32.totalorder %v6418_v10, %v5138_v42  ;;  %vm726_vm2 = vcmp.eq.s32.totalorder %v6418_v10, %v5141_v43 }
 0x13b   : > { %9784 = vst [vmem:[#allocation114_spill] sm:$0xff] %v6448_v55  ;;  %1193 = vmatpush2.msra.mxu0 %v6448_v55  ;;  %v863_v21 = vadd.f32 %v799_v60, %v655_v18  ;;  %v1494_v28 = vsub.f32 %v6422_v56, %v9325_v41  ;;  %v446_v49 = vsel %vm374_vm0, %v5126_v38, 0.0  ;;  %v590_v25 = vsel %vm518_vm1, %v5149_v45, 0.0 }
 0x13c   : > { %1490 = vmatpush2.msra.mxu1 %v1489_v61  ;;  %v654_v11 = vadd.f32 %v590_v25, %v446_v49  ;;  %vm934_vm3 = vcmp.eq.s32.totalorder %v6418_v10, %v5144_v44  ;;  %v9328_v54 = vand.u32 4294901760, %v6427_v53  ;;  %v798_v18 = vsel %vm726_vm2, %v5152_v46, 0.0 }
 0x13d   : > { %v6469_v27 = vadd.f32 %v1007_v12, %v863_v21  ;;  %v1495_v60 = vand.u32 4294901760, %v1494_v28  ;;  %v1006_v41 = vsel %vm934_vm3, %v5155_v47, 0.0  ;;  %vm373_vm4 = vcmp.eq.s32.totalorder %v6430_v9, %v5073_v58 }
 0x13e   : > { %v862_v56 = vadd.f32 %v798_v18, %v654_v11  ;;  %v1500_v25 = vsub.f32 %v6427_v53, %v9328_v54  ;;  %vm517_vm5 = vcmp.eq.s32.totalorder %v6430_v9, %v5076_v59  ;;  %v445_v12 = vsel %vm373_vm4, %v5082_v63, 0.0 }
 0x13f   : > { %v6481_v61 = vand.u32 4294901760, %v6469_v27  ;;  %1496 = vmatprep.subr.mxu1 %v1495_v60  ;;  %v589_v21 = vsel %vm517_vm5, %v5085_v1, 0.0  ;;  %vm725_vm6 = vcmp.eq.s32.totalorder %v6430_v9, %v5088_v3  ;;  %vm933_vm7 = vcmp.eq.s32.totalorder %v6430_v9, %v5100_v13 }
 0x140   : > { %v6487_v28 = vadd.f32 %v1006_v41, %v862_v56  ;;  %v1501_v49 = vand.u32 4294901760, %v1500_v25  ;;  %v653_v11 = vadd.f32 %v589_v21, %v445_v12  ;;  %v797_v18 = vsel %vm725_vm6, %v5091_v6, 0.0 }
 0x141   : > { %9785 = vst [vmem:[#allocation115_spill] sm:$0xff] %v6481_v61  ;;  %1195 = vmatprep.subr.mxu0 %v6481_v61  ;;  %v6495_v60 = vsub.f32 %v6293_v23, %v6312_v48  ;;  %vm372_vm8 = vcmp.eq.s32.totalorder %v6430_v9, %v5112_v29  ;;  %vm516_vm9 = vcmp.eq.s32.totalorder %v6430_v9, %v5138_v42  ;;  %v1005_v25 = vsel %vm933_vm7, %v5105_v17, 0.0 }
 0x142   : > { %v6502_v41 = vand.u32 4294901760, %v6487_v28  ;;  %1502 = vmatpush2.msra.mxu1 %v1501_v49  ;;  %v861_v56 = vadd.f32 %v797_v18, %v653_v11  ;;  %v444_v12 = vsel %vm372_vm8, %v5126_v38, 0.0  ;;  %v588_v23 = vsel %vm516_vm9, %v5149_v45, 0.0 }
 0x143   : > { %9786 = vst [vmem:[#allocation116_spill] sm:$0xff] %v6495_v60  ;;  %v9335_v21 = vand.u32 4294901760, %v6495_v60  ;;  %vm724_vm10 = vcmp.eq.s32.totalorder %v6430_v9, %v5141_v43  ;;  %vm932_vm11 = vcmp.eq.s32.totalorder %v6430_v9, %v5144_v44  ;;  %v652_v49 = vadd.f32 %v588_v23, %v444_v12 }
 0x144   : > { %9787 = vst [vmem:[#allocation117_spill] sm:$0xff] %v6502_v41  ;;  %1197 = vmatpush2.msra.mxu0 %v6502_v41  ;;  %v6513_v54 = vadd.f32 %v1005_v25, %v861_v56  ;;  %v796_v11 = vsel %vm724_vm10, %v5152_v46, 0.0  ;;  %v1004_v18 = vsel %vm932_vm11, %v5155_v47, 0.0  ;;  %v6522_v48 = vsub.f32 %v6327_v30, %v6340_v24 }
 0x145   : > { %v1506_v10 = vsub.f32 %v6495_v60, %v9335_v21  ;;  %v6525_v53 = vadd.s32 160, %v5067_v37  ;;  %v6529_v56 = vsub.f32 %v6358_v33, %v6368_v2  ;;  %v860_v12 = vadd.f32 %v796_v11, %v652_v49 }
 0x146   : > { %9788 = vst [vmem:[#allocation118_spill] sm:$0xff] %v6522_v48  ;;  %v6532_v25 = vand.u32 4294901760, %v6513_v54  ;;  %v6536_v23 = vsub.f32 %v6380_v52, %v6393_v8  ;;  %v6539_v21 = vadd.s32 152, %v5067_v37  ;;  %v9344_v9 = vand.u32 4294901760, %v6522_v48 }
 0x147   : > { %9789 = vst [vmem:[#allocation119_spill] sm:$0xff] %v6525_v53  ;;  %9790 = vst [vmem:[#allocation120_spill] sm:$0xff] %v6529_v56  ;;  %v1507_v30 = vand.u32 4294901760, %v1506_v10  ;;  %vm371_vm12 = vcmp.eq.s32.totalorder %v6525_v53, %v5073_v58  ;;  %vm515_vm13 = vcmp.eq.s32.totalorder %v6525_v53, %v5076_v59  ;;  %v6547_v33 = vadd.f32 %v1004_v18, %v860_v12 }
 0x148   : > { %9791 = vst [vmem:[#allocation121_spill] sm:$0xff] %v6532_v25  ;;  %9792 = vst [vmem:[#allocation122_spill] sm:$0xff] %v6536_v23  ;;  %1199 = vmatprep.subr.mxu0 %v6532_v25  ;;  %v443_v49 = vsel %vm371_vm12, %v5082_v63, 0.0  ;;  %v587_v52 = vsel %vm515_vm13, %v5085_v1, 0.0  ;;  %vm723_vm14 = vcmp.eq.s32.totalorder %v6525_v53, %v5088_v3  ;;  %v1512_v10 = vsub.f32 %v6522_v48, %v9344_v9 }
 0x149   : > { %9793 = vst [vmem:[#allocation123_spill] sm:$0xff] %v6539_v21  ;;  %1508 = vmatprep.subr.mxu1 %v1507_v30  ;;  %v651_v11 = vadd.f32 %v587_v52, %v443_v49  ;;  %v795_v8 = vsel %vm723_vm14, %v5091_v6, 0.0  ;;  %vm931_vm15 = vcmp.eq.s32.totalorder %v6525_v53, %v5100_v13  ;;  %v6560_v18 = vand.u32 4294901760, %v6547_v33 }
 0x14a   : > { %v1003_v12 = vsel %vm931_vm15, %v5105_v17, 0.0  ;;  %v9351_v2 = vand.u32 4294901760, %v6529_v56  ;;  %vm370_vm0 = vcmp.eq.s32.totalorder %v6525_v53, %v5112_v29  ;;  %v1513_v30 = vand.u32 4294901760, %v1512_v10 }
 0x14b   : > { %9794 = vst [vmem:[#allocation124_spill] sm:$0xff] %v6560_v18  ;;  %v859_v24 = vadd.f32 %v795_v8, %v651_v11  ;;  %v442_v9 = vsel %vm370_vm0, %v5126_v38, 0.0  ;;  %vm514_vm1 = vcmp.eq.s32.totalorder %v6525_v53, %v5138_v42  ;;  %1201 = vmatpush2.msra.mxu0 %v6560_v18  ;;  %vm722_vm2 = vcmp.eq.s32.totalorder %v6525_v53, %v5141_v43 }
 0x14c   : > { %v1518_v49 = vsub.f32 %v6529_v56, %v9351_v2  ;;  %v586_v52 = vsel %vm514_vm1, %v5149_v45, 0.0  ;;  %vm930_vm3 = vcmp.eq.s32.totalorder %v6525_v53, %v5144_v44  ;;  %1514 = vmatpush2.msra.mxu1 %v1513_v30  ;;  %v794_v11 = vsel %vm722_vm2, %v5152_v46, 0.0 }
 0x14d   : > { %v6578_v8 = vadd.f32 %v1003_v12, %v859_v24  ;;  %v650_v10 = vadd.f32 %v586_v52, %v442_v9  ;;  %v1002_v48 = vsel %vm930_vm3, %v5155_v47, 0.0  ;;  %v9352_v31 = vand.u32 4294901760, %v6536_v23 }
 0x14e   : > { %v1519_v60 = vand.u32 4294901760, %v1518_v49  ;;  %vm369_vm4 = vcmp.eq.s32.totalorder %v6539_v21, %v5073_v58  ;;  %vm513_vm5 = vcmp.eq.s32.totalorder %v6539_v21, %v5076_v59  ;;  %vm721_vm6 = vcmp.eq.s32.totalorder %v6539_v21, %v5088_v3 }
 0x14f   : > { %v6588_v2 = vand.u32 4294901760, %v6578_v8  ;;  %v858_v30 = vadd.f32 %v794_v11, %v650_v10  ;;  %v441_v24 = vsel %vm369_vm4, %v5082_v63, 0.0  ;;  %v585_v9 = vsel %vm513_vm5, %v5085_v1, 0.0 }
 0x150   : > { %1520 = vmatprep.subr.mxu1 %v1519_v60  ;;  %v1524_v12 = vsub.f32 %v6536_v23, %v9352_v31  ;;  %v649_v49 = vadd.f32 %v585_v9, %v441_v24  ;;  %vm929_vm7 = vcmp.eq.s32.totalorder %v6539_v21, %v5100_v13  ;;  %v793_v10 = vsel %vm721_vm6, %v5091_v6, 0.0 }
 0x151   : > { %9795 = vst [vmem:[#allocation125_spill] sm:$0xff] %v6588_v2  ;;  %1203 = vmatprep.subr.mxu0 %v6588_v2  ;;  %v6600_v52 = vadd.f32 %v1002_v48, %v858_v30  ;;  %v1001_v11 = vsel %vm929_vm7, %v5105_v17, 0.0  ;;  %v6606_v60 = vsub.f32 %v6398_v35, %v6415_v62  ;;  %vm368_vm8 = vcmp.eq.s32.totalorder %v6539_v21, %v5112_v29 }
 0x152   : > { %v1525_v31 = vand.u32 4294901760, %v1524_v12  ;;  %v857_v24 = vadd.f32 %v793_v10, %v649_v49  ;;  %vm512_vm9 = vcmp.eq.s32.totalorder %v6539_v21, %v5138_v42  ;;  %v440_v30 = vsel %vm368_vm8, %v5126_v38, 0.0 }
 0x153   : > { %9796 = vst [vmem:[#allocation126_spill] sm:$0xff] %v6606_v60  ;;  %v6613_v9 = vand.u32 4294901760, %v6600_v52  ;;  %v9357_v48 = vand.u32 4294901760, %v6606_v60  ;;  %v584_v53 = vsel %vm512_vm9, %v5149_v45, 0.0  ;;  %vm720_vm10 = vcmp.eq.s32.totalorder %v6539_v21, %v5141_v43 }
 0x154   : > { %1526 = vmatpush2.msra.mxu1 %v1525_v31  ;;  %v6618_v35 = vadd.f32 %v1001_v11, %v857_v24  ;;  %v648_v12 = vadd.f32 %v584_v53, %v440_v30  ;;  %vm928_vm11 = vcmp.eq.s32.totalorder %v6539_v21, %v5144_v44  ;;  %v792_v10 = vsel %vm720_vm10, %v5152_v46, 0.0 }
 0x155   : > { %9797 = vst [vmem:[#allocation127_spill] sm:$0xff] %v6613_v9  ;;  %1205 = vmatpush2.msra.mxu0 %v6613_v9  ;;  %v1530_v49 = vsub.f32 %v6606_v60, %v9357_v48  ;;  %v1000_v62 = vsel %vm928_vm11, %v5155_v47, 0.0  ;;  %v6632_v31 = vsub.f32 %v6433_v15, %v6448_v55  ;;  %v6638_v24 = vadd.s32 144, %v5067_v37 }
 0x156   : > { %v6635_v53 = vand.u32 4294901760, %v6618_v35  ;;  %v856_v11 = vadd.f32 %v792_v10, %v648_v12  ;;  %v6642_v30 = vsub.f32 %v6469_v27, %v6481_v61  ;;  %v6647_v60 = vsub.f32 %v6487_v28, %v6502_v41 }
 0x157   : > { %9798 = vst [vmem:[#allocation128_spill] sm:$0xff] %v6632_v31  ;;  %9799 = vst [vmem:[#allocation129_spill] sm:$0xff] %v6638_v24  ;;  %v1531_v48 = vand.u32 4294901760, %v1530_v49  ;;  %v9366_v21 = vand.u32 4294901760, %v6632_v31  ;;  %v6650_v15 = vadd.s32 136, %v5067_v37  ;;  %vm367_vm12 = vcmp.eq.s32.totalorder %v6638_v24, %v5073_v58 }
 0x158   : > { %9800 = vst [vmem:[#allocation130_spill] sm:$0xff] %v6642_v30  ;;  %9801 = vst [vmem:[#allocation131_spill] sm:$0xff] %v6647_v60  ;;  %1207 = vmatprep.subr.mxu0 %v6635_v53  ;;  %v6653_v12 = vadd.f32 %v1000_v62, %v856_v11  ;;  %vm511_vm13 = vcmp.eq.s32.totalorder %v6638_v24, %v5076_v59  ;;  %vm719_vm14 = vcmp.eq.s32.totalorder %v6638_v24, %v5088_v3 }
 0x159   : > { %9802 = vst [vmem:[#allocation132_spill] sm:$0xff] %v6650_v15  ;;  %1532 = vmatprep.subr.mxu1 %v1531_v48  ;;  %v1536_v27 = vsub.f32 %v6632_v31, %v9366_v21  ;;  %v439_v28 = vsel %vm367_vm12, %v5082_v63, 0.0  ;;  %v583_v49 = vsel %vm511_vm13, %v5085_v1, 0.0  ;;  %v791_v62 = vsel %vm719_vm14, %v5091_v6, 0.0 }
 0x15a   : > { %v6668_v10 = vand.u32 4294901760, %v6653_v12  ;;  %v647_v11 = vadd.f32 %v583_v49, %v439_v28  ;;  %vm927_vm15 = vcmp.eq.s32.totalorder %v6638_v24, %v5100_v13  ;;  %v9373_v41 = vand.u32 4294901760, %v6642_v30 }
 0x15b   : > { %v1537_v48 = vand.u32 4294901760, %v1536_v27  ;;  %v999_v61 = vsel %vm927_vm15, %v5105_v17, 0.0  ;;  %vm366_vm0 = vcmp.eq.s32.totalorder %v6638_v24, %v5112_v29  ;;  %vm510_vm1 = vcmp.eq.s32.totalorder %v6638_v24, %v5138_v42 }
 0x15c   : > { %1209 = vmatpush2.msra.mxu0 %v6668_v10  ;;  %v855_v21 = vadd.f32 %v791_v62, %v647_v11  ;;  %v1542_v28 = vsub.f32 %v6642_v30, %v9373_v41  ;;  %v438_v49 = vsel %vm366_vm0, %v5126_v38, 0.0  ;;  %v582_v55 = vsel %vm510_vm1, %v5149_v45, 0.0 }
 0x15d   : > { %1538 = vmatpush2.msra.mxu1 %v1537_v48  ;;  %v646_v27 = vadd.f32 %v582_v55, %v438_v49  ;;  %vm718_vm2 = vcmp.eq.s32.totalorder %v6638_v24, %v5141_v43  ;;  %vm926_vm3 = vcmp.eq.s32.totalorder %v6638_v24, %v5144_v44  ;;  %v9376_v31 = vand.u32 4294901760, %v6647_v60 }
 0x15e   : > { %v6689_v23 = vadd.f32 %v999_v61, %v855_v21  ;;  %v1543_v62 = vand.u32 4294901760, %v1542_v28  ;;  %v790_v11 = vsel %vm718_vm2, %v5152_v46, 0.0  ;;  %v998_v41 = vsel %vm926_vm3, %v5155_v47, 0.0 }
 0x15f   : > { %v854_v30 = vadd.f32 %v790_v11, %v646_v27  ;;  %v1548_v55 = vsub.f32 %v6647_v60, %v9376_v31  ;;  %vm365_vm4 = vcmp.eq.s32.totalorder %v6650_v15, %v5073_v58  ;;  %vm509_vm5 = vcmp.eq.s32.totalorder %v6650_v15, %v5076_v59  ;;  %v1090_v31 = vld [vmem:[%s5051_s30] sm:$0xff] }
 0x160   : > { %v6701_v48 = vand.u32 4294901760, %v6689_v23  ;;  %1544 = vmatprep.subr.mxu1 %v1543_v62  ;;  %v437_v61 = vsel %vm365_vm4, %v5082_v63, 0.0  ;;  %v581_v21 = vsel %vm509_vm5, %v5085_v1, 0.0  ;;  %vm717_vm6 = vcmp.eq.s32.totalorder %v6650_v15, %v5088_v3 }
 0x161   : > { %v6707_v28 = vadd.f32 %v998_v41, %v854_v30  ;;  %v1549_v49 = vand.u32 4294901760, %v1548_v55  ;;  %v645_v27 = vadd.f32 %v581_v21, %v437_v61  ;;  %v789_v11 = vsel %vm717_vm6, %v5091_v6, 0.0 }
 0x162   : > { %1211 = vmatprep.subr.mxu0 %v6701_v48  ;;  %vm925_vm7 = vcmp.eq.s32.totalorder %v6650_v15, %v5100_v13  ;;  %v6715_v62 = vsub.f32 %v6513_v54, %v6532_v25  ;;  %vm364_vm8 = vcmp.eq.s32.totalorder %v6650_v15, %v5112_v29  ;;  %vm508_vm9 = vcmp.eq.s32.totalorder %v6650_v15, %v5138_v42 }
 0x163   : > { %v6722_v41 = vand.u32 4294901760, %v6707_v28  ;;  %1550 = vmatpush2.msra.mxu1 %v1549_v49  ;;  %v853_v30 = vadd.f32 %v789_v11, %v645_v27  ;;  %v997_v55 = vsel %vm925_vm7, %v5105_v17, 0.0  ;;  %v436_v61 = vsel %vm364_vm8, %v5126_v38, 0.0 }
 0x164   : > { %9803 = vst [vmem:[#allocation133_spill] sm:$0xff] %v6715_v62  ;;  %v9385_v21 = vand.u32 4294901760, %v6715_v62  ;;  %v580_v54 = vsel %vm508_vm9, %v5149_v45, 0.0  ;;  %vm716_vm10 = vcmp.eq.s32.totalorder %v6650_v15, %v5141_v43  ;;  %vm924_vm11 = vcmp.eq.s32.totalorder %v6650_v15, %v5144_v44 }
 0x165   : > { %1213 = vmatpush2.msra.mxu0 %v6722_v41  ;;  %v6734_v24 = vadd.f32 %v997_v55, %v853_v30  ;;  %v644_v49 = vadd.f32 %v580_v54, %v436_v61  ;;  %v788_v27 = vsel %vm716_vm10, %v5152_v46, 0.0  ;;  %v996_v11 = vsel %vm924_vm11, %v5155_v47, 0.0 }
 0x166   : > { %v1554_v25 = vsub.f32 %v6715_v62, %v9385_v21  ;;  %v6743_v60 = vsub.f32 %v6547_v33, %v6560_v18  ;;  %v6746_v15 = vadd.s32 128, %v5067_v37  ;;  %v6750_v30 = vsub.f32 %v6578_v8, %v6588_v2  ;;  %v9831_v37 = vld [vmem:[#allocation63_spill] sm:$0xff] }
 0x167   : > { %v6753_v55 = vand.u32 4294901760, %v6734_v24  ;;  %v852_v61 = vadd.f32 %v788_v27, %v644_v49  ;;  %v6757_v54 = vsub.f32 %v6600_v52, %v6613_v9  ;;  %v1092_v21 = vcombine.high %v1090_v31, %v1090_v31 }
 0x168   : > { %9804 = vst [vmem:[#allocation134_spill] sm:$0xff] %v6743_v60  ;;  %9805 = vst [vmem:[#allocation135_spill] sm:$0xff] %v6746_v15  ;;  %v1555_v62 = vand.u32 4294901760, %v1554_v25  ;;  %v9393_v33 = vand.u32 4294901760, %v6743_v60  ;;  %vm363_vm12 = vcmp.eq.s32.totalorder %v6746_v15, %v5073_v58  ;;  %vm507_vm13 = vcmp.eq.s32.totalorder %v6746_v15, %v5076_v59 }
 0x169   : > { %9806 = vst [vmem:[#allocation136_spill] sm:$0xff] %v6750_v30  ;;  %9807 = vst [vmem:[#allocation137_spill] sm:$0xff] %v6757_v54  ;;  %1215 = vmatprep.subr.mxu0 %v6753_v55  ;;  %v6765_v8 = vadd.f32 %v996_v11, %v852_v61  ;;  %v435_v49 = vsel %vm363_vm12, %v5082_v63, 0.0  ;;  %v579_v27 = vsel %vm507_vm13, %v5085_v1, 0.0  ;;  %vm715_vm14 = vcmp.eq.s32.totalorder %v6746_v15, %v5088_v3 }
 0x16a   : > { %1556 = vmatprep.subr.mxu1 %v1555_v62  ;;  %v1560_v25 = vsub.f32 %v6743_v60, %v9393_v33  ;;  %v643_v58 = vadd.f32 %v579_v27, %v435_v49  ;;  %v787_v52 = vsel %vm715_vm14, %v5091_v6, 0.0  ;;  %vm923_vm15 = vcmp.eq.s32.totalorder %v6746_v15, %v5100_v13 }
 0x16b   : > { %v6778_v59 = vand.u32 4294901760, %v6765_v8  ;;  %v995_v63 = vsel %vm923_vm15, %v5105_v17, 0.0  ;;  %v9392_v1 = vand.u32 4294901760, %v6750_v30  ;;  %vm362_vm0 = vcmp.eq.s32.totalorder %v6746_v15, %v5112_v29 }
 0x16c   : > { %v1561_v3 = vand.u32 4294901760, %v1560_v25  ;;  %v851_v62 = vadd.f32 %v787_v52, %v643_v58  ;;  %v434_v11 = vsel %vm362_vm0, %v5126_v38, 0.0  ;;  %vm506_vm1 = vcmp.eq.s32.totalorder %v6746_v15, %v5138_v42 }
 0x16d   : > { %1217 = vmatpush2.msra.mxu0 %v6778_v59  ;;  %v1566_v6 = vsub.f32 %v6750_v30, %v9392_v1  ;;  %v578_v13 = vsel %vm506_vm1, %v5149_v45, 0.0  ;;  %vm714_vm2 = vcmp.eq.s32.totalorder %v6746_v15, %v5141_v43  ;;  %vm922_vm3 = vcmp.eq.s32.totalorder %v6746_v15, %v5144_v44  ;;  %v9828_v15 = vld [vmem:[#allocation36_spill] sm:$0xff] }
 0x16e   : > { %1562 = vmatpush2.msra.mxu1 %v1561_v3  ;;  %v1059_v17 = vadd.f32 %v995_v63, %v851_v62  ;;  %v642_v29 = vadd.f32 %v578_v13, %v434_v11  ;;  %v786_v38 = vsel %vm714_vm2, %v5152_v46, 0.0  ;;  %v994_v42 = vsel %vm922_vm3, %v5155_v47, 0.0 }
 0x16f   : > { %v1567_v61 = vand.u32 4294901760, %v1566_v6  ;;  %v9390_v49 = vand.u32 4294901760, %v6757_v54  ;;  %v6799_v27 = vand.u32 4294901760, %v1092_v21  ;;  %v6801_v25 = vand.u32 4294901760, %v1090_v31 }
 0x170   : > { %v6803_v45 = vand.u32 4294901760, %v1059_v17  ;;  %v850_v43 = vadd.f32 %v786_v38, %v642_v29  ;;  %v6807_v44 = vsub.f32 %v6618_v35, %v6635_v53  ;;  %v6811_v58 = vsub.f32 %v6653_v12, %v6668_v10 }
 0x171   : > { %9808 = vst [vmem:[#allocation138_spill] sm:$0xff] %v6799_v27  ;;  %9809 = vst [vmem:[#allocation139_spill] sm:$0xff] %v6801_v25  ;;  %1568 = vmatprep.subr.mxu1 %v1567_v61  ;;  %v1572_v46 = vsub.f32 %v6757_v54, %v9390_v49  ;;  %v6817_v47 = vsub.f32 %v1092_v21, %v6799_v27  ;;  %v6820_v52 = vsub.f32 %v1090_v31, %v6801_v25 }
 0x172   : > { %v6824_v63 = vsub.f32 %v6689_v23, %v6701_v48  ;;  %1219 = vmatprep.subr.mxu0 %v6803_v45  ;;  %v1058_v35 = vadd.f32 %v994_v42, %v850_v43  ;;  %v9389_v12 = vand.u32 4294901760, %v6807_v44  ;;  %v9388_v3 = vand.u32 4294901760, %v6811_v58  ;;  %1624 = vmatprep.mubr.f32.mxu1 %v6799_v27  ;;  %v9830_v27 = vld [vmem:[#allocation37_spill] sm:$0xff] }
 0x173   : > { %v6831_v62 = vsub.f32 %v6707_v28, %v6722_v41  ;;  %v1573_v21 = vand.u32 4294901760, %v1572_v46  ;;  %v9400_v31 = vand.u32 4294901760, %v6817_v47  ;;  %v9399_v11 = vand.u32 4294901760, %v6820_v52 }
 0x174   : > { %v9391_v23 = vand.u32 4294901760, %v6824_v63  ;;  %v6837_v6 = vand.u32 4294901760, %v1058_v35  ;;  %v1578_v13 = vsub.f32 %v6807_v44, %v9389_v12  ;;  %v1584_v28 = vsub.f32 %v6811_v58, %v9388_v3 }
 0x175   : > { %v9394_v29 = vand.u32 4294901760, %v6831_v62  ;;  %1574 = vmatpush2.msra.mxu1 %v1573_v21  ;;  %v1225_v38 = vsub.f32 %v6817_v47, %v9400_v31  ;;  %v1231_v42 = vsub.f32 %v6820_v52, %v9399_v11  ;;  %v6857_v43 = vsub.f32 %v6734_v24, %v6753_v55  ;;  %v9826_v11 = vld [vmem:[#allocation35_spill] sm:$0xff]  ;;  %v9827_v31 = vld [vmem:[#allocation58_spill] sm:$0xff] }
 0x176   : > { %v1590_v61 = vsub.f32 %v6824_v63, %v9391_v23  ;;  %1221 = vmatpush2.msra.mxu0 %v6837_v6  ;;  %v1579_v46 = vand.u32 4294901760, %v1578_v13  ;;  %v1585_v21 = vand.u32 4294901760, %v1584_v28  ;;  %v6865_v12 = vsub.f32 %v6765_v8, %v6778_v59 }
 0x177   : > { %9810 = vst [vmem:[#allocation140_spill] sm:$0xff] %v6857_v43  ;;  %v1596_v3 = vsub.f32 %v6831_v62, %v9394_v29  ;;  %v1226_v49 = vand.u32 4294901760, %v1225_v38  ;;  %1634 = vmatprep.subr.mxu0 %v5315_v0  ;;  %v1232_v23 = vand.u32 4294901760, %v1231_v42  ;;  %v9398_v24 = vand.u32 4294901760, %v6857_v43 }
 0x178   : > { %v1591_v1 = vand.u32 4294901760, %v1590_v61  ;;  %1580 = vmatprep.subr.mxu1 %v1579_v46  ;;  %v9397_v13 = vand.u32 4294901760, %v6865_v12  ;;  %v6871_v28 = vsub.f32 %v1059_v17, %v6803_v45  ;;  %v6874_v29 = vsub.f32 %v1058_v35, %v6837_v6  ;;  %v9811_v61 = vld [vmem:[#allocation27_spill] sm:$0xff]  ;;  %v9812_v46 = vld [vmem:[#allocation44_spill] sm:$0xff] }
 0x179   : > { %v1597_v33 = vand.u32 4294901760, %v1596_v3  ;;  %1227 = vmatprep.mubr.f32.mxu0 %v1226_v49  ;;  %1586 = vmatpush2.msra.mxu1 %v1585_v21  ;;  %v1602_v8 = vsub.f32 %v6857_v43, %v9398_v24  ;;  %v9813_v21 = vld [vmem:[#allocation28_spill] sm:$0xff]  ;;  %v9825_v24 = vld [vmem:[#allocation57_spill] sm:$0xff] }
 0x17a   : > { %1233 = vmatmul.mubr.f32.vlgmr.msra.gmra.mxu0 %v1232_v23  ;;  %1592 = vmatprep.subr.mxu1 %v1591_v1  ;;  %v1608_v3 = vsub.f32 %v6865_v12, %v9397_v13  ;;  %v9396_v38 = vand.u32 4294901760, %v6871_v28  ;;  %v9395_v17 = vand.u32 4294901760, %v6874_v29  ;;  %v9824_v13 = vld [vmem:[#allocation34_spill] sm:$0xff] }
 0x17b   : > { %1637 = vmatpush1.msra.mxu0 %v5336_v16  ;;  %1598 = vmatpush2.msra.mxu1 %v1597_v33  ;;  %v1603_v35 = vand.u32 4294901760, %v1602_v8  ;;  %v9814_v8 = vld [vmem:[#allocation29_spill] sm:$0xff] }
 0x17c   : > { %1640 = vmatprep.subr.mxu0 %v5368_v14  ;;  %v1609_v49 = vand.u32 4294901760, %v1608_v3  ;;  %v1614_v23 = vsub.f32 %v6871_v28, %v9396_v38  ;;  %v1620_v1 = vsub.f32 %v6874_v29, %v9395_v17  ;;  %1826 = vmatprep.mubr.f32.mxu0 %v6817_v47  ;;  %v9815_v3 = vld [vmem:[#allocation46_spill] sm:$0xff]  ;;  %v9822_v17 = vld [vmem:[#allocation33_spill] sm:$0xff]  ;;  %v9823_v38 = vld [vmem:[#allocation55_spill] sm:$0xff] }
 0x17d   : > { %1643 = vmatpush1.msra.mxu0 %v5390_v4  ;;  %1604 = vmatprep.subr.mxu1 %v1603_v35  ;;  %v9816_v35 = vld [vmem:[#allocation30_spill] sm:$0xff] }
 0x17e   : > { %1646 = vmatprep.subr.mxu0 %v5420_v40  ;;  %1610 = vmatpush2.msra.mxu1 %v1609_v49  ;;  %v1615_v33 = vand.u32 4294901760, %v1614_v23  ;;  %v1621_v42 = vand.u32 4294901760, %v1620_v1  ;;  %v9817_v49 = vld [vmem:[#allocation49_spill] sm:$0xff]  ;;  %v9818_v23 = vld [vmem:[#allocation31_spill] sm:$0xff]  ;;  %v9819_v1 = vld [vmem:[#allocation50_spill] sm:$0xff] }
 0x17f   : > { %1649 = vmatpush1.msra.mxu0 %v5446_v36 }
 0x180   : > { %1616 = vmatprep.subr.mxu1 %v1615_v33  ;;  %1652 = vmatprep.subr.mxu0 %v5468_v39  ;;  %v9820_v33 = vld [vmem:[#allocation32_spill] sm:$0xff] }
 0x181   : > { %1622 = vmatpush2.msra.mxu1 %v1621_v42  ;;  %1655 = vmatpush1.msra.mxu0 %v5501_v19  ;;  %v9821_v42 = vld [vmem:[#allocation52_spill] sm:$0xff] }
 0x182   : > { %1626 = vmatmul.mubr.f32.vlgmr.msra.gmra.mxu1 %v6801_v25  ;;  %1658 = vmatprep.subr.mxu0 %v5524_v7  ;;  %v9829_v25 = vld [vmem:[#allocation61_spill] sm:$0xff] }
 0x183   : > { %1836 = vmatprep.subr.mxu1 %v5161_v50  ;;  %1661 = vmatpush1.msra.mxu0 %v5546_v34 }
 0x184   : > { %1838 = vmatpush1.msra.mxu1 %v5226_v20  ;;  %1664 = vmatprep.subr.mxu0 %v5579_v57 }
 0x185   : > { %1840 = vmatprep.subr.mxu1 %v5238_v26  ;;  %1667 = vmatpush1.msra.mxu0 %v5602_v22 }
 0x186   : > { %1842 = vmatpush1.msra.mxu1 %v5252_v32  ;;  %1670 = vmatprep.subr.mxu0 %v5624_v51 }
 0x187   : > { %1844 = vmatprep.subr.mxu1 %v9811_v61  ;;  %1673 = vmatpush1.msra.mxu0 %v9812_v46 }
 0x188   : > { %1846 = vmatpush1.msra.mxu1 %v9813_v21  ;;  %1676 = vmatprep.subr.mxu0 %v5680_v5 }
 0x189   : > { %1848 = vmatprep.subr.mxu1 %v9814_v8  ;;  %1679 = vmatpush1.msra.mxu0 %v9815_v3 }
 0x18a   : > { %1850 = vmatpush1.msra.mxu1 %v9816_v35  ;;  %1682 = vmatprep.subr.mxu0 %v9817_v49 }
 0x18b   : > { %1852 = vmatprep.subr.mxu1 %v9818_v23  ;;  %1685 = vmatpush1.msra.mxu0 %v9819_v1 }
 0x18c   : > { %1854 = vmatpush1.msra.mxu1 %v9820_v33  ;;  %1688 = vmatprep.subr.mxu0 %v9821_v42  ;;  %v9832_v42 = vld [vmem:[#allocation38_spill] sm:$0xff] }
 0x18d   : > { %1856 = vmatprep.subr.mxu1 %v9822_v17  ;;  %1691 = vmatpush1.msra.mxu0 %v9823_v38  ;;  %v9833_v17 = vld [vmem:[#allocation66_spill] sm:$0xff]  ;;  %v9834_v38 = vld [vmem:[#allocation39_spill] sm:$0xff] }
 0x18e   : > { %1858 = vmatpush1.msra.mxu1 %v9824_v13  ;;  %1694 = vmatprep.subr.mxu0 %v9825_v24  ;;  %v9835_v13 = vld [vmem:[#allocation67_spill] sm:$0xff]  ;;  %v9836_v24 = vld [vmem:[#allocation40_spill] sm:$0xff] }
 0x18f   : > { %1860 = vmatprep.subr.mxu1 %v9826_v11  ;;  %1697 = vmatpush1.msra.mxu0 %v9827_v31  ;;  %v9837_v11 = vld [vmem:[#allocation70_spill] sm:$0xff]  ;;  %v9838_v31 = vld [vmem:[#allocation41_spill] sm:$0xff] }
 0x190   : > { %1862 = vmatpush1.msra.mxu1 %v9828_v15  ;;  %1700 = vmatprep.subr.mxu0 %v9829_v25  ;;  %v9839_v15 = vld [vmem:[#allocation72_spill] sm:$0xff]  ;;  %v9840_v25 = vld [vmem:[#allocation42_spill] sm:$0xff] }
 0x191   : > { %1864 = vmatprep.subr.mxu1 %v9830_v27  ;;  %1703 = vmatpush1.msra.mxu0 %v9831_v37  ;;  %v9841_v27 = vld [vmem:[#allocation76_spill] sm:$0xff]  ;;  %v9842_v37 = vld [vmem:[#allocation43_spill] sm:$0xff] }
 0x192   : > { %1866 = vmatpush1.msra.mxu1 %v9832_v42  ;;  %1706 = vmatprep.subr.mxu0 %v9833_v17  ;;  %v9843_v42 = vld [vmem:[#allocation78_spill] sm:$0xff]  ;;  %v9844_v17 = vld [vmem:[#allocation45_spill] sm:$0xff] }
 0x193   : > { %1868 = vmatprep.subr.mxu1 %v9834_v38  ;;  %1709 = vmatpush1.msra.mxu0 %v9835_v13  ;;  %v9845_v38 = vld [vmem:[#allocation80_spill] sm:$0xff]  ;;  %v9846_v13 = vld [vmem:[#allocation47_spill] sm:$0xff] }
 0x194   : > { %1870 = vmatpush1.msra.mxu1 %v9836_v24  ;;  %1712 = vmatprep.subr.mxu0 %v9837_v11  ;;  %v9847_v24 = vld [vmem:[#allocation82_spill] sm:$0xff]  ;;  %v9848_v11 = vld [vmem:[#allocation48_spill] sm:$0xff] }
 0x195   : > { %1872 = vmatprep.subr.mxu1 %v9838_v31  ;;  %1715 = vmatpush1.msra.mxu0 %v9839_v15  ;;  %v9849_v31 = vld [vmem:[#allocation86_spill] sm:$0xff]  ;;  %v9850_v15 = vld [vmem:[#allocation51_spill] sm:$0xff] }
 0x196   : > { %1874 = vmatpush1.msra.mxu1 %v9840_v25  ;;  %1718 = vmatprep.subr.mxu0 %v9841_v27  ;;  %v9851_v25 = vld [vmem:[#allocation88_spill] sm:$0xff]  ;;  %v9852_v27 = vld [vmem:[#allocation53_spill] sm:$0xff] }
 0x197   : > { %1876 = vmatprep.subr.mxu1 %v9842_v37  ;;  %1721 = vmatpush1.msra.mxu0 %v9843_v42  ;;  %v9853_v37 = vld [vmem:[#allocation91_spill] sm:$0xff]  ;;  %v9854_v42 = vld [vmem:[#allocation54_spill] sm:$0xff] }
 0x198   : > { %1878 = vmatpush1.msra.mxu1 %v9844_v17  ;;  %1724 = vmatprep.subr.mxu0 %v9845_v38  ;;  %v9855_v17 = vld [vmem:[#allocation92_spill] sm:$0xff]  ;;  %v9856_v38 = vld [vmem:[#allocation59_spill] sm:$0xff] }
 0x199   : > { %1880 = vmatprep.subr.mxu1 %v9846_v13  ;;  %1727 = vmatpush1.msra.mxu0 %v9847_v24  ;;  %v9857_v13 = vld [vmem:[#allocation96_spill] sm:$0xff] }
 0x19a   : > { %1882 = vmatpush1.msra.mxu1 %v9848_v11  ;;  %1730 = vmatprep.subr.mxu0 %v9849_v31  ;;  %v9858_v24 = vld [vmem:[#allocation60_spill] sm:$0xff]  ;;  %v9859_v11 = vld [vmem:[#allocation98_spill] sm:$0xff] }
 0x19b   : > { %1884 = vmatprep.subr.mxu1 %v9850_v15  ;;  %1733 = vmatpush2.msra.mxu0 %v9851_v25  ;;  %v9860_v31 = vld [vmem:[#allocation62_spill] sm:$0xff]  ;;  %v9861_v15 = vld [vmem:[#allocation100_spill] sm:$0xff]  ;;  %v9862_v25 = vld [vmem:[#allocation65_spill] sm:$0xff] }
 0x19c   : > { %1886 = vmatpush1.msra.mxu1 %v9852_v27  ;;  %1736 = vmatprep.subr.mxu0 %v9853_v37  ;;  %v9863_v27 = vld [vmem:[#allocation102_spill] sm:$0xff]  ;;  %v9864_v37 = vld [vmem:[#allocation68_spill] sm:$0xff] }
 0x19d   : > { %1888 = vmatprep.subr.mxu1 %v9854_v42  ;;  %1739 = vmatpush2.msra.mxu0 %v9855_v17  ;;  %v9865_v42 = vld [vmem:[#allocation106_spill] sm:$0xff]  ;;  %v9866_v17 = vld [vmem:[#allocation71_spill] sm:$0xff] }
 0x19e   : > { %1890 = vmatpush1.msra.mxu1 %v9856_v38  ;;  %1742 = vmatprep.subr.mxu0 %v9857_v13  ;;  %v9867_v38 = vld [vmem:[#allocation108_spill] sm:$0xff]  ;;  %v9868_v13 = vld [vmem:[#allocation74_spill] sm:$0xff] }
 0x19f   : > { %1892 = vmatprep.subr.mxu1 %v9858_v24  ;;  %1745 = vmatpush2.msra.mxu0 %v9859_v11  ;;  %v9869_v24 = vld [vmem:[#allocation111_spill] sm:$0xff] }
 0x1a0   : > { %1894 = vmatpush1.msra.mxu1 %v9860_v31  ;;  %1748 = vmatprep.subr.mxu0 %v9861_v15  ;;  %v9870_v11 = vld [vmem:[#allocation75_spill] sm:$0xff]  ;;  %v9871_v31 = vld [vmem:[#allocation112_spill] sm:$0xff]  ;;  %v9872_v15 = vld [vmem:[#allocation77_spill] sm:$0xff] }
 0x1a1   : > { %1896 = vmatprep.subr.mxu1 %v9862_v25  ;;  %1751 = vmatpush2.msra.mxu0 %v9863_v27  ;;  %v9873_v25 = vld [vmem:[#allocation116_spill] sm:$0xff]  ;;  %v9874_v27 = vld [vmem:[#allocation81_spill] sm:$0xff] }
 0x1a2   : > { %1898 = vmatpush1.msra.mxu1 %v9864_v37  ;;  %1754 = vmatprep.subr.mxu0 %v9865_v42  ;;  %v9875_v37 = vld [vmem:[#allocation118_spill] sm:$0xff]  ;;  %v9876_v42 = vld [vmem:[#allocation84_spill] sm:$0xff] }
 0x1a3   : > { %1900 = vmatprep.subr.mxu1 %v9866_v17  ;;  %1757 = vmatpush2.msra.mxu0 %v9867_v38  ;;  %v9877_v38 = vld [vmem:[#allocation85_spill] sm:$0xff] }
 0x1a4   : > { %1902 = vmatpush2.msra.mxu1 %v9868_v13  ;;  %1760 = vmatprep.subr.mxu0 %v9869_v24  ;;  %v9878_v13 = vld [vmem:[#allocation122_spill] sm:$0xff]  ;;  %v9879_v24 = vld [vmem:[#allocation87_spill] sm:$0xff] }
 0x1a5   : > { %1904 = vmatprep.subr.mxu1 %v9870_v11  ;;  %1763 = vmatpush2.msra.mxu0 %v9871_v31  ;;  %v9880_v11 = vld [vmem:[#allocation126_spill] sm:$0xff]  ;;  %v9881_v31 = vld [vmem:[#allocation89_spill] sm:$0xff] }
 0x1a6   : > { %1906 = vmatpush2.msra.mxu1 %v9872_v15  ;;  %1766 = vmatprep.subr.mxu0 %v9873_v25  ;;  %v9882_v15 = vld [vmem:[#allocation128_spill] sm:$0xff]  ;;  %v9883_v25 = vld [vmem:[#allocation94_spill] sm:$0xff] }
 0x1a7   : > { %1908 = vmatprep.subr.mxu1 %v9874_v27  ;;  %1769 = vmatpush2.msra.mxu0 %v9875_v37  ;;  %v9884_v27 = vld [vmem:[#allocation130_spill] sm:$0xff]  ;;  %v9885_v37 = vld [vmem:[#allocation95_spill] sm:$0xff] }
 0x1a8   : > { %1910 = vmatpush2.msra.mxu1 %v9876_v42  ;;  %1772 = vmatprep.subr.mxu0 %v6529_v56  ;;  %v9886_v42 = vld [vmem:[#allocation131_spill] sm:$0xff]  ;;  %v9887_v56 = vld [vmem:[#allocation97_spill] sm:$0xff] }
 0x1a9   : > { %1912 = vmatprep.subr.mxu1 %v9877_v38  ;;  %1775 = vmatpush2.msra.mxu0 %v9878_v13  ;;  %v9888_v38 = vld [vmem:[#allocation133_spill] sm:$0xff] }
 0x1aa   : > { %1914 = vmatpush2.msra.mxu1 %v9879_v24  ;;  %1778 = vmatprep.subr.mxu0 %v9880_v11  ;;  %v9889_v13 = vld [vmem:[#allocation101_spill] sm:$0xff]  ;;  %v9890_v11 = vld [vmem:[#allocation104_spill] sm:$0xff] }
 0x1ab   : > { %1916 = vmatprep.subr.mxu1 %v9881_v31  ;;  %1781 = vmatpush2.msra.mxu0 %v9882_v15  ;;  %v9891_v15 = vld [vmem:[#allocation105_spill] sm:$0xff] }
 0x1ac   : > { %1918 = vmatpush2.msra.mxu1 %v9883_v25  ;;  %1784 = vmatprep.subr.mxu0 %v9884_v27  ;;  %v9892_v27 = vld [vmem:[#allocation107_spill] sm:$0xff] }
 0x1ad   : > { %1920 = vmatprep.subr.mxu1 %v9885_v37  ;;  %1787 = vmatpush2.msra.mxu0 %v9886_v42  ;;  %v9893_v42 = vld [vmem:[#allocation109_spill] sm:$0xff] }
 0x1ae   : > { %1922 = vmatpush2.msra.mxu1 %v9887_v56  ;;  %1790 = vmatprep.subr.mxu0 %v9888_v38  ;;  %v9894_v38 = vld [vmem:[#allocation114_spill] sm:$0xff] }
 0x1af   : > { %1924 = vmatprep.subr.mxu1 %v9889_v13  ;;  %1793 = vmatpush2.msra.mxu0 %v6743_v60  ;;  %v9895_v60 = vld [vmem:[#allocation115_spill] sm:$0xff] }
 0x1b0   : > { %1926 = vmatpush2.msra.mxu1 %v9890_v11  ;;  %1796 = vmatprep.subr.mxu0 %v6750_v30  ;;  %v9896_v30 = vld [vmem:[#allocation117_spill] sm:$0xff] }
 0x1b1   : > { %1928 = vmatprep.subr.mxu1 %v9891_v15  ;;  %1799 = vmatpush2.msra.mxu0 %v6757_v54  ;;  %v9897_v54 = vld [vmem:[#allocation121_spill] sm:$0xff] }
 0x1b2   : > { %1930 = vmatpush2.msra.mxu1 %v9892_v27  ;;  %1802 = vmatprep.subr.mxu0 %v6807_v44 }
 0x1b3   : > { %1932 = vmatprep.subr.mxu1 %v9893_v42  ;;  %1805 = vmatpush2.msra.mxu0 %v6811_v58 }
 0x1b4   : > { %1934 = vmatpush2.msra.mxu1 %v9894_v38  ;;  %1808 = vmatprep.subr.mxu0 %v6824_v63 }
 0x1b5   : > { %1936 = vmatprep.subr.mxu1 %v9895_v60  ;;  %1811 = vmatpush2.msra.mxu0 %v6831_v62 }
 0x1b6   : > { %1938 = vmatpush2.msra.mxu1 %v9896_v30  ;;  %1814 = vmatprep.subr.mxu0 %v6857_v43  ;;  %v9898_v43 = vand.u32 4294901760, %v5315_v0  ;;  %v9902_v0 = vand.u32 4294901760, %v5420_v40  ;;  %v9906_v40 = vand.u32 4294901760, %v5501_v19  ;;  %v9910_v19 = vand.u32 4294901760, %v5579_v57 }
 0x1b7   : > { %1940 = vmatprep.subr.mxu1 %v9897_v54  ;;  %1817 = vmatpush2.msra.mxu0 %v6865_v12 }
 0x1b8   : > { %1942 = vmatpush2.msra.mxu1 %v6560_v18  ;;  %1820 = vmatprep.subr.mxu0 %v6871_v28  ;;  %v9899_v18 = vand.u32 4294901760, %v5336_v16  ;;  %v9903_v16 = vand.u32 4294901760, %v5446_v36  ;;  %v9907_v36 = vand.u32 4294901760, %v6820_v52 }
 0x1b9   : > { %1944 = vmatprep.subr.mxu1 %v6588_v2  ;;  %1823 = vmatpush2.msra.mxu0 %v6874_v29  ;;  %v9900_v2 = vand.u32 4294901760, %v5368_v14  ;;  %v9904_v14 = vand.u32 4294901760, %v5468_v39 }
 0x1ba   : > { %1946 = vmatpush2.msra.mxu1 %v6613_v9  ;;  %1829 = vmatmul.mubr.f32.vlgmr.msra.gmra.mxu0 %v6820_v52  ;;  %v9901_v9 = vand.u32 4294901760, %v5390_v4  ;;  %v9911_v52 = vand.u32 4294901760, %v5602_v22  ;;  %v9914_v22 = vand.u32 4294901760, %v5680_v5 }
 0x1bb   : > { %1948 = vmatprep.subr.mxu1 %v6635_v53  ;;  %1979 = vmatprep.subr.mxu0 %v9898_v43 }
 0x1bc   : > { %1950 = vmatpush2.msra.mxu1 %v6668_v10  ;;  %1983 = vmatpush1.msra.mxu0 %v9899_v18  ;;  %v4759_v18 = vld [vmem:[%s5059_s7 + $0x8] sm:$0xff] }
 0x1bd   : > { %1952 = vmatprep.subr.mxu1 %v6701_v48  ;;  %1987 = vmatprep.subr.mxu0 %v9900_v2  ;;  %v2386_v43 = vrot.slane %v4759_v18, 2  ;;  %v4760_v2 = vld [vmem:[%s5059_s7] sm:$0xff] }
 0x1be   : > { %1954 = vmatpush2.msra.mxu1 %v6722_v41  ;;  %1991 = vmatpush1.msra.mxu0 %v9901_v9  ;;  %v2385_v4 = vrot.slane %v4760_v2, 2  ;;  %v9905_v9 = vand.u32 4294901760, %v6817_v47 }
 0x1bf   : > { %1956 = vmatprep.subr.mxu1 %v6753_v55  ;;  %1995 = vmatprep.subr.mxu0 %v9902_v0  ;;  %v9908_v0 = vand.u32 4294901760, %v5524_v7  ;;  %v7045_v39 = vadd.f32 %v4759_v18, %v2386_v43  ;;  %v9926_v18 = vld [vmem:[#allocation35_spill] sm:$0xff]  ;;  %v9927_v43 = vld [vmem:[#allocation58_spill] sm:$0xff] }
 0x1c0   : > { %1958 = vmatpush2.msra.mxu1 %v6778_v59  ;;  %1999 = vmatpush1.msra.mxu0 %v9903_v16  ;;  %v9909_v16 = vand.u32 4294901760, %v5546_v34  ;;  %v7050_v47 = vadd.f32 %v4760_v2, %v2385_v4  ;;  %v9916_v34 = vand.u32 4294901760, %v9817_v49  ;;  %v9924_v49 = vld [vmem:[#allocation57_spill] sm:$0xff]  ;;  %v9929_v2 = vld [vmem:[#allocation36_spill] sm:$0xff] }
 0x1c1   : > { %1960 = vmatprep.subr.mxu1 %v6803_v45  ;;  %2003 = vmatprep.subr.mxu0 %v9904_v14  ;;  %v7062_v7 = vfloor.f32 %v7045_v39  ;;  %v9928_v14 = vand.u32 4294901760, %v9927_v43  ;;  %v9947_v43 = vld [vmem:[#allocation42_spill] sm:$0xff] }
 0x1c2   : > { %1962 = vmatpush2.msra.mxu1 %v6837_v6  ;;  %1966 = vmatprep.mubr.f32.mxu1 %v9905_v9 }
 0x1c3   : > { %2007 = vmatpush1.msra.mxu0 %v9906_v40  ;;  %1970 = vmatmul.mubr.f32.vlgmr.msra.gmra.mxu1 %v9907_v36  ;;  %v2406_v57 = vadd.f32 1.0, %v7062_v7  ;;  %v9930_v40 = vld [vmem:[#allocation61_spill] sm:$0xff] }
 0x1c4   : > { %2011 = vmatprep.subr.mxu0 %v9908_v0  ;;  %2242 = vmatprep.subr.mxu1 %v5161_v50  ;;  %v9912_v50 = vand.u32 4294901760, %v5624_v51  ;;  %v9917_v51 = vand.u32 4294901760, %v9819_v1  ;;  %v2421_v1 = vmul.f32 0.03125, %v7062_v7  ;;  %v9931_v36 = vand.u32 4294901760, %v9930_v40  ;;  %v9932_v0 = vld [vmem:[#allocation37_spill] sm:$0xff] }
 0x1c5   : > { %2015 = vmatpush1.msra.mxu0 %v9909_v16  ;;  %2244 = vmatpush1.msra.mxu1 %v5226_v20  ;;  %v9913_v20 = vand.u32 4294901760, %v9812_v46  ;;  %v9933_v16 = vld [vmem:[#allocation63_spill] sm:$0xff] }
 0x1c6   : > { %2019 = vmatprep.subr.mxu0 %v9910_v19  ;;  %2246 = vmatprep.subr.mxu1 %v5238_v26  ;;  %v7068_v26 = vfloor.f32 %v7050_v47  ;;  %v9934_v19 = vand.u32 4294901760, %v9933_v16 }
 0x1c7   : > { %2023 = vmatpush1.msra.mxu0 %v9911_v52  ;;  %2248 = vmatpush1.msra.mxu1 %v5252_v32  ;;  %v9915_v32 = vand.u32 4294901760, %v9815_v3  ;;  %v9935_v52 = vld [vmem:[#allocation38_spill] sm:$0xff] }
 0x1c8   : > { %2027 = vmatprep.subr.mxu0 %v9912_v50  ;;  %2250 = vmatprep.subr.mxu1 %v9811_v61  ;;  %v2405_v5 = vadd.f32 1.0, %v7068_v26  ;;  %v9918_v61 = vld [vmem:[#allocation52_spill] sm:$0xff]  ;;  %v2420_v4 = vmul.f32 0.03125, %v7068_v26  ;;  %v9936_v50 = vld [vmem:[#allocation66_spill] sm:$0xff] }
 0x1c9   : > { %2031 = vmatpush1.msra.mxu0 %v9913_v20  ;;  %2252 = vmatpush1.msra.mxu1 %v9813_v21  ;;  %v9919_v46 = vand.u32 4294901760, %v9918_v61  ;;  %v9920_v21 = vld [vmem:[#allocation33_spill] sm:$0xff]  ;;  %v9937_v20 = vand.u32 4294901760, %v9936_v50  ;;  %v9956_v50 = vld [vmem:[#allocation47_spill] sm:$0xff] }
 0x1ca   : > { %2035 = vmatprep.subr.mxu0 %v9914_v22  ;;  %2254 = vmatprep.subr.mxu1 %v9814_v8  ;;  %v9921_v8 = vld [vmem:[#allocation55_spill] sm:$0xff]  ;;  %v2446_v9 = vmul.f32 0.03125, %v2405_v5 }
 0x1cb   : > { %2039 = vmatpush1.msra.mxu0 %v9915_v32  ;;  %2256 = vmatpush1.msra.mxu1 %v9816_v35  ;;  %v9922_v3 = vand.u32 4294901760, %v9921_v8  ;;  %v9923_v35 = vld [vmem:[#allocation34_spill] sm:$0xff]  ;;  %v9938_v22 = vld [vmem:[#allocation39_spill] sm:$0xff]  ;;  %v2423_v32 = vfloor.f32 %v2421_v1 }
 0x1cc   : > { %2043 = vmatprep.subr.mxu0 %v9916_v34  ;;  %2258 = vmatprep.subr.mxu1 %v9818_v23  ;;  %v9925_v23 = vand.u32 4294901760, %v9924_v49  ;;  %v2448_v8 = vfloor.f32 %v2446_v9  ;;  %v9944_v49 = vld [vmem:[#allocation41_spill] sm:$0xff] }
 0x1cd   : > { %2047 = vmatpush1.msra.mxu0 %v9917_v51  ;;  %2260 = vmatpush1.msra.mxu1 %v9820_v33  ;;  %v2447_v33 = vmul.f32 0.03125, %v2406_v57  ;;  %v9939_v51 = vld [vmem:[#allocation67_spill] sm:$0xff]  ;;  %v9953_v9 = vld [vmem:[#allocation45_spill] sm:$0xff] }
 0x1ce   : > { %2051 = vmatprep.subr.mxu0 %v9919_v46  ;;  %2262 = vmatprep.subr.mxu1 %v9920_v21  ;;  %v9940_v61 = vand.u32 4294901760, %v9939_v51  ;;  %v9941_v46 = vld [vmem:[#allocation40_spill] sm:$0xff]  ;;  %v2422_v21 = vfloor.f32 %v2420_v4  ;;  %v2450_v16 = vmul.f32 32.0, %v2448_v8 }
 0x1cf   : > { %2055 = vmatpush1.msra.mxu0 %v9922_v3  ;;  %2264 = vmatpush1.msra.mxu1 %v9923_v35  ;;  %v2449_v34 = vfloor.f32 %v2447_v33  ;;  %v9942_v3 = vld [vmem:[#allocation70_spill] sm:$0xff]  ;;  %v9950_v33 = vld [vmem:[#allocation43_spill] sm:$0xff]  ;;  %v9959_v51 = vld [vmem:[#allocation48_spill] sm:$0xff] }
 0x1d0   : > { %2059 = vmatprep.subr.mxu0 %v9925_v23  ;;  %2266 = vmatprep.subr.mxu1 %v9926_v18  ;;  %v9943_v35 = vand.u32 4294901760, %v9942_v3  ;;  %v9945_v23 = vld [vmem:[#allocation72_spill] sm:$0xff] }
 0x1d1   : > { %2063 = vmatpush1.msra.mxu0 %v9928_v14  ;;  %2268 = vmatpush1.msra.mxu1 %v9929_v2  ;;  %v9946_v18 = vand.u32 4294901760, %v9945_v23  ;;  %v9948_v14 = vld [vmem:[#allocation76_spill] sm:$0xff]  ;;  %v2425_v2 = vmul.f32 32.0, %v2423_v32  ;;  %v2451_v40 = vmul.f32 32.0, %v2449_v34  ;;  %v9962_v34 = vld [vmem:[#allocation51_spill] sm:$0xff]  ;;  %v2452_v23 = vsub.f32 %v2405_v5, %v2450_v16  ;;  %v9977_v5 = vld [vmem:[#allocation62_spill] sm:$0xff] }
 0x1d2   : > { %2067 = vmatprep.subr.mxu0 %v9931_v36  ;;  %2270 = vmatprep.subr.mxu1 %v9932_v0  ;;  %v9949_v1 = vand.u32 4294901760, %v9948_v14  ;;  %v9951_v36 = vld [vmem:[#allocation78_spill] sm:$0xff]  ;;  %v2424_v0 = vmul.f32 32.0, %v2422_v21  ;;  %v9963_v21 = vld [vmem:[#allocation88_spill] sm:$0xff] }
 0x1d3   : > { %2071 = vmatpush1.msra.mxu0 %v9934_v19  ;;  %2272 = vmatpush1.msra.mxu1 %v9935_v52  ;;  %v9952_v4 = vand.u32 4294901760, %v9951_v36  ;;  %v9954_v19 = vld [vmem:[#allocation80_spill] sm:$0xff]  ;;  %v2453_v3 = vsub.f32 %v2406_v57, %v2451_v40  ;;  %v9964_v8 = vand.u32 4294901760, %v9963_v21  ;;  %v9968_v14 = vld [vmem:[#allocation54_spill] sm:$0xff]  ;;  %v9971_v36 = vld [vmem:[#allocation59_spill] sm:$0xff]  ;;  %vm2454_vm7 = vcmp.gt.f32.partialorder %v2452_v23, 15.0 }
 0x1d4   : > { %2075 = vmatprep.subr.mxu0 %v9937_v20  ;;  %2274 = vmatprep.subr.mxu1 %v9938_v22  ;;  %v9955_v52 = vand.u32 4294901760, %v9954_v19  ;;  %v9957_v20 = vld [vmem:[#allocation82_spill] sm:$0xff]  ;;  %v9974_v40 = vld [vmem:[#allocation60_spill] sm:$0xff] }
 0x1d5   : > { %2079 = vmatpush1.msra.mxu0 %v9940_v61  ;;  %2276 = vmatpush1.msra.mxu1 %v9941_v46  ;;  %v9958_v22 = vand.u32 4294901760, %v9957_v20  ;;  %v9960_v61 = vld [vmem:[#allocation86_spill] sm:$0xff]  ;;  %v2427_v46 = vsub.f32 %v7062_v7, %v2425_v2  ;;  %v9972_v2 = vld [vmem:[#allocation96_spill] sm:$0xff]  ;;  %vm2455_vm5 = vcmp.gt.f32.partialorder %v2453_v3, 15.0 }
 0x1d6   : > { %2083 = vmatprep.subr.mxu0 %v9943_v35  ;;  %2278 = vmatprep.subr.mxu1 %v9944_v49  ;;  %v9961_v32 = vand.u32 4294901760, %v9960_v61  ;;  %v9965_v35 = vld [vmem:[#allocation53_spill] sm:$0xff]  ;;  %v2426_v49 = vsub.f32 %v7068_v26, %v2424_v0  ;;  %v9973_v57 = vand.u32 4294901760, %v9972_v2  ;;  %v9975_v19 = vld [vmem:[#allocation98_spill] sm:$0xff]  ;;  %v9989_v2 = vld [vmem:[#allocation111_spill] sm:$0xff] }
 0x1d7   : > { %2087 = vmatpush1.msra.mxu0 %v9946_v18  ;;  %2280 = vmatpush1.msra.mxu1 %v9947_v43  ;;  %v9966_v18 = vld [vmem:[#allocation91_spill] sm:$0xff]  ;;  %v9976_v0 = vand.u32 4294901760, %v9975_v19  ;;  %vm2429_vm4 = vcmp.gt.f32.partialorder %v2427_v46, 15.0 }
 0x1d8   : > { %2091 = vmatprep.subr.mxu0 %v9949_v1  ;;  %2282 = vmatprep.subr.mxu1 %v9950_v33  ;;  %v9967_v43 = vand.u32 4294901760, %v9966_v18  ;;  %v9969_v1 = vld [vmem:[#allocation92_spill] sm:$0xff]  ;;  %v2430_v16 = vsub.f32 31.0, %v2426_v49  ;;  %vm2428_vm6 = vcmp.gt.f32.partialorder %v2426_v49, 15.0 }
 0x1d9   : > { %2095 = vmatpush1.msra.mxu0 %v9952_v4  ;;  %2284 = vmatpush1.msra.mxu1 %v9953_v9  ;;  %v9970_v33 = vand.u32 4294901760, %v9969_v1  ;;  %v2431_v4 = vsub.f32 31.0, %v2427_v46  ;;  %v2457_v9 = vsub.f32 31.0, %v2453_v3  ;;  %v9986_v18 = vld [vmem:[#allocation108_spill] sm:$0xff]  ;;  %v7162_v1 = vsub.f32 %v7050_v47, %v7068_v26 }
 0x1da   : > { %2099 = vmatprep.subr.mxu0 %v9955_v52  ;;  %2286 = vmatprep.subr.mxu1 %v9956_v50  ;;  %v2456_v52 = vsub.f32 31.0, %v2452_v23  ;;  %v9978_v50 = vld [vmem:[#allocation100_spill] sm:$0xff] }
 0x1db   : > { %2103 = vmatpush1.msra.mxu0 %v9958_v22  ;;  %2288 = vmatpush1.msra.mxu1 %v9959_v51  ;;  %v9979_v20 = vand.u32 4294901760, %v9978_v50  ;;  %v9980_v22 = vld [vmem:[#allocation65_spill] sm:$0xff]  ;;  %v9981_v51 = vld [vmem:[#allocation102_spill] sm:$0xff]  ;;  %v9995_v26 = vld [vmem:[#allocation116_spill] sm:$0xff] }
 0x1dc   : > { %2107 = vmatprep.subr.mxu0 %v9961_v32  ;;  %2290 = vmatprep.subr.mxu1 %v9962_v34  ;;  %v9982_v61 = vand.u32 4294901760, %v9981_v51  ;;  %v9983_v32 = vld [vmem:[#allocation68_spill] sm:$0xff]  ;;  %v9984_v34 = vld [vmem:[#allocation106_spill] sm:$0xff] }
 0x1dd   : > { %2111 = vmatpush2.msra.mxu0 %v9964_v8  ;;  %2292 = vmatpush1.msra.mxu1 %v9965_v35  ;;  %v9985_v21 = vand.u32 4294901760, %v9984_v34  ;;  %v2433_v8 = vsel %vm2429_vm4, %v2431_v4, %v2427_v46  ;;  %v2459_v35 = vsel %vm2455_vm5, %v2457_v9, %v2453_v3  ;;  %v9992_v46 = vld [vmem:[#allocation112_spill] sm:$0xff]  ;;  %v9994_v4 = vld [vmem:[#allocation77_spill] sm:$0xff] }
 0x1de   : > { %2115 = vmatprep.subr.mxu0 %v9967_v43  ;;  %2294 = vmatprep.subr.mxu1 %v9968_v14  ;;  %v9987_v43 = vand.u32 4294901760, %v9986_v18  ;;  %v9988_v14 = vld [vmem:[#allocation74_spill] sm:$0xff]  ;;  %v9993_v3 = vand.u32 4294901760, %v9992_v46  ;;  %v2435_v9 = vmul.f32 16.0, %v2433_v8  ;;  %v2439_v19 = vrot.slane %v2433_v8, 1 }
 0x1df   : > { %2119 = vmatpush2.msra.mxu0 %v9970_v33  ;;  %2296 = vmatpush1.msra.mxu1 %v9971_v36  ;;  %v2432_v33 = vsel %vm2428_vm6, %v2430_v16, %v2426_v49  ;;  %v2458_v36 = vsel %vm2454_vm7, %v2456_v52, %v2452_v23  ;;  %v2463_v47 = vrot.slane %v2459_v35, 1  ;;  %v9996_v49 = vand.u32 4294901760, %v9995_v26  ;;  %v9997_v23 = vld [vmem:[#allocation81_spill] sm:$0xff]  ;;  %v9998_v52 = vld [vmem:[#allocation118_spill] sm:$0xff] }
 0x1e0   : > { %2123 = vmatprep.subr.mxu0 %v9973_v57  ;;  %2298 = vmatprep.subr.mxu1 %v9974_v40  ;;  %v9990_v57 = vand.u32 4294901760, %v9989_v2  ;;  %v9991_v40 = vld [vmem:[#allocation75_spill] sm:$0xff]  ;;  %v2462_v16 = vrot.slane %v2458_v36, 1  ;;  %v9999_v50 = vand.u32 4294901760, %v9998_v52  ;;  %v2470_v34 = vmul.f32 16.0, %v2458_v36 }
 0x1e1   : > { %2127 = vmatpush2.msra.mxu0 %v9976_v0  ;;  %2300 = vmatpush1.msra.mxu1 %v9977_v5  ;;  %v2434_v0 = vmul.f32 16.0, %v2432_v33  ;;  %v2438_v5 = vrot.slane %v2432_v33, 1  ;;  %v2443_v18 = vadd.f32 %v2439_v19, %v2435_v9 }
 0x1e2   : > { %2131 = vmatprep.subr.mxu0 %v9979_v20  ;;  %2302 = vmatprep.subr.mxu1 %v9980_v22  ;;  %v2471_v20 = vmul.f32 16.0, %v2459_v35  ;;  %v10001_v22 = vld [vmem:[#allocation120_spill] sm:$0xff] }
 0x1e3   : > { %2135 = vmatpush2.msra.mxu0 %v9982_v61  ;;  %2304 = vmatpush1.msra.mxu1 %v9983_v32  ;;  %v10002_v51 = vand.u32 4294901760, %v10001_v22  ;;  %v10003_v61 = vld [vmem:[#allocation85_spill] sm:$0xff]  ;;  %v2442_v35 = vadd.f32 %v2438_v5, %v2434_v0  ;;  %v2466_v2 = vadd.f32 %v2462_v16, %v2434_v0  ;;  %v2472_v26 = vadd.f32 %v2470_v34, %v2438_v5 }
 0x1e4   : > { %2139 = vmatprep.subr.mxu0 %v9985_v21  ;;  %2306 = vmatprep.subr.mxu1 %v9866_v17  ;;  %v7169_v17 = vsub.f32 %v7045_v39, %v7062_v7  ;;  %v10000_v39 = vld [vmem:[#allocation84_spill] sm:$0xff]  ;;  %v2395_v7 = vsub.f32 1.0, %v7162_v1  ;;  %v10004_v21 = vld [vmem:[#allocation122_spill] sm:$0xff]  ;;  %v2473_v46 = vadd.f32 %v2471_v20, %v2439_v19  ;;  %v2477_v19 = vadd.f32 %v2471_v20, %v2463_v47 }
 0x1e5   : > { %2143 = vmatpush2.msra.mxu0 %v9987_v43  ;;  %2308 = vmatpush2.msra.mxu1 %v9988_v14  ;;  %v10005_v8 = vand.u32 4294901760, %v10004_v21  ;;  %v2467_v43 = vadd.f32 %v2463_v47, %v2435_v9  ;;  %v10006_v14 = vld [vmem:[#allocation126_spill] sm:$0xff]  ;;  %v2409_v9 = vrot.slane %v7162_v1, 1  ;;  %v4695_v22 = vtrunc.f32 %v2466_v2  ;;  %v10019_v21 = vld [vmem:[#allocation136_spill] sm:$0xff] }
 0x1e6   : > { %2147 = vmatprep.subr.mxu0 %v9990_v57  ;;  %2310 = vmatprep.subr.mxu1 %v9991_v40  ;;  %v2396_v32 = vsub.f32 1.0, %v7169_v17  ;;  %v10007_v33 = vand.u32 4294901760, %v10006_v14  ;;  %v10008_v57 = vld [vmem:[#allocation128_spill] sm:$0xff]  ;;  %v2399_v36 = vrot.slane %v2395_v7, 1  ;;  %v2410_v0 = vrot.slane %v7169_v17, 1 }
 0x1e7   : > { %2151 = vmatpush2.msra.mxu0 %v9993_v3  ;;  %2312 = vmatpush2.msra.mxu1 %v9994_v4  ;;  %v10009_v40 = vand.u32 4294901760, %v10008_v57  ;;  %v10010_v3 = vld [vmem:[#allocation130_spill] sm:$0xff]  ;;  %v4697_v52 = vtrunc.f32 %v2467_v43  ;;  %v2413_v20 = vmul.f32 %v2409_v9, %v2395_v7  ;;  %v10021_v43 = vld [vmem:[#allocation137_spill] sm:$0xff]  ;;  %v4705_v2 = vtrunc.f32 %v2477_v19 }
 0x1e8   : > { %2155 = vmatprep.subr.mxu0 %v9996_v49  ;;  %2314 = vmatprep.subr.mxu1 %v9997_v23  ;;  %v10011_v4 = vand.u32 4294901760, %v10010_v3  ;;  %v2476_v49 = vadd.f32 %v2470_v34, %v2462_v16  ;;  %v2403_v16 = vmul.f32 %v2399_v36, %v2395_v7  ;;  %v10022_v14 = vand.u32 4294901760, %v10021_v43 }
 0x1e9   : > { %2159 = vmatpush2.msra.mxu0 %v9999_v50  ;;  %2316 = vmatpush2.msra.mxu1 %v10000_v39  ;;  %v10014_v50 = vld [vmem:[#allocation133_spill] sm:$0xff]  ;;  %v10023_v57 = vand.u32 4294901760, %v6807_v44  ;;  %v10024_v3 = vand.u32 4294901760, %v6811_v58 }
 0x1ea   : > { %2163 = vmatprep.subr.mxu0 %v10002_v51  ;;  %2318 = vmatprep.subr.mxu1 %v10003_v61  ;;  %v10015_v39 = vand.u32 4294901760, %v10014_v50  ;;  %v10016_v51 = vld [vmem:[#allocation134_spill] sm:$0xff]  ;;  %v4701_v61 = vtrunc.f32 %v2473_v46  ;;  %v4696_v46 = vcvt.f32.s32 %v4695_v22  ;;  %v10031_v50 = vand.u32 4294901760, %v6871_v28  ;;  %v10037_v28 = vld [vmem:[#allocation13_spill] sm:$0xff] }
 0x1eb   : > { %2167 = vmatpush2.msra.mxu0 %v10005_v8  ;;  %2320 = vmatpush2.msra.mxu1 %v9879_v24  ;;  %v2400_v24 = vrot.slane %v2396_v32, 1  ;;  %v10017_v5 = vand.u32 4294901760, %v10016_v51  ;;  %v10020_v8 = vand.u32 4294901760, %v10019_v21  ;;  %v10034_v51 = vld [vmem:[#allocation138_spill] sm:$0xff] }
 0x1ec   : > { %2171 = vmatprep.subr.mxu0 %v10007_v33  ;;  %2322 = vmatprep.subr.mxu1 %v9881_v31  ;;  %v10012_v31 = vld [vmem:[#allocation131_spill] sm:$0xff]  ;;  %v2414_v33 = vmul.f32 %v2410_v0, %v2396_v32 }
 0x1ed   : > { %2175 = vmatpush2.msra.mxu0 %v10009_v40  ;;  %2324 = vmatpush2.msra.mxu1 %v9883_v25  ;;  %v10013_v23 = vand.u32 4294901760, %v10012_v31  ;;  %v4693_v25 = vtrunc.f32 %v2443_v18  ;;  %v2404_v47 = vmul.f32 %v2400_v24, %v2396_v32  ;;  %v4699_v18 = vtrunc.f32 %v2472_v26 }
 0x1ee   : > { %2179 = vmatprep.subr.mxu0 %v10011_v4  ;;  %2326 = vmatprep.subr.mxu1 %v9885_v37  ;;  %v4691_v37 = vtrunc.f32 %v2442_v35  ;;  %v4698_v35 = vcvt.f32.s32 %v4697_v52  ;;  %v2416_v7 = vmul.f32 %v2400_v24, %v7169_v17  ;;  %v2418_v32 = vmul.f32 %v2410_v0, %v7169_v17  ;;  %v10030_v0 = vld [vmem:[#allocation124_spill] sm:$0xff] }
 0x1ef   : > { %2183 = vmatpush2.msra.mxu0 %v10013_v23  ;;  %2328 = vmatpush2.msra.mxu1 %v9887_v56  ;;  %v10018_v56 = vld [vmem:[#allocation12_spill] sm:$0xff]  ;;  %v4702_v4 = vcvt.f32.s32 %v4701_v61  ;;  %v10036_v61 = vld [vmem:[#allocation139_spill] sm:$0xff] }
 0x1f0   : > { %2187 = vmatprep.subr.mxu0 %v10015_v39  ;;  %2330 = vmatprep.subr.mxu1 %v9889_v13  ;;  %v2482_v34 = vsub.s32 2, %v10018_v56  ;;  %v4703_v13 = vtrunc.f32 %v2476_v49  ;;  %v4692_v40 = vcvt.f32.s32 %v4691_v37  ;;  %v10027_v49 = vld [vmem:[#allocation140_spill] sm:$0xff] }
 0x1f1   : > { %2191 = vmatpush2.msra.mxu0 %v10017_v5  ;;  %2332 = vmatpush2.msra.mxu1 %v9890_v11  ;;  %v4694_v11 = vcvt.f32.s32 %v4693_v25 }
 0x1f2   : > { %2195 = vmatprep.subr.mxu0 %v10020_v8  ;;  %2334 = vmatprep.subr.mxu1 %v9891_v15  ;;  %v2415_v15 = vmul.f32 %v2399_v36, %v7162_v1  ;;  %v7225_v44 = vrot.slane %v2403_v16, %v2482_v34  ;;  %v4700_v36 = vcvt.f32.s32 %v4699_v18  ;;  %v4704_v24 = vcvt.f32.s32 %v4703_v13  ;;  %v10035_v16 = vld [vmem:[#allocation127_spill] sm:$0xff]  ;;  %v10038_v18 = vld [vmem:[#allocation14_spill] sm:$0xff] }
 0x1f3   : > { %2199 = vmatpush2.msra.mxu0 %v10022_v14  ;;  %2336 = vmatpush2.msra.mxu1 %v9892_v27  ;;  %v2417_v27 = vmul.f32 %v2409_v9, %v7162_v1  ;;  %v7230_v26 = vrot.slane %v2404_v47, %v2482_v34  ;;  %v7232_v58 = vrot.slane %v2413_v20, %v2482_v34  ;;  %v4706_v1 = vcvt.f32.s32 %v4705_v2 }
 0x1f4   : > { %2203 = vmatprep.subr.mxu0 %v10023_v57  ;;  %2338 = vmatprep.subr.mxu1 %v9893_v42  ;;  %v10025_v42 = vand.u32 4294901760, %v6824_v63  ;;  %v7237_v17 = vrot.slane %v4694_v11, %v2482_v34  ;;  %v7239_v9 = vrot.slane %v4698_v35, %v2482_v34  ;;  %v7241_v63 = vrot.slane %v2414_v33, %v2482_v34 }
 0x1f5   : > { %2207 = vmatpush2.msra.mxu0 %v10024_v3  ;;  %2340 = vmatpush2.msra.mxu1 %v9894_v38  ;;  %v10026_v38 = vand.u32 4294901760, %v6831_v62  ;;  %v7246_v31 = vrot.slane %v4692_v40, %v2482_v34  ;;  %v7248_v23 = vrot.slane %v4696_v46, %v2482_v34  ;;  %v7250_v62 = vrot.slane %v2415_v15, %v2482_v34 }
 0x1f6   : > { %2211 = vmatprep.subr.mxu0 %v10025_v42  ;;  %2342 = vmatprep.subr.mxu1 %v9895_v60  ;;  %v10028_v60 = vand.u32 4294901760, %v10027_v49  ;;  %v7255_v25 = vrot.slane %v4702_v4, %v2482_v34  ;;  %v7257_v52 = vrot.slane %v2416_v7, %v2482_v34  ;;  %v7259_v19 = vrot.slane %v2417_v27, %v2482_v34 }
 0x1f7   : > { %2215 = vmatpush2.msra.mxu0 %v10026_v38  ;;  %2344 = vmatpush2.msra.mxu1 %v9896_v30  ;;  %v10029_v30 = vand.u32 4294901760, %v6865_v12  ;;  %v7264_v39 = vrot.slane %v4700_v36, %v2482_v34  ;;  %v7266_v37 = vrot.slane %v4704_v24, %v2482_v34  ;;  %v7268_v22 = vrot.slane %v2418_v32, %v2482_v34  ;;  %v10039_v24 = vld [vmem:[#allocation15_spill] sm:$0xff] }
 0x1f8   : > { %2219 = vmatprep.subr.mxu0 %v10028_v60  ;;  %2346 = vmatprep.subr.mxu1 %v9897_v54  ;;  %v10032_v54 = vld [vmem:[#allocation125_spill] sm:$0xff]  ;;  %v10033_v12 = vand.u32 4294901760, %v6874_v29  ;;  %v7273_v5 = vrot.slane %v4706_v1, %v2482_v34  ;;  %vm2519_vm8 = vcmp.eq.s32.totalorder %v10037_v28, %v7237_v17  ;;  %vm2663_vm9 = vcmp.eq.s32.totalorder %v10037_v28, %v7239_v9 }
 0x1f9   : > { %2223 = vmatpush2.msra.mxu0 %v10029_v30  ;;  %2348 = vmatpush2.msra.mxu1 %v10030_v0  ;;  %v2591_v29 = vsel %vm2519_vm8, %v7230_v26, 0.0  ;;  %v2735_v21 = vsel %vm2663_vm9, %v7241_v63, 0.0  ;;  %vm2518_vm10 = vcmp.eq.s32.totalorder %v10037_v28, %v7246_v31  ;;  %vm2662_vm11 = vcmp.eq.s32.totalorder %v10037_v28, %v7248_v23 }
 0x1fa   : > { %2227 = vmatprep.subr.mxu0 %v10031_v50  ;;  %2350 = vmatprep.subr.mxu1 %v10032_v54  ;;  %v2799_v34 = vadd.f32 %v2735_v21, %v2591_v29  ;;  %vm2871_vm12 = vcmp.eq.s32.totalorder %v10037_v28, %v7255_v25  ;;  %v2734_v8 = vsel %vm2662_vm11, %v7232_v58, 0.0  ;;  %vm2870_vm13 = vcmp.eq.s32.totalorder %v10037_v28, %v7264_v39 }
 0x1fb   : > { %2231 = vmatpush2.msra.mxu0 %v10033_v12  ;;  %2233 = vmatprep.mubr.f32.mxu0 %v10034_v51  ;;  %v2943_v47 = vsel %vm2871_vm12, %v7257_v52, 0.0  ;;  %vm2517_vm14 = vcmp.eq.s32.totalorder %v10038_v18, %v7237_v17  ;;  %vm3079_vm15 = vcmp.eq.s32.totalorder %v10037_v28, %v7273_v5  ;;  %v2942_v13 = vsel %vm2870_vm13, %v7250_v62, 0.0 }
 0x1fc   : > { %2352 = vmatpush2.msra.mxu1 %v10035_v16  ;;  %2235 = vmatmul.mubr.f32.vlgmr.msra.gmra.mxu0 %v10036_v61  ;;  %v2589_v43 = vsel %vm2517_vm14, %v7230_v26, 0.0  ;;  %vm3078_vm0 = vcmp.eq.s32.totalorder %v10037_v28, %v7266_v37  ;;  %vm2661_vm1 = vcmp.eq.s32.totalorder %v10038_v18, %v7239_v9  ;;  %vm2869_vm2 = vcmp.eq.s32.totalorder %v10038_v18, %v7255_v25 }
 0x1fd   : > { %2354 = vmatprep.subr.mxu1 %v6635_v53  ;;  %2370 = vmatprep.mubr.f32.mxu1 %v10034_v51  ;;  %v2590_v53 = vsel %vm2518_vm10, %v7225_v44, 0.0  ;;  %v3150_v33 = vsel %vm3078_vm0, %v7259_v19, 0.0  ;;  %v2733_v11 = vsel %vm2661_vm1, %v7241_v63, 0.0  ;;  %v2941_v2 = vsel %vm2869_vm2, %v7257_v52, 0.0 }
 0x1fe   : > { %2356 = vmatpush2.msra.mxu1 %v6668_v10  ;;  %v2798_v20 = vadd.f32 %v2734_v8, %v2590_v53  ;;  %v3007_v10 = vadd.f32 %v2943_v47, %v2799_v34  ;;  %v2797_v35 = vadd.f32 %v2733_v11, %v2589_v43  ;;  %vm3077_vm3 = vcmp.eq.s32.totalorder %v10038_v18, %v7273_v5  ;;  %v10040_v11 = vld [vmem:[#allocation16_spill] sm:$0xff] }
 0x1ff   : > { %2358 = vmatprep.subr.mxu1 %v6701_v48  ;;  %v3151_v48 = vsel %vm3079_vm15, %v7268_v22, 0.0  ;;  %v3149_v57 = vsel %vm3077_vm3, %v7268_v22, 0.0  ;;  %vm2516_vm4 = vcmp.eq.s32.totalorder %v10038_v18, %v7246_v31  ;;  %vm2660_vm5 = vcmp.eq.s32.totalorder %v10038_v18, %v7248_v23 }
 0x200   : > { %2360 = vmatpush2.msra.mxu1 %v6722_v41  ;;  %v3006_v14 = vadd.f32 %v2942_v13, %v2798_v20  ;;  %v3215_v41 = vadd.f32 %v3151_v48, %v3007_v10  ;;  %v3005_v15 = vadd.f32 %v2941_v2, %v2797_v35  ;;  %v2588_v7 = vsel %vm2516_vm4, %v7225_v44, 0.0 }
 0x201   : > { %2362 = vmatprep.subr.mxu1 %v6753_v55  ;;  %v2732_v40 = vsel %vm2660_vm5, %v7232_v58, 0.0  ;;  %vm2868_vm6 = vcmp.eq.s32.totalorder %v10038_v18, %v7264_v39  ;;  %vm3076_vm7 = vcmp.eq.s32.totalorder %v10038_v18, %v7266_v37  ;;  %vm2515_vm8 = vcmp.eq.s32.totalorder %v10039_v24, %v7237_v17 }
 0x202   : > { %2364 = vmatpush2.msra.mxu1 %v6778_v59  ;;  %v3214_v55 = vadd.f32 %v3150_v33, %v3006_v14  ;;  %v7321_v59 = vand.u32 4294901760, %v3215_v41  ;;  %v2796_v46 = vadd.f32 %v2732_v40, %v2588_v7  ;;  %v3213_v27 = vadd.f32 %v3149_v57, %v3005_v15 }
 0x203   : > { %2366 = vmatprep.subr.mxu1 %v6803_v45  ;;  %v2940_v32 = vsel %vm2868_vm6, %v7250_v62, 0.0  ;;  %v3148_v4 = vsel %vm3076_vm7, %v7259_v19, 0.0  ;;  %vm2659_vm9 = vcmp.eq.s32.totalorder %v10039_v24, %v7239_v9  ;;  %v2587_v49 = vsel %vm2515_vm8, %v7230_v26, 0.0 }
 0x204   : > { %2368 = vmatpush2.msra.mxu1 %v6837_v6  ;;  %v7329_v45 = vand.u32 4294901760, %v3214_v55  ;;  %v7334_v6 = vsub.f32 %v3215_v41, %v7321_v59  ;;  %3253 = vmatprep.subr.mxu0 %v7321_v59  ;;  %v3004_v36 = vadd.f32 %v2940_v32, %v2796_v46  ;;  %v7353_v1 = vand.u32 4294901760, %v3213_v27 }
 0x205   : > { %2372 = vmatmul.mubr.f32.vlgmr.msra.gmra.mxu1 %v10036_v61  ;;  %v2731_v60 = vsel %vm2659_vm9, %v7241_v63, 0.0  ;;  %vm2867_vm10 = vcmp.eq.s32.totalorder %v10039_v24, %v7255_v25  ;;  %vm3075_vm11 = vcmp.eq.s32.totalorder %v10039_v24, %v7273_v5  ;;  %vm2514_vm12 = vcmp.eq.s32.totalorder %v10039_v24, %v7246_v31 }
 0x206   : > { %v7342_v3 = vsub.f32 %v3214_v55, %v7329_v45  ;;  %3255 = vmatpush1.msra.mxu0 %v7329_v45  ;;  %v9430_v42 = vand.u32 4294901760, %v7334_v6  ;;  %v3212_v0 = vadd.f32 %v3148_v4, %v3004_v36  ;;  %v2795_v50 = vadd.f32 %v2731_v60, %v2587_v49 }
 0x207   : > { %v7366_v12 = vsub.f32 %v3213_v27, %v7353_v1  ;;  %v2939_v51 = vsel %vm2867_vm10, %v7257_v52, 0.0  ;;  %3257 = vmatprep.subr.mxu0 %v7353_v1  ;;  %v3147_v29 = vsel %vm3075_vm11, %v7268_v22, 0.0  ;;  %vm2658_vm13 = vcmp.eq.s32.totalorder %v10039_v24, %v7248_v23 }
 0x208   : > { %v9429_v38 = vand.u32 4294901760, %v7342_v3  ;;  %v3400_v30 = vsub.f32 %v7334_v6, %v9430_v42  ;;  %v7372_v61 = vand.u32 4294901760, %v3212_v0  ;;  %v3003_v28 = vadd.f32 %v2939_v51, %v2795_v50  ;;  %v10052_v42 = vld [vmem:[#allocation22_spill] sm:$0xff] }
 0x209   : > { %v9428_v34 = vand.u32 4294901760, %v7366_v12  ;;  %v2586_v47 = vsel %vm2514_vm12, %v7225_v44, 0.0  ;;  %v2730_v20 = vsel %vm2658_vm13, %v7232_v58, 0.0  ;;  %vm2866_vm14 = vcmp.eq.s32.totalorder %v10039_v24, %v7264_v39 }
 0x20a   : > { %v3406_v54 = vsub.f32 %v7342_v3, %v9429_v38  ;;  %v3401_v16 = vand.u32 4294901760, %v3400_v30  ;;  %v7381_v53 = vsub.f32 %v3212_v0, %v7372_v61  ;;  %v3211_v8 = vadd.f32 %v3147_v29, %v3003_v28  ;;  %3259 = vmatpush1.msra.mxu0 %v7372_v61 }
 0x20b   : > { %v3412_v18 = vsub.f32 %v7366_v12, %v9428_v34  ;;  %v2794_v10 = vadd.f32 %v2730_v20, %v2586_v47  ;;  %vm3074_vm15 = vcmp.eq.s32.totalorder %v10039_v24, %v7266_v37  ;;  %v2938_v48 = vsel %vm2866_vm14, %v7250_v62, 0.0 }
 0x20c   : > { %v3407_v21 = vand.u32 4294901760, %v3406_v54  ;;  %3402 = vmatprep.subr.mxu1 %v3401_v16  ;;  %v9427_v13 = vand.u32 4294901760, %v7381_v53  ;;  %v7394_v43 = vand.u32 4294901760, %v3211_v8  ;;  %v3146_v14 = vsel %vm3074_vm15, %v7259_v19, 0.0  ;;  %v10041_v16 = vld [vmem:[#allocation17_spill] sm:$0xff] }
 0x20d   : > { %v3413_v41 = vand.u32 4294901760, %v3412_v18  ;;  %v3002_v33 = vadd.f32 %v2938_v48, %v2794_v10  ;;  %vm2513_vm0 = vcmp.eq.s32.totalorder %v10040_v11, %v7237_v17  ;;  %vm2657_vm1 = vcmp.eq.s32.totalorder %v10040_v11, %v7239_v9 }
 0x20e   : > { %3408 = vmatpush1.msra.mxu1 %v3407_v21  ;;  %v3418_v55 = vsub.f32 %v7381_v53, %v9427_v13  ;;  %v7406_v35 = vsub.f32 %v3211_v8, %v7394_v43  ;;  %v2585_v2 = vsel %vm2513_vm0, %v7230_v26, 0.0  ;;  %v2729_v57 = vsel %vm2657_vm1, %v7241_v63, 0.0  ;;  %3261 = vmatprep.subr.mxu0 %v7394_v43 }
 0x20f   : > { %3414 = vmatprep.subr.mxu1 %v3413_v41  ;;  %v3210_v15 = vadd.f32 %v3146_v14, %v3002_v33  ;;  %v2793_v7 = vadd.f32 %v2729_v57, %v2585_v2  ;;  %vm2865_vm2 = vcmp.eq.s32.totalorder %v10040_v11, %v7255_v25  ;;  %vm3073_vm3 = vcmp.eq.s32.totalorder %v10040_v11, %v7273_v5 }
 0x210   : > { %v3419_v40 = vand.u32 4294901760, %v3418_v55  ;;  %v9425_v46 = vand.u32 4294901760, %v7406_v35  ;;  %v2937_v27 = vsel %vm2865_vm2, %v7257_v52, 0.0  ;;  %v3145_v32 = vsel %vm3073_vm3, %v7268_v22, 0.0 }
 0x211   : > { %v7418_v4 = vand.u32 4294901760, %v3210_v15  ;;  %v3001_v36 = vadd.f32 %v2937_v27, %v2793_v7  ;;  %vm2512_vm4 = vcmp.eq.s32.totalorder %v10040_v11, %v7246_v31  ;;  %vm2656_vm5 = vcmp.eq.s32.totalorder %v10040_v11, %v7248_v23 }
 0x212   : > { %3420 = vmatpush1.msra.mxu1 %v3419_v40  ;;  %v3424_v24 = vsub.f32 %v7406_v35, %v9425_v46  ;;  %v2584_v49 = vsel %vm2512_vm4, %v7225_v44, 0.0  ;;  %v2728_v60 = vsel %vm2656_vm5, %v7232_v58, 0.0  ;;  %vm2864_vm6 = vcmp.eq.s32.totalorder %v10040_v11, %v7264_v39 }
 0x213   : > { %v7432_v30 = vsub.f32 %v3210_v15, %v7418_v4  ;;  %v3209_v0 = vadd.f32 %v3145_v32, %v3001_v36  ;;  %v2792_v50 = vadd.f32 %v2728_v60, %v2584_v49  ;;  %v2936_v54 = vsel %vm2864_vm6, %v7250_v62, 0.0  ;;  %3263 = vmatpush1.msra.mxu0 %v7418_v4  ;;  %v10042_v60 = vld [vmem:[#allocation18_spill] sm:$0xff] }
 0x214   : > { %v3425_v51 = vand.u32 4294901760, %v3424_v24  ;;  %vm3072_vm7 = vcmp.eq.s32.totalorder %v10040_v11, %v7266_v37  ;;  %vm2511_vm8 = vcmp.eq.s32.totalorder %v10041_v16, %v7237_v17  ;;  %vm2655_vm9 = vcmp.eq.s32.totalorder %v10041_v16, %v7239_v9 }
 0x215   : > { %v9423_v28 = vand.u32 4294901760, %v7432_v30  ;;  %v7443_v29 = vand.u32 4294901760, %v3209_v0  ;;  %v3000_v21 = vadd.f32 %v2936_v54, %v2792_v50  ;;  %v3144_v8 = vsel %vm3072_vm7, %v7259_v19, 0.0 }
 0x216   : > { %3426 = vmatprep.subr.mxu1 %v3425_v51  ;;  %v2583_v47 = vsel %vm2511_vm8, %v7230_v26, 0.0  ;;  %v2727_v20 = vsel %vm2655_vm9, %v7241_v63, 0.0  ;;  %vm2863_vm10 = vcmp.eq.s32.totalorder %v10041_v16, %v7255_v25  ;;  %vm3071_vm11 = vcmp.eq.s32.totalorder %v10041_v16, %v7273_v5 }
 0x217   : > { %v3430_v18 = vsub.f32 %v7432_v30, %v9423_v28  ;;  %v7456_v10 = vsub.f32 %v3209_v0, %v7443_v29  ;;  %v3208_v48 = vadd.f32 %v3144_v8, %v3000_v21  ;;  %v2791_v14 = vadd.f32 %v2727_v20, %v2583_v47  ;;  %3265 = vmatprep.subr.mxu0 %v7443_v29  ;;  %v10049_v28 = vld [vmem:[#allocation21_spill] sm:$0xff] }
 0x218   : > { %v2935_v41 = vsel %vm2863_vm10, %v7257_v52, 0.0  ;;  %v3143_v33 = vsel %vm3071_vm11, %v7268_v22, 0.0  ;;  %vm2510_vm12 = vcmp.eq.s32.totalorder %v10041_v16, %v7246_v31  ;;  %vm2654_vm13 = vcmp.eq.s32.totalorder %v10041_v16, %v7248_v23 }
 0x219   : > { %v3431_v11 = vand.u32 4294901760, %v3430_v18  ;;  %v9422_v55 = vand.u32 4294901760, %v7456_v10  ;;  %v7466_v2 = vand.u32 4294901760, %v3208_v48  ;;  %v2999_v57 = vadd.f32 %v2935_v41, %v2791_v14 }
 0x21a   : > { %v2582_v15 = vsel %vm2510_vm12, %v7225_v44, 0.0  ;;  %v2726_v7 = vsel %vm2654_vm13, %v7232_v58, 0.0  ;;  %vm2862_vm14 = vcmp.eq.s32.totalorder %v10041_v16, %v7264_v39  ;;  %vm3070_vm15 = vcmp.eq.s32.totalorder %v10041_v16, %v7266_v37 }
 0x21b   : > { %3432 = vmatpush1.msra.mxu1 %v3431_v11  ;;  %v3436_v40 = vsub.f32 %v7456_v10, %v9422_v55  ;;  %v7478_v27 = vsub.f32 %v3208_v48, %v7466_v2  ;;  %v3207_v32 = vadd.f32 %v3143_v33, %v2999_v57  ;;  %v2790_v36 = vadd.f32 %v2726_v7, %v2582_v15 }
 0x21c   : > { %v2934_v24 = vsel %vm2862_vm14, %v7250_v62, 0.0  ;;  %v3142_v49 = vsel %vm3070_vm15, %v7259_v19, 0.0  ;;  %vm2509_vm0 = vcmp.eq.s32.totalorder %v10042_v60, %v7237_v17  ;;  %vm2653_vm1 = vcmp.eq.s32.totalorder %v10042_v60, %v7239_v9  ;;  %3267 = vmatpush1.msra.mxu0 %v7466_v2 }
 0x21d   : > { %v3437_v0 = vand.u32 4294901760, %v3436_v40  ;;  %v9421_v50 = vand.u32 4294901760, %v7478_v27  ;;  %v7488_v54 = vand.u32 4294901760, %v3207_v32  ;;  %v2998_v51 = vadd.f32 %v2934_v24, %v2790_v36 }
 0x21e   : > { %v2581_v16 = vsel %vm2509_vm0, %v7230_v26, 0.0  ;;  %v2725_v21 = vsel %vm2653_vm1, %v7241_v63, 0.0  ;;  %vm2861_vm2 = vcmp.eq.s32.totalorder %v10042_v60, %v7255_v25  ;;  %vm3069_vm3 = vcmp.eq.s32.totalorder %v10042_v60, %v7273_v5 }
 0x21f   : > { %3438 = vmatprep.subr.mxu1 %v3437_v0  ;;  %v3442_v8 = vsub.f32 %v7478_v27, %v9421_v50  ;;  %v7500_v47 = vsub.f32 %v3207_v32, %v7488_v54  ;;  %v3206_v20 = vadd.f32 %v3142_v49, %v2998_v51  ;;  %v2789_v18 = vadd.f32 %v2725_v21, %v2581_v16  ;;  %v10043_v51 = vld [vmem:[#allocation19_spill] sm:$0xff] }
 0x220   : > { %v2933_v48 = vsel %vm2861_vm2, %v7257_v52, 0.0  ;;  %v3141_v14 = vsel %vm3069_vm3, %v7268_v22, 0.0  ;;  %vm2508_vm4 = vcmp.eq.s32.totalorder %v10042_v60, %v7246_v31  ;;  %vm2652_vm5 = vcmp.eq.s32.totalorder %v10042_v60, %v7248_v23  ;;  %3269 = vmatprep.subr.mxu0 %v7488_v54 }
 0x221   : > { %v3443_v41 = vand.u32 4294901760, %v3442_v8  ;;  %v9419_v33 = vand.u32 4294901760, %v7500_v47  ;;  %v7510_v11 = vand.u32 4294901760, %v3206_v20  ;;  %v2997_v57 = vadd.f32 %v2933_v48, %v2789_v18 }
 0x222   : > { %v2580_v15 = vsel %vm2508_vm4, %v7225_v44, 0.0  ;;  %v2724_v7 = vsel %vm2652_vm5, %v7232_v58, 0.0  ;;  %vm2860_vm6 = vcmp.eq.s32.totalorder %v10042_v60, %v7264_v39  ;;  %vm3068_vm7 = vcmp.eq.s32.totalorder %v10042_v60, %v7266_v37 }
 0x223   : > { %3444 = vmatpush1.msra.mxu1 %v3443_v41  ;;  %v3448_v40 = vsub.f32 %v7500_v47, %v9419_v33  ;;  %v7522_v32 = vsub.f32 %v3206_v20, %v7510_v11  ;;  %v3205_v36 = vadd.f32 %v3141_v14, %v2997_v57  ;;  %v2788_v24 = vadd.f32 %v2724_v7, %v2580_v15 }
 0x224   : > { %v2932_v49 = vsel %vm2860_vm6, %v7250_v62, 0.0  ;;  %v3140_v0 = vsel %vm3068_vm7, %v7259_v19, 0.0  ;;  %vm2507_vm8 = vcmp.eq.s32.totalorder %v10043_v51, %v7237_v17  ;;  %vm2651_vm9 = vcmp.eq.s32.totalorder %v10043_v51, %v7239_v9  ;;  %3271 = vmatpush1.msra.mxu0 %v7510_v11 }
 0x225   : > { %v3449_v60 = vand.u32 4294901760, %v3448_v40  ;;  %v9417_v16 = vand.u32 4294901760, %v7522_v32  ;;  %v7532_v21 = vand.u32 4294901760, %v3205_v36  ;;  %v2996_v8 = vadd.f32 %v2932_v49, %v2788_v24 }
 0x226   : > { %v2579_v20 = vsel %vm2507_vm8, %v7230_v26, 0.0  ;;  %v2723_v18 = vsel %vm2651_vm9, %v7241_v63, 0.0  ;;  %vm2859_vm10 = vcmp.eq.s32.totalorder %v10043_v51, %v7255_v25  ;;  %vm3067_vm11 = vcmp.eq.s32.totalorder %v10043_v51, %v7273_v5 }
 0x227   : > { %10044 = vst [vmem:[#allocation27_spill] sm:$0xff] %v7532_v21  ;;  %3450 = vmatprep.subr.mxu1 %v3449_v60  ;;  %v3454_v48 = vsub.f32 %v7522_v32, %v9417_v16  ;;  %v7544_v14 = vsub.f32 %v3205_v36, %v7532_v21  ;;  %v3204_v41 = vadd.f32 %v3140_v0, %v2996_v8  ;;  %v2931_v15 = vsel %vm2859_vm10, %v7257_v52, 0.0  ;;  %v10046_v16 = vld [vmem:[#allocation20_spill] sm:$0xff] }
 0x228   : > { %v2787_v57 = vadd.f32 %v2723_v18, %v2579_v20  ;;  %v3139_v7 = vsel %vm3067_vm11, %v7268_v22, 0.0  ;;  %vm2506_vm12 = vcmp.eq.s32.totalorder %v10043_v51, %v7246_v31  ;;  %vm2650_vm13 = vcmp.eq.s32.totalorder %v10043_v51, %v7248_v23  ;;  %3273 = vmatprep.subr.mxu0 %v7532_v21 }
 0x229   : > { %v3455_v40 = vand.u32 4294901760, %v3454_v48  ;;  %v9418_v24 = vand.u32 4294901760, %v7544_v14  ;;  %v7554_v49 = vand.u32 4294901760, %v3204_v41  ;;  %v2578_v0 = vsel %vm2506_vm12, %v7225_v44, 0.0 }
 0x22a   : > { %v2995_v36 = vadd.f32 %v2931_v15, %v2787_v57  ;;  %v2722_v60 = vsel %vm2650_vm13, %v7232_v58, 0.0  ;;  %vm2858_vm14 = vcmp.eq.s32.totalorder %v10043_v51, %v7264_v39  ;;  %vm3066_vm15 = vcmp.eq.s32.totalorder %v10043_v51, %v7266_v37 }
 0x22b   : > { %10045 = vst [vmem:[#allocation44_spill] sm:$0xff] %v7554_v49  ;;  %3456 = vmatpush1.msra.mxu1 %v3455_v40  ;;  %v3460_v8 = vsub.f32 %v7544_v14, %v9418_v24  ;;  %v7566_v20 = vsub.f32 %v3204_v41, %v7554_v49  ;;  %v2786_v48 = vadd.f32 %v2722_v60, %v2578_v0  ;;  %v2930_v57 = vsel %vm2858_vm14, %v7250_v62, 0.0 }
 0x22c   : > { %v3203_v18 = vadd.f32 %v3139_v7, %v2995_v36  ;;  %v3138_v15 = vsel %vm3066_vm15, %v7259_v19, 0.0  ;;  %vm2505_vm0 = vcmp.eq.s32.totalorder %v10046_v16, %v7237_v17  ;;  %vm2649_vm1 = vcmp.eq.s32.totalorder %v10046_v16, %v7239_v9  ;;  %3275 = vmatpush1.msra.mxu0 %v7554_v49 }
 0x22d   : > { %v3461_v51 = vand.u32 4294901760, %v3460_v8  ;;  %v9420_v40 = vand.u32 4294901760, %v7566_v20  ;;  %v2994_v41 = vadd.f32 %v2930_v57, %v2786_v48  ;;  %v2577_v7 = vsel %vm2505_vm0, %v7230_v26, 0.0 }
 0x22e   : > { %v7576_v24 = vand.u32 4294901760, %v3203_v18  ;;  %v2721_v36 = vsel %vm2649_vm1, %v7241_v63, 0.0  ;;  %vm2857_vm2 = vcmp.eq.s32.totalorder %v10046_v16, %v7255_v25  ;;  %vm3065_vm3 = vcmp.eq.s32.totalorder %v10046_v16, %v7273_v5 }
 0x22f   : > { %3462 = vmatprep.subr.mxu1 %v3461_v51  ;;  %v3466_v0 = vsub.f32 %v7566_v20, %v9420_v40  ;;  %v3202_v8 = vadd.f32 %v3138_v15, %v2994_v41  ;;  %v2785_v48 = vadd.f32 %v2721_v36, %v2577_v7  ;;  %v2929_v57 = vsel %vm2857_vm2, %v7257_v52, 0.0 }
 0x230   : > { %10047 = vst [vmem:[#allocation28_spill] sm:$0xff] %v7576_v24  ;;  %v7588_v60 = vsub.f32 %v3203_v18, %v7576_v24  ;;  %v3137_v33 = vsel %vm3065_vm3, %v7268_v22, 0.0  ;;  %vm2504_vm4 = vcmp.eq.s32.totalorder %v10046_v16, %v7246_v31  ;;  %vm2648_vm5 = vcmp.eq.s32.totalorder %v10046_v16, %v7248_v23  ;;  %3277 = vmatprep.subr.mxu0 %v7576_v24 }
 0x231   : > { %v3467_v51 = vand.u32 4294901760, %v3466_v0  ;;  %v7598_v50 = vand.u32 4294901760, %v3202_v8  ;;  %v2993_v18 = vadd.f32 %v2929_v57, %v2785_v48  ;;  %v2576_v15 = vsel %vm2504_vm4, %v7225_v44, 0.0 }
 0x232   : > { %v9424_v40 = vand.u32 4294901760, %v7588_v60  ;;  %v2720_v41 = vsel %vm2648_vm5, %v7232_v58, 0.0  ;;  %vm2856_vm6 = vcmp.eq.s32.totalorder %v10046_v16, %v7264_v39  ;;  %vm3064_vm7 = vcmp.eq.s32.totalorder %v10046_v16, %v7266_v37 }
 0x233   : > { %10048 = vst [vmem:[#allocation29_spill] sm:$0xff] %v7598_v50  ;;  %3468 = vmatpush1.msra.mxu1 %v3467_v51  ;;  %v7610_v36 = vsub.f32 %v3202_v8, %v7598_v50  ;;  %v3201_v0 = vadd.f32 %v3137_v33, %v2993_v18  ;;  %v2784_v48 = vadd.f32 %v2720_v41, %v2576_v15  ;;  %v2928_v57 = vsel %vm2856_vm6, %v7250_v62, 0.0 }
 0x234   : > { %v3472_v7 = vsub.f32 %v7588_v60, %v9424_v40  ;;  %v3136_v55 = vsel %vm3064_vm7, %v7259_v19, 0.0  ;;  %vm2503_vm8 = vcmp.eq.s32.totalorder %v10049_v28, %v7237_v17  ;;  %vm2647_vm9 = vcmp.eq.s32.totalorder %v10049_v28, %v7239_v9  ;;  %3279 = vmatpush1.msra.mxu0 %v7598_v50 }
 0x235   : > { %v9426_v51 = vand.u32 4294901760, %v7610_v36  ;;  %v7620_v40 = vand.u32 4294901760, %v3201_v0  ;;  %v2992_v8 = vadd.f32 %v2928_v57, %v2784_v48  ;;  %v2575_v33 = vsel %vm2503_vm8, %v7230_v26, 0.0 }
 0x236   : > { %v3473_v16 = vand.u32 4294901760, %v3472_v7  ;;  %v2719_v18 = vsel %vm2647_vm9, %v7241_v63, 0.0  ;;  %vm2855_vm10 = vcmp.eq.s32.totalorder %v10049_v28, %v7255_v25  ;;  %vm3063_vm11 = vcmp.eq.s32.totalorder %v10049_v28, %v7273_v5 }
 0x237   : > { %10050 = vst [vmem:[#allocation46_spill] sm:$0xff] %v7620_v40  ;;  %v3478_v15 = vsub.f32 %v7610_v36, %v9426_v51  ;;  %v7632_v41 = vsub.f32 %v3201_v0, %v7620_v40  ;;  %v3200_v7 = vadd.f32 %v3136_v55, %v2992_v8  ;;  %v2783_v48 = vadd.f32 %v2719_v18, %v2575_v33 }
 0x238   : > { %3474 = vmatprep.subr.mxu1 %v3473_v16  ;;  %v2927_v57 = vsel %vm2855_vm10, %v7257_v52, 0.0  ;;  %v3135_v46 = vsel %vm3063_vm11, %v7268_v22, 0.0  ;;  %vm2502_vm12 = vcmp.eq.s32.totalorder %v10049_v28, %v7246_v31  ;;  %vm2646_vm13 = vcmp.eq.s32.totalorder %v10049_v28, %v7248_v23  ;;  %3281 = vmatprep.subr.mxu0 %v7620_v40 }
 0x239   : > { %v3479_v16 = vand.u32 4294901760, %v3478_v15  ;;  %v9431_v51 = vand.u32 4294901760, %v7632_v41  ;;  %v7642_v13 = vand.u32 4294901760, %v3200_v7  ;;  %v2991_v0 = vadd.f32 %v2927_v57, %v2783_v48 }
 0x23a   : > { %v2574_v55 = vsel %vm2502_vm12, %v7225_v44, 0.0  ;;  %v2718_v8 = vsel %vm2646_vm13, %v7232_v58, 0.0  ;;  %vm2854_vm14 = vcmp.eq.s32.totalorder %v10049_v28, %v7264_v39  ;;  %vm3062_vm15 = vcmp.eq.s32.totalorder %v10049_v28, %v7266_v37  ;;  %v1234_v57 = vpop.f32.mrf.mxu0 }
 0x23b   : > { %10051 = vst [vmem:[#allocation30_spill] sm:$0xff] %v7642_v13  ;;  %3480 = vmatpush1.msra.mxu1 %v3479_v16  ;;  %v3484_v33 = vsub.f32 %v7632_v41, %v9431_v51  ;;  %v7654_v18 = vsub.f32 %v3200_v7, %v7642_v13  ;;  %v3199_v15 = vadd.f32 %v3135_v46, %v2991_v0  ;;  %v2926_v34 = vsel %vm2854_vm14, %v7250_v62, 0.0 }
 0x23c   : > { %v2782_v48 = vadd.f32 %v2718_v8, %v2574_v55  ;;  %v3134_v38 = vsel %vm3062_vm15, %v7259_v19, 0.0  ;;  %vm2501_vm0 = vcmp.eq.s32.totalorder %v10052_v42, %v7237_v17  ;;  %vm2645_vm1 = vcmp.eq.s32.totalorder %v10052_v42, %v7239_v9  ;;  %3283 = vmatpush1.msra.mxu0 %v7642_v13  ;;  %v1236_v13 = vpop.f32.mrf.mxu0 }
 0x23d   : > { %v3485_v28 = vand.u32 4294901760, %v3484_v33  ;;  %v9443_v16 = vand.u32 4294901760, %v7654_v18  ;;  %v7664_v7 = vand.u32 4294901760, %v3199_v15  ;;  %v2573_v55 = vsel %vm2501_vm0, %v7230_v26, 0.0 }
 0x23e   : > { %v2990_v46 = vadd.f32 %v2926_v34, %v2782_v48  ;;  %v2717_v8 = vsel %vm2645_vm1, %v7241_v63, 0.0  ;;  %vm2853_vm2 = vcmp.eq.s32.totalorder %v10052_v42, %v7255_v25  ;;  %vm3061_vm3 = vcmp.eq.s32.totalorder %v10052_v42, %v7273_v5 }
 0x23f   : > { %10053 = vst [vmem:[#allocation49_spill] sm:$0xff] %v7664_v7  ;;  %3486 = vmatprep.subr.mxu1 %v3485_v28  ;;  %v3490_v33 = vsub.f32 %v7654_v18, %v9443_v16  ;;  %v7678_v34 = vsub.f32 %v3199_v15, %v7664_v7  ;;  %v2781_v50 = vadd.f32 %v2717_v8, %v2573_v55  ;;  %v2925_v24 = vsel %vm2853_vm2, %v7257_v52, 0.0 }
 0x240   : > { %v3198_v48 = vadd.f32 %v3134_v38, %v2990_v46  ;;  %v3133_v49 = vsel %vm3061_vm3, %v7268_v22, 0.0  ;;  %vm2500_vm4 = vcmp.eq.s32.totalorder %v10052_v42, %v7246_v31  ;;  %3285 = vmatprep.subr.mxu0 %v7664_v7  ;;  %vm2644_vm5 = vcmp.eq.s32.totalorder %v10052_v42, %v7248_v23 }
 0x241   : > { %10054 = vst [vmem:[#allocation31_spill] sm:$0xff] %v7678_v34  ;;  %v3491_v28 = vand.u32 4294901760, %v3490_v33  ;;  %v2989_v38 = vadd.f32 %v2925_v24, %v2781_v50  ;;  %v2572_v46 = vsel %vm2500_vm4, %v7225_v44, 0.0  ;;  %vm2852_vm6 = vcmp.eq.s32.totalorder %v10052_v42, %v7264_v39  ;;  %v10057_v33 = vld [vmem:[#allocation23_spill] sm:$0xff] }
 0x242   : > { %v1627_v0 = vpop.f32.mrf.mxu1  ;;  %v7688_v15 = vand.u32 4294901760, %v3198_v48  ;;  %v2716_v55 = vsel %vm2644_vm5, %v7232_v58, 0.0  ;;  %v2924_v50 = vsel %vm2852_vm6, %v7250_v62, 0.0  ;;  %vm3060_vm7 = vcmp.eq.s32.totalorder %v10052_v42, %v7266_v37 }
 0x243   : > { %v7672_v51 = vadd.f32 %v1627_v0, %v1234_v57  ;;  %v9442_v0 = vand.u32 4294901760, %v7678_v34  ;;  %3492 = vmatpush1.msra.mxu1 %v3491_v28  ;;  %v3197_v24 = vadd.f32 %v3133_v49, %v2989_v38  ;;  %v2780_v8 = vadd.f32 %v2716_v55, %v2572_v46 }
 0x244   : > { %v1629_v40 = vpop.f32.mrf.mxu1  ;;  %10055 = vst [vmem:[#allocation50_spill] sm:$0xff] %v7688_v15  ;;  %3287 = vmatpush1.msra.mxu0 %v7688_v15  ;;  %vm2499_vm8 = vcmp.eq.s32.totalorder %v10057_v33, %v7237_v17  ;;  %vm2643_vm9 = vcmp.eq.s32.totalorder %v10057_v33, %v7239_v9  ;;  %vm2851_vm10 = vcmp.eq.s32.totalorder %v10057_v33, %v7255_v25 }
 0x245   : > { %v7685_v57 = vadd.f32 %v1629_v40, %v1236_v13  ;;  %v3496_v13 = vsub.f32 %v7678_v34, %v9442_v0  ;;  %v7699_v40 = vsub.f32 %v3198_v48, %v7688_v15  ;;  %v3132_v48 = vsel %vm3060_vm7, %v7259_v19, 0.0 }
 0x246   : > { %v2571_v16 = vsel %vm2499_vm8, %v7230_v26, 0.0  ;;  %v7711_v7 = vand.u32 4294901760, %v3197_v24  ;;  %v2988_v34 = vadd.f32 %v2924_v50, %v2780_v8  ;;  %v2715_v49 = vsel %vm2643_vm9, %v7241_v63, 0.0 }
 0x247   : > { %10056 = vst [vmem:[#allocation32_spill] sm:$0xff] %v7699_v40  ;;  %v3497_v28 = vand.u32 4294901760, %v3496_v13  ;;  %v9448_v0 = vand.u32 4294901760, %v7699_v40  ;;  %v2923_v38 = vsel %vm2851_vm10, %v7257_v52, 0.0  ;;  %vm3059_vm11 = vcmp.eq.s32.totalorder %v10057_v33, %v7273_v5 }
 0x248   : > { %10058 = vst [vmem:[#allocation71_spill] sm:$0xff] %v7711_v7  ;;  %v7725_v46 = vsub.f32 %v3197_v24, %v7711_v7  ;;  %v3196_v13 = vadd.f32 %v3132_v48, %v2988_v34  ;;  %v2779_v55 = vadd.f32 %v2715_v49, %v2571_v16  ;;  %v3131_v50 = vsel %vm3059_vm11, %v7268_v22, 0.0  ;;  %3289 = vmatprep.subr.mxu0 %v7711_v7  ;;  %v10061_v49 = vld [vmem:[#allocation24_spill] sm:$0xff] }
 0x249   : > { %3498 = vmatprep.subr.mxu1 %v3497_v28  ;;  %v3502_v42 = vsub.f32 %v7699_v40, %v9448_v0  ;;  %vm2498_vm12 = vcmp.eq.s32.totalorder %v10057_v33, %v7246_v31  ;;  %vm2642_vm13 = vcmp.eq.s32.totalorder %v10057_v33, %v7248_v23  ;;  %vm2850_vm14 = vcmp.eq.s32.totalorder %v10057_v33, %v7264_v39 }
 0x24a   : > { %10059 = vst [vmem:[#allocation87_spill] sm:$0xff] %v7725_v46  ;;  %v9453_v28 = vand.u32 4294901760, %v7725_v46  ;;  %v7736_v24 = vand.u32 4294901760, %v3196_v13  ;;  %v2987_v34 = vadd.f32 %v2923_v38, %v2779_v55  ;;  %v2570_v16 = vsel %vm2498_vm12, %v7225_v44, 0.0 }
 0x24b   : > { %v3503_v8 = vand.u32 4294901760, %v3502_v42  ;;  %v2714_v48 = vsel %vm2642_vm13, %v7232_v58, 0.0  ;;  %v2922_v42 = vsel %vm2850_vm14, %v7250_v62, 0.0  ;;  %vm3058_vm15 = vcmp.eq.s32.totalorder %v10057_v33, %v7266_v37 }
 0x24c   : > { %10060 = vst [vmem:[#allocation89_spill] sm:$0xff] %v7736_v24  ;;  %vm2497_vm0 = vcmp.eq.s32.totalorder %v10061_v49, %v7237_v17  ;;  %v3508_v0 = vsub.f32 %v7725_v46, %v9453_v28  ;;  %v7749_v7 = vsub.f32 %v3196_v13, %v7736_v24  ;;  %v3195_v38 = vadd.f32 %v3131_v50, %v2987_v34 }
 0x24d   : > { %3504 = vmatpush1.msra.mxu1 %v3503_v8  ;;  %v2778_v55 = vadd.f32 %v2714_v48, %v2570_v16  ;;  %3291 = vmatpush1.msra.mxu0 %v7736_v24  ;;  %v3130_v8 = vsel %vm3058_vm15, %v7259_v19, 0.0  ;;  %v2569_v15 = vsel %vm2497_vm0, %v7230_v26, 0.0  ;;  %vm2641_vm1 = vcmp.eq.s32.totalorder %v10061_v49, %v7239_v9 }
 0x24e   : > { %10062 = vst [vmem:[#allocation94_spill] sm:$0xff] %v7749_v7  ;;  %vm2849_vm2 = vcmp.eq.s32.totalorder %v10061_v49, %v7255_v25  ;;  %v3509_v33 = vand.u32 4294901760, %v3508_v0  ;;  %v9458_v28 = vand.u32 4294901760, %v7749_v7  ;;  %v7759_v46 = vand.u32 4294901760, %v3195_v38 }
 0x24f   : > { %v2986_v13 = vadd.f32 %v2922_v42, %v2778_v55  ;;  %v2713_v50 = vsel %vm2641_vm1, %v7241_v63, 0.0  ;;  %v2921_v34 = vsel %vm2849_vm2, %v7257_v52, 0.0  ;;  %vm3057_vm3 = vcmp.eq.s32.totalorder %v10061_v49, %v7273_v5 }
 0x250   : > { %10063 = vst [vmem:[#allocation95_spill] sm:$0xff] %v7759_v46  ;;  %vm2496_vm4 = vcmp.eq.s32.totalorder %v10061_v49, %v7246_v31  ;;  %3510 = vmatprep.subr.mxu1 %v3509_v33  ;;  %v3514_v0 = vsub.f32 %v7749_v7, %v9458_v28  ;;  %v7771_v16 = vsub.f32 %v3195_v38, %v7759_v46  ;;  %v3129_v55 = vsel %vm3057_vm3, %v7268_v22, 0.0 }
 0x251   : > { %v3194_v48 = vadd.f32 %v3130_v8, %v2986_v13  ;;  %v2777_v42 = vadd.f32 %v2713_v50, %v2569_v15  ;;  %v2568_v24 = vsel %vm2496_vm4, %v7225_v44, 0.0  ;;  %vm2640_vm5 = vcmp.eq.s32.totalorder %v10061_v49, %v7248_v23  ;;  %3293 = vmatprep.subr.mxu0 %v7759_v46  ;;  %v10066_v13 = vld [vmem:[#allocation25_spill] sm:$0xff] }
 0x252   : > { %10064 = vst [vmem:[#allocation97_spill] sm:$0xff] %v7771_v16  ;;  %vm2848_vm6 = vcmp.eq.s32.totalorder %v10061_v49, %v7264_v39  ;;  %v3515_v33 = vand.u32 4294901760, %v3514_v0  ;;  %v9465_v28 = vand.u32 4294901760, %v7771_v16  ;;  %v2712_v15 = vsel %vm2640_vm5, %v7232_v58, 0.0 }
 0x253   : > { %v7781_v7 = vand.u32 4294901760, %v3194_v48  ;;  %v2985_v38 = vadd.f32 %v2921_v34, %v2777_v42  ;;  %v2920_v8 = vsel %vm2848_vm6, %v7250_v62, 0.0  ;;  %vm3056_vm7 = vcmp.eq.s32.totalorder %v10061_v49, %v7266_v37 }
 0x254   : > { %vm2495_vm8 = vcmp.eq.s32.totalorder %v10066_v13, %v7237_v17  ;;  %3516 = vmatpush1.msra.mxu1 %v3515_v33  ;;  %v3520_v50 = vsub.f32 %v7771_v16, %v9465_v28  ;;  %v2776_v34 = vadd.f32 %v2712_v15, %v2568_v24  ;;  %v3128_v42 = vsel %vm3056_vm7, %v7259_v19, 0.0 }
 0x255   : > { %10065 = vst [vmem:[#allocation101_spill] sm:$0xff] %v7781_v7  ;;  %v7793_v0 = vsub.f32 %v3194_v48, %v7781_v7  ;;  %v3193_v46 = vadd.f32 %v3129_v55, %v2985_v38  ;;  %v2567_v40 = vsel %vm2495_vm8, %v7230_v26, 0.0  ;;  %vm2639_vm9 = vcmp.eq.s32.totalorder %v10066_v13, %v7239_v9  ;;  %3295 = vmatpush1.msra.mxu0 %v7781_v7 }
 0x256   : > { %vm2847_vm10 = vcmp.eq.s32.totalorder %v10066_v13, %v7255_v25  ;;  %v3521_v49 = vand.u32 4294901760, %v3520_v50  ;;  %v2984_v48 = vadd.f32 %v2920_v8, %v2776_v34  ;;  %v2711_v24 = vsel %vm2639_vm9, %v7241_v63, 0.0 }
 0x257   : > { %10067 = vst [vmem:[#allocation104_spill] sm:$0xff] %v7793_v0  ;;  %v9468_v33 = vand.u32 4294901760, %v7793_v0  ;;  %v7803_v28 = vand.u32 4294901760, %v3193_v46  ;;  %v2919_v55 = vsel %vm2847_vm10, %v7257_v52, 0.0  ;;  %vm3055_vm11 = vcmp.eq.s32.totalorder %v10066_v13, %v7273_v5 }
 0x258   : > { %vm2494_vm12 = vcmp.eq.s32.totalorder %v10066_v13, %v7246_v31  ;;  %3522 = vmatprep.subr.mxu1 %v3521_v49  ;;  %v3192_v50 = vadd.f32 %v3128_v42, %v2984_v48  ;;  %v2775_v8 = vadd.f32 %v2711_v24, %v2567_v40  ;;  %v3127_v34 = vsel %vm3055_vm11, %v7268_v22, 0.0  ;;  %v10071_v48 = vld [vmem:[#allocation26_spill] sm:$0xff] }
 0x259   : > { %10068 = vst [vmem:[#allocation105_spill] sm:$0xff] %v7803_v28  ;;  %v3526_v38 = vsub.f32 %v7793_v0, %v9468_v33  ;;  %v7815_v15 = vsub.f32 %v3193_v46, %v7803_v28  ;;  %v2566_v7 = vsel %vm2494_vm12, %v7225_v44, 0.0  ;;  %vm2638_vm13 = vcmp.eq.s32.totalorder %v10066_v13, %v7248_v23  ;;  %3297 = vmatprep.subr.mxu0 %v7803_v28 }
 0x25a   : > { %vm2846_vm14 = vcmp.eq.s32.totalorder %v10066_v13, %v7264_v39  ;;  %v7825_v0 = vand.u32 4294901760, %v3192_v50  ;;  %v2983_v46 = vadd.f32 %v2919_v55, %v2775_v8  ;;  %v2710_v40 = vsel %vm2638_vm13, %v7232_v58, 0.0 }
 0x25b   : > { %10069 = vst [vmem:[#allocation107_spill] sm:$0xff] %v7815_v15  ;;  %v3527_v49 = vand.u32 4294901760, %v3526_v38  ;;  %v9475_v33 = vand.u32 4294901760, %v7815_v15  ;;  %v2918_v42 = vsel %vm2846_vm14, %v7250_v62, 0.0  ;;  %vm3054_vm15 = vcmp.eq.s32.totalorder %v10066_v13, %v7266_v37 }
 0x25c   : > { %10070 = vst [vmem:[#allocation109_spill] sm:$0xff] %v7825_v0  ;;  %vm2493_vm0 = vcmp.eq.s32.totalorder %v10071_v48, %v7237_v17  ;;  %v7837_v38 = vsub.f32 %v3192_v50, %v7825_v0  ;;  %v3191_v28 = vadd.f32 %v3127_v34, %v2983_v46  ;;  %v2774_v55 = vadd.f32 %v2710_v40, %v2566_v7 }
 0x25d   : > { %3528 = vmatpush1.msra.mxu1 %v3527_v49  ;;  %v3532_v24 = vsub.f32 %v7815_v15, %v9475_v33  ;;  %v3126_v8 = vsel %vm3054_vm15, %v7259_v19, 0.0  ;;  %v2565_v16 = vsel %vm2493_vm0, %v7230_v26, 0.0  ;;  %vm2637_vm1 = vcmp.eq.s32.totalorder %v10071_v48, %v7239_v9  ;;  %3299 = vmatpush1.msra.mxu0 %v7825_v0 }
 0x25e   : > { %10072 = vst [vmem:[#allocation114_spill] sm:$0xff] %v7837_v38  ;;  %vm2845_vm2 = vcmp.eq.s32.totalorder %v10071_v48, %v7255_v25  ;;  %v9478_v49 = vand.u32 4294901760, %v7837_v38  ;;  %v7847_v33 = vand.u32 4294901760, %v3191_v28  ;;  %v2982_v50 = vadd.f32 %v2918_v42, %v2774_v55 }
 0x25f   : > { %v3533_v13 = vand.u32 4294901760, %v3532_v24  ;;  %v2709_v7 = vsel %vm2637_vm1, %v7241_v63, 0.0  ;;  %v2917_v34 = vsel %vm2845_vm2, %v7257_v52, 0.0  ;;  %vm3053_vm3 = vcmp.eq.s32.totalorder %v10071_v48, %v7273_v5 }
 0x260   : > { %10073 = vst [vmem:[#allocation115_spill] sm:$0xff] %v7847_v33  ;;  %vm2492_vm4 = vcmp.eq.s32.totalorder %v10071_v48, %v7246_v31  ;;  %v3538_v46 = vsub.f32 %v7837_v38, %v9478_v49  ;;  %v7859_v40 = vsub.f32 %v3191_v28, %v7847_v33  ;;  %v3190_v24 = vadd.f32 %v3126_v8, %v2982_v50  ;;  %v10076_v50 = vld [vmem:[#allocation56_spill] sm:$0xff] }
 0x261   : > { %3534 = vmatprep.subr.mxu1 %v3533_v13  ;;  %v2773_v42 = vadd.f32 %v2709_v7, %v2565_v16  ;;  %v3125_v55 = vsel %vm3053_vm3, %v7268_v22, 0.0  ;;  %v2564_v0 = vsel %vm2492_vm4, %v7225_v44, 0.0  ;;  %vm2636_vm5 = vcmp.eq.s32.totalorder %v10071_v48, %v7248_v23  ;;  %3301 = vmatprep.subr.mxu0 %v7847_v33 }
 0x262   : > { %10074 = vst [vmem:[#allocation117_spill] sm:$0xff] %v7859_v40  ;;  %vm2844_vm6 = vcmp.eq.s32.totalorder %v10071_v48, %v7264_v39  ;;  %v3539_v13 = vand.u32 4294901760, %v3538_v46  ;;  %v9485_v49 = vand.u32 4294901760, %v7859_v40  ;;  %v7869_v38 = vand.u32 4294901760, %v3190_v24 }
 0x263   : > { %v2981_v28 = vadd.f32 %v2917_v34, %v2773_v42  ;;  %v2708_v16 = vsel %vm2636_vm5, %v7232_v58, 0.0  ;;  %v2916_v8 = vsel %vm2844_vm6, %v7250_v62, 0.0  ;;  %vm3052_vm7 = vcmp.eq.s32.totalorder %v10071_v48, %v7266_v37 }
 0x264   : > { %10075 = vst [vmem:[#allocation121_spill] sm:$0xff] %v7869_v38  ;;  %vm2491_vm8 = vcmp.eq.s32.totalorder %v10076_v50, %v7237_v17  ;;  %3540 = vmatpush1.msra.mxu1 %v3539_v13  ;;  %v3544_v7 = vsub.f32 %v7859_v40, %v9485_v49  ;;  %v7881_v46 = vsub.f32 %v3190_v24, %v7869_v38  ;;  %v3124_v42 = vsel %vm3052_vm7, %v7259_v19, 0.0 }
 0x265   : > { %v3189_v33 = vadd.f32 %v3125_v55, %v2981_v28  ;;  %v2772_v34 = vadd.f32 %v2708_v16, %v2564_v0  ;;  %v2563_v15 = vsel %vm2491_vm8, %v7230_v26, 0.0  ;;  %vm2635_vm9 = vcmp.eq.s32.totalorder %v10076_v50, %v7239_v9  ;;  %3303 = vmatpush1.msra.mxu0 %v7869_v38 }
 0x266   : > { %10077 = vst [vmem:[#allocation52_spill] sm:$0xff] %v7881_v46  ;;  %vm2843_vm10 = vcmp.eq.s32.totalorder %v10076_v50, %v7255_v25  ;;  %v3545_v48 = vand.u32 4294901760, %v3544_v7  ;;  %v9488_v13 = vand.u32 4294901760, %v7881_v46  ;;  %v2707_v0 = vsel %vm2635_vm9, %v7241_v63, 0.0 }
 0x267   : > { %v7891_v49 = vand.u32 4294901760, %v3189_v33  ;;  %v2980_v24 = vadd.f32 %v2916_v8, %v2772_v34  ;;  %v2915_v55 = vsel %vm2843_vm10, %v7257_v52, 0.0  ;;  %vm3051_vm11 = vcmp.eq.s32.totalorder %v10076_v50, %v7273_v5 }
 0x268   : > { %vm2490_vm12 = vcmp.eq.s32.totalorder %v10076_v50, %v7246_v31  ;;  %3546 = vmatprep.subr.mxu1 %v3545_v48  ;;  %v3550_v28 = vsub.f32 %v7881_v46, %v9488_v13  ;;  %v2771_v8 = vadd.f32 %v2707_v0, %v2563_v15  ;;  %v3123_v34 = vsel %vm3051_vm11, %v7268_v22, 0.0 }
 0x269   : > { %10078 = vst [vmem:[#allocation33_spill] sm:$0xff] %v7891_v49  ;;  %v7903_v16 = vsub.f32 %v3189_v33, %v7891_v49  ;;  %v3188_v7 = vadd.f32 %v3124_v42, %v2980_v24  ;;  %v2562_v38 = vsel %vm2490_vm12, %v7225_v44, 0.0  ;;  %vm2634_vm13 = vcmp.eq.s32.totalorder %v10076_v50, %v7248_v23  ;;  %3305 = vmatprep.subr.mxu0 %v7891_v49 }
 0x26a   : > { %vm2842_vm14 = vcmp.eq.s32.totalorder %v10076_v50, %v7264_v39  ;;  %v3551_v48 = vand.u32 4294901760, %v3550_v28  ;;  %v2979_v33 = vadd.f32 %v2915_v55, %v2771_v8  ;;  %v2706_v15 = vsel %vm2634_vm13, %v7232_v58, 0.0 }
 0x26b   : > { %10079 = vst [vmem:[#allocation55_spill] sm:$0xff] %v7903_v16  ;;  %v9493_v13 = vand.u32 4294901760, %v7903_v16  ;;  %v7913_v46 = vand.u32 4294901760, %v3188_v7  ;;  %v2914_v42 = vsel %vm2842_vm14, %v7250_v62, 0.0  ;;  %vm3050_vm15 = vcmp.eq.s32.totalorder %v10076_v50, %v7266_v37 }
 0x26c   : > { %vm2489_vm0 = vcmp.eq.s32.totalorder %v10018_v56, %v7237_v17  ;;  %3552 = vmatpush1.msra.mxu1 %v3551_v48  ;;  %v3187_v28 = vadd.f32 %v3123_v34, %v2979_v33  ;;  %v2770_v55 = vadd.f32 %v2706_v15, %v2562_v38  ;;  %v3122_v8 = vsel %vm3050_vm15, %v7259_v19, 0.0 }
 0x26d   : > { %10080 = vst [vmem:[#allocation34_spill] sm:$0xff] %v7913_v46  ;;  %v3556_v24 = vsub.f32 %v7903_v16, %v9493_v13  ;;  %v7925_v0 = vsub.f32 %v3188_v7, %v7913_v46  ;;  %v2561_v49 = vsel %vm2489_vm0, %v7230_v26, 0.0  ;;  %vm2633_vm1 = vcmp.eq.s32.totalorder %v10018_v56, %v7239_v9  ;;  %3307 = vmatpush1.msra.mxu0 %v7913_v46 }
 0x26e   : > { %vm2841_vm2 = vcmp.eq.s32.totalorder %v10018_v56, %v7255_v25  ;;  %v7935_v13 = vand.u32 4294901760, %v3187_v28  ;;  %v2978_v7 = vadd.f32 %v2914_v42, %v2770_v55  ;;  %v2705_v38 = vsel %vm2633_vm1, %v7241_v63, 0.0 }
 0x26f   : > { %10081 = vst [vmem:[#allocation57_spill] sm:$0xff] %v7925_v0  ;;  %v3557_v50 = vand.u32 4294901760, %v3556_v24  ;;  %v9496_v48 = vand.u32 4294901760, %v7925_v0  ;;  %v2913_v34 = vsel %vm2841_vm2, %v7257_v52, 0.0  ;;  %vm3049_vm3 = vcmp.eq.s32.totalorder %v10018_v56, %v7273_v5 }
 0x270   : > { %10082 = vst [vmem:[#allocation35_spill] sm:$0xff] %v7935_v13  ;;  %vm2488_vm4 = vcmp.eq.s32.totalorder %v10018_v56, %v7246_v31  ;;  %v7947_v15 = vsub.f32 %v3187_v28, %v7935_v13  ;;  %v3186_v24 = vadd.f32 %v3122_v8, %v2978_v7  ;;  %v2769_v42 = vadd.f32 %v2705_v38, %v2561_v49  ;;  %v10085_v7 = vld [vmem:[#allocation64_spill] sm:$0xff] }
 0x271   : > { %3558 = vmatprep.subr.mxu1 %v3557_v50  ;;  %v3562_v33 = vsub.f32 %v7925_v0, %v9496_v48  ;;  %v3121_v55 = vsel %vm3049_vm3, %v7268_v22, 0.0  ;;  %v2560_v46 = vsel %vm2488_vm4, %v7225_v44, 0.0  ;;  %vm2632_vm5 = vcmp.eq.s32.totalorder %v10018_v56, %v7248_v23  ;;  %3309 = vmatprep.subr.mxu0 %v7935_v13 }
 0x272   : > { %10083 = vst [vmem:[#allocation58_spill] sm:$0xff] %v7947_v15  ;;  %vm2840_vm6 = vcmp.eq.s32.totalorder %v10018_v56, %v7264_v39  ;;  %v9503_v48 = vand.u32 4294901760, %v7947_v15  ;;  %v7957_v0 = vand.u32 4294901760, %v3186_v24  ;;  %v2977_v28 = vadd.f32 %v2913_v34, %v2769_v42 }
 0x273   : > { %v3563_v50 = vand.u32 4294901760, %v3562_v33  ;;  %v2704_v49 = vsel %vm2632_vm5, %v7232_v58, 0.0  ;;  %v2912_v8 = vsel %vm2840_vm6, %v7250_v62, 0.0  ;;  %vm3048_vm7 = vcmp.eq.s32.totalorder %v10018_v56, %v7266_v37 }
 0x274   : > { %10084 = vst [vmem:[#allocation36_spill] sm:$0xff] %v7957_v0  ;;  %vm2551_vm8 = vcmp.eq.s32.totalorder %v10085_v7, %v7237_v17  ;;  %v3568_v38 = vsub.f32 %v7947_v15, %v9503_v48  ;;  %v7969_v33 = vsub.f32 %v3186_v24, %v7957_v0  ;;  %v3185_v13 = vadd.f32 %v3121_v55, %v2977_v28 }
 0x275   : > { %3564 = vmatpush1.msra.mxu1 %v3563_v50  ;;  %v2768_v34 = vadd.f32 %v2704_v49, %v2560_v46  ;;  %v3120_v42 = vsel %vm3048_vm7, %v7259_v19, 0.0  ;;  %v2623_v16 = vsel %vm2551_vm8, %v7230_v26, 0.0  ;;  %vm2695_vm9 = vcmp.eq.s32.totalorder %v10085_v7, %v7239_v9  ;;  %3311 = vmatpush1.msra.mxu0 %v7957_v0 }
 0x276   : > { %10086 = vst [vmem:[#allocation61_spill] sm:$0xff] %v7969_v33  ;;  %vm2903_vm10 = vcmp.eq.s32.totalorder %v10085_v7, %v7255_v25  ;;  %v3569_v50 = vand.u32 4294901760, %v3568_v38  ;;  %v9510_v48 = vand.u32 4294901760, %v7969_v33  ;;  %v7979_v24 = vand.u32 4294901760, %v3185_v13 }
 0x277   : > { %v2976_v55 = vadd.f32 %v2912_v8, %v2768_v34  ;;  %v2767_v28 = vsel %vm2695_vm9, %v7241_v63, 0.0  ;;  %v2975_v49 = vsel %vm2903_vm10, %v7257_v52, 0.0  ;;  %vm3111_vm11 = vcmp.eq.s32.totalorder %v10085_v7, %v7273_v5 }
 0x278   : > { %10087 = vst [vmem:[#allocation37_spill] sm:$0xff] %v7979_v24  ;;  %3570 = vmatprep.subr.mxu1 %v3569_v50  ;;  %v3574_v38 = vsub.f32 %v7969_v33, %v9510_v48  ;;  %v7990_v0 = vsub.f32 %v3185_v13, %v7979_v24  ;;  %v2831_v8 = vadd.f32 %v2767_v28, %v2623_v16  ;;  %v3183_v34 = vsel %vm3111_vm11, %v7268_v22, 0.0 }
 0x279   : > { %v3184_v40 = vadd.f32 %v3120_v42, %v2976_v55  ;;  %vm2550_vm12 = vcmp.eq.s32.totalorder %v10085_v7, %v7246_v31  ;;  %vm2694_vm13 = vcmp.eq.s32.totalorder %v10085_v7, %v7248_v23  ;;  %3313 = vmatprep.subr.mxu0 %v7979_v24  ;;  %vm2902_vm14 = vcmp.eq.s32.totalorder %v10085_v7, %v7264_v39 }
 0x27a   : > { %v1830_v56 = vpop.f32.mrf.mxu0  ;;  %10088 = vst [vmem:[#allocation63_spill] sm:$0xff] %v7990_v0  ;;  %v9511_v50 = vand.u32 4294901760, %v7990_v0  ;;  %v3039_v13 = vadd.f32 %v2975_v49, %v2831_v8  ;;  %v2622_v16 = vsel %vm2550_vm12, %v7225_v44, 0.0  ;;  %vm3110_vm15 = vcmp.eq.s32.totalorder %v10085_v7, %v7266_v37  ;;  %v10091_v8 = vld [vmem:[#allocation69_spill] sm:$0xff] }
 0x27b   : > { %v1831_v46 = vadd.f32 %v1830_v56, %v7672_v51  ;;  %v3575_v56 = vand.u32 4294901760, %v3574_v38  ;;  %v8000_v48 = vand.u32 4294901760, %v3184_v40  ;;  %v2974_v49 = vsel %vm2902_vm14, %v7250_v62, 0.0 }
 0x27c   : > { %v1832_v15 = vpop.f32.mrf.mxu0  ;;  %v3247_v55 = vadd.f32 %v3183_v34, %v3039_v13  ;;  %v3182_v38 = vsel %vm3110_vm15, %v7259_v19, 0.0  ;;  %vm2549_vm0 = vcmp.eq.s32.totalorder %v10091_v8, %v7237_v17  ;;  %vm2693_vm1 = vcmp.eq.s32.totalorder %v10091_v8, %v7239_v9 }
 0x27d   : > { %v1833_v51 = vadd.f32 %v1832_v15, %v7685_v57  ;;  %10089 = vst [vmem:[#allocation38_spill] sm:$0xff] %v8000_v48  ;;  %v2766_v57 = vsel %vm2694_vm13, %v7232_v58, 0.0  ;;  %3576 = vmatpush1.msra.mxu1 %v3575_v56  ;;  %v3580_v15 = vsub.f32 %v7990_v0, %v9511_v50  ;;  %v8012_v42 = vsub.f32 %v3184_v40, %v8000_v48 }
 0x27e   : > { %v2830_v28 = vadd.f32 %v2766_v57, %v2622_v16  ;;  %3315 = vmatpush1.msra.mxu0 %v8000_v48  ;;  %v8022_v50 = vand.u32 4294901760, %v3247_v55  ;;  %v2621_v13 = vsel %vm2549_vm0, %v7230_v26, 0.0  ;;  %v2765_v16 = vsel %vm2693_vm1, %v7241_v63, 0.0 }
 0x27f   : > { %10090 = vst [vmem:[#allocation66_spill] sm:$0xff] %v8012_v42  ;;  %v3581_v7 = vand.u32 4294901760, %v3580_v15  ;;  %v9520_v56 = vand.u32 4294901760, %v8012_v42  ;;  %vm2901_vm2 = vcmp.eq.s32.totalorder %v10091_v8, %v7255_v25  ;;  %vm3109_vm3 = vcmp.eq.s32.totalorder %v10091_v8, %v7273_v5 }
 0x280   : > { %10092 = vst [vmem:[#allocation39_spill] sm:$0xff] %v8022_v50  ;;  %v3038_v40 = vadd.f32 %v2974_v49, %v2830_v28  ;;  %v8036_v28 = vsub.f32 %v3247_v55, %v8022_v50  ;;  %v2829_v24 = vadd.f32 %v2765_v16, %v2621_v13  ;;  %v2973_v0 = vsel %vm2901_vm2, %v7257_v52, 0.0  ;;  %3317 = vmatprep.subr.mxu0 %v8022_v50  ;;  %v10096_v16 = vld [vmem:[#allocation73_spill] sm:$0xff] }
 0x281   : > { %3582 = vmatprep.subr.mxu1 %v3581_v7  ;;  %v3586_v15 = vsub.f32 %v8012_v42, %v9520_v56  ;;  %v3181_v33 = vsel %vm3109_vm3, %v7268_v22, 0.0  ;;  %vm2548_vm4 = vcmp.eq.s32.totalorder %v10091_v8, %v7246_v31  ;;  %vm2692_vm5 = vcmp.eq.s32.totalorder %v10091_v8, %v7248_v23 }
 0x282   : > { %10093 = vst [vmem:[#allocation67_spill] sm:$0xff] %v8036_v28  ;;  %v3246_v49 = vadd.f32 %v3182_v38, %v3038_v40  ;;  %v3037_v55 = vadd.f32 %v2973_v0, %v2829_v24  ;;  %v2620_v38 = vsel %vm2548_vm4, %v7225_v44, 0.0  ;;  %vm2900_vm6 = vcmp.eq.s32.totalorder %v10091_v8, %v7264_v39 }
 0x283   : > { %v1971_v34 = vpop.f32.mrf.mxu1  ;;  %v3587_v7 = vand.u32 4294901760, %v3586_v15  ;;  %v2764_v40 = vsel %vm2692_vm5, %v7232_v58, 0.0  ;;  %v2972_v0 = vsel %vm2900_vm6, %v7250_v62, 0.0  ;;  %vm3108_vm7 = vcmp.eq.s32.totalorder %v10091_v8, %v7266_v37 }
 0x284   : > { %v8030_v57 = vadd.f32 %v1971_v34, %v1831_v46  ;;  %v9521_v34 = vand.u32 4294901760, %v8036_v28  ;;  %v8046_v56 = vand.u32 4294901760, %v3246_v49  ;;  %v3245_v24 = vadd.f32 %v3181_v33, %v3037_v55 }
 0x285   : > { %v1973_v48 = vpop.f32.mrf.mxu1  ;;  %3588 = vmatpush1.msra.mxu1 %v3587_v7  ;;  %v2828_v13 = vadd.f32 %v2764_v40, %v2620_v38  ;;  %vm2547_vm8 = vcmp.eq.s32.totalorder %v10096_v16, %v7237_v17  ;;  %vm2691_vm9 = vcmp.eq.s32.totalorder %v10096_v16, %v7239_v9  ;;  %vm2899_vm10 = vcmp.eq.s32.totalorder %v10096_v16, %v7255_v25 }
 0x286   : > { %v8043_v46 = vadd.f32 %v1973_v48, %v1833_v51  ;;  %10094 = vst [vmem:[#allocation40_spill] sm:$0xff] %v8046_v56  ;;  %v3592_v48 = vsub.f32 %v8036_v28, %v9521_v34  ;;  %v8057_v51 = vsub.f32 %v3246_v49, %v8046_v56  ;;  %3319 = vmatpush2.msra.mxu0 %v8046_v56  ;;  %v3180_v49 = vsel %vm3108_vm7, %v7259_v19, 0.0 }
 0x287   : > { %v2619_v34 = vsel %vm2547_vm8, %v7230_v26, 0.0  ;;  %v8069_v50 = vand.u32 4294901760, %v3245_v24  ;;  %v3036_v28 = vadd.f32 %v2972_v0, %v2828_v13  ;;  %v2763_v8 = vsel %vm2691_vm9, %v7241_v63, 0.0 }
 0x288   : > { %10095 = vst [vmem:[#allocation70_spill] sm:$0xff] %v8057_v51  ;;  %v3593_v15 = vand.u32 4294901760, %v3592_v48  ;;  %v9526_v7 = vand.u32 4294901760, %v8057_v51  ;;  %v2971_v55 = vsel %vm2899_vm10, %v7257_v52, 0.0  ;;  %vm3107_vm11 = vcmp.eq.s32.totalorder %v10096_v16, %v7273_v5 }
 0x289   : > { %10097 = vst [vmem:[#allocation41_spill] sm:$0xff] %v8069_v50  ;;  %v8083_v38 = vsub.f32 %v3245_v24, %v8069_v50  ;;  %v3244_v48 = vadd.f32 %v3180_v49, %v3036_v28  ;;  %v2827_v40 = vadd.f32 %v2763_v8, %v2619_v34  ;;  %v3179_v0 = vsel %vm3107_vm11, %v7268_v22, 0.0  ;;  %3321 = vmatprep.subr.mxu0 %v8069_v50  ;;  %v10100_v8 = vld [vmem:[#allocation79_spill] sm:$0xff] }
 0x28a   : > { %3594 = vmatprep.subr.mxu1 %v3593_v15  ;;  %v3598_v33 = vsub.f32 %v8057_v51, %v9526_v7  ;;  %vm2546_vm12 = vcmp.eq.s32.totalorder %v10096_v16, %v7246_v31  ;;  %vm2690_vm13 = vcmp.eq.s32.totalorder %v10096_v16, %v7248_v23  ;;  %vm2898_vm14 = vcmp.eq.s32.totalorder %v10096_v16, %v7264_v39 }
 0x28b   : > { %10098 = vst [vmem:[#allocation72_spill] sm:$0xff] %v8083_v38  ;;  %v9531_v15 = vand.u32 4294901760, %v8083_v38  ;;  %v8094_v24 = vand.u32 4294901760, %v3244_v48  ;;  %v3035_v28 = vadd.f32 %v2971_v55, %v2827_v40  ;;  %v2618_v34 = vsel %vm2546_vm12, %v7225_v44, 0.0 }
 0x28c   : > { %v3599_v13 = vand.u32 4294901760, %v3598_v33  ;;  %v2762_v49 = vsel %vm2690_vm13, %v7232_v58, 0.0  ;;  %v2970_v33 = vsel %vm2898_vm14, %v7250_v62, 0.0  ;;  %vm3106_vm15 = vcmp.eq.s32.totalorder %v10096_v16, %v7266_v37 }
 0x28d   : > { %10099 = vst [vmem:[#allocation42_spill] sm:$0xff] %v8094_v24  ;;  %vm2545_vm0 = vcmp.eq.s32.totalorder %v10100_v8, %v7237_v17  ;;  %v3604_v7 = vsub.f32 %v8083_v38, %v9531_v15  ;;  %v8107_v50 = vsub.f32 %v3244_v48, %v8094_v24  ;;  %v3243_v55 = vadd.f32 %v3179_v0, %v3035_v28 }
 0x28e   : > { %3600 = vmatpush2.msra.mxu1 %v3599_v13  ;;  %v2826_v40 = vadd.f32 %v2762_v49, %v2618_v34  ;;  %3323 = vmatpush2.msra.mxu0 %v8094_v24  ;;  %v3178_v13 = vsel %vm3106_vm15, %v7259_v19, 0.0  ;;  %v2617_v56 = vsel %vm2545_vm0, %v7230_v26, 0.0  ;;  %vm2689_vm1 = vcmp.eq.s32.totalorder %v10100_v8, %v7239_v9 }
 0x28f   : > { %10101 = vst [vmem:[#allocation76_spill] sm:$0xff] %v8107_v50  ;;  %vm2897_vm2 = vcmp.eq.s32.totalorder %v10100_v8, %v7255_v25  ;;  %v3605_v16 = vand.u32 4294901760, %v3604_v7  ;;  %v9536_v15 = vand.u32 4294901760, %v8107_v50  ;;  %v8117_v38 = vand.u32 4294901760, %v3243_v55 }
 0x290   : > { %v3034_v48 = vadd.f32 %v2970_v33, %v2826_v40  ;;  %v2761_v0 = vsel %vm2689_vm1, %v7241_v63, 0.0  ;;  %v2969_v28 = vsel %vm2897_vm2, %v7257_v52, 0.0  ;;  %vm3105_vm3 = vcmp.eq.s32.totalorder %v10100_v8, %v7273_v5 }
 0x291   : > { %10102 = vst [vmem:[#allocation43_spill] sm:$0xff] %v8117_v38  ;;  %vm2544_vm4 = vcmp.eq.s32.totalorder %v10100_v8, %v7246_v31  ;;  %3606 = vmatprep.subr.mxu1 %v3605_v16  ;;  %v3610_v7 = vsub.f32 %v8107_v50, %v9536_v15  ;;  %v8129_v34 = vsub.f32 %v3243_v55, %v8117_v38  ;;  %v3177_v40 = vsel %vm3105_vm3, %v7268_v22, 0.0 }
 0x292   : > { %v3242_v49 = vadd.f32 %v3178_v13, %v3034_v48  ;;  %v2825_v33 = vadd.f32 %v2761_v0, %v2617_v56  ;;  %v2616_v24 = vsel %vm2544_vm4, %v7225_v44, 0.0  ;;  %vm2688_vm5 = vcmp.eq.s32.totalorder %v10100_v8, %v7248_v23  ;;  %3325 = vmatprep.subr.mxu0 %v8117_v38  ;;  %v10105_v48 = vld [vmem:[#allocation83_spill] sm:$0xff] }
 0x293   : > { %10103 = vst [vmem:[#allocation78_spill] sm:$0xff] %v8129_v34  ;;  %vm2896_vm6 = vcmp.eq.s32.totalorder %v10100_v8, %v7264_v39  ;;  %v3611_v16 = vand.u32 4294901760, %v3610_v7  ;;  %v9543_v15 = vand.u32 4294901760, %v8129_v34  ;;  %v2760_v56 = vsel %vm2688_vm5, %v7232_v58, 0.0 }
 0x294   : > { %v8139_v50 = vand.u32 4294901760, %v3242_v49  ;;  %v3033_v55 = vadd.f32 %v2969_v28, %v2825_v33  ;;  %v2968_v13 = vsel %vm2896_vm6, %v7250_v62, 0.0  ;;  %vm3104_vm7 = vcmp.eq.s32.totalorder %v10100_v8, %v7266_v37 }
 0x295   : > { %vm2543_vm8 = vcmp.eq.s32.totalorder %v10105_v48, %v7237_v17  ;;  %3612 = vmatpush2.msra.mxu1 %v3611_v16  ;;  %v3616_v0 = vsub.f32 %v8129_v34, %v9543_v15  ;;  %v2824_v28 = vadd.f32 %v2760_v56, %v2616_v24  ;;  %v3176_v33 = vsel %vm3104_vm7, %v7259_v19, 0.0 }
 0x296   : > { %10104 = vst [vmem:[#allocation45_spill] sm:$0xff] %v8139_v50  ;;  %v8151_v7 = vsub.f32 %v3242_v49, %v8139_v50  ;;  %v3241_v38 = vadd.f32 %v3177_v40, %v3033_v55  ;;  %v2615_v51 = vsel %vm2543_vm8, %v7230_v26, 0.0  ;;  %vm2687_vm9 = vcmp.eq.s32.totalorder %v10105_v48, %v7239_v9  ;;  %3327 = vmatpush2.msra.mxu0 %v8139_v50 }
 0x297   : > { %vm2895_vm10 = vcmp.eq.s32.totalorder %v10105_v48, %v7255_v25  ;;  %v3617_v8 = vand.u32 4294901760, %v3616_v0  ;;  %v3032_v49 = vadd.f32 %v2968_v13, %v2824_v28  ;;  %v2759_v24 = vsel %vm2687_vm9, %v7241_v63, 0.0 }
 0x298   : > { %10106 = vst [vmem:[#allocation80_spill] sm:$0xff] %v8151_v7  ;;  %v9546_v16 = vand.u32 4294901760, %v8151_v7  ;;  %v8161_v15 = vand.u32 4294901760, %v3241_v38  ;;  %v2967_v40 = vsel %vm2895_vm10, %v7257_v52, 0.0  ;;  %vm3103_vm11 = vcmp.eq.s32.totalorder %v10105_v48, %v7273_v5 }
 0x299   : > { %vm2542_vm12 = vcmp.eq.s32.totalorder %v10105_v48, %v7246_v31  ;;  %3618 = vmatprep.subr.mxu1 %v3617_v8  ;;  %v3240_v0 = vadd.f32 %v3176_v33, %v3032_v49  ;;  %v2823_v13 = vadd.f32 %v2759_v24, %v2615_v51  ;;  %v3175_v28 = vsel %vm3103_vm11, %v7268_v22, 0.0  ;;  %v10110_v49 = vld [vmem:[#allocation90_spill] sm:$0xff] }
 0x29a   : > { %10107 = vst [vmem:[#allocation47_spill] sm:$0xff] %v8161_v15  ;;  %v3622_v55 = vsub.f32 %v8151_v7, %v9546_v16  ;;  %v8173_v56 = vsub.f32 %v3241_v38, %v8161_v15  ;;  %v2614_v50 = vsel %vm2542_vm12, %v7225_v44, 0.0  ;;  %vm2686_vm13 = vcmp.eq.s32.totalorder %v10105_v48, %v7248_v23  ;;  %3329 = vmatprep.subr.mxu0 %v8161_v15 }
 0x29b   : > { %vm2894_vm14 = vcmp.eq.s32.totalorder %v10105_v48, %v7264_v39  ;;  %v8183_v7 = vand.u32 4294901760, %v3240_v0  ;;  %v3031_v38 = vadd.f32 %v2967_v40, %v2823_v13  ;;  %v2758_v51 = vsel %vm2686_vm13, %v7232_v58, 0.0 }
 0x29c   : > { %10108 = vst [vmem:[#allocation82_spill] sm:$0xff] %v8173_v56  ;;  %v3623_v8 = vand.u32 4294901760, %v3622_v55  ;;  %v9553_v16 = vand.u32 4294901760, %v8173_v56  ;;  %v2966_v33 = vsel %vm2894_vm14, %v7250_v62, 0.0  ;;  %vm3102_vm15 = vcmp.eq.s32.totalorder %v10105_v48, %v7266_v37 }
 0x29d   : > { %10109 = vst [vmem:[#allocation48_spill] sm:$0xff] %v8183_v7  ;;  %vm2541_vm0 = vcmp.eq.s32.totalorder %v10110_v49, %v7237_v17  ;;  %v8195_v55 = vsub.f32 %v3240_v0, %v8183_v7  ;;  %v3239_v15 = vadd.f32 %v3175_v28, %v3031_v38  ;;  %v2822_v40 = vadd.f32 %v2758_v51, %v2614_v50 }
 0x29e   : > { %3624 = vmatpush2.msra.mxu1 %v3623_v8  ;;  %v3628_v24 = vsub.f32 %v8173_v56, %v9553_v16  ;;  %v3174_v13 = vsel %vm3102_vm15, %v7259_v19, 0.0  ;;  %v2613_v34 = vsel %vm2541_vm0, %v7230_v26, 0.0  ;;  %vm2685_vm1 = vcmp.eq.s32.totalorder %v10110_v49, %v7239_v9  ;;  %3331 = vmatpush2.msra.mxu0 %v8183_v7 }
 0x29f   : > { %10111 = vst [vmem:[#allocation86_spill] sm:$0xff] %v8195_v55  ;;  %vm2893_vm2 = vcmp.eq.s32.totalorder %v10110_v49, %v7255_v25  ;;  %v9556_v8 = vand.u32 4294901760, %v8195_v55  ;;  %v8205_v16 = vand.u32 4294901760, %v3239_v15  ;;  %v3030_v0 = vadd.f32 %v2966_v33, %v2822_v40 }
 0x2a0   : > { %v3629_v48 = vand.u32 4294901760, %v3628_v24  ;;  %v2757_v50 = vsel %vm2685_vm1, %v7241_v63, 0.0  ;;  %v2965_v28 = vsel %vm2893_vm2, %v7257_v52, 0.0  ;;  %vm3101_vm3 = vcmp.eq.s32.totalorder %v10110_v49, %v7273_v5 }
 0x2a1   : > { %10112 = vst [vmem:[#allocation51_spill] sm:$0xff] %v8205_v16  ;;  %vm2540_vm4 = vcmp.eq.s32.totalorder %v10110_v49, %v7246_v31  ;;  %v3634_v38 = vsub.f32 %v8195_v55, %v9556_v8  ;;  %v8217_v51 = vsub.f32 %v3239_v15, %v8205_v16  ;;  %v3238_v24 = vadd.f32 %v3174_v13, %v3030_v0  ;;  %v10115_v0 = vld [vmem:[#allocation93_spill] sm:$0xff] }
 0x2a2   : > { %3630 = vmatprep.subr.mxu1 %v3629_v48  ;;  %v2821_v33 = vadd.f32 %v2757_v50, %v2613_v34  ;;  %v3173_v40 = vsel %vm3101_vm3, %v7268_v22, 0.0  ;;  %v2612_v7 = vsel %vm2540_vm4, %v7225_v44, 0.0  ;;  %vm2684_vm5 = vcmp.eq.s32.totalorder %v10110_v49, %v7248_v23  ;;  %3333 = vmatprep.subr.mxu0 %v8205_v16 }
 0x2a3   : > { %10113 = vst [vmem:[#allocation88_spill] sm:$0xff] %v8217_v51  ;;  %vm2892_vm6 = vcmp.eq.s32.totalorder %v10110_v49, %v7264_v39  ;;  %v3635_v48 = vand.u32 4294901760, %v3634_v38  ;;  %v9563_v8 = vand.u32 4294901760, %v8217_v51  ;;  %v8227_v55 = vand.u32 4294901760, %v3238_v24 }
 0x2a4   : > { %v3029_v15 = vadd.f32 %v2965_v28, %v2821_v33  ;;  %v2756_v34 = vsel %vm2684_vm5, %v7232_v58, 0.0  ;;  %v2964_v13 = vsel %vm2892_vm6, %v7250_v62, 0.0  ;;  %vm3100_vm7 = vcmp.eq.s32.totalorder %v10110_v49, %v7266_v37 }
 0x2a5   : > { %10114 = vst [vmem:[#allocation53_spill] sm:$0xff] %v8227_v55  ;;  %vm2539_vm8 = vcmp.eq.s32.totalorder %v10115_v0, %v7237_v17  ;;  %3636 = vmatpush2.msra.mxu1 %v3635_v48  ;;  %v3640_v50 = vsub.f32 %v8217_v51, %v9563_v8  ;;  %v8239_v38 = vsub.f32 %v3238_v24, %v8227_v55  ;;  %v3172_v33 = vsel %vm3100_vm7, %v7259_v19, 0.0 }
 0x2a6   : > { %v3237_v16 = vadd.f32 %v3173_v40, %v3029_v15  ;;  %v2820_v28 = vadd.f32 %v2756_v34, %v2612_v7  ;;  %v2611_v56 = vsel %vm2539_vm8, %v7230_v26, 0.0  ;;  %vm2683_vm9 = vcmp.eq.s32.totalorder %v10115_v0, %v7239_v9  ;;  %3335 = vmatpush2.msra.mxu0 %v8227_v55 }
 0x2a7   : > { %10116 = vst [vmem:[#allocation91_spill] sm:$0xff] %v8239_v38  ;;  %vm2891_vm10 = vcmp.eq.s32.totalorder %v10115_v0, %v7255_v25  ;;  %v3641_v49 = vand.u32 4294901760, %v3640_v50  ;;  %v9566_v48 = vand.u32 4294901760, %v8239_v38  ;;  %v2755_v7 = vsel %vm2683_vm9, %v7241_v63, 0.0 }
 0x2a8   : > { %v8249_v8 = vand.u32 4294901760, %v3237_v16  ;;  %v3028_v24 = vadd.f32 %v2964_v13, %v2820_v28  ;;  %v2963_v40 = vsel %vm2891_vm10, %v7257_v52, 0.0  ;;  %vm3099_vm11 = vcmp.eq.s32.totalorder %v10115_v0, %v7273_v5 }
 0x2a9   : > { %vm2538_vm12 = vcmp.eq.s32.totalorder %v10115_v0, %v7246_v31  ;;  %3642 = vmatprep.subr.mxu1 %v3641_v49  ;;  %v3646_v15 = vsub.f32 %v8239_v38, %v9566_v48  ;;  %v2819_v13 = vadd.f32 %v2755_v7, %v2611_v56  ;;  %v3171_v28 = vsel %vm3099_vm11, %v7268_v22, 0.0 }
 0x2aa   : > { %10117 = vst [vmem:[#allocation54_spill] sm:$0xff] %v8249_v8  ;;  %v8261_v34 = vsub.f32 %v3237_v16, %v8249_v8  ;;  %v3236_v50 = vadd.f32 %v3172_v33, %v3028_v24  ;;  %v2610_v55 = vsel %vm2538_vm12, %v7225_v44, 0.0  ;;  %vm2682_vm13 = vcmp.eq.s32.totalorder %v10115_v0, %v7248_v23  ;;  %3337 = vmatprep.subr.mxu0 %v8249_v8  ;;  %v10120_v24 = vld [vmem:[#allocation99_spill] sm:$0xff] }
 0x2ab   : > { %vm2890_vm14 = vcmp.eq.s32.totalorder %v10115_v0, %v7264_v39  ;;  %v3647_v49 = vand.u32 4294901760, %v3646_v15  ;;  %v3027_v16 = vadd.f32 %v2963_v40, %v2819_v13  ;;  %v2754_v56 = vsel %vm2682_vm13, %v7232_v58, 0.0 }
 0x2ac   : > { %10118 = vst [vmem:[#allocation92_spill] sm:$0xff] %v8261_v34  ;;  %v9573_v48 = vand.u32 4294901760, %v8261_v34  ;;  %v8271_v38 = vand.u32 4294901760, %v3236_v50  ;;  %v2962_v33 = vsel %vm2890_vm14, %v7250_v62, 0.0  ;;  %vm3098_vm15 = vcmp.eq.s32.totalorder %v10115_v0, %v7266_v37 }
 0x2ad   : > { %vm2537_vm0 = vcmp.eq.s32.totalorder %v10120_v24, %v7237_v17  ;;  %3648 = vmatpush2.msra.mxu1 %v3647_v49  ;;  %v3235_v8 = vadd.f32 %v3171_v28, %v3027_v16  ;;  %v2818_v40 = vadd.f32 %v2754_v56, %v2610_v55  ;;  %v3170_v13 = vsel %vm3098_vm15, %v7259_v19, 0.0 }
 0x2ae   : > { %10119 = vst [vmem:[#allocation59_spill] sm:$0xff] %v8271_v38  ;;  %v3652_v7 = vsub.f32 %v8261_v34, %v9573_v48  ;;  %v8283_v15 = vsub.f32 %v3236_v50, %v8271_v38  ;;  %v2609_v51 = vsel %vm2537_vm0, %v7230_v26, 0.0  ;;  %vm2681_vm1 = vcmp.eq.s32.totalorder %v10120_v24, %v7239_v9  ;;  %3339 = vmatpush2.msra.mxu0 %v8271_v38 }
 0x2af   : > { %vm2889_vm2 = vcmp.eq.s32.totalorder %v10120_v24, %v7255_v25  ;;  %v8293_v48 = vand.u32 4294901760, %v3235_v8  ;;  %v3026_v50 = vadd.f32 %v2962_v33, %v2818_v40  ;;  %v2753_v55 = vsel %vm2681_vm1, %v7241_v63, 0.0 }
 0x2b0   : > { %10121 = vst [vmem:[#allocation96_spill] sm:$0xff] %v8283_v15  ;;  %v3653_v0 = vand.u32 4294901760, %v3652_v7  ;;  %v9576_v49 = vand.u32 4294901760, %v8283_v15  ;;  %v2961_v28 = vsel %vm2889_vm2, %v7257_v52, 0.0  ;;  %vm3097_vm3 = vcmp.eq.s32.totalorder %v10120_v24, %v7273_v5 }
 0x2b1   : > { %10122 = vst [vmem:[#allocation60_spill] sm:$0xff] %v8293_v48  ;;  %vm2536_vm4 = vcmp.eq.s32.totalorder %v10120_v24, %v7246_v31  ;;  %v8305_v56 = vsub.f32 %v3235_v8, %v8293_v48  ;;  %v3234_v7 = vadd.f32 %v3170_v13, %v3026_v50  ;;  %v2817_v33 = vadd.f32 %v2753_v55, %v2609_v51  ;;  %v10125_v50 = vld [vmem:[#allocation103_spill] sm:$0xff] }
 0x2b2   : > { %3654 = vmatprep.subr.mxu1 %v3653_v0  ;;  %v3658_v16 = vsub.f32 %v8283_v15, %v9576_v49  ;;  %v3169_v40 = vsel %vm3097_vm3, %v7268_v22, 0.0  ;;  %v2608_v38 = vsel %vm2536_vm4, %v7225_v44, 0.0  ;;  %vm2680_vm5 = vcmp.eq.s32.totalorder %v10120_v24, %v7248_v23  ;;  %3341 = vmatprep.subr.mxu0 %v8293_v48 }
 0x2b3   : > { %10123 = vst [vmem:[#allocation98_spill] sm:$0xff] %v8305_v56  ;;  %vm2888_vm6 = vcmp.eq.s32.totalorder %v10120_v24, %v7264_v39  ;;  %v9583_v49 = vand.u32 4294901760, %v8305_v56  ;;  %v8315_v15 = vand.u32 4294901760, %v3234_v7  ;;  %v3025_v8 = vadd.f32 %v2961_v28, %v2817_v33 }
 0x2b4   : > { %v3659_v0 = vand.u32 4294901760, %v3658_v16  ;;  %v2752_v51 = vsel %vm2680_vm5, %v7232_v58, 0.0  ;;  %v2960_v13 = vsel %vm2888_vm6, %v7250_v62, 0.0  ;;  %vm3096_vm7 = vcmp.eq.s32.totalorder %v10120_v24, %v7266_v37 }
 0x2b5   : > { %10124 = vst [vmem:[#allocation62_spill] sm:$0xff] %v8315_v15  ;;  %vm2535_vm8 = vcmp.eq.s32.totalorder %v10125_v50, %v7237_v17  ;;  %v3664_v55 = vsub.f32 %v8305_v56, %v9583_v49  ;;  %v8327_v16 = vsub.f32 %v3234_v7, %v8315_v15  ;;  %v3233_v48 = vadd.f32 %v3169_v40, %v3025_v8 }
 0x2b6   : > { %3660 = vmatpush2.msra.mxu1 %v3659_v0  ;;  %v2816_v28 = vadd.f32 %v2752_v51, %v2608_v38  ;;  %v3168_v33 = vsel %vm3096_vm7, %v7259_v19, 0.0  ;;  %v2607_v34 = vsel %vm2535_vm8, %v7230_v26, 0.0  ;;  %vm2679_vm9 = vcmp.eq.s32.totalorder %v10125_v50, %v7239_v9  ;;  %3343 = vmatpush2.msra.mxu0 %v8315_v15 }
 0x2b7   : > { %10126 = vst [vmem:[#allocation100_spill] sm:$0xff] %v8327_v16  ;;  %vm2887_vm10 = vcmp.eq.s32.totalorder %v10125_v50, %v7255_v25  ;;  %v3665_v24 = vand.u32 4294901760, %v3664_v55  ;;  %v9592_v0 = vand.u32 4294901760, %v8327_v16  ;;  %v8337_v49 = vand.u32 4294901760, %v3233_v48 }
 0x2b8   : > { %v3024_v7 = vadd.f32 %v2960_v13, %v2816_v28  ;;  %v2751_v38 = vsel %vm2679_vm9, %v7241_v63, 0.0  ;;  %v2959_v8 = vsel %vm2887_vm10, %v7257_v52, 0.0  ;;  %vm3095_vm11 = vcmp.eq.s32.totalorder %v10125_v50, %v7273_v5 }
 0x2b9   : > { %10127 = vst [vmem:[#allocation65_spill] sm:$0xff] %v8337_v49  ;;  %vm2534_vm12 = vcmp.eq.s32.totalorder %v10125_v50, %v7246_v31  ;;  %3666 = vmatprep.subr.mxu1 %v3665_v24  ;;  %v3670_v51 = vsub.f32 %v8327_v16, %v9592_v0  ;;  %v8349_v55 = vsub.f32 %v3233_v48, %v8337_v49  ;;  %v3167_v56 = vsel %vm3095_vm11, %v7268_v22, 0.0 }
 0x2ba   : > { %v3232_v28 = vadd.f32 %v3168_v33, %v3024_v7  ;;  %v2815_v15 = vadd.f32 %v2751_v38, %v2607_v34  ;;  %v2606_v21 = vsel %vm2534_vm12, %v7225_v44, 0.0  ;;  %vm2678_vm13 = vcmp.eq.s32.totalorder %v10125_v50, %v7248_v23  ;;  %3345 = vmatprep.subr.mxu0 %v8337_v49  ;;  %v10136_v49 = vld [vmem:[#allocation113_spill] sm:$0xff] }
 0x2bb   : > { %10128 = vst [vmem:[#allocation102_spill] sm:$0xff] %v8349_v55  ;;  %v3671_v24 = vand.u32 4294901760, %v3670_v51  ;;  %v9593_v0 = vand.u32 4294901760, %v8349_v55  ;;  %v2750_v34 = vsel %vm2678_vm13, %v7232_v58, 0.0  ;;  %vm2886_vm14 = vcmp.eq.s32.totalorder %v10125_v50, %v7264_v39 }
 0x2bc   : > { %v2236_v40 = vpop.f32.mrf.mxu0  ;;  %v8360_v48 = vand.u32 4294901760, %v3232_v28  ;;  %v3023_v33 = vadd.f32 %v2959_v8, %v2815_v15  ;;  %vm3094_vm15 = vcmp.eq.s32.totalorder %v10125_v50, %v7266_v37  ;;  %v2814_v38 = vadd.f32 %v2750_v34, %v2606_v21  ;;  %v10131_v8 = vld [vmem:[#allocation110_spill] sm:$0xff] }
 0x2bd   : > { %v8352_v13 = vadd.f32 %v2236_v40, %v8030_v57  ;;  %3672 = vmatpush2.msra.mxu1 %v3671_v24  ;;  %v3676_v7 = vsub.f32 %v8349_v55, %v9593_v0  ;;  %v3166_v15 = vsel %vm3094_vm15, %v7259_v19, 0.0  ;;  %vm2533_vm0 = vcmp.eq.s32.totalorder %v10131_v8, %v7237_v17 }
 0x2be   : > { %v2238_v42 = vpop.f32.mrf.mxu0  ;;  %10129 = vst [vmem:[#allocation68_spill] sm:$0xff] %v8360_v48  ;;  %v8374_v40 = vsub.f32 %v3232_v28, %v8360_v48  ;;  %3347 = vmatpush2.msra.mxu0 %v8360_v48  ;;  %vm2677_vm1 = vcmp.eq.s32.totalorder %v10131_v8, %v7239_v9  ;;  %v2605_v28 = vsel %vm2533_vm0, %v7230_v26, 0.0  ;;  %vm2885_vm2 = vcmp.eq.s32.totalorder %v10131_v8, %v7255_v25 }
 0x2bf   : > { %v8363_v57 = vadd.f32 %v2238_v42, %v8043_v46  ;;  %v2958_v42 = vsel %vm2886_vm14, %v7250_v62, 0.0  ;;  %v3231_v46 = vadd.f32 %v3167_v56, %v3023_v33  ;;  %v3677_v50 = vand.u32 4294901760, %v3676_v7 }
 0x2c0   : > { %10130 = vst [vmem:[#allocation106_spill] sm:$0xff] %v8374_v40  ;;  %v9596_v51 = vand.u32 4294901760, %v8374_v40  ;;  %v3022_v24 = vadd.f32 %v2958_v42, %v2814_v38  ;;  %v2749_v34 = vsel %vm2677_vm1, %v7241_v63, 0.0  ;;  %vm3093_vm3 = vcmp.eq.s32.totalorder %v10131_v8, %v7273_v5 }
 0x2c1   : > { %v8385_v21 = vand.u32 4294901760, %v3231_v46  ;;  %3678 = vmatprep.subr.mxu1 %v3677_v50  ;;  %v2813_v7 = vadd.f32 %v2749_v34, %v2605_v28  ;;  %v2957_v38 = vsel %vm2885_vm2, %v7257_v52, 0.0  ;;  %v3165_v0 = vsel %vm3093_vm3, %v7268_v22, 0.0 }
 0x2c2   : > { %v3682_v56 = vsub.f32 %v8374_v40, %v9596_v51  ;;  %v3230_v33 = vadd.f32 %v3166_v15, %v3022_v24  ;;  %vm2532_vm4 = vcmp.eq.s32.totalorder %v10131_v8, %v7246_v31  ;;  %vm2676_vm5 = vcmp.eq.s32.totalorder %v10131_v8, %v7248_v23 }
 0x2c3   : > { %10132 = vst [vmem:[#allocation108_spill] sm:$0xff] %v8385_v21  ;;  %v8397_v42 = vsub.f32 %v3231_v46, %v8385_v21  ;;  %3349 = vmatprep.subr.mxu0 %v8385_v21  ;;  %v3021_v15 = vadd.f32 %v2957_v38, %v2813_v7  ;;  %v2604_v24 = vsel %vm2532_vm4, %v7225_v44, 0.0  ;;  %v2748_v46 = vsel %vm2676_vm5, %v7232_v58, 0.0 }
 0x2c4   : > { %v3683_v50 = vand.u32 4294901760, %v3682_v56  ;;  %v8405_v48 = vand.u32 4294901760, %v3230_v33  ;;  %vm2884_vm6 = vcmp.eq.s32.totalorder %v10131_v8, %v7264_v39  ;;  %vm3092_vm7 = vcmp.eq.s32.totalorder %v10131_v8, %v7266_v37 }
 0x2c5   : > { %10133 = vst [vmem:[#allocation74_spill] sm:$0xff] %v8397_v42  ;;  %v9601_v28 = vand.u32 4294901760, %v8397_v42  ;;  %v3229_v56 = vadd.f32 %v3165_v0, %v3021_v15  ;;  %v2812_v51 = vadd.f32 %v2748_v46, %v2604_v24  ;;  %v2956_v7 = vsel %vm2884_vm6, %v7250_v62, 0.0 }
 0x2c6   : > { %10134 = vst [vmem:[#allocation111_spill] sm:$0xff] %v8405_v48  ;;  %3684 = vmatpush2.msra.mxu1 %v3683_v50  ;;  %v8415_v34 = vsub.f32 %v3230_v33, %v8405_v48  ;;  %3351 = vmatpush2.msra.mxu0 %v8405_v48  ;;  %v3164_v21 = vsel %vm3092_vm7, %v7259_v19, 0.0  ;;  %vm2531_vm8 = vcmp.eq.s32.totalorder %v10136_v49, %v7237_v17 }
 0x2c7   : > { %v3688_v38 = vsub.f32 %v8397_v42, %v9601_v28  ;;  %vm2675_vm9 = vcmp.eq.s32.totalorder %v10136_v49, %v7239_v9  ;;  %v8428_v0 = vand.u32 4294901760, %v3229_v56  ;;  %v3020_v33 = vadd.f32 %v2956_v7, %v2812_v51 }
 0x2c8   : > { %10135 = vst [vmem:[#allocation75_spill] sm:$0xff] %v8415_v34  ;;  %v9606_v8 = vand.u32 4294901760, %v8415_v34  ;;  %v2603_v50 = vsel %vm2531_vm8, %v7230_v26, 0.0  ;;  %v2747_v24 = vsel %vm2675_vm9, %v7241_v63, 0.0  ;;  %vm2883_vm10 = vcmp.eq.s32.totalorder %v10136_v49, %v7255_v25 }
 0x2c9   : > { %10137 = vst [vmem:[#allocation112_spill] sm:$0xff] %v8428_v0  ;;  %v3689_v15 = vand.u32 4294901760, %v3688_v38  ;;  %vm3091_vm11 = vcmp.eq.s32.totalorder %v10136_v49, %v7273_v5  ;;  %v8440_v28 = vsub.f32 %v3229_v56, %v8428_v0  ;;  %v3228_v48 = vadd.f32 %v3164_v21, %v3020_v33  ;;  %3353 = vmatprep.subr.mxu0 %v8428_v0 }
 0x2ca   : > { %v3694_v46 = vsub.f32 %v8415_v34, %v9606_v8  ;;  %v2811_v51 = vadd.f32 %v2747_v24, %v2603_v50  ;;  %v2955_v7 = vsel %vm2883_vm10, %v7257_v52, 0.0  ;;  %v3163_v38 = vsel %vm3091_vm11, %v7268_v22, 0.0  ;;  %v10141_v34 = vld [vmem:[#allocation119_spill] sm:$0xff] }
 0x2cb   : > { %10138 = vst [vmem:[#allocation77_spill] sm:$0xff] %v8440_v28  ;;  %3690 = vmatprep.subr.mxu1 %v3689_v15  ;;  %vm2530_vm12 = vcmp.eq.s32.totalorder %v10136_v49, %v7246_v31  ;;  %vm2674_vm13 = vcmp.eq.s32.totalorder %v10136_v49, %v7248_v23  ;;  %v9611_v8 = vand.u32 4294901760, %v8440_v28  ;;  %v8450_v56 = vand.u32 4294901760, %v3228_v48 }
 0x2cc   : > { %v3695_v42 = vand.u32 4294901760, %v3694_v46  ;;  %v3019_v21 = vadd.f32 %v2955_v7, %v2811_v51  ;;  %v2602_v33 = vsel %vm2530_vm12, %v7225_v44, 0.0  ;;  %v2746_v50 = vsel %vm2674_vm13, %v7232_v58, 0.0 }
 0x2cd   : > { %10139 = vst [vmem:[#allocation116_spill] sm:$0xff] %v8450_v56  ;;  %vm2882_vm14 = vcmp.eq.s32.totalorder %v10136_v49, %v7264_v39  ;;  %vm3090_vm15 = vcmp.eq.s32.totalorder %v10136_v49, %v7266_v37  ;;  %v3700_v15 = vsub.f32 %v8440_v28, %v9611_v8  ;;  %v8462_v24 = vsub.f32 %v3228_v48, %v8450_v56 }
 0x2ce   : > { %3696 = vmatpush2.msra.mxu1 %v3695_v42  ;;  %v3227_v46 = vadd.f32 %v3163_v38, %v3019_v21  ;;  %v2810_v51 = vadd.f32 %v2746_v50, %v2602_v33  ;;  %v2954_v7 = vsel %vm2882_vm14, %v7250_v62, 0.0  ;;  %v3162_v0 = vsel %vm3090_vm15, %v7259_v19, 0.0  ;;  %3355 = vmatpush2.msra.mxu0 %v8450_v56  ;;  %v2373_v38 = vpop.f32.mrf.mxu1 }
 0x2cf   : > { %10140 = vst [vmem:[#allocation81_spill] sm:$0xff] %v8462_v24  ;;  %vm2529_vm0 = vcmp.eq.s32.totalorder %v10141_v34, %v7237_v17  ;;  %vm2673_vm1 = vcmp.eq.s32.totalorder %v10141_v34, %v7239_v9  ;;  %v3701_v49 = vand.u32 4294901760, %v3700_v15  ;;  %v9620_v42 = vand.u32 4294901760, %v8462_v24 }
 0x2d0   : > { %v8472_v8 = vand.u32 4294901760, %v3227_v46  ;;  %v3018_v48 = vadd.f32 %v2954_v7, %v2810_v51  ;;  %v2601_v21 = vsel %vm2529_vm0, %v7230_v26, 0.0  ;;  %v2745_v33 = vsel %vm2673_vm1, %v7241_v63, 0.0 }
 0x2d1   : > { %vm2881_vm2 = vcmp.eq.s32.totalorder %v10141_v34, %v7255_v25  ;;  %vm3089_vm3 = vcmp.eq.s32.totalorder %v10141_v34, %v7273_v5  ;;  %3702 = vmatprep.subr.mxu1 %v3701_v49  ;;  %v3706_v50 = vsub.f32 %v8462_v24, %v9620_v42  ;;  %v2809_v7 = vadd.f32 %v2745_v33, %v2601_v21 }
 0x2d2   : > { %10142 = vst [vmem:[#allocation118_spill] sm:$0xff] %v8472_v8  ;;  %v8484_v15 = vsub.f32 %v3227_v46, %v8472_v8  ;;  %v3226_v51 = vadd.f32 %v3162_v0, %v3018_v48  ;;  %v2953_v56 = vsel %vm2881_vm2, %v7257_v52, 0.0  ;;  %v3161_v28 = vsel %vm3089_vm3, %v7268_v22, 0.0  ;;  %3357 = vmatprep.subr.mxu0 %v8472_v8 }
 0x2d3   : > { %v2374_v40 = vadd.f32 %v2373_v38, %v8352_v13  ;;  %vm2528_vm4 = vcmp.eq.s32.totalorder %v10141_v34, %v7246_v31  ;;  %v3707_v49 = vand.u32 4294901760, %v3706_v50  ;;  %v3017_v46 = vadd.f32 %v2953_v56, %v2809_v7 }
 0x2d4   : > { %10143 = vst [vmem:[#allocation84_spill] sm:$0xff] %v8484_v15  ;;  %v9621_v55 = vand.u32 4294901760, %v8484_v15  ;;  %v8493_v42 = vand.u32 4294901760, %v3226_v51  ;;  %v2600_v0 = vsel %vm2528_vm4, %v7225_v44, 0.0  ;;  %vm2672_vm5 = vcmp.eq.s32.totalorder %v10141_v34, %v7248_v23 }
 0x2d5   : > { %vm2880_vm6 = vcmp.eq.s32.totalorder %v10141_v34, %v7264_v39  ;;  %vm3088_vm7 = vcmp.eq.s32.totalorder %v10141_v34, %v7266_v37  ;;  %3708 = vmatpush2.msra.mxu1 %v3707_v49  ;;  %v3225_v56 = vadd.f32 %v3161_v28, %v3017_v46  ;;  %v2744_v38 = vsel %vm2672_vm5, %v7232_v58, 0.0  ;;  %v10146_v34 = vld [vmem:[#allocation123_spill] sm:$0xff]  ;;  %v2375_v28 = vpop.f32.mrf.mxu1 }
 0x2d6   : > { %10144 = vst [vmem:[#allocation120_spill] sm:$0xff] %v8493_v42  ;;  %v3712_v13 = vsub.f32 %v8484_v15, %v9621_v55  ;;  %v8506_v48 = vsub.f32 %v3226_v51, %v8493_v42  ;;  %3359 = vmatpush2.msra.mxu0 %v8493_v42  ;;  %v2808_v21 = vadd.f32 %v2744_v38, %v2600_v0  ;;  %v2952_v33 = vsel %vm2880_vm6, %v7250_v62, 0.0 }
 0x2d7   : > { %v3160_v50 = vsel %vm3088_vm7, %v7259_v19, 0.0  ;;  %vm2527_vm8 = vcmp.eq.s32.totalorder %v10146_v34, %v7237_v17  ;;  %v8515_v55 = vand.u32 4294901760, %v3225_v56  ;;  %vm2671_vm9 = vcmp.eq.s32.totalorder %v10146_v34, %v7239_v9 }
 0x2d8   : > { %10145 = vst [vmem:[#allocation85_spill] sm:$0xff] %v8506_v48  ;;  %v3713_v7 = vand.u32 4294901760, %v3712_v13  ;;  %v9630_v49 = vand.u32 4294901760, %v8506_v48  ;;  %v2599_v51 = vsel %vm2527_vm8, %v7230_v26, 0.0  ;;  %v3016_v46 = vadd.f32 %v2952_v33, %v2808_v21 }
 0x2d9   : > { %10147 = vst [vmem:[#allocation122_spill] sm:$0xff] %v8515_v55  ;;  %vm2879_vm10 = vcmp.eq.s32.totalorder %v10146_v34, %v7255_v25  ;;  %vm3087_vm11 = vcmp.eq.s32.totalorder %v10146_v34, %v7273_v5  ;;  %v8528_v13 = vsub.f32 %v3225_v56, %v8515_v55  ;;  %v2743_v38 = vsel %vm2671_vm9, %v7241_v63, 0.0  ;;  %3361 = vmatprep.subr.mxu0 %v8515_v55 }
 0x2da   : > { %3714 = vmatprep.subr.mxu1 %v3713_v7  ;;  %v3718_v0 = vsub.f32 %v8506_v48, %v9630_v49  ;;  %v2951_v21 = vsel %vm2879_vm10, %v7257_v52, 0.0  ;;  %v3224_v33 = vadd.f32 %v3160_v50, %v3016_v46  ;;  %v2807_v42 = vadd.f32 %v2743_v38, %v2599_v51 }
 0x2db   : > { %10148 = vst [vmem:[#allocation126_spill] sm:$0xff] %v8528_v13  ;;  %v3159_v8 = vsel %vm3087_vm11, %v7268_v22, 0.0  ;;  %v2376_v15 = vadd.f32 %v2375_v28, %v8363_v57  ;;  %v9636_v24 = vand.u32 4294901760, %v8528_v13  ;;  %vm2526_vm12 = vcmp.eq.s32.totalorder %v10146_v34, %v7246_v31 }
 0x2dc   : > { %v3719_v7 = vand.u32 4294901760, %v3718_v0  ;;  %vm2670_vm13 = vcmp.eq.s32.totalorder %v10146_v34, %v7248_v23  ;;  %v8540_v56 = vand.u32 4294901760, %v3224_v33  ;;  %v3015_v49 = vadd.f32 %v2951_v21, %v2807_v42 }
 0x2dd   : > { %v2380_v48 = vcombine.low %v2374_v40, %v2376_v15  ;;  %v4674_v55 = vcombine.low %v2376_v15, %v2376_v15  ;;  %v3724_v50 = vsub.f32 %v8528_v13, %v9636_v24  ;;  %v2598_v57 = vsel %vm2526_vm12, %v7225_v44, 0.0 }
 0x2de   : > { %10149 = vst [vmem:[#allocation128_spill] sm:$0xff] %v8540_v56  ;;  %3720 = vmatpush2.msra.mxu1 %v3719_v7  ;;  %v2742_v51 = vsel %vm2670_vm13, %v7232_v58, 0.0  ;;  %vm2878_vm14 = vcmp.eq.s32.totalorder %v10146_v34, %v7264_v39  ;;  %v8550_v28 = vsub.f32 %v3224_v33, %v8540_v56  ;;  %v3223_v46 = vadd.f32 %v3159_v8, %v3015_v49 }
 0x2df   : > { %v8552_v0 = vand.u32 4294901760, %v4674_v55  ;;  %v8554_v40 = vand.u32 4294901760, %v2380_v48  ;;  %3363 = vmatpush2.msra.mxu0 %v8540_v56  ;;  %v3725_v42 = vand.u32 4294901760, %v3724_v50  ;;  %v2806_v15 = vadd.f32 %v2742_v51, %v2598_v57  ;;  %v10154_v57 = vld [vmem:[#allocation129_spill] sm:$0xff] }
 0x2e0   : > { %10150 = vst [vmem:[#allocation130_spill] sm:$0xff] %v8550_v28  ;;  %v2950_v38 = vsel %vm2878_vm14, %v7250_v62, 0.0  ;;  %vm3086_vm15 = vcmp.eq.s32.totalorder %v10146_v34, %v7266_v37  ;;  %v9635_v21 = vand.u32 4294901760, %v8550_v28  ;;  %v8561_v7 = vand.u32 4294901760, %v3223_v46 }
 0x2e1   : > { %10151 = vst [vmem:[#allocation131_spill] sm:$0xff] %v8552_v0  ;;  %10152 = vst [vmem:[#allocation133_spill] sm:$0xff] %v8554_v40  ;;  %v8564_v33 = vsub.f32 %v4674_v55, %v8552_v0  ;;  %v8567_v8 = vsub.f32 %v2380_v48, %v8554_v40  ;;  %3782 = vmatprep.mubr.f32.mxu1 %v8552_v0  ;;  %3726 = vmatprep.subr.mxu1 %v3725_v42  ;;  %v3158_v50 = vsel %vm3086_vm15, %v7259_v19, 0.0 }
 0x2e2   : > { %10153 = vst [vmem:[#allocation134_spill] sm:$0xff] %v8561_v7  ;;  %v3014_v49 = vadd.f32 %v2950_v38, %v2806_v15  ;;  %vm2525_vm0 = vcmp.eq.s32.totalorder %v10154_v57, %v7237_v17  ;;  %vm2669_vm1 = vcmp.eq.s32.totalorder %v10154_v57, %v7239_v9  ;;  %v3730_v55 = vsub.f32 %v8550_v28, %v9635_v21 }
 0x2e3   : > { %v8579_v34 = vsub.f32 %v3223_v46, %v8561_v7  ;;  %v2597_v51 = vsel %vm2525_vm0, %v7230_v26, 0.0  ;;  %3365 = vmatprep.subr.mxu0 %v8561_v7  ;;  %v2741_v15 = vsel %vm2669_vm1, %v7241_v63, 0.0  ;;  %vm2877_vm2 = vcmp.eq.s32.totalorder %v10154_v57, %v7255_v25 }
 0x2e4   : > { %v3222_v42 = vadd.f32 %v3158_v50, %v3014_v49  ;;  %vm3085_vm3 = vcmp.eq.s32.totalorder %v10154_v57, %v7273_v5  ;;  %v3731_v38 = vand.u32 4294901760, %v3730_v55  ;;  %v2805_v46 = vadd.f32 %v2741_v15, %v2597_v51 }
 0x2e5   : > { %10155 = vst [vmem:[#allocation12_spill] sm:$0xff] %v8579_v34  ;;  %v9643_v21 = vand.u32 4294901760, %v8579_v34  ;;  %v2949_v24 = vsel %vm2877_vm2, %v7257_v52, 0.0  ;;  %v3157_v0 = vsel %vm3085_vm3, %v7268_v22, 0.0  ;;  %vm2524_vm4 = vcmp.eq.s32.totalorder %v10154_v57, %v7246_v31 }
 0x2e6   : > { %v8591_v48 = vand.u32 4294901760, %v3222_v42  ;;  %vm2668_vm5 = vcmp.eq.s32.totalorder %v10154_v57, %v7248_v23  ;;  %3732 = vmatpush2.msra.mxu1 %v3731_v38  ;;  %v3013_v50 = vadd.f32 %v2949_v24, %v2805_v46  ;;  %v2596_v55 = vsel %vm2524_vm4, %v7225_v44, 0.0 }
 0x2e7   : > { %v3736_v49 = vsub.f32 %v8579_v34, %v9643_v21  ;;  %v2740_v51 = vsel %vm2668_vm5, %v7232_v58, 0.0  ;;  %vm2876_vm6 = vcmp.eq.s32.totalorder %v10154_v57, %v7264_v39  ;;  %vm3084_vm7 = vcmp.eq.s32.totalorder %v10154_v57, %v7266_v37 }
 0x2e8   : > { %10156 = vst [vmem:[#allocation136_spill] sm:$0xff] %v8591_v48  ;;  %v8604_v15 = vsub.f32 %v3222_v42, %v8591_v48  ;;  %v2804_v7 = vadd.f32 %v2740_v51, %v2596_v55  ;;  %3367 = vmatpush2.msra.mxu0 %v8591_v48  ;;  %v3221_v56 = vadd.f32 %v3157_v0, %v3013_v50  ;;  %v2948_v24 = vsel %vm2876_vm6, %v7250_v62, 0.0  ;;  %v10158_v42 = vld [vmem:[#allocation132_spill] sm:$0xff] }
 0x2e9   : > { %v3737_v38 = vand.u32 4294901760, %v3736_v49  ;;  %v3156_v46 = vsel %vm3084_vm7, %v7259_v19, 0.0  ;;  %vm2523_vm8 = vcmp.eq.s32.totalorder %v10158_v42, %v7237_v17  ;;  %vm2667_vm9 = vcmp.eq.s32.totalorder %v10158_v42, %v7239_v9 }
 0x2ea   : > { %10157 = vst [vmem:[#allocation137_spill] sm:$0xff] %v8604_v15  ;;  %v9646_v21 = vand.u32 4294901760, %v8604_v15  ;;  %v3012_v34 = vadd.f32 %v2948_v24, %v2804_v7  ;;  %v8618_v55 = vand.u32 4294901760, %v3221_v56  ;;  %v2595_v57 = vsel %vm2523_vm8, %v7230_v26, 0.0 }
 0x2eb   : > { %3738 = vmatprep.subr.mxu1 %v3737_v38  ;;  %v2739_v0 = vsel %vm2667_vm9, %v7241_v63, 0.0  ;;  %vm2875_vm10 = vcmp.eq.s32.totalorder %v10158_v42, %v7255_v25  ;;  %vm3083_vm11 = vcmp.eq.s32.totalorder %v10158_v42, %v7273_v5  ;;  %vm2522_vm12 = vcmp.eq.s32.totalorder %v10158_v42, %v7246_v31 }
 0x2ec   : > { %10159 = vst [vmem:[#allocation140_spill] sm:$0xff] %v8618_v55  ;;  %v3742_v7 = vsub.f32 %v8604_v15, %v9646_v21  ;;  %v3220_v49 = vadd.f32 %v3156_v46, %v3012_v34  ;;  %v2803_v50 = vadd.f32 %v2739_v0, %v2595_v57  ;;  %v2947_v51 = vsel %vm2875_vm10, %v7257_v52, 0.0  ;;  %3369 = vmatprep.subr.mxu0 %v8618_v55 }
 0x2ed   : > { %v8629_v24 = vsub.f32 %v3221_v56, %v8618_v55  ;;  %vm2666_vm13 = vcmp.eq.s32.totalorder %v10158_v42, %v7248_v23  ;;  %v3155_v46 = vsel %vm3083_vm11, %v7268_v22, 0.0  ;;  %v2594_v57 = vsel %vm2522_vm12, %v7225_v44, 0.0 }
 0x2ee   : > { %v3743_v38 = vand.u32 4294901760, %v3742_v7  ;;  %v8638_v21 = vand.u32 4294901760, %v3220_v49  ;;  %v3011_v34 = vadd.f32 %v2947_v51, %v2803_v50  ;;  %v2738_v0 = vsel %vm2666_vm13, %v7232_v58, 0.0  ;;  %v10163_v51 = vld [vmem:[#allocation135_spill] sm:$0xff] }
 0x2ef   : > { %10160 = vst [vmem:[#allocation124_spill] sm:$0xff] %v8629_v24  ;;  %v9653_v56 = vand.u32 4294901760, %v8629_v24  ;;  %vm2874_vm14 = vcmp.eq.s32.totalorder %v10158_v42, %v7264_v39  ;;  %v2802_v7 = vadd.f32 %v2738_v0, %v2594_v57  ;;  %vm3082_vm15 = vcmp.eq.s32.totalorder %v10158_v42, %v7266_v37 }
 0x2f0   : > { %10161 = vst [vmem:[#allocation125_spill] sm:$0xff] %v8638_v21  ;;  %3744 = vmatpush2.msra.mxu1 %v3743_v38  ;;  %v8647_v48 = vsub.f32 %v3220_v49, %v8638_v21  ;;  %v3219_v55 = vadd.f32 %v3155_v46, %v3011_v34  ;;  %v2946_v15 = vsel %vm2874_vm14, %v7250_v62, 0.0  ;;  %3371 = vmatpush2.msra.mxu0 %v8638_v21  ;;  %v3154_v46 = vsel %vm3082_vm15, %v7259_v19, 0.0 }
 0x2f1   : > { %v3748_v50 = vsub.f32 %v8629_v24, %v9653_v56  ;;  %vm2521_vm0 = vcmp.eq.s32.totalorder %v10163_v51, %v7237_v17  ;;  %vm2665_vm1 = vcmp.eq.s32.totalorder %v10163_v51, %v7239_v9  ;;  %v3010_v34 = vadd.f32 %v2946_v15, %v2802_v7 }
 0x2f2   : > { %10162 = vst [vmem:[#allocation138_spill] sm:$0xff] %v8647_v48  ;;  %v9660_v49 = vand.u32 4294901760, %v8647_v48  ;;  %v8661_v38 = vand.u32 4294901760, %v3219_v55  ;;  %v2593_v0 = vsel %vm2521_vm0, %v7230_v26, 0.0  ;;  %v2737_v56 = vsel %vm2665_vm1, %v7241_v63, 0.0 }
 0x2f3   : > { %v3749_v57 = vand.u32 4294901760, %v3748_v50  ;;  %vm2873_vm2 = vcmp.eq.s32.totalorder %v10163_v51, %v7255_v25  ;;  %v3218_v42 = vadd.f32 %v3154_v46, %v3010_v34  ;;  %v2801_v21 = vadd.f32 %v2737_v56, %v2593_v0 }
 0x2f4   : > { %v3754_v17 = vsub.f32 %v8647_v48, %v9660_v49  ;;  %v8672_v9 = vsub.f32 %v3219_v55, %v8661_v38  ;;  %3373 = vmatprep.subr.mxu0 %v8661_v38  ;;  %v2945_v15 = vsel %vm2873_vm2, %v7257_v52, 0.0  ;;  %vm3081_vm3 = vcmp.eq.s32.totalorder %v10163_v51, %v7273_v5  ;;  %v10191_v49 = vld [vmem:[#allocation101_spill] sm:$0xff] }
 0x2f5   : > { %3750 = vmatprep.subr.mxu1 %v3749_v57  ;;  %vm2520_vm4 = vcmp.eq.s32.totalorder %v10163_v51, %v7246_v31  ;;  %vm2664_vm5 = vcmp.eq.s32.totalorder %v10163_v51, %v7248_v23  ;;  %v8683_v25 = vand.u32 4294901760, %v3218_v42  ;;  %v3009_v55 = vadd.f32 %v2945_v15, %v2801_v21 }
 0x2f6   : > { %10164 = vst [vmem:[#allocation127_spill] sm:$0xff] %v8672_v9  ;;  %v3755_v26 = vand.u32 4294901760, %v3754_v17  ;;  %v9659_v63 = vand.u32 4294901760, %v8672_v9  ;;  %v3153_v56 = vsel %vm3081_vm3, %v7268_v22, 0.0  ;;  %v2592_v7 = vsel %vm2520_vm4, %v7225_v44, 0.0 }
 0x2f7   : > { %v2736_v52 = vsel %vm2664_vm5, %v7232_v58, 0.0  ;;  %vm2872_vm6 = vcmp.eq.s32.totalorder %v10163_v51, %v7264_v39  ;;  %v8694_v23 = vsub.f32 %v3218_v42, %v8683_v25  ;;  %v3217_v5 = vadd.f32 %v3153_v56, %v3009_v55  ;;  %3375 = vmatpush2.msra.mxu0 %v8683_v25 }
 0x2f8   : > { %3756 = vmatpush2.msra.mxu1 %v3755_v26  ;;  %v3760_v31 = vsub.f32 %v8672_v9, %v9659_v63  ;;  %v2800_v50 = vadd.f32 %v2736_v52, %v2592_v7  ;;  %v2944_v21 = vsel %vm2872_vm6, %v7250_v62, 0.0  ;;  %vm3080_vm7 = vcmp.eq.s32.totalorder %v10163_v51, %v7266_v37  ;;  %v10190_v63 = vld [vmem:[#allocation55_spill] sm:$0xff] }
 0x2f9   : > { %10165 = vst [vmem:[#allocation139_spill] sm:$0xff] %v8694_v23  ;;  %v3382_v44 = vand.u32 4294901760, %v8564_v33  ;;  %v10166_v58 = vand.u32 4294901760, %v8567_v8  ;;  %v9658_v34 = vand.u32 4294901760, %v8694_v23  ;;  %v8705_v46 = vand.u32 4294901760, %v3217_v5 }
 0x2fa   : > { %v3761_v22 = vand.u32 4294901760, %v3760_v31  ;;  %v3008_v57 = vadd.f32 %v2944_v21, %v2800_v50  ;;  %v3152_v0 = vsel %vm3080_vm7, %v7259_v19, 0.0  ;;  %v10170_v21 = vld [vmem:[#allocation31_spill] sm:$0xff] }
 0x2fb   : > { %v3389_v39 = vsub.f32 %v8567_v8, %v10166_v58  ;;  %v3383_v62 = vsub.f32 %v8564_v33, %v3382_v44  ;;  %v3766_v37 = vsub.f32 %v8694_v23, %v9658_v34  ;;  %v8713_v51 = vsub.f32 %v3217_v5, %v8705_v46  ;;  %3377 = vmatprep.subr.mxu0 %v8705_v46  ;;  %v10172_v58 = vld [vmem:[#allocation32_spill] sm:$0xff]  ;;  %v10189_v34 = vld [vmem:[#allocation95_spill] sm:$0xff] }
 0x2fc   : > { %3762 = vmatprep.subr.mxu1 %v3761_v22  ;;  %v3216_v17 = vadd.f32 %v3152_v0, %v3008_v57  ;;  %v10174_v22 = vld [vmem:[#allocation87_spill] sm:$0xff]  ;;  %v10175_v57 = vld [vmem:[#allocation29_spill] sm:$0xff]  ;;  %v10176_v0 = vld [vmem:[#allocation94_spill] sm:$0xff] }
 0x2fd   : > { %10167 = vst [vmem:[#allocation13_spill] sm:$0xff] %v8713_v51  ;;  %v3384_v42 = vand.u32 4294901760, %v3383_v62  ;;  %v3390_v15 = vand.u32 4294901760, %v3389_v39  ;;  %v3767_v26 = vand.u32 4294901760, %v3766_v37  ;;  %v9657_v55 = vand.u32 4294901760, %v8713_v51  ;;  %v10173_v39 = vld [vmem:[#allocation28_spill] sm:$0xff] }
 0x2fe   : > { %v8717_v56 = vand.u32 4294901760, %v3216_v17  ;;  %v10177_v62 = vld [vmem:[#allocation46_spill] sm:$0xff]  ;;  %v10178_v37 = vld [vmem:[#allocation97_spill] sm:$0xff] }
 0x2ff   : > { %3385 = vmatprep.mubr.f32.mxu0 %v3384_v42  ;;  %3768 = vmatpush2.msra.mxu1 %v3767_v26  ;;  %v3772_v19 = vsub.f32 %v8713_v51, %v9657_v55  ;;  %v10180_v42 = vld [vmem:[#allocation104_spill] sm:$0xff]  ;;  %v10182_v26 = vld [vmem:[#allocation107_spill] sm:$0xff] }
 0x300   : > { %v8723_v7 = vsub.f32 %v3216_v17, %v8717_v56  ;;  %3379 = vmatpush2.msra.mxu0 %v8717_v56  ;;  %v10179_v17 = vld [vmem:[#allocation30_spill] sm:$0xff]  ;;  %v10188_v55 = vld [vmem:[#allocation52_spill] sm:$0xff] }
 0x301   : > { %3792 = vmatprep.subr.mxu0 %v7334_v6  ;;  %3391 = vmatmul.mubr.f32.vlgmr.msra.gmra.mxu0 %v3390_v15  ;;  %v3773_v52 = vand.u32 4294901760, %v3772_v19  ;;  %v10181_v15 = vld [vmem:[#allocation49_spill] sm:$0xff]  ;;  %v10183_v19 = vld [vmem:[#allocation50_spill] sm:$0xff] }
 0x302   : > { %10168 = vst [vmem:[#allocation14_spill] sm:$0xff] %v8723_v7  ;;  %v9656_v31 = vand.u32 4294901760, %v8723_v7  ;;  %3795 = vmatpush1.msra.mxu0 %v7342_v3  ;;  %3984 = vmatprep.mubr.f32.mxu0 %v8564_v33  ;;  %v10169_v33 = vld [vmem:[#allocation27_spill] sm:$0xff] }
 0x303   : > { %3798 = vmatprep.subr.mxu0 %v7366_v12  ;;  %3774 = vmatprep.subr.mxu1 %v3773_v52  ;;  %v10184_v52 = vld [vmem:[#allocation114_spill] sm:$0xff] }
 0x304   : > { %v3778_v5 = vsub.f32 %v8723_v7, %v9656_v31  ;;  %3801 = vmatpush1.msra.mxu0 %v7381_v53  ;;  %v10187_v31 = vld [vmem:[#allocation89_spill] sm:$0xff] }
 0x305   : > { %3804 = vmatprep.subr.mxu0 %v7406_v35 }
 0x306   : > { %v3779_v50 = vand.u32 4294901760, %v3778_v5  ;;  %3807 = vmatpush1.msra.mxu0 %v7432_v30  ;;  %v10185_v5 = vld [vmem:[#allocation71_spill] sm:$0xff] }
 0x307   : > { %3810 = vmatprep.subr.mxu0 %v7456_v10 }
 0x308   : > { %3780 = vmatpush2.msra.mxu1 %v3779_v50  ;;  %3813 = vmatpush1.msra.mxu0 %v7478_v27  ;;  %v10186_v50 = vld [vmem:[#allocation117_spill] sm:$0xff] }
 0x309   : > { %3994 = vmatprep.subr.mxu1 %v7321_v59  ;;  %3784 = vmatmul.mubr.f32.vlgmr.msra.gmra.mxu1 %v8554_v40  ;;  %v10192_v40 = vld [vmem:[#allocation57_spill] sm:$0xff] }
 0x30a   : > { %3996 = vmatpush1.msra.mxu1 %v7329_v45  ;;  %4124 = vmatprep.mubr.f32.mxu1 %v3382_v44  ;;  %v10171_v44 = vld [vmem:[#allocation44_spill] sm:$0xff] }
 0x30b   : > { %3998 = vmatprep.subr.mxu1 %v7353_v1  ;;  %3816 = vmatprep.subr.mxu0 %v7500_v47 }
 0x30c   : > { %4000 = vmatpush1.msra.mxu1 %v7372_v61  ;;  %3819 = vmatpush1.msra.mxu0 %v7522_v32 }
 0x30d   : > { %4002 = vmatprep.subr.mxu1 %v7394_v43  ;;  %3822 = vmatprep.subr.mxu0 %v7544_v14 }
 0x30e   : > { %4004 = vmatpush1.msra.mxu1 %v7418_v4  ;;  %3825 = vmatpush1.msra.mxu0 %v7566_v20 }
 0x30f   : > { %4006 = vmatprep.subr.mxu1 %v7443_v29  ;;  %3828 = vmatprep.subr.mxu0 %v7588_v60 }
 0x310   : > { %4008 = vmatpush1.msra.mxu1 %v7466_v2  ;;  %3831 = vmatpush1.msra.mxu0 %v7610_v36 }
 0x311   : > { %4010 = vmatprep.subr.mxu1 %v7488_v54  ;;  %3834 = vmatprep.subr.mxu0 %v7632_v41 }
 0x312   : > { %4012 = vmatpush1.msra.mxu1 %v7510_v11  ;;  %3837 = vmatpush1.msra.mxu0 %v7654_v18 }
 0x313   : > { %4014 = vmatprep.subr.mxu1 %v10169_v33  ;;  %3840 = vmatprep.subr.mxu0 %v10170_v21 }
 0x314   : > { %4016 = vmatpush1.msra.mxu1 %v10171_v44  ;;  %3843 = vmatpush1.msra.mxu0 %v10172_v58 }
 0x315   : > { %4018 = vmatprep.subr.mxu1 %v10173_v39  ;;  %3846 = vmatprep.subr.mxu0 %v10174_v22 }
 0x316   : > { %4020 = vmatpush1.msra.mxu1 %v10175_v57  ;;  %3849 = vmatpush1.msra.mxu0 %v10176_v0 }
 0x317   : > { %4022 = vmatprep.subr.mxu1 %v10177_v62  ;;  %3852 = vmatprep.subr.mxu0 %v10178_v37  ;;  %v10196_v37 = vld [vmem:[#allocation61_spill] sm:$0xff] }
 0x318   : > { %4024 = vmatpush1.msra.mxu1 %v10179_v17  ;;  %3855 = vmatpush1.msra.mxu0 %v10180_v42  ;;  %v10194_v42 = vld [vmem:[#allocation58_spill] sm:$0xff] }
 0x319   : > { %4026 = vmatprep.subr.mxu1 %v10181_v15  ;;  %3858 = vmatprep.subr.mxu0 %v10182_v26  ;;  %v10193_v26 = vld [vmem:[#allocation105_spill] sm:$0xff] }
 0x31a   : > { %4028 = vmatpush1.msra.mxu1 %v10183_v19  ;;  %3861 = vmatpush1.msra.mxu0 %v10184_v52  ;;  %v10195_v52 = vld [vmem:[#allocation109_spill] sm:$0xff] }
 0x31b   : > { %4030 = vmatprep.subr.mxu1 %v10185_v5  ;;  %3864 = vmatprep.subr.mxu0 %v10186_v50  ;;  %v10197_v50 = vld [vmem:[#allocation115_spill] sm:$0xff] }
 0x31c   : > { %4032 = vmatpush1.msra.mxu1 %v10187_v31  ;;  %3867 = vmatpush1.msra.mxu0 %v10188_v55  ;;  %v10198_v31 = vld [vmem:[#allocation63_spill] sm:$0xff]  ;;  %v10199_v55 = vld [vmem:[#allocation121_spill] sm:$0xff] }
 0x31d   : > { %4034 = vmatprep.subr.mxu1 %v10189_v34  ;;  %3870 = vmatprep.subr.mxu0 %v10190_v63  ;;  %v10200_v34 = vld [vmem:[#allocation66_spill] sm:$0xff]  ;;  %v10201_v63 = vld [vmem:[#allocation33_spill] sm:$0xff] }
 0x31e   : > { %4036 = vmatpush1.msra.mxu1 %v10191_v49  ;;  %3873 = vmatpush1.msra.mxu0 %v10192_v40  ;;  %v10202_v49 = vld [vmem:[#allocation67_spill] sm:$0xff]  ;;  %v10203_v40 = vld [vmem:[#allocation34_spill] sm:$0xff] }
 0x31f   : > { %4038 = vmatprep.subr.mxu1 %v10193_v26  ;;  %3876 = vmatprep.subr.mxu0 %v10194_v42  ;;  %v10204_v26 = vld [vmem:[#allocation70_spill] sm:$0xff]  ;;  %v10205_v42 = vld [vmem:[#allocation35_spill] sm:$0xff] }
 0x320   : > { %4040 = vmatpush1.msra.mxu1 %v10195_v52  ;;  %3879 = vmatpush1.msra.mxu0 %v10196_v37  ;;  %v10206_v52 = vld [vmem:[#allocation72_spill] sm:$0xff] }
 0x321   : > { %4042 = vmatprep.subr.mxu1 %v10197_v50  ;;  %3882 = vmatprep.subr.mxu0 %v10198_v31  ;;  %v10207_v37 = vld [vmem:[#allocation36_spill] sm:$0xff]  ;;  %v10209_v31 = vld [vmem:[#allocation37_spill] sm:$0xff] }
 0x322   : > { %4044 = vmatpush1.msra.mxu1 %v10199_v55  ;;  %3885 = vmatpush1.msra.mxu0 %v10200_v34  ;;  %v10208_v50 = vld [vmem:[#allocation76_spill] sm:$0xff]  ;;  %v10210_v55 = vld [vmem:[#allocation78_spill] sm:$0xff] }
 0x323   : > { %4046 = vmatprep.subr.mxu1 %v10201_v63  ;;  %3888 = vmatprep.subr.mxu0 %v10202_v49  ;;  %v10211_v34 = vld [vmem:[#allocation38_spill] sm:$0xff]  ;;  %v10212_v63 = vld [vmem:[#allocation80_spill] sm:$0xff]  ;;  %v10213_v49 = vld [vmem:[#allocation39_spill] sm:$0xff] }
 0x324   : > { %4048 = vmatpush1.msra.mxu1 %v10203_v40  ;;  %3891 = vmatpush2.msra.mxu0 %v10204_v26  ;;  %v10214_v40 = vld [vmem:[#allocation82_spill] sm:$0xff]  ;;  %v10215_v26 = vld [vmem:[#allocation40_spill] sm:$0xff] }
 0x325   : > { %4050 = vmatprep.subr.mxu1 %v10205_v42  ;;  %3894 = vmatprep.subr.mxu0 %v10206_v52  ;;  %v10216_v42 = vld [vmem:[#allocation86_spill] sm:$0xff]  ;;  %v10217_v52 = vld [vmem:[#allocation41_spill] sm:$0xff] }
 0x326   : > { %4052 = vmatpush1.msra.mxu1 %v10207_v37  ;;  %3897 = vmatpush2.msra.mxu0 %v10208_v50  ;;  %v10218_v37 = vld [vmem:[#allocation88_spill] sm:$0xff]  ;;  %v10219_v50 = vld [vmem:[#allocation42_spill] sm:$0xff] }
 0x327   : > { %4054 = vmatprep.subr.mxu1 %v10209_v31  ;;  %3900 = vmatprep.subr.mxu0 %v10210_v55  ;;  %v10220_v31 = vld [vmem:[#allocation91_spill] sm:$0xff] }
 0x328   : > { %4056 = vmatpush1.msra.mxu1 %v10211_v34  ;;  %3903 = vmatpush2.msra.mxu0 %v10212_v63  ;;  %v10221_v55 = vld [vmem:[#allocation43_spill] sm:$0xff]  ;;  %v10222_v34 = vld [vmem:[#allocation92_spill] sm:$0xff]  ;;  %v10223_v63 = vld [vmem:[#allocation45_spill] sm:$0xff] }
 0x329   : > { %4058 = vmatprep.subr.mxu1 %v10213_v49  ;;  %3906 = vmatprep.subr.mxu0 %v10214_v40  ;;  %v10224_v49 = vld [vmem:[#allocation96_spill] sm:$0xff]  ;;  %v10225_v40 = vld [vmem:[#allocation47_spill] sm:$0xff] }
 0x32a   : > { %4060 = vmatpush2.msra.mxu1 %v10215_v26  ;;  %3909 = vmatpush2.msra.mxu0 %v10216_v42  ;;  %v10226_v26 = vld [vmem:[#allocation98_spill] sm:$0xff]  ;;  %v10227_v42 = vld [vmem:[#allocation48_spill] sm:$0xff] }
 0x32b   : > { %4062 = vmatprep.subr.mxu1 %v10217_v52  ;;  %3912 = vmatprep.subr.mxu0 %v10218_v37  ;;  %v10228_v37 = vld [vmem:[#allocation51_spill] sm:$0xff] }
 0x32c   : > { %4064 = vmatpush2.msra.mxu1 %v10219_v50  ;;  %3915 = vmatpush2.msra.mxu0 %v10220_v31  ;;  %v10229_v50 = vld [vmem:[#allocation102_spill] sm:$0xff]  ;;  %v10230_v31 = vld [vmem:[#allocation53_spill] sm:$0xff] }
 0x32d   : > { %4066 = vmatprep.subr.mxu1 %v10221_v55  ;;  %3918 = vmatprep.subr.mxu0 %v10222_v34  ;;  %v10231_v55 = vld [vmem:[#allocation106_spill] sm:$0xff] }
 0x32e   : > { %4068 = vmatpush2.msra.mxu1 %v10223_v63  ;;  %3921 = vmatpush2.msra.mxu0 %v10224_v49  ;;  %v10232_v34 = vld [vmem:[#allocation54_spill] sm:$0xff]  ;;  %v10234_v49 = vld [vmem:[#allocation59_spill] sm:$0xff] }
 0x32f   : > { %4070 = vmatprep.subr.mxu1 %v10225_v40  ;;  %3924 = vmatprep.subr.mxu0 %v10226_v26  ;;  %v10233_v63 = vld [vmem:[#allocation74_spill] sm:$0xff]  ;;  %v10235_v40 = vld [vmem:[#allocation75_spill] sm:$0xff]  ;;  %v10236_v26 = vld [vmem:[#allocation60_spill] sm:$0xff] }
 0x330   : > { %4072 = vmatpush2.msra.mxu1 %v10227_v42  ;;  %3927 = vmatpush2.msra.mxu0 %v8327_v16  ;;  %v10237_v42 = vld [vmem:[#allocation77_spill] sm:$0xff]  ;;  %v10238_v16 = vld [vmem:[#allocation62_spill] sm:$0xff] }
 0x331   : > { %4074 = vmatprep.subr.mxu1 %v10228_v37  ;;  %3930 = vmatprep.subr.mxu0 %v10229_v50  ;;  %v10239_v37 = vld [vmem:[#allocation81_spill] sm:$0xff] }
 0x332   : > { %4076 = vmatpush2.msra.mxu1 %v10230_v31  ;;  %3933 = vmatpush2.msra.mxu0 %v10231_v55  ;;  %v10240_v50 = vld [vmem:[#allocation65_spill] sm:$0xff]  ;;  %v10241_v31 = vld [vmem:[#allocation84_spill] sm:$0xff] }
 0x333   : > { %4078 = vmatprep.subr.mxu1 %v10232_v34  ;;  %3936 = vmatprep.subr.mxu0 %v10233_v63  ;;  %v10242_v55 = vld [vmem:[#allocation68_spill] sm:$0xff]  ;;  %v10243_v34 = vld [vmem:[#allocation85_spill] sm:$0xff] }
 0x334   : > { %4080 = vmatpush2.msra.mxu1 %v10234_v49  ;;  %3939 = vmatpush2.msra.mxu0 %v10235_v40  ;;  %v10244_v63 = vld [vmem:[#allocation108_spill] sm:$0xff]  ;;  %v10245_v40 = vld [vmem:[#allocation111_spill] sm:$0xff] }
 0x335   : > { %4082 = vmatprep.subr.mxu1 %v10236_v26  ;;  %3942 = vmatprep.subr.mxu0 %v10237_v42  ;;  %v10246_v42 = vld [vmem:[#allocation112_spill] sm:$0xff] }
 0x336   : > { %4084 = vmatpush2.msra.mxu1 %v10238_v16  ;;  %3945 = vmatpush2.msra.mxu0 %v10239_v37  ;;  %v10247_v16 = vld [vmem:[#allocation12_spill] sm:$0xff] }
 0x337   : > { %4086 = vmatprep.subr.mxu1 %v10240_v50  ;;  %3948 = vmatprep.subr.mxu0 %v10241_v31  ;;  %v10248_v37 = vld [vmem:[#allocation116_spill] sm:$0xff]  ;;  %v10249_v50 = vld [vmem:[#allocation137_spill] sm:$0xff]  ;;  %v10250_v31 = vld [vmem:[#allocation118_spill] sm:$0xff] }
 0x338   : > { %4088 = vmatpush2.msra.mxu1 %v10242_v55  ;;  %3951 = vmatpush2.msra.mxu0 %v10243_v34  ;;  %v10251_v34 = vld [vmem:[#allocation120_spill] sm:$0xff] }
 0x339   : > { %4090 = vmatprep.subr.mxu1 %v10244_v63  ;;  %3954 = vmatprep.subr.mxu0 %v8528_v13  ;;  %v10252_v13 = vld [vmem:[#allocation122_spill] sm:$0xff] }
 0x33a   : > { %4092 = vmatpush2.msra.mxu1 %v10245_v40  ;;  %3957 = vmatpush2.msra.mxu0 %v8550_v28  ;;  %v10253_v28 = vld [vmem:[#allocation128_spill] sm:$0xff] }
 0x33b   : > { %4094 = vmatprep.subr.mxu1 %v10246_v42  ;;  %3960 = vmatprep.subr.mxu0 %v10247_v16  ;;  %v10254_v16 = vld [vmem:[#allocation134_spill] sm:$0xff] }
 0x33c   : > { %4096 = vmatpush2.msra.mxu1 %v10248_v37  ;;  %3963 = vmatpush2.msra.mxu0 %v10249_v50  ;;  %v10255_v50 = vld [vmem:[#allocation136_spill] sm:$0xff] }
 0x33d   : > { %4098 = vmatprep.subr.mxu1 %v10250_v31  ;;  %3966 = vmatprep.subr.mxu0 %v8629_v24  ;;  %v10256_v24 = vld [vmem:[#allocation140_spill] sm:$0xff] }
 0x33e   : > { %4100 = vmatpush2.msra.mxu1 %v10251_v34  ;;  %3969 = vmatpush2.msra.mxu0 %v8647_v48  ;;  %v10257_v48 = vld [vmem:[#allocation125_spill] sm:$0xff] }
 0x33f   : > { %4102 = vmatprep.subr.mxu1 %v10252_v13  ;;  %3972 = vmatprep.subr.mxu0 %v8672_v9  ;;  %v10258_v9 = vand.u32 4294901760, %v7334_v6  ;;  %v10263_v6 = vand.u32 4294901760, %v8567_v8 }
 0x340   : > { %4104 = vmatpush2.msra.mxu1 %v10253_v28  ;;  %3975 = vmatpush2.msra.mxu0 %v8694_v23  ;;  %v10259_v23 = vand.u32 4294901760, %v7342_v3  ;;  %v10264_v3 = vand.u32 4294901760, %v7406_v35  ;;  %v10272_v35 = vand.u32 4294901760, %v7588_v60  ;;  %v10285_v60 = vld [vmem:[#allocation95_spill] sm:$0xff] }
 0x341   : > { %4106 = vmatprep.subr.mxu1 %v10254_v16  ;;  %3978 = vmatprep.subr.mxu0 %v8713_v51  ;;  %v10260_v51 = vld [vmem:[#allocation131_spill] sm:$0xff] }
 0x342   : > { %4108 = vmatpush2.msra.mxu1 %v10255_v50  ;;  %3981 = vmatpush2.msra.mxu0 %v8723_v7  ;;  %v10261_v7 = vand.u32 4294901760, %v7366_v12  ;;  %v10265_v12 = vand.u32 4294901760, %v7432_v30  ;;  %v10274_v30 = vand.u32 4294901760, %v7632_v41 }
 0x343   : > { %4110 = vmatprep.subr.mxu1 %v10256_v24  ;;  %3987 = vmatmul.mubr.f32.vlgmr.msra.gmra.mxu0 %v8567_v8  ;;  %v10289_v8 = vld [vmem:[#allocation114_spill] sm:$0xff] }
 0x344   : > { %4112 = vmatpush2.msra.mxu1 %v10257_v48  ;;  %4137 = vmatprep.subr.mxu0 %v10258_v9  ;;  %v10262_v48 = vand.u32 4294901760, %v7381_v53  ;;  %v10266_v53 = vand.u32 4294901760, %v7456_v10  ;;  %v10276_v10 = vand.u32 4294901760, %v10170_v21  ;;  %v10291_v9 = vld [vmem:[#allocation105_spill] sm:$0xff] }
 0x345   : > { %4114 = vmatprep.subr.mxu1 %v8661_v38  ;;  %4141 = vmatpush1.msra.mxu0 %v10259_v23  ;;  %v10292_v23 = vld [vmem:[#allocation117_spill] sm:$0xff] }
 0x346   : > { %4116 = vmatpush2.msra.mxu1 %v8683_v25  ;;  %4391 = vmatprep.mubr.f32.mxu0 %v10260_v51 }
 0x347   : > { %4118 = vmatprep.subr.mxu1 %v8705_v46  ;;  %4145 = vmatprep.subr.mxu0 %v10261_v7  ;;  %v10294_v7 = vld [vmem:[#allocation109_spill] sm:$0xff] }
 0x348   : > { %4120 = vmatpush2.msra.mxu1 %v8717_v56  ;;  %4149 = vmatpush1.msra.mxu0 %v10262_v48  ;;  %v10290_v48 = vand.u32 4294901760, %v10289_v8 }
 0x349   : > { %4128 = vmatmul.mubr.f32.vlgmr.msra.gmra.mxu1 %v10263_v6  ;;  %4400 = vmatprep.subr.mxu1 %v7321_v59  ;;  %v10267_v59 = vand.u32 4294901760, %v7478_v27  ;;  %v10278_v27 = vand.u32 4294901760, %v10174_v22  ;;  %v10300_v22 = vld [vmem:[#allocation121_spill] sm:$0xff] }
 0x34a   : > { %4402 = vmatpush1.msra.mxu1 %v7329_v45  ;;  %4528 = vmatprep.mubr.f32.mxu1 %v10260_v51  ;;  %v10268_v45 = vand.u32 4294901760, %v7500_v47  ;;  %v10280_v47 = vld [vmem:[#allocation97_spill] sm:$0xff]  ;;  %v10293_v51 = vand.u32 4294901760, %v10292_v23 }
 0x34b   : > { %4404 = vmatprep.subr.mxu1 %v7353_v1  ;;  %4153 = vmatprep.subr.mxu0 %v10264_v3  ;;  %v10269_v1 = vand.u32 4294901760, %v7522_v32  ;;  %v10282_v32 = vld [vmem:[#allocation89_spill] sm:$0xff]  ;;  %v10309_v3 = vld [vmem:[#allocation35_spill] sm:$0xff] }
 0x34c   : > { %4406 = vmatpush1.msra.mxu1 %v7372_v61  ;;  %4157 = vmatpush1.msra.mxu0 %v10265_v12  ;;  %v10270_v61 = vand.u32 4294901760, %v7544_v14  ;;  %v10283_v14 = vld [vmem:[#allocation104_spill] sm:$0xff]  ;;  %v10310_v12 = vld [vmem:[#allocation63_spill] sm:$0xff] }
 0x34d   : > { %4408 = vmatprep.subr.mxu1 %v7394_v43  ;;  %4161 = vmatprep.subr.mxu0 %v10266_v53  ;;  %v10271_v43 = vand.u32 4294901760, %v7566_v20  ;;  %v10284_v20 = vand.u32 4294901760, %v10283_v14  ;;  %v10311_v53 = vand.u32 4294901760, %v10310_v12 }
 0x34e   : > { %4410 = vmatpush1.msra.mxu1 %v7418_v4  ;;  %4165 = vmatpush1.msra.mxu0 %v10267_v59  ;;  %v10273_v4 = vand.u32 4294901760, %v7610_v36  ;;  %v10286_v36 = vld [vmem:[#allocation107_spill] sm:$0xff]  ;;  %v10312_v59 = vld [vmem:[#allocation36_spill] sm:$0xff] }
 0x34f   : > { %4412 = vmatprep.subr.mxu1 %v7443_v29  ;;  %4169 = vmatprep.subr.mxu0 %v10268_v45  ;;  %v10275_v29 = vand.u32 4294901760, %v7654_v18  ;;  %v10287_v41 = vand.u32 4294901760, %v10286_v36  ;;  %v10288_v18 = vld [vmem:[#allocation101_spill] sm:$0xff]  ;;  %v10313_v45 = vld [vmem:[#allocation66_spill] sm:$0xff] }
 0x350   : > { %4414 = vmatpush1.msra.mxu1 %v7466_v2  ;;  %4173 = vmatpush1.msra.mxu0 %v10269_v1  ;;  %v10277_v2 = vand.u32 4294901760, %v10172_v58  ;;  %v10298_v58 = vld [vmem:[#allocation55_spill] sm:$0xff]  ;;  %v10314_v1 = vand.u32 4294901760, %v10313_v45 }
 0x351   : > { %4416 = vmatprep.subr.mxu1 %v7488_v54  ;;  %4177 = vmatprep.subr.mxu0 %v10270_v61  ;;  %v10279_v54 = vand.u32 4294901760, %v10176_v0  ;;  %v10315_v61 = vld [vmem:[#allocation37_spill] sm:$0xff] }
 0x352   : > { %4418 = vmatpush1.msra.mxu1 %v7510_v11  ;;  %4181 = vmatpush1.msra.mxu0 %v10271_v43  ;;  %v10281_v11 = vand.u32 4294901760, %v10280_v47  ;;  %v10316_v43 = vld [vmem:[#allocation67_spill] sm:$0xff]  ;;  %v10325_v47 = vld [vmem:[#allocation76_spill] sm:$0xff] }
 0x353   : > { %4420 = vmatprep.subr.mxu1 %v10169_v33  ;;  %4185 = vmatprep.subr.mxu0 %v10272_v35  ;;  %v10295_v33 = vld [vmem:[#allocation52_spill] sm:$0xff]  ;;  %v10317_v35 = vand.u32 4294901760, %v10316_v43 }
 0x354   : > { %4422 = vmatpush1.msra.mxu1 %v10171_v44  ;;  %4189 = vmatpush1.msra.mxu0 %v10273_v4  ;;  %v10296_v21 = vand.u32 4294901760, %v10295_v33  ;;  %v10297_v44 = vld [vmem:[#allocation115_spill] sm:$0xff]  ;;  %v10318_v4 = vld [vmem:[#allocation38_spill] sm:$0xff]  ;;  %v10341_v33 = vld [vmem:[#allocation48_spill] sm:$0xff] }
 0x355   : > { %4424 = vmatprep.subr.mxu1 %v10173_v39  ;;  %4193 = vmatprep.subr.mxu0 %v10274_v30  ;;  %v10299_v39 = vand.u32 4294901760, %v10298_v58  ;;  %v10319_v30 = vld [vmem:[#allocation70_spill] sm:$0xff]  ;;  %v10344_v58 = vld [vmem:[#allocation51_spill] sm:$0xff] }
 0x356   : > { %4426 = vmatpush1.msra.mxu1 %v10175_v57  ;;  %4197 = vmatpush1.msra.mxu0 %v10275_v29  ;;  %v10301_v57 = vld [vmem:[#allocation57_spill] sm:$0xff]  ;;  %v10320_v29 = vand.u32 4294901760, %v10319_v30 }
 0x357   : > { %4428 = vmatprep.subr.mxu1 %v10177_v62  ;;  %4201 = vmatprep.subr.mxu0 %v10276_v10  ;;  %v10302_v0 = vand.u32 4294901760, %v10301_v57  ;;  %v10303_v62 = vld [vmem:[#allocation33_spill] sm:$0xff]  ;;  %v10321_v10 = vld [vmem:[#allocation39_spill] sm:$0xff] }
 0x358   : > { %4430 = vmatpush1.msra.mxu1 %v10179_v17  ;;  %4205 = vmatpush1.msra.mxu0 %v10277_v2  ;;  %v10304_v17 = vld [vmem:[#allocation58_spill] sm:$0xff]  ;;  %v10322_v2 = vld [vmem:[#allocation72_spill] sm:$0xff]  ;;  %v10347_v57 = vld [vmem:[#allocation53_spill] sm:$0xff] }
 0x359   : > { %4432 = vmatprep.subr.mxu1 %v10181_v15  ;;  %4209 = vmatprep.subr.mxu0 %v10278_v27  ;;  %v10305_v15 = vand.u32 4294901760, %v10304_v17  ;;  %v10323_v27 = vand.u32 4294901760, %v10322_v2  ;;  %v10350_v17 = vld [vmem:[#allocation54_spill] sm:$0xff]  ;;  %v10367_v30 = vld [vmem:[#allocation81_spill] sm:$0xff] }
 0x35a   : > { %4434 = vmatpush1.msra.mxu1 %v10183_v19  ;;  %4213 = vmatpush1.msra.mxu0 %v10279_v54  ;;  %v10306_v19 = vld [vmem:[#allocation34_spill] sm:$0xff]  ;;  %v10324_v54 = vld [vmem:[#allocation40_spill] sm:$0xff] }
 0x35b   : > { %4436 = vmatprep.subr.mxu1 %v10185_v5  ;;  %4217 = vmatprep.subr.mxu0 %v10281_v11  ;;  %v10307_v5 = vld [vmem:[#allocation61_spill] sm:$0xff]  ;;  %v10326_v11 = vand.u32 4294901760, %v10325_v47 }
 0x35c   : > { %4438 = vmatpush1.msra.mxu1 %v10282_v32  ;;  %4221 = vmatpush1.msra.mxu0 %v10284_v20  ;;  %v10308_v6 = vand.u32 4294901760, %v10307_v5  ;;  %v10327_v32 = vld [vmem:[#allocation78_spill] sm:$0xff]  ;;  %v10353_v5 = vld [vmem:[#allocation100_spill] sm:$0xff] }
 0x35d   : > { %4440 = vmatprep.subr.mxu1 %v10285_v60  ;;  %4225 = vmatprep.subr.mxu0 %v10287_v41  ;;  %v10328_v14 = vand.u32 4294901760, %v10327_v32  ;;  %v10329_v20 = vld [vmem:[#allocation42_spill] sm:$0xff]  ;;  %v10330_v60 = vld [vmem:[#allocation80_spill] sm:$0xff]  ;;  %v10332_v41 = vld [vmem:[#allocation43_spill] sm:$0xff] }
 0x35e   : > { %4442 = vmatpush1.msra.mxu1 %v10288_v18  ;;  %4229 = vmatpush1.msra.mxu0 %v10290_v48  ;;  %v10331_v36 = vand.u32 4294901760, %v10330_v60  ;;  %v10333_v18 = vld [vmem:[#allocation82_spill] sm:$0xff]  ;;  %v10335_v48 = vld [vmem:[#allocation45_spill] sm:$0xff] }
 0x35f   : > { %4444 = vmatprep.subr.mxu1 %v10291_v9  ;;  %4233 = vmatprep.subr.mxu0 %v10293_v51  ;;  %v10334_v8 = vand.u32 4294901760, %v10333_v18  ;;  %v10336_v9 = vld [vmem:[#allocation86_spill] sm:$0xff]  ;;  %v10338_v51 = vld [vmem:[#allocation47_spill] sm:$0xff] }
 0x360   : > { %4446 = vmatpush1.msra.mxu1 %v10294_v7  ;;  %4237 = vmatpush1.msra.mxu0 %v10296_v21  ;;  %v10337_v23 = vand.u32 4294901760, %v10336_v9  ;;  %v10342_v21 = vld [vmem:[#allocation91_spill] sm:$0xff] }
 0x361   : > { %4448 = vmatprep.subr.mxu1 %v10297_v44  ;;  %4241 = vmatprep.subr.mxu0 %v10299_v39  ;;  %v10343_v44 = vand.u32 4294901760, %v10342_v21  ;;  %v10345_v39 = vld [vmem:[#allocation92_spill] sm:$0xff] }
 0x362   : > { %4450 = vmatpush1.msra.mxu1 %v10300_v22  ;;  %4245 = vmatpush1.msra.mxu0 %v10302_v0  ;;  %v10346_v22 = vand.u32 4294901760, %v10345_v39  ;;  %v10348_v0 = vld [vmem:[#allocation96_spill] sm:$0xff] }
 0x363   : > { %4452 = vmatprep.subr.mxu1 %v10303_v62  ;;  %4249 = vmatprep.subr.mxu0 %v10305_v15  ;;  %v10349_v62 = vand.u32 4294901760, %v10348_v0  ;;  %v10351_v15 = vld [vmem:[#allocation98_spill] sm:$0xff] }
 0x364   : > { %4454 = vmatpush1.msra.mxu1 %v10306_v19  ;;  %4253 = vmatpush1.msra.mxu0 %v10308_v6  ;;  %v10352_v19 = vand.u32 4294901760, %v10351_v15  ;;  %v10354_v6 = vand.u32 4294901760, %v10353_v5 }
 0x365   : > { %4456 = vmatprep.subr.mxu1 %v10309_v3  ;;  %4257 = vmatprep.subr.mxu0 %v10311_v53  ;;  %v10355_v3 = vld [vmem:[#allocation102_spill] sm:$0xff] }
 0x366   : > { %4458 = vmatpush1.msra.mxu1 %v10312_v59  ;;  %4261 = vmatpush1.msra.mxu0 %v10314_v1  ;;  %v10356_v12 = vand.u32 4294901760, %v10355_v3  ;;  %v10357_v53 = vld [vmem:[#allocation62_spill] sm:$0xff]  ;;  %v10360_v1 = vld [vmem:[#allocation65_spill] sm:$0xff] }
 0x367   : > { %4460 = vmatprep.subr.mxu1 %v10315_v61  ;;  %4265 = vmatprep.subr.mxu0 %v10317_v35  ;;  %v10358_v59 = vld [vmem:[#allocation106_spill] sm:$0xff] }
 0x368   : > { %4462 = vmatpush1.msra.mxu1 %v10318_v4  ;;  %4269 = vmatpush2.msra.mxu0 %v10320_v29  ;;  %v10359_v45 = vand.u32 4294901760, %v10358_v59  ;;  %v10361_v61 = vld [vmem:[#allocation74_spill] sm:$0xff]  ;;  %v10368_v29 = vand.u32 4294901760, %v10367_v30 }
 0x369   : > { %4464 = vmatprep.subr.mxu1 %v10321_v10  ;;  %4273 = vmatprep.subr.mxu0 %v10323_v27  ;;  %v10362_v43 = vand.u32 4294901760, %v10361_v61  ;;  %v10369_v10 = vld [vmem:[#allocation84_spill] sm:$0xff] }
 0x36a   : > { %4466 = vmatpush2.msra.mxu1 %v10324_v54  ;;  %4277 = vmatpush2.msra.mxu0 %v10326_v11  ;;  %v10370_v2 = vand.u32 4294901760, %v10369_v10 }
 0x36b   : > { %4468 = vmatprep.subr.mxu1 %v10217_v52  ;;  %4281 = vmatprep.subr.mxu0 %v10328_v14  ;;  %v10339_v52 = vld [vmem:[#allocation88_spill] sm:$0xff] }
 0x36c   : > { %4470 = vmatpush2.msra.mxu1 %v10329_v20  ;;  %4285 = vmatpush2.msra.mxu0 %v10331_v36  ;;  %v10340_v7 = vand.u32 4294901760, %v10339_v52  ;;  %v10387_v36 = vld [vmem:[#allocation125_spill] sm:$0xff] }
 0x36d   : > { %4472 = vmatprep.subr.mxu1 %v10332_v41  ;;  %4289 = vmatprep.subr.mxu0 %v10334_v8 }
 0x36e   : > { %4474 = vmatpush2.msra.mxu1 %v10335_v48  ;;  %4293 = vmatpush2.msra.mxu0 %v10337_v23 }
 0x36f   : > { %4476 = vmatprep.subr.mxu1 %v10338_v51  ;;  %4297 = vmatprep.subr.mxu0 %v10340_v7 }
 0x370   : > { %4478 = vmatpush2.msra.mxu1 %v10341_v33  ;;  %4301 = vmatpush2.msra.mxu0 %v10343_v44 }
 0x371   : > { %4480 = vmatprep.subr.mxu1 %v10344_v58  ;;  %4305 = vmatprep.subr.mxu0 %v10346_v22 }
 0x372   : > { %4482 = vmatpush2.msra.mxu1 %v10347_v57  ;;  %4309 = vmatpush2.msra.mxu0 %v10349_v62 }
 0x373   : > { %4484 = vmatprep.subr.mxu1 %v10350_v17  ;;  %4313 = vmatprep.subr.mxu0 %v10352_v19 }
 0x374   : > { %4486 = vmatpush2.msra.mxu1 %v10234_v49  ;;  %4317 = vmatpush2.msra.mxu0 %v10354_v6  ;;  %v10363_v49 = vld [vmem:[#allocation75_spill] sm:$0xff] }
 0x375   : > { %4488 = vmatprep.subr.mxu1 %v10236_v26  ;;  %4321 = vmatprep.subr.mxu0 %v10356_v12  ;;  %v10364_v35 = vand.u32 4294901760, %v10363_v49  ;;  %v10365_v26 = vld [vmem:[#allocation77_spill] sm:$0xff] }
 0x376   : > { %4490 = vmatpush2.msra.mxu1 %v10357_v53  ;;  %4325 = vmatpush2.msra.mxu0 %v10359_v45  ;;  %v10366_v4 = vand.u32 4294901760, %v10365_v26 }
 0x377   : > { %4492 = vmatprep.subr.mxu1 %v10360_v1  ;;  %4329 = vmatprep.subr.mxu0 %v10362_v43 }
 0x378   : > { %4494 = vmatpush2.msra.mxu1 %v10242_v55  ;;  %4333 = vmatpush2.msra.mxu0 %v10364_v35  ;;  %v10371_v55 = vld [vmem:[#allocation85_spill] sm:$0xff] }
 0x379   : > { %4496 = vmatprep.subr.mxu1 %v10244_v63  ;;  %4337 = vmatprep.subr.mxu0 %v10366_v4  ;;  %v10372_v27 = vand.u32 4294901760, %v10371_v55  ;;  %v10373_v63 = vld [vmem:[#allocation126_spill] sm:$0xff] }
 0x37a   : > { %4498 = vmatpush2.msra.mxu1 %v10245_v40  ;;  %4341 = vmatpush2.msra.mxu0 %v10368_v29  ;;  %v10374_v54 = vand.u32 4294901760, %v10373_v63  ;;  %v10375_v40 = vld [vmem:[#allocation130_spill] sm:$0xff] }
 0x37b   : > { %4500 = vmatprep.subr.mxu1 %v10246_v42  ;;  %4345 = vmatprep.subr.mxu0 %v10370_v2  ;;  %v10376_v47 = vand.u32 4294901760, %v10375_v40  ;;  %v10377_v42 = vld [vmem:[#allocation12_spill] sm:$0xff] }
 0x37c   : > { %4502 = vmatpush2.msra.mxu1 %v10248_v37  ;;  %4349 = vmatpush2.msra.mxu0 %v10372_v27  ;;  %v10378_v11 = vand.u32 4294901760, %v10377_v42  ;;  %v10379_v37 = vld [vmem:[#allocation137_spill] sm:$0xff] }
 0x37d   : > { %4504 = vmatprep.subr.mxu1 %v10250_v31  ;;  %4353 = vmatprep.subr.mxu0 %v10374_v54  ;;  %v10380_v32 = vand.u32 4294901760, %v10379_v37  ;;  %v10381_v31 = vld [vmem:[#allocation124_spill] sm:$0xff] }
 0x37e   : > { %4506 = vmatpush2.msra.mxu1 %v10251_v34  ;;  %4357 = vmatpush2.msra.mxu0 %v10376_v47  ;;  %v10382_v14 = vand.u32 4294901760, %v10381_v31  ;;  %v10383_v34 = vld [vmem:[#allocation138_spill] sm:$0xff] }
 0x37f   : > { %4508 = vmatprep.subr.mxu1 %v10252_v13  ;;  %4361 = vmatprep.subr.mxu0 %v10378_v11  ;;  %v10384_v20 = vand.u32 4294901760, %v10383_v34  ;;  %v10385_v13 = vld [vmem:[#allocation127_spill] sm:$0xff] }
 0x380   : > { %4510 = vmatpush2.msra.mxu1 %v10253_v28  ;;  %4365 = vmatpush2.msra.mxu0 %v10380_v32  ;;  %v10386_v60 = vand.u32 4294901760, %v10385_v13  ;;  %v10388_v28 = vld [vmem:[#allocation139_spill] sm:$0xff] }
 0x381   : > { %4512 = vmatprep.subr.mxu1 %v10254_v16  ;;  %4369 = vmatprep.subr.mxu0 %v10382_v14  ;;  %v10389_v41 = vand.u32 4294901760, %v10388_v28  ;;  %v10390_v16 = vld [vmem:[#allocation13_spill] sm:$0xff] }
 0x382   : > { %4514 = vmatpush2.msra.mxu1 %v10255_v50  ;;  %4373 = vmatpush2.msra.mxu0 %v10384_v20  ;;  %v10391_v18 = vand.u32 4294901760, %v10390_v16  ;;  %v10392_v50 = vld [vmem:[#allocation14_spill] sm:$0xff] }
 0x383   : > { %4516 = vmatprep.subr.mxu1 %v10256_v24  ;;  %4377 = vmatprep.subr.mxu0 %v10386_v60  ;;  %v10393_v8 = vand.u32 4294901760, %v10392_v50  ;;  %v10394_v24 = vld [vmem:[#allocation133_spill] sm:$0xff] }
 0x384   : > { %4518 = vmatpush2.msra.mxu1 %v10387_v36  ;;  %4381 = vmatpush2.msra.mxu0 %v10389_v41 }
 0x385   : > { %4520 = vmatprep.subr.mxu1 %v8661_v38  ;;  %4385 = vmatprep.subr.mxu0 %v10391_v18 }
 0x386   : > { %4522 = vmatpush2.msra.mxu1 %v8683_v25  ;;  %4389 = vmatpush2.msra.mxu0 %v10393_v8 }
 0x387   : > { %4524 = vmatprep.subr.mxu1 %v8705_v46  ;;  %4393 = vmatmul.mubr.f32.vlgmr.msra.gmra.mxu0 %v10394_v24 }
 0x388   : > { %4526 = vmatpush2.msra.mxu1 %v8717_v56 }
 0x389   : > { %4530 = vmatmul.mubr.f32.vlgmr.msra.gmra.mxu1 %v10394_v24 }
 0x3c1   : > { %v3392_v48 = vpop.f32.mrf.mxu0 }
 0x3c3   : > { %v3394_v9 = vpop.f32.mrf.mxu0 }
 0x3c9   : > { %v3785_v23 = vpop.f32.mrf.mxu1 }
 0x3ca   : > { %v3786_v51 = vadd.f32 %v3785_v23, %v3392_v48 }
 0x3cb   : > { %v3787_v52 = vpop.f32.mrf.mxu1 }
 0x3cc   : > { %v3788_v33 = vadd.f32 %v3787_v52, %v3394_v9 }
 0x403   : > { %v3988_v38 = vpop.f32.mrf.mxu0 }
 0x404   : > { %v3989_v25 = vadd.f32 %v3988_v38, %v3786_v51 }
 0x405   : > { %v3990_v7 = vpop.f32.mrf.mxu0 }
 0x406   : > { %v3991_v44 = vadd.f32 %v3990_v7, %v3788_v33 }
 0x409   : > { %v4129_v21 = vpop.f32.mrf.mxu1 }
 0x40a   : > { %v4130_v46 = vadd.f32 %v4129_v21, %v3989_v25 }
 0x40b   : > { %v4131_v58 = vpop.f32.mrf.mxu1 }
 0x40c   : > { %v4132_v56 = vadd.f32 %v4131_v58, %v3991_v44 }
 0x447   : > { %v4394_v39 = vpop.f32.mrf.mxu0 }
 0x448   : > { %v4395_v22 = vadd.f32 %v4394_v39, %v4130_v46 }
 0x449   : > { %v4531_v57 = vpop.f32.mrf.mxu1  ;;  %v4396_v0 = vpop.f32.mrf.mxu0 }
 0x44a   : > { %v4532_v62 = vadd.f32 %v4531_v57, %v4395_v22  ;;  %v4397_v17 = vadd.f32 %v4396_v0, %v4132_v56 }
 0x44b   : > { %v4533_v15 = vpop.f32.mrf.mxu1 }
 0x44c   : > { %v4536_v19 = vmax.f32 %v4532_v62, 0.0  ;;  %v4534_v5 = vadd.f32 %v4533_v15, %v4397_v17 }
 0x44e   : > { %v4537_v6 = vmax.f32 %v4534_v5, 0.0  ;;  %v4538_v3 = vmin.f32 %v4536_v19, 1.0 }
 0x450   : > { %v4539_v12 = vmin.f32 %v4537_v6, 1.0 }
 0x452   : > { %v4542_v53 = vcombine.low %v4538_v3, %v4539_v12 }
 0x454   : > { %4544 = vst [vmem:[%s197_s14] sm:$0xff] %v4542_v53 }
 0x455   : > { %4830 = shalt.err (!%p4827_p5)
}
 0x456   : > { %s4831_s27 = scalar_lea.hbm %s4558_s17, 128  ;;  %s4835_s6 = scalar_lea.hbm %s9098_s2, 256 }
 0x457   : > { %p4832_p9 = scmp.ne.s32.totalorder %s4558_s17, %s4831_s27  ;;  %p4836_p12 = scmp.lt.s32.totalorder %s4558_s17, %s9098_s2 }
 0x458   : > { %p4837_p1 = scmp.lt.s32.totalorder %s4835_s6, %s4831_s27 }
 0x459   : > { %p4833_p0 = pnand %p4832_p9, %p10395_p3 }
 0x45a   : > { %p4838_p6 = por %p4837_p1, %p4836_p12 }
 0x45b   : > { %p4834_p11 = pneg %p4833_p0 }
 0x45d   : > { %p4839_p13 = pnand %p4838_p6, %p4834_p11 }
 0x45f   : > { %4842 = shalt.err (!%p4839_p13)
}
 0x460   : > { %4711 = dma.vmem_to_hbm [thread:$0]  (%p10395_p3), %s4561_s28, 128, %s4558_s17, %s4546_s19  }
 0x461 PF: > { %s4572_s3 = sand.u32 1, %s4873_s9   ;;  %p10396_p7 = scmp.ne.s32.totalorder %s9675_s22, 0 }
 0x462   : > { %p10397_p8 = scmp.ge.s32.totalorder %s4885_s12, 2  ;;  %s4573_s26 = scalar_lea.sflag [#allocation5], %s4572_s3 }
 0x464   : > { %p4721_p10 = pnand %p10397_p8, %p10396_p7 }
 0x466   : > { %p4722_p2 = pneg %p4721_p10 }
 0x468   : > { %4868 = dma.done.wait (%p4722_p2), %s4573_s26, 128  }
 0x469   : > { %4870 = vsyncadd (%p4722_p2), %s4573_s26, 4294967168  ;;  %p18_p4 = scmp.ge.s32.totalorder %s4930_s15, 4   ;;  %s10398_s9 = smov %s4877_s10 }
 0x46a   : > { %s10399_s10 = smov %s4881_s11  ;;  %s10400_s11 = smov %s4942_s18 }
 0x46b   : > { %s10401_s12 = smov %s4930_s15  ;;  %20 = sbr.rel (!%p18_p4) target bundleno = 7 (0x7), region = 86 }
 0x470   :  { %4578 = vsyncpa [#allocation4], 1 }
 0x471   :  { %4580 = vsyncpa [#allocation4 + $0x1], 1 }
 0x472   :  { %4581 = vsyncpa [#allocation7], 1 }
 0x473   :  { %4583 = vsyncpa [#allocation7 + $0x1], 1 }
 0x474   :  { %4584 = vsyncpa [#allocation5], 1 }
 0x475   :  { %4586 = vsyncpa [#allocation5 + $0x1], 1 }

</bundles_post_ra>
